<compile_context>
chip_gen: v5e
topology: v5e:2x2
jax: 0.10.0
libtpu: 0.0.40
codegen_flags: <defaults>
</compile_context>

<pallas_src>
import functools
import math

import jax
import jax.numpy as jnp
from jax.experimental import pallas as pl
from jax.experimental.pallas import tpu as pltpu

BN_EPS = 1e-5
TM_DEFAULT = 256                      # M-tile rows (multiple of 8, modest for v7x VMEM)
VMEM_LIMIT = 32 * 1024 * 1024


def _round_up(x, m):
    return ((x + m - 1) // m) * m


# ----------------------------------------------------------------------------
# Pallas kernel 1: fused (A @ W) + bias -> activation  (+ partial BN stats)
#   a_ref: (TM, Kp) bf16   w_ref: (Kp, Cp) bf16   b_ref: (1, Cp) f32
#   y_ref: (TM, Cp) f32    stats_ref (optional): (1, 2, Cp) f32 = [sum; sumsq]
# ----------------------------------------------------------------------------
def _matmul_bias_act_kernel(a_ref, w_ref, b_ref, y_ref, *stats_refs,
                            act, with_stats, m_true, tm):
    y = jnp.dot(a_ref[...], w_ref[...], preferred_element_type=jnp.float32)
    y = y + b_ref[...]
    if act == "relu":
        y = jnp.maximum(y, 0.0)
    elif act == "sigmoid":
        y = jax.nn.sigmoid(y)
    y_ref[...] = y

    if with_stats:
        stats_ref = stats_refs[0]
        # mask rows that are pure M-padding so they do not pollute the batch stats
        row = jax.lax.broadcasted_iota(jnp.int32, y.shape, 0) + pl.program_id(0) * tm
        ym = jnp.where(row < m_true, y, 0.0)
        s = jnp.sum(ym, axis=0, keepdims=True)            # (1, Cp)
        ss = jnp.sum(ym * ym, axis=0, keepdims=True)       # (1, Cp)
        stats_ref[...] = jnp.concatenate([s, ss], axis=0).reshape(1, 2, y.shape[1])


# ----------------------------------------------------------------------------
# Pallas kernel 2: per-channel BatchNorm apply  y*scale + shift  (lane-dense)
# ----------------------------------------------------------------------------
def _scale_shift_kernel(y_ref, scale_ref, shift_ref, o_ref):
    o_ref[...] = (y_ref[...] * scale_ref[...] + shift_ref[...]).astype(o_ref.dtype)


# ----------------------------------------------------------------------------
# Pallas wrappers
# ----------------------------------------------------------------------------
def fused_conv_matmul(A, Wm, bias, *, act, with_stats):
    """A: (M, K), Wm: (K, C), bias: (C,).
    Returns (y_pad (Mp, Cp) f32, stats (n_tiles, 2, Cp) f32 or None)."""
    m_true, k_true = A.shape
    c_true = Wm.shape[1]
    k_pad = _round_up(k_true, 128)
    c_pad = _round_up(c_true, 128)
    tm = min(TM_DEFAULT, _round_up(m_true, 8))
    m_pad = _round_up(m_true, tm)
    n_tiles = m_pad // tm

    A_p = jnp.pad(A.astype(jnp.bfloat16), ((0, m_pad - m_true), (0, k_pad - k_true)))
    W_p = jnp.pad(Wm.astype(jnp.bfloat16), ((0, k_pad - k_true), (0, c_pad - c_true)))
    b_p = jnp.pad(bias.astype(jnp.float32), (0, c_pad - c_true)).reshape(1, c_pad)

    kernel = functools.partial(_matmul_bias_act_kernel, act=act,
                               with_stats=with_stats, m_true=m_true, tm=tm)

    out_shape = [jax.ShapeDtypeStruct((m_pad, c_pad), jnp.float32)]
    out_specs = [pl.BlockSpec((tm, c_pad), lambda i: (i, 0))]
    if with_stats:
        out_shape.append(jax.ShapeDtypeStruct((n_tiles, 2, c_pad), jnp.float32))
        out_specs.append(pl.BlockSpec((1, 2, c_pad), lambda i: (i, 0, 0)))

    cost = pl.CostEstimate(
        flops=2 * m_pad * k_pad * c_pad,
        transcendentals=m_pad * c_pad if act == "sigmoid" else 0,
        bytes_accessed=m_pad * k_pad * 2 + k_pad * c_pad * 2 + m_pad * c_pad * 4,
    )

    outs = pl.pallas_call(
        kernel,
        out_shape=tuple(out_shape),
        grid=(n_tiles,),
        in_specs=[
            pl.BlockSpec((tm, k_pad), lambda i: (i, 0)),     # A tile
            pl.BlockSpec((k_pad, c_pad), lambda i: (0, 0)),  # W resident
            pl.BlockSpec((1, c_pad), lambda i: (0, 0)),      # bias
        ],
        out_specs=tuple(out_specs),
        compiler_params=pltpu.CompilerParams(
            dimension_semantics=("parallel",),
            vmem_limit_bytes=VMEM_LIMIT,
        ),
        cost_estimate=cost,
    )(A_p, W_p, b_p)

    if with_stats:
        return outs[0], outs[1]
    return outs[0], None


def bn_apply(y_pad, scale, shift, out_dtype):
    """Elementwise per-channel y*scale + shift, M-tiled, lane-dense."""
    m_pad, c_pad = y_pad.shape
    tm = min(TM_DEFAULT, m_pad)
    n_tiles = m_pad // tm
    scale2 = scale.astype(jnp.float32).reshape(1, c_pad)
    shift2 = shift.astype(jnp.float32).reshape(1, c_pad)
    return pl.pallas_call(
        _scale_shift_kernel,
        out_shape=jax.ShapeDtypeStruct((m_pad, c_pad), out_dtype),
        grid=(n_tiles,),
        in_specs=[
            pl.BlockSpec((tm, c_pad), lambda i: (i, 0)),
            pl.BlockSpec((1, c_pad), lambda i: (0, 0)),
            pl.BlockSpec((1, c_pad), lambda i: (0, 0)),
        ],
        out_specs=pl.BlockSpec((tm, c_pad), lambda i: (i, 0)),
        compiler_params=pltpu.CompilerParams(
            dimension_semantics=("parallel",),
            vmem_limit_bytes=VMEM_LIMIT,
        ),
    )(y_pad, scale2, shift2)


# ----------------------------------------------------------------------------
# JAX glue: im2col + weight re-layouts
# ----------------------------------------------------------------------------
def im2col(x, kh, kw, stride, dilation, padding):
    """x: (N, H, W, C) -> (N*Ho*Wo, kh*kw*C), Ho, Wo.  Column order (kh, kw, c)."""
    N, H, W, C = x.shape
    xp = jnp.pad(x, ((0, 0), (padding, padding), (padding, padding), (0, 0)))
    Ho = (H + 2 * padding - dilation * (kh - 1) - 1) // stride + 1
    Wo = (W + 2 * padding - dilation * (kw - 1) - 1) // stride + 1
    cols = []
    for i in range(kh):
        for j in range(kw):
            hs, ws = i * dilation, j * dilation
            patch = xp[:, hs:hs + stride * (Ho - 1) + 1:stride,
                          ws:ws + stride * (Wo - 1) + 1:stride, :]
            cols.append(patch)
    A = jnp.concatenate(cols, axis=-1)                      # (N, Ho, Wo, kh*kw*C)
    return A.reshape(N * Ho * Wo, kh * kw * C), Ho, Wo


def conv_weight_to_matrix(w):
    """PyTorch Conv2d weight (Cout, Cin, KH, KW) -> (KH*KW*Cin, Cout)."""
    cout, cin, kh, kw = w.shape
    return jnp.transpose(w, (2, 3, 1, 0)).reshape(kh * kw * cin, cout)


def deconv_weight_to_phase_matrix(w):
    """ConvTranspose2d(k=4, s=2, p=1) weight (Cin, Cout, 4, 4) -> (9*Cin, 4*Cout)
    phase matrix for the sub-pixel decomposition.  Output column order (a, b, co):
    output pixel (2m+a, 2j+b) = 3x3-tap-row(m, j) of the input @ this column group."""
    cin, cout, kh, kw = w.shape
    # (phase a, tap t) -> kernel index; tap t in {0,1,2} is input offset t-1; -1 unused.
    kmap = {(0, 0): 3, (0, 1): 1, (1, 1): 2, (1, 2): 0}
    Wd = jnp.zeros((3, 3, cin, 2, 2, cout), w.dtype)
    for (a, th), kh_idx in kmap.items():
        for (b, tw), kw_idx in kmap.items():
            Wd = Wd.at[th, tw, :, a, b, :].set(w[:, :, kh_idx, kw_idx])
    return Wd.reshape(9 * cin, 4 * cout)


# ----------------------------------------------------------------------------
# Network definition (matches CompletionNetwork.__init__)
# each spec: (type, cin, cout, k, stride, pad, dilation, act, use_bn)
# ----------------------------------------------------------------------------
LAYER_SPECS = [
    ("conv",   4,   32,  5, 1, 2,   1, "relu", True),    # conv1
    ("conv",   32,  64,  3, 2, 1,   1, "relu", True),    # conv2
    ("conv",   64,  64,  3, 1, 1,   1, "relu", True),    # conv3
    ("conv",   64,  128, 3, 2, 1,   1, "relu", True),    # conv4
    ("conv",   128, 128, 3, 1, 1,   1, "relu", True),    # conv5
    ("conv",   128, 128, 3, 1, 1,   1, "relu", True),    # conv6
    ("conv",   128, 128, 3, 1, 2,   2, "relu", True),    # conv7  (dil 2)
    ("conv",   128, 128, 3, 1, 4,   4, "relu", True),    # conv8  (dil 4)
    ("conv",   128, 128, 3, 1, 8,   8, "relu", True),    # conv9  (dil 8)
    ("conv",   128, 128, 3, 1, 16, 16, "relu", True),    # conv10 (dil 16)
    ("conv",   128, 128, 3, 1, 1,   1, "relu", True),    # conv11
    ("conv",   128, 128, 3, 1, 1,   1, "relu", True),    # conv12
    ("deconv", 128, 64,  4, 2, 1,   1, "relu", True),    # deconv13
    ("conv",   64,  64,  3, 1, 1,   1, "relu", True),    # conv14
    ("deconv", 64,  32,  4, 2, 1,   1, "relu", True),    # deconv15
    ("conv",   32,  32,  3, 1, 1,   1, "relu", True),    # conv16
    ("conv",   32,  3,   3, 1, 1,   1, "sigmoid", False),  # conv17 + sigmoid
]


def init_params(key):
    params = []
    for (ltype, cin, cout, k, _s, _p, _d, _act, _bn) in LAYER_SPECS:
        key, kw_, kb_ = jax.random.split(key, 3)
        if ltype == "conv":
            wshape = (cout, cin, k, k)
        else:  # ConvTranspose2d weight layout (Cin, Cout, KH, KW)
            wshape = (cin, cout, k, k)
        fan_in = cin * k * k
        w = jax.random.normal(kw_, wshape, jnp.float32) / math.sqrt(fan_in)
        b = 0.01 * jax.random.normal(kb_, (cout,), jnp.float32)
        gamma = jnp.ones((cout,), jnp.float32)     # BatchNorm2d default init
        beta = jnp.zeros((cout,), jnp.float32)
        params.append({"w": w, "b": b, "gamma": gamma, "beta": beta})
    return params


def completion_forward(x_nchw, params):
    # NCHW (PyTorch) -> NHWC, bf16 activations feeding the MXU
    x = jnp.transpose(x_nchw, (0, 2, 3, 1)).astype(jnp.bfloat16)
    N = x.shape[0]

    for (ltype, cin, cout, k, stride, padding, dil, act, use_bn), p in zip(LAYER_SPECS, params):
        if ltype == "conv":
            A, Ho, Wo = im2col(x, k, k, stride, dil, padding)
            Wm = conv_weight_to_matrix(p["w"])           # (k*k*cin, cout)
            n_phase = 1
        else:
            # sub-pixel decomposition of ConvTranspose2d(k=4, s=2, p=1)
            A, Ho, Wo = im2col(x, 3, 3, 1, 1, 1)
            Wm = deconv_weight_to_phase_matrix(p["w"])   # (9*cin, 4*cout)
            n_phase = 4

        m_true = A.shape[0]
        c_true = cout * n_phase
        bias = p["b"] if n_phase == 1 else jnp.tile(p["b"], n_phase)

        y_pad, stats = fused_conv_matmul(A, Wm, bias, act=act, with_stats=use_bn)
        c_pad = y_pad.shape[1]

        if use_bn:
            # training-mode BatchNorm2d (biased batch stats), applied AFTER the activation,
            # exactly as in the PyTorch forward  bn(act(conv(x))).
            s = jnp.sum(stats[:, 0, :c_true], axis=0)
            ss = jnp.sum(stats[:, 1, :c_true], axis=0)
            if n_phase > 1:                               # combine the 4 deconv phases per channel
                s = jnp.sum(s.reshape(n_phase, cout), axis=0)
                ss = jnp.sum(ss.reshape(n_phase, cout), axis=0)
            count = float(m_true * n_phase)
            mean = s / count
            var = jnp.maximum(ss / count - mean * mean, 0.0)
            scale = p["gamma"] * jax.lax.rsqrt(var + BN_EPS)
            shift = p["beta"] - mean * scale
            if n_phase > 1:
                scale = jnp.tile(scale, n_phase)
                shift = jnp.tile(shift, n_phase)
            scale = jnp.pad(scale, (0, c_pad - c_true))
            shift = jnp.pad(shift, (0, c_pad - c_true))
            y_pad = bn_apply(y_pad, scale, shift, out_dtype=jnp.bfloat16)

        y = y_pad[:m_true, :c_true]                       # drop M / channel padding
        if n_phase == 1:
            x = y.reshape(N, Ho, Wo, cout)
        else:
            x = (y.reshape(N, Ho, Wo, 2, 2, cout)
                   .transpose(0, 1, 3, 2, 4, 5)
                   .reshape(N, 2 * Ho, 2 * Wo, cout))

    # last layer has no BN -> x is the f32 sigmoid output; NHWC -> NCHW
    return jnp.transpose(x, (0, 3, 1, 2)).astype(jnp.float32)


if __name__ == "__main__":
    key = jax.random.PRNGKey(0)
    key, kparam, kx = jax.random.split(key, 3)
    params = init_params(kparam)

    # small example input consistent with the module: 4 input channels (RGB + mask)
    x = jax.random.normal(kx, (2, 4, 16, 16), jnp.float32)

    fwd = jax.jit(completion_forward)
    out = fwd(x, params)
    out = jax.block_until_ready(out)

    assert out.shape == (2, 3, 16, 16), out.shape
    assert bool(jnp.all(jnp.isfinite(out)))
    assert bool(jnp.all((out >= 0.0) & (out <= 1.0)))
    print("KERNEL_OK")
</pallas_src>

<mosaic_0001>
module attributes {stable_mosaic.version = 11 : i64} {
  func.func @_matmul_bias_act_kernel(%arg0: i32, %arg1: memref<256x128xbf16, #tpu.memory_space<vmem>>, %arg2: memref<128x128xbf16, #tpu.memory_space<vmem>>, %arg3: memref<1x128xf32, #tpu.memory_space<vmem>>, %arg4: memref<256x128xf32, #tpu.memory_space<vmem>>, %arg5: memref<1x2x128xf32, #tpu.memory_space<vmem>>) attributes {dimension_semantics = [#tpu.dimension_semantics<parallel>], iteration_bounds = array<i64: 2>, scalar_prefetch = 0 : i64, scratch_operands = 0 : i64, tpu.core_type = #tpu.core_type<tc>, window_params = [{transform_indices = @transform_0, window_bounds = array<i64: 256, 128>}, {pipeline_mode = #tpu.pipeline_mode<synchronous>, transform_indices = @transform_1, window_bounds = array<i64: 128, 128>}, {pipeline_mode = #tpu.pipeline_mode<synchronous>, transform_indices = @transform_2, window_bounds = array<i64: 1, 128>}, {transform_indices = @transform_3, window_bounds = array<i64: 256, 128>}, {transform_indices = @transform_4, window_bounds = array<i64: 1, 2, 128>}]} {
    %c0 = arith.constant 0 : index
    %c0_0 = arith.constant 0 : index
    %0 = vector.load %arg1[%c0, %c0_0] : memref<256x128xbf16, #tpu.memory_space<vmem>>, vector<256x128xbf16>
    %c0_1 = arith.constant 0 : index
    %c0_2 = arith.constant 0 : index
    %1 = vector.load %arg2[%c0_1, %c0_2] : memref<128x128xbf16, #tpu.memory_space<vmem>>, vector<128x128xbf16>
    %cst = arith.constant dense<0.000000e+00> : vector<256x128xf32>
    %2 = tpu.matmul %0, %1, %cst {dimension_numbers = #tpu.dot_dimension_numbers<[1], [0], [0], [1], [0, 0, 1, 1], [], []>} : vector<256x128xbf16>, vector<128x128xbf16>, vector<256x128xf32> -> vector<256x128xf32>
    %c0_3 = arith.constant 0 : index
    %c0_4 = arith.constant 0 : index
    %3 = vector.load %arg3[%c0_3, %c0_4] : memref<1x128xf32, #tpu.memory_space<vmem>>, vector<1x128xf32>
    %4 = vector.broadcast %3 : vector<1x128xf32> to vector<256x128xf32>
    %5 = arith.addf %2, %4 : vector<256x128xf32>
    %cst_5 = arith.constant 0.000000e+00 : f32
    %6 = vector.broadcast %cst_5 : f32 to vector<256x128xf32>
    %7 = arith.maximumf %5, %6 : vector<256x128xf32>
    %c0_6 = arith.constant 0 : index
    %c0_7 = arith.constant 0 : index
    %8 = vector.load %arg4[%c0_6, %c0_7] : memref<256x128xf32, #tpu.memory_space<vmem>>, vector<256x128xf32>
    tpu.vector_store %arg4[%c0_6, %c0_7], %7 {strides = array<i32>} : memref<256x128xf32, #tpu.memory_space<vmem>>, vector<256x128xf32>,
    %9 = tpu.iota {dimensions = array<i32: 0>} : vector<256x128xi32>
    %c256_i32 = arith.constant 256 : i32
    %10 = arith.muli %arg0, %c256_i32 : i32
    %11 = vector.broadcast %10 : i32 to vector<256x128xi32>
    %12 = arith.addi %9, %11 : vector<256x128xi32>
    %c512_i32 = arith.constant 512 : i32
    %13 = vector.broadcast %c512_i32 : i32 to vector<256x128xi32>
    %14 = arith.cmpi slt, %12, %13 : vector<256x128xi32>
    %cst_8 = arith.constant 0.000000e+00 : f32
    %15 = vector.broadcast %cst_8 : f32 to vector<256x128xf32>
    %16 = arith.select %14, %7, %15 : vector<256x128xi1>, vector<256x128xf32>
    %cst_9 = arith.constant dense<0.000000e+00> : vector<128xf32>
    %17 = vector.multi_reduction <add>, %16, %cst_9 [0] : vector<256x128xf32> to vector<128xf32>
    %18 = vector.shape_cast %17 : vector<128xf32> to vector<1x128xf32>
    %19 = arith.mulf %16, %16 : vector<256x128xf32>
    %cst_10 = arith.constant dense<0.000000e+00> : vector<128xf32>
    %20 = vector.multi_reduction <add>, %19, %cst_10 [0] : vector<256x128xf32> to vector<128xf32>
    %21 = vector.shape_cast %20 : vector<128xf32> to vector<1x128xf32>
    %22 = tpu.concatenate %18, %21 in 0 : vector<1x128xf32>, vector<1x128xf32> -> vector<2x128xf32>
    %23 = vector.shape_cast %22 : vector<2x128xf32> to vector<1x2x128xf32>
    %c0_11 = arith.constant 0 : index
    %c0_12 = arith.constant 0 : index
    %c0_13 = arith.constant 0 : index
    %24 = vector.load %arg5[%c0_11, %c0_12, %c0_13] : memref<1x2x128xf32, #tpu.memory_space<vmem>>, vector<1x2x128xf32>
    tpu.vector_store %arg5[%c0_11, %c0_12, %c0_13], %23 {strides = array<i32>} : memref<1x2x128xf32, #tpu.memory_space<vmem>>, vector<1x2x128xf32>,
    return
  }
  func.func @transform_0(%arg0: i32) -> (i32, i32) {
    %c0_i32 = arith.constant 0 : i32
    %c0_i32_0 = arith.constant 0 : i32
    return %arg0, %c0_i32 : i32, i32
  }
  func.func @transform_1(%arg0: i32) -> (i32, i32) {
    %c0_i32 = arith.constant 0 : i32
    %c0_i32_0 = arith.constant 0 : i32
    %c0_i32_1 = arith.constant 0 : i32
    return %c0_i32, %c0_i32_0 : i32, i32
  }
  func.func @transform_2(%arg0: i32) -> (i32, i32) {
    %c0_i32 = arith.constant 0 : i32
    %c0_i32_0 = arith.constant 0 : i32
    %c0_i32_1 = arith.constant 0 : i32
    return %c0_i32, %c0_i32_0 : i32, i32
  }
  func.func @transform_3(%arg0: i32) -> (i32, i32) {
    %c0_i32 = arith.constant 0 : i32
    %c0_i32_0 = arith.constant 0 : i32
    return %arg0, %c0_i32 : i32, i32
  }
  func.func @transform_4(%arg0: i32) -> (i32, i32, i32) {
    %c0_i32 = arith.constant 0 : i32
    %c0_i32_0 = arith.constant 0 : i32
    %c0_i32_1 = arith.constant 0 : i32
    return %arg0, %c0_i32, %c0_i32_0 : i32, i32, i32
  }
}

module attributes {stable_mosaic.version = 11 : i64} {
  func.func @_scale_shift_kernel(%arg0: i32, %arg1: memref<256x128xf32, #tpu.memory_space<vmem>>, %arg2: memref<1x128xf32, #tpu.memory_space<vmem>>, %arg3: memref<1x128xf32, #tpu.memory_space<vmem>>, %arg4: memref<256x128xbf16, #tpu.memory_space<vmem>>) attributes {dimension_semantics = [#tpu.dimension_semantics<parallel>], iteration_bounds = array<i64: 2>, scalar_prefetch = 0 : i64, scratch_operands = 0 : i64, tpu.core_type = #tpu.core_type<tc>, window_params = [{transform_indices = @transform_0, window_bounds = array<i64: 256, 128>}, {pipeline_mode = #tpu.pipeline_mode<synchronous>, transform_indices = @transform_1, window_bounds = array<i64: 1, 128>}, {pipeline_mode = #tpu.pipeline_mode<synchronous>, transform_indices = @transform_2, window_bounds = array<i64: 1, 128>}, {transform_indices = @transform_3, window_bounds = array<i64: 256, 128>}]} {
    %c0 = arith.constant 0 : index
    %c0_0 = arith.constant 0 : index
    %0 = vector.load %arg1[%c0, %c0_0] : memref<256x128xf32, #tpu.memory_space<vmem>>, vector<256x128xf32>
    %c0_1 = arith.constant 0 : index
    %c0_2 = arith.constant 0 : index
    %1 = vector.load %arg2[%c0_1, %c0_2] : memref<1x128xf32, #tpu.memory_space<vmem>>, vector<1x128xf32>
    %2 = vector.broadcast %1 : vector<1x128xf32> to vector<256x128xf32>
    %3 = arith.mulf %0, %2 : vector<256x128xf32>
    %c0_3 = arith.constant 0 : index
    %c0_4 = arith.constant 0 : index
    %4 = vector.load %arg3[%c0_3, %c0_4] : memref<1x128xf32, #tpu.memory_space<vmem>>, vector<1x128xf32>
    %5 = vector.broadcast %4 : vector<1x128xf32> to vector<256x128xf32>
    %6 = arith.addf %3, %5 : vector<256x128xf32>
    %7 = arith.truncf %6 : vector<256x128xf32> to vector<256x128xbf16>
    %c0_5 = arith.constant 0 : index
    %c0_6 = arith.constant 0 : index
    %8 = vector.load %arg4[%c0_5, %c0_6] : memref<256x128xbf16, #tpu.memory_space<vmem>>, vector<256x128xbf16>
    tpu.vector_store %arg4[%c0_5, %c0_6], %7 {strides = array<i32>} : memref<256x128xbf16, #tpu.memory_space<vmem>>, vector<256x128xbf16>,
    return
  }
  func.func @transform_0(%arg0: i32) -> (i32, i32) {
    %c0_i32 = arith.constant 0 : i32
    %c0_i32_0 = arith.constant 0 : i32
    return %arg0, %c0_i32 : i32, i32
  }
  func.func @transform_1(%arg0: i32) -> (i32, i32) {
    %c0_i32 = arith.constant 0 : i32
    %c0_i32_0 = arith.constant 0 : i32
    %c0_i32_1 = arith.constant 0 : i32
    return %c0_i32, %c0_i32_0 : i32, i32
  }
  func.func @transform_2(%arg0: i32) -> (i32, i32) {
    %c0_i32 = arith.constant 0 : i32
    %c0_i32_0 = arith.constant 0 : i32
    %c0_i32_1 = arith.constant 0 : i32
    return %c0_i32, %c0_i32_0 : i32, i32
  }
  func.func @transform_3(%arg0: i32) -> (i32, i32) {
    %c0_i32 = arith.constant 0 : i32
    %c0_i32_0 = arith.constant 0 : i32
    return %arg0, %c0_i32 : i32, i32
  }
}

module attributes {stable_mosaic.version = 11 : i64} {
  func.func @_matmul_bias_act_kernel(%arg0: i32, %arg1: memref<128x384xbf16, #tpu.memory_space<vmem>>, %arg2: memref<384x128xbf16, #tpu.memory_space<vmem>>, %arg3: memref<1x128xf32, #tpu.memory_space<vmem>>, %arg4: memref<128x128xf32, #tpu.memory_space<vmem>>, %arg5: memref<1x2x128xf32, #tpu.memory_space<vmem>>) attributes {dimension_semantics = [#tpu.dimension_semantics<parallel>], iteration_bounds = array<i64: 1>, scalar_prefetch = 0 : i64, scratch_operands = 0 : i64, tpu.core_type = #tpu.core_type<tc>, window_params = [{transform_indices = @transform_0, window_bounds = array<i64: 128, 384>}, {pipeline_mode = #tpu.pipeline_mode<synchronous>, transform_indices = @transform_1, window_bounds = array<i64: 384, 128>}, {pipeline_mode = #tpu.pipeline_mode<synchronous>, transform_indices = @transform_2, window_bounds = array<i64: 1, 128>}, {transform_indices = @transform_3, window_bounds = array<i64: 128, 128>}, {transform_indices = @transform_4, window_bounds = array<i64: 1, 2, 128>}]} {
    %c0 = arith.constant 0 : index
    %c0_0 = arith.constant 0 : index
    %0 = vector.load %arg1[%c0, %c0_0] : memref<128x384xbf16, #tpu.memory_space<vmem>>, vector<128x384xbf16>
    %c0_1 = arith.constant 0 : index
    %c0_2 = arith.constant 0 : index
    %1 = vector.load %arg2[%c0_1, %c0_2] : memref<384x128xbf16, #tpu.memory_space<vmem>>, vector<384x128xbf16>
    %cst = arith.constant dense<0.000000e+00> : vector<128x128xf32>
    %2 = tpu.matmul %0, %1, %cst {dimension_numbers = #tpu.dot_dimension_numbers<[1], [0], [0], [1], [0, 0, 1, 1], [], []>} : vector<128x384xbf16>, vector<384x128xbf16>, vector<128x128xf32> -> vector<128x128xf32>
    %c0_3 = arith.constant 0 : index
    %c0_4 = arith.constant 0 : index
    %3 = vector.load %arg3[%c0_3, %c0_4] : memref<1x128xf32, #tpu.memory_space<vmem>>, vector<1x128xf32>
    %4 = vector.broadcast %3 : vector<1x128xf32> to vector<128x128xf32>
    %5 = arith.addf %2, %4 : vector<128x128xf32>
    %cst_5 = arith.constant 0.000000e+00 : f32
    %6 = vector.broadcast %cst_5 : f32 to vector<128x128xf32>
    %7 = arith.maximumf %5, %6 : vector<128x128xf32>
    %c0_6 = arith.constant 0 : index
    %c0_7 = arith.constant 0 : index
    %8 = vector.load %arg4[%c0_6, %c0_7] : memref<128x128xf32, #tpu.memory_space<vmem>>, vector<128x128xf32>
    tpu.vector_store %arg4[%c0_6, %c0_7], %7 {strides = array<i32>} : memref<128x128xf32, #tpu.memory_space<vmem>>, vector<128x128xf32>,
    %9 = tpu.iota {dimensions = array<i32: 0>} : vector<128x128xi32>
    %c128_i32 = arith.constant 128 : i32
    %10 = arith.muli %arg0, %c128_i32 : i32
    %11 = vector.broadcast %10 : i32 to vector<128x128xi32>
    %12 = arith.addi %9, %11 : vector<128x128xi32>
    %c128_i32_8 = arith.constant 128 : i32
    %13 = vector.broadcast %c128_i32_8 : i32 to vector<128x128xi32>
    %14 = arith.cmpi slt, %12, %13 : vector<128x128xi32>
    %cst_9 = arith.constant 0.000000e+00 : f32
    %15 = vector.broadcast %cst_9 : f32 to vector<128x128xf32>
    %16 = arith.select %14, %7, %15 : vector<128x128xi1>, vector<128x128xf32>
    %cst_10 = arith.constant dense<0.000000e+00> : vector<128xf32>
    %17 = vector.multi_reduction <add>, %16, %cst_10 [0] : vector<128x128xf32> to vector<128xf32>
    %18 = vector.shape_cast %17 : vector<128xf32> to vector<1x128xf32>
    %19 = arith.mulf %16, %16 : vector<128x128xf32>
    %cst_11 = arith.constant dense<0.000000e+00> : vector<128xf32>
    %20 = vector.multi_reduction <add>, %19, %cst_11 [0] : vector<128x128xf32> to vector<128xf32>
    %21 = vector.shape_cast %20 : vector<128xf32> to vector<1x128xf32>
    %22 = tpu.concatenate %18, %21 in 0 : vector<1x128xf32>, vector<1x128xf32> -> vector<2x128xf32>
    %23 = vector.shape_cast %22 : vector<2x128xf32> to vector<1x2x128xf32>
    %c0_12 = arith.constant 0 : index
    %c0_13 = arith.constant 0 : index
    %c0_14 = arith.constant 0 : index
    %24 = vector.load %arg5[%c0_12, %c0_13, %c0_14] : memref<1x2x128xf32, #tpu.memory_space<vmem>>, vector<1x2x128xf32>
    tpu.vector_store %arg5[%c0_12, %c0_13, %c0_14], %23 {strides = array<i32>} : memref<1x2x128xf32, #tpu.memory_space<vmem>>, vector<1x2x128xf32>,
    return
  }
  func.func @transform_0(%arg0: i32) -> (i32, i32) {
    %c0_i32 = arith.constant 0 : i32
    %c0_i32_0 = arith.constant 0 : i32
    return %arg0, %c0_i32 : i32, i32
  }
  func.func @transform_1(%arg0: i32) -> (i32, i32) {
    %c0_i32 = arith.constant 0 : i32
    %c0_i32_0 = arith.constant 0 : i32
    %c0_i32_1 = arith.constant 0 : i32
    return %c0_i32, %c0_i32_0 : i32, i32
  }
  func.func @transform_2(%arg0: i32) -> (i32, i32) {
    %c0_i32 = arith.constant 0 : i32
    %c0_i32_0 = arith.constant 0 : i32
    %c0_i32_1 = arith.constant 0 : i32
    return %c0_i32, %c0_i32_0 : i32, i32
  }
  func.func @transform_3(%arg0: i32) -> (i32, i32) {
    %c0_i32 = arith.constant 0 : i32
    %c0_i32_0 = arith.constant 0 : i32
    return %arg0, %c0_i32 : i32, i32
  }
  func.func @transform_4(%arg0: i32) -> (i32, i32, i32) {
    %c0_i32 = arith.constant 0 : i32
    %c0_i32_0 = arith.constant 0 : i32
    %c0_i32_1 = arith.constant 0 : i32
    return %arg0, %c0_i32, %c0_i32_0 : i32, i32, i32
  }
}

module attributes {stable_mosaic.version = 11 : i64} {
  func.func @_scale_shift_kernel(%arg0: i32, %arg1: memref<128x128xf32, #tpu.memory_space<vmem>>, %arg2: memref<1x128xf32, #tpu.memory_space<vmem>>, %arg3: memref<1x128xf32, #tpu.memory_space<vmem>>, %arg4: memref<128x128xbf16, #tpu.memory_space<vmem>>) attributes {dimension_semantics = [#tpu.dimension_semantics<parallel>], iteration_bounds = array<i64: 1>, scalar_prefetch = 0 : i64, scratch_operands = 0 : i64, tpu.core_type = #tpu.core_type<tc>, window_params = [{transform_indices = @transform_0, window_bounds = array<i64: 128, 128>}, {pipeline_mode = #tpu.pipeline_mode<synchronous>, transform_indices = @transform_1, window_bounds = array<i64: 1, 128>}, {pipeline_mode = #tpu.pipeline_mode<synchronous>, transform_indices = @transform_2, window_bounds = array<i64: 1, 128>}, {transform_indices = @transform_3, window_bounds = array<i64: 128, 128>}]} {
    %c0 = arith.constant 0 : index
    %c0_0 = arith.constant 0 : index
    %0 = vector.load %arg1[%c0, %c0_0] : memref<128x128xf32, #tpu.memory_space<vmem>>, vector<128x128xf32>
    %c0_1 = arith.constant 0 : index
    %c0_2 = arith.constant 0 : index
    %1 = vector.load %arg2[%c0_1, %c0_2] : memref<1x128xf32, #tpu.memory_space<vmem>>, vector<1x128xf32>
    %2 = vector.broadcast %1 : vector<1x128xf32> to vector<128x128xf32>
    %3 = arith.mulf %0, %2 : vector<128x128xf32>
    %c0_3 = arith.constant 0 : index
    %c0_4 = arith.constant 0 : index
    %4 = vector.load %arg3[%c0_3, %c0_4] : memref<1x128xf32, #tpu.memory_space<vmem>>, vector<1x128xf32>
    %5 = vector.broadcast %4 : vector<1x128xf32> to vector<128x128xf32>
    %6 = arith.addf %3, %5 : vector<128x128xf32>
    %7 = arith.truncf %6 : vector<128x128xf32> to vector<128x128xbf16>
    %c0_5 = arith.constant 0 : index
    %c0_6 = arith.constant 0 : index
    %8 = vector.load %arg4[%c0_5, %c0_6] : memref<128x128xbf16, #tpu.memory_space<vmem>>, vector<128x128xbf16>
    tpu.vector_store %arg4[%c0_5, %c0_6], %7 {strides = array<i32>} : memref<128x128xbf16, #tpu.memory_space<vmem>>, vector<128x128xbf16>,
    return
  }
  func.func @transform_0(%arg0: i32) -> (i32, i32) {
    %c0_i32 = arith.constant 0 : i32
    %c0_i32_0 = arith.constant 0 : i32
    return %arg0, %c0_i32 : i32, i32
  }
  func.func @transform_1(%arg0: i32) -> (i32, i32) {
    %c0_i32 = arith.constant 0 : i32
    %c0_i32_0 = arith.constant 0 : i32
    %c0_i32_1 = arith.constant 0 : i32
    return %c0_i32, %c0_i32_0 : i32, i32
  }
  func.func @transform_2(%arg0: i32) -> (i32, i32) {
    %c0_i32 = arith.constant 0 : i32
    %c0_i32_0 = arith.constant 0 : i32
    %c0_i32_1 = arith.constant 0 : i32
    return %c0_i32, %c0_i32_0 : i32, i32
  }
  func.func @transform_3(%arg0: i32) -> (i32, i32) {
    %c0_i32 = arith.constant 0 : i32
    %c0_i32_0 = arith.constant 0 : i32
    return %arg0, %c0_i32 : i32, i32
  }
}

module attributes {stable_mosaic.version = 11 : i64} {
  func.func @_matmul_bias_act_kernel(%arg0: i32, %arg1: memref<128x640xbf16, #tpu.memory_space<vmem>>, %arg2: memref<640x128xbf16, #tpu.memory_space<vmem>>, %arg3: memref<1x128xf32, #tpu.memory_space<vmem>>, %arg4: memref<128x128xf32, #tpu.memory_space<vmem>>, %arg5: memref<1x2x128xf32, #tpu.memory_space<vmem>>) attributes {dimension_semantics = [#tpu.dimension_semantics<parallel>], iteration_bounds = array<i64: 1>, scalar_prefetch = 0 : i64, scratch_operands = 0 : i64, tpu.core_type = #tpu.core_type<tc>, window_params = [{transform_indices = @transform_0, window_bounds = array<i64: 128, 640>}, {pipeline_mode = #tpu.pipeline_mode<synchronous>, transform_indices = @transform_1, window_bounds = array<i64: 640, 128>}, {pipeline_mode = #tpu.pipeline_mode<synchronous>, transform_indices = @transform_2, window_bounds = array<i64: 1, 128>}, {transform_indices = @transform_3, window_bounds = array<i64: 128, 128>}, {transform_indices = @transform_4, window_bounds = array<i64: 1, 2, 128>}]} {
    %c0 = arith.constant 0 : index
    %c0_0 = arith.constant 0 : index
    %0 = vector.load %arg1[%c0, %c0_0] : memref<128x640xbf16, #tpu.memory_space<vmem>>, vector<128x640xbf16>
    %c0_1 = arith.constant 0 : index
    %c0_2 = arith.constant 0 : index
    %1 = vector.load %arg2[%c0_1, %c0_2] : memref<640x128xbf16, #tpu.memory_space<vmem>>, vector<640x128xbf16>
    %cst = arith.constant dense<0.000000e+00> : vector<128x128xf32>
    %2 = tpu.matmul %0, %1, %cst {dimension_numbers = #tpu.dot_dimension_numbers<[1], [0], [0], [1], [0, 0, 1, 1], [], []>} : vector<128x640xbf16>, vector<640x128xbf16>, vector<128x128xf32> -> vector<128x128xf32>
    %c0_3 = arith.constant 0 : index
    %c0_4 = arith.constant 0 : index
    %3 = vector.load %arg3[%c0_3, %c0_4] : memref<1x128xf32, #tpu.memory_space<vmem>>, vector<1x128xf32>
    %4 = vector.broadcast %3 : vector<1x128xf32> to vector<128x128xf32>
    %5 = arith.addf %2, %4 : vector<128x128xf32>
    %cst_5 = arith.constant 0.000000e+00 : f32
    %6 = vector.broadcast %cst_5 : f32 to vector<128x128xf32>
    %7 = arith.maximumf %5, %6 : vector<128x128xf32>
    %c0_6 = arith.constant 0 : index
    %c0_7 = arith.constant 0 : index
    %8 = vector.load %arg4[%c0_6, %c0_7] : memref<128x128xf32, #tpu.memory_space<vmem>>, vector<128x128xf32>
    tpu.vector_store %arg4[%c0_6, %c0_7], %7 {strides = array<i32>} : memref<128x128xf32, #tpu.memory_space<vmem>>, vector<128x128xf32>,
    %9 = tpu.iota {dimensions = array<i32: 0>} : vector<128x128xi32>
    %c128_i32 = arith.constant 128 : i32
    %10 = arith.muli %arg0, %c128_i32 : i32
    %11 = vector.broadcast %10 : i32 to vector<128x128xi32>
    %12 = arith.addi %9, %11 : vector<128x128xi32>
    %c128_i32_8 = arith.constant 128 : i32
    %13 = vector.broadcast %c128_i32_8 : i32 to vector<128x128xi32>
    %14 = arith.cmpi slt, %12, %13 : vector<128x128xi32>
    %cst_9 = arith.constant 0.000000e+00 : f32
    %15 = vector.broadcast %cst_9 : f32 to vector<128x128xf32>
    %16 = arith.select %14, %7, %15 : vector<128x128xi1>, vector<128x128xf32>
    %cst_10 = arith.constant dense<0.000000e+00> : vector<128xf32>
    %17 = vector.multi_reduction <add>, %16, %cst_10 [0] : vector<128x128xf32> to vector<128xf32>
    %18 = vector.shape_cast %17 : vector<128xf32> to vector<1x128xf32>
    %19 = arith.mulf %16, %16 : vector<128x128xf32>
    %cst_11 = arith.constant dense<0.000000e+00> : vector<128xf32>
    %20 = vector.multi_reduction <add>, %19, %cst_11 [0] : vector<128x128xf32> to vector<128xf32>
    %21 = vector.shape_cast %20 : vector<128xf32> to vector<1x128xf32>
    %22 = tpu.concatenate %18, %21 in 0 : vector<1x128xf32>, vector<1x128xf32> -> vector<2x128xf32>
    %23 = vector.shape_cast %22 : vector<2x128xf32> to vector<1x2x128xf32>
    %c0_12 = arith.constant 0 : index
    %c0_13 = arith.constant 0 : index
    %c0_14 = arith.constant 0 : index
    %24 = vector.load %arg5[%c0_12, %c0_13, %c0_14] : memref<1x2x128xf32, #tpu.memory_space<vmem>>, vector<1x2x128xf32>
    tpu.vector_store %arg5[%c0_12, %c0_13, %c0_14], %23 {strides = array<i32>} : memref<1x2x128xf32, #tpu.memory_space<vmem>>, vector<1x2x128xf32>,
    return
  }
  func.func @transform_0(%arg0: i32) -> (i32, i32) {
    %c0_i32 = arith.constant 0 : i32
    %c0_i32_0 = arith.constant 0 : i32
    return %arg0, %c0_i32 : i32, i32
  }
  func.func @transform_1(%arg0: i32) -> (i32, i32) {
    %c0_i32 = arith.constant 0 : i32
    %c0_i32_0 = arith.constant 0 : i32
    %c0_i32_1 = arith.constant 0 : i32
    return %c0_i32, %c0_i32_0 : i32, i32
  }
  func.func @transform_2(%arg0: i32) -> (i32, i32) {
    %c0_i32 = arith.constant 0 : i32
    %c0_i32_0 = arith.constant 0 : i32
    %c0_i32_1 = arith.constant 0 : i32
    return %c0_i32, %c0_i32_0 : i32, i32
  }
  func.func @transform_3(%arg0: i32) -> (i32, i32) {
    %c0_i32 = arith.constant 0 : i32
    %c0_i32_0 = arith.constant 0 : i32
    return %arg0, %c0_i32 : i32, i32
  }
  func.func @transform_4(%arg0: i32) -> (i32, i32, i32) {
    %c0_i32 = arith.constant 0 : i32
    %c0_i32_0 = arith.constant 0 : i32
    %c0_i32_1 = arith.constant 0 : i32
    return %arg0, %c0_i32, %c0_i32_0 : i32, i32, i32
  }
}

module attributes {stable_mosaic.version = 11 : i64} {
  func.func @_matmul_bias_act_kernel(%arg0: i32, %arg1: memref<32x640xbf16, #tpu.memory_space<vmem>>, %arg2: memref<640x128xbf16, #tpu.memory_space<vmem>>, %arg3: memref<1x128xf32, #tpu.memory_space<vmem>>, %arg4: memref<32x128xf32, #tpu.memory_space<vmem>>, %arg5: memref<1x2x128xf32, #tpu.memory_space<vmem>>) attributes {dimension_semantics = [#tpu.dimension_semantics<parallel>], iteration_bounds = array<i64: 1>, scalar_prefetch = 0 : i64, scratch_operands = 0 : i64, tpu.core_type = #tpu.core_type<tc>, window_params = [{transform_indices = @transform_0, window_bounds = array<i64: 32, 640>}, {pipeline_mode = #tpu.pipeline_mode<synchronous>, transform_indices = @transform_1, window_bounds = array<i64: 640, 128>}, {pipeline_mode = #tpu.pipeline_mode<synchronous>, transform_indices = @transform_2, window_bounds = array<i64: 1, 128>}, {transform_indices = @transform_3, window_bounds = array<i64: 32, 128>}, {transform_indices = @transform_4, window_bounds = array<i64: 1, 2, 128>}]} {
    %c0 = arith.constant 0 : index
    %c0_0 = arith.constant 0 : index
    %0 = vector.load %arg1[%c0, %c0_0] : memref<32x640xbf16, #tpu.memory_space<vmem>>, vector<32x640xbf16>
    %c0_1 = arith.constant 0 : index
    %c0_2 = arith.constant 0 : index
    %1 = vector.load %arg2[%c0_1, %c0_2] : memref<640x128xbf16, #tpu.memory_space<vmem>>, vector<640x128xbf16>
    %cst = arith.constant dense<0.000000e+00> : vector<32x128xf32>
    %2 = tpu.matmul %0, %1, %cst {dimension_numbers = #tpu.dot_dimension_numbers<[1], [0], [0], [1], [0, 0, 1, 1], [], []>} : vector<32x640xbf16>, vector<640x128xbf16>, vector<32x128xf32> -> vector<32x128xf32>
    %c0_3 = arith.constant 0 : index
    %c0_4 = arith.constant 0 : index
    %3 = vector.load %arg3[%c0_3, %c0_4] : memref<1x128xf32, #tpu.memory_space<vmem>>, vector<1x128xf32>
    %4 = vector.broadcast %3 : vector<1x128xf32> to vector<32x128xf32>
    %5 = arith.addf %2, %4 : vector<32x128xf32>
    %cst_5 = arith.constant 0.000000e+00 : f32
    %6 = vector.broadcast %cst_5 : f32 to vector<32x128xf32>
    %7 = arith.maximumf %5, %6 : vector<32x128xf32>
    %c0_6 = arith.constant 0 : index
    %c0_7 = arith.constant 0 : index
    %8 = vector.load %arg4[%c0_6, %c0_7] : memref<32x128xf32, #tpu.memory_space<vmem>>, vector<32x128xf32>
    tpu.vector_store %arg4[%c0_6, %c0_7], %7 {strides = array<i32>} : memref<32x128xf32, #tpu.memory_space<vmem>>, vector<32x128xf32>,
    %9 = tpu.iota {dimensions = array<i32: 0>} : vector<32x128xi32>
    %c32_i32 = arith.constant 32 : i32
    %10 = arith.muli %arg0, %c32_i32 : i32
    %11 = vector.broadcast %10 : i32 to vector<32x128xi32>
    %12 = arith.addi %9, %11 : vector<32x128xi32>
    %c32_i32_8 = arith.constant 32 : i32
    %13 = vector.broadcast %c32_i32_8 : i32 to vector<32x128xi32>
    %14 = arith.cmpi slt, %12, %13 : vector<32x128xi32>
    %cst_9 = arith.constant 0.000000e+00 : f32
    %15 = vector.broadcast %cst_9 : f32 to vector<32x128xf32>
    %16 = arith.select %14, %7, %15 : vector<32x128xi1>, vector<32x128xf32>
    %cst_10 = arith.constant dense<0.000000e+00> : vector<128xf32>
    %17 = vector.multi_reduction <add>, %16, %cst_10 [0] : vector<32x128xf32> to vector<128xf32>
    %18 = vector.shape_cast %17 : vector<128xf32> to vector<1x128xf32>
    %19 = arith.mulf %16, %16 : vector<32x128xf32>
    %cst_11 = arith.constant dense<0.000000e+00> : vector<128xf32>
    %20 = vector.multi_reduction <add>, %19, %cst_11 [0] : vector<32x128xf32> to vector<128xf32>
    %21 = vector.shape_cast %20 : vector<128xf32> to vector<1x128xf32>
    %22 = tpu.concatenate %18, %21 in 0 : vector<1x128xf32>, vector<1x128xf32> -> vector<2x128xf32>
    %23 = vector.shape_cast %22 : vector<2x128xf32> to vector<1x2x128xf32>
    %c0_12 = arith.constant 0 : index
    %c0_13 = arith.constant 0 : index
    %c0_14 = arith.constant 0 : index
    %24 = vector.load %arg5[%c0_12, %c0_13, %c0_14] : memref<1x2x128xf32, #tpu.memory_space<vmem>>, vector<1x2x128xf32>
    tpu.vector_store %arg5[%c0_12, %c0_13, %c0_14], %23 {strides = array<i32>} : memref<1x2x128xf32, #tpu.memory_space<vmem>>, vector<1x2x128xf32>,
    return
  }
  func.func @transform_0(%arg0: i32) -> (i32, i32) {
    %c0_i32 = arith.constant 0 : i32
    %c0_i32_0 = arith.constant 0 : i32
    return %arg0, %c0_i32 : i32, i32
  }
  func.func @transform_1(%arg0: i32) -> (i32, i32) {
    %c0_i32 = arith.constant 0 : i32
    %c0_i32_0 = arith.constant 0 : i32
    %c0_i32_1 = arith.constant 0 : i32
    return %c0_i32, %c0_i32_0 : i32, i32
  }
  func.func @transform_2(%arg0: i32) -> (i32, i32) {
    %c0_i32 = arith.constant 0 : i32
    %c0_i32_0 = arith.constant 0 : i32
    %c0_i32_1 = arith.constant 0 : i32
    return %c0_i32, %c0_i32_0 : i32, i32
  }
  func.func @transform_3(%arg0: i32) -> (i32, i32) {
    %c0_i32 = arith.constant 0 : i32
    %c0_i32_0 = arith.constant 0 : i32
    return %arg0, %c0_i32 : i32, i32
  }
  func.func @transform_4(%arg0: i32) -> (i32, i32, i32) {
    %c0_i32 = arith.constant 0 : i32
    %c0_i32_0 = arith.constant 0 : i32
    %c0_i32_1 = arith.constant 0 : i32
    return %arg0, %c0_i32, %c0_i32_0 : i32, i32, i32
  }
}

module attributes {stable_mosaic.version = 11 : i64} {
  func.func @_scale_shift_kernel(%arg0: i32, %arg1: memref<32x128xf32, #tpu.memory_space<vmem>>, %arg2: memref<1x128xf32, #tpu.memory_space<vmem>>, %arg3: memref<1x128xf32, #tpu.memory_space<vmem>>, %arg4: memref<32x128xbf16, #tpu.memory_space<vmem>>) attributes {dimension_semantics = [#tpu.dimension_semantics<parallel>], iteration_bounds = array<i64: 1>, scalar_prefetch = 0 : i64, scratch_operands = 0 : i64, tpu.core_type = #tpu.core_type<tc>, window_params = [{transform_indices = @transform_0, window_bounds = array<i64: 32, 128>}, {pipeline_mode = #tpu.pipeline_mode<synchronous>, transform_indices = @transform_1, window_bounds = array<i64: 1, 128>}, {pipeline_mode = #tpu.pipeline_mode<synchronous>, transform_indices = @transform_2, window_bounds = array<i64: 1, 128>}, {transform_indices = @transform_3, window_bounds = array<i64: 32, 128>}]} {
    %c0 = arith.constant 0 : index
    %c0_0 = arith.constant 0 : index
    %0 = vector.load %arg1[%c0, %c0_0] : memref<32x128xf32, #tpu.memory_space<vmem>>, vector<32x128xf32>
    %c0_1 = arith.constant 0 : index
    %c0_2 = arith.constant 0 : index
    %1 = vector.load %arg2[%c0_1, %c0_2] : memref<1x128xf32, #tpu.memory_space<vmem>>, vector<1x128xf32>
    %2 = vector.broadcast %1 : vector<1x128xf32> to vector<32x128xf32>
    %3 = arith.mulf %0, %2 : vector<32x128xf32>
    %c0_3 = arith.constant 0 : index
    %c0_4 = arith.constant 0 : index
    %4 = vector.load %arg3[%c0_3, %c0_4] : memref<1x128xf32, #tpu.memory_space<vmem>>, vector<1x128xf32>
    %5 = vector.broadcast %4 : vector<1x128xf32> to vector<32x128xf32>
    %6 = arith.addf %3, %5 : vector<32x128xf32>
    %7 = arith.truncf %6 : vector<32x128xf32> to vector<32x128xbf16>
    %c0_5 = arith.constant 0 : index
    %c0_6 = arith.constant 0 : index
    %8 = vector.load %arg4[%c0_5, %c0_6] : memref<32x128xbf16, #tpu.memory_space<vmem>>, vector<32x128xbf16>
    tpu.vector_store %arg4[%c0_5, %c0_6], %7 {strides = array<i32>} : memref<32x128xbf16, #tpu.memory_space<vmem>>, vector<32x128xbf16>,
    return
  }
  func.func @transform_0(%arg0: i32) -> (i32, i32) {
    %c0_i32 = arith.constant 0 : i32
    %c0_i32_0 = arith.constant 0 : i32
    return %arg0, %c0_i32 : i32, i32
  }
  func.func @transform_1(%arg0: i32) -> (i32, i32) {
    %c0_i32 = arith.constant 0 : i32
    %c0_i32_0 = arith.constant 0 : i32
    %c0_i32_1 = arith.constant 0 : i32
    return %c0_i32, %c0_i32_0 : i32, i32
  }
  func.func @transform_2(%arg0: i32) -> (i32, i32) {
    %c0_i32 = arith.constant 0 : i32
    %c0_i32_0 = arith.constant 0 : i32
    %c0_i32_1 = arith.constant 0 : i32
    return %c0_i32, %c0_i32_0 : i32, i32
  }
  func.func @transform_3(%arg0: i32) -> (i32, i32) {
    %c0_i32 = arith.constant 0 : i32
    %c0_i32_0 = arith.constant 0 : i32
    return %arg0, %c0_i32 : i32, i32
  }
}

module attributes {stable_mosaic.version = 11 : i64} {
  func.func @_matmul_bias_act_kernel(%arg0: i32, %arg1: memref<32x1152xbf16, #tpu.memory_space<vmem>>, %arg2: memref<1152x128xbf16, #tpu.memory_space<vmem>>, %arg3: memref<1x128xf32, #tpu.memory_space<vmem>>, %arg4: memref<32x128xf32, #tpu.memory_space<vmem>>, %arg5: memref<1x2x128xf32, #tpu.memory_space<vmem>>) attributes {dimension_semantics = [#tpu.dimension_semantics<parallel>], iteration_bounds = array<i64: 1>, scalar_prefetch = 0 : i64, scratch_operands = 0 : i64, tpu.core_type = #tpu.core_type<tc>, window_params = [{transform_indices = @transform_0, window_bounds = array<i64: 32, 1152>}, {pipeline_mode = #tpu.pipeline_mode<synchronous>, transform_indices = @transform_1, window_bounds = array<i64: 1152, 128>}, {pipeline_mode = #tpu.pipeline_mode<synchronous>, transform_indices = @transform_2, window_bounds = array<i64: 1, 128>}, {transform_indices = @transform_3, window_bounds = array<i64: 32, 128>}, {transform_indices = @transform_4, window_bounds = array<i64: 1, 2, 128>}]} {
    %c0 = arith.constant 0 : index
    %c0_0 = arith.constant 0 : index
    %0 = vector.load %arg1[%c0, %c0_0] : memref<32x1152xbf16, #tpu.memory_space<vmem>>, vector<32x1152xbf16>
    %c0_1 = arith.constant 0 : index
    %c0_2 = arith.constant 0 : index
    %1 = vector.load %arg2[%c0_1, %c0_2] : memref<1152x128xbf16, #tpu.memory_space<vmem>>, vector<1152x128xbf16>
    %cst = arith.constant dense<0.000000e+00> : vector<32x128xf32>
    %2 = tpu.matmul %0, %1, %cst {dimension_numbers = #tpu.dot_dimension_numbers<[1], [0], [0], [1], [0, 0, 1, 1], [], []>} : vector<32x1152xbf16>, vector<1152x128xbf16>, vector<32x128xf32> -> vector<32x128xf32>
    %c0_3 = arith.constant 0 : index
    %c0_4 = arith.constant 0 : index
    %3 = vector.load %arg3[%c0_3, %c0_4] : memref<1x128xf32, #tpu.memory_space<vmem>>, vector<1x128xf32>
    %4 = vector.broadcast %3 : vector<1x128xf32> to vector<32x128xf32>
    %5 = arith.addf %2, %4 : vector<32x128xf32>
    %cst_5 = arith.constant 0.000000e+00 : f32
    %6 = vector.broadcast %cst_5 : f32 to vector<32x128xf32>
    %7 = arith.maximumf %5, %6 : vector<32x128xf32>
    %c0_6 = arith.constant 0 : index
    %c0_7 = arith.constant 0 : index
    %8 = vector.load %arg4[%c0_6, %c0_7] : memref<32x128xf32, #tpu.memory_space<vmem>>, vector<32x128xf32>
    tpu.vector_store %arg4[%c0_6, %c0_7], %7 {strides = array<i32>} : memref<32x128xf32, #tpu.memory_space<vmem>>, vector<32x128xf32>,
    %9 = tpu.iota {dimensions = array<i32: 0>} : vector<32x128xi32>
    %c32_i32 = arith.constant 32 : i32
    %10 = arith.muli %arg0, %c32_i32 : i32
    %11 = vector.broadcast %10 : i32 to vector<32x128xi32>
    %12 = arith.addi %9, %11 : vector<32x128xi32>
    %c32_i32_8 = arith.constant 32 : i32
    %13 = vector.broadcast %c32_i32_8 : i32 to vector<32x128xi32>
    %14 = arith.cmpi slt, %12, %13 : vector<32x128xi32>
    %cst_9 = arith.constant 0.000000e+00 : f32
    %15 = vector.broadcast %cst_9 : f32 to vector<32x128xf32>
    %16 = arith.select %14, %7, %15 : vector<32x128xi1>, vector<32x128xf32>
    %cst_10 = arith.constant dense<0.000000e+00> : vector<128xf32>
    %17 = vector.multi_reduction <add>, %16, %cst_10 [0] : vector<32x128xf32> to vector<128xf32>
    %18 = vector.shape_cast %17 : vector<128xf32> to vector<1x128xf32>
    %19 = arith.mulf %16, %16 : vector<32x128xf32>
    %cst_11 = arith.constant dense<0.000000e+00> : vector<128xf32>
    %20 = vector.multi_reduction <add>, %19, %cst_11 [0] : vector<32x128xf32> to vector<128xf32>
    %21 = vector.shape_cast %20 : vector<128xf32> to vector<1x128xf32>
    %22 = tpu.concatenate %18, %21 in 0 : vector<1x128xf32>, vector<1x128xf32> -> vector<2x128xf32>
    %23 = vector.shape_cast %22 : vector<2x128xf32> to vector<1x2x128xf32>
    %c0_12 = arith.constant 0 : index
    %c0_13 = arith.constant 0 : index
    %c0_14 = arith.constant 0 : index
    %24 = vector.load %arg5[%c0_12, %c0_13, %c0_14] : memref<1x2x128xf32, #tpu.memory_space<vmem>>, vector<1x2x128xf32>
    tpu.vector_store %arg5[%c0_12, %c0_13, %c0_14], %23 {strides = array<i32>} : memref<1x2x128xf32, #tpu.memory_space<vmem>>, vector<1x2x128xf32>,
    return
  }
  func.func @transform_0(%arg0: i32) -> (i32, i32) {
    %c0_i32 = arith.constant 0 : i32
    %c0_i32_0 = arith.constant 0 : i32
    return %arg0, %c0_i32 : i32, i32
  }
  func.func @transform_1(%arg0: i32) -> (i32, i32) {
    %c0_i32 = arith.constant 0 : i32
    %c0_i32_0 = arith.constant 0 : i32
    %c0_i32_1 = arith.constant 0 : i32
    return %c0_i32, %c0_i32_0 : i32, i32
  }
  func.func @transform_2(%arg0: i32) -> (i32, i32) {
    %c0_i32 = arith.constant 0 : i32
    %c0_i32_0 = arith.constant 0 : i32
    %c0_i32_1 = arith.constant 0 : i32
    return %c0_i32, %c0_i32_0 : i32, i32
  }
  func.func @transform_3(%arg0: i32) -> (i32, i32) {
    %c0_i32 = arith.constant 0 : i32
    %c0_i32_0 = arith.constant 0 : i32
    return %arg0, %c0_i32 : i32, i32
  }
  func.func @transform_4(%arg0: i32) -> (i32, i32, i32) {
    %c0_i32 = arith.constant 0 : i32
    %c0_i32_0 = arith.constant 0 : i32
    %c0_i32_1 = arith.constant 0 : i32
    return %arg0, %c0_i32, %c0_i32_0 : i32, i32, i32
  }
}

module attributes {stable_mosaic.version = 11 : i64} {
  func.func @_matmul_bias_act_kernel(%arg0: i32, %arg1: memref<32x1152xbf16, #tpu.memory_space<vmem>>, %arg2: memref<1152x256xbf16, #tpu.memory_space<vmem>>, %arg3: memref<1x256xf32, #tpu.memory_space<vmem>>, %arg4: memref<32x256xf32, #tpu.memory_space<vmem>>, %arg5: memref<1x2x256xf32, #tpu.memory_space<vmem>>) attributes {dimension_semantics = [#tpu.dimension_semantics<parallel>], iteration_bounds = array<i64: 1>, scalar_prefetch = 0 : i64, scratch_operands = 0 : i64, tpu.core_type = #tpu.core_type<tc>, window_params = [{transform_indices = @transform_0, window_bounds = array<i64: 32, 1152>}, {pipeline_mode = #tpu.pipeline_mode<synchronous>, transform_indices = @transform_1, window_bounds = array<i64: 1152, 256>}, {pipeline_mode = #tpu.pipeline_mode<synchronous>, transform_indices = @transform_2, window_bounds = array<i64: 1, 256>}, {transform_indices = @transform_3, window_bounds = array<i64: 32, 256>}, {transform_indices = @transform_4, window_bounds = array<i64: 1, 2, 256>}]} {
    %c0 = arith.constant 0 : index
    %c0_0 = arith.constant 0 : index
    %0 = vector.load %arg1[%c0, %c0_0] : memref<32x1152xbf16, #tpu.memory_space<vmem>>, vector<32x1152xbf16>
    %c0_1 = arith.constant 0 : index
    %c0_2 = arith.constant 0 : index
    %1 = vector.load %arg2[%c0_1, %c0_2] : memref<1152x256xbf16, #tpu.memory_space<vmem>>, vector<1152x256xbf16>
    %cst = arith.constant dense<0.000000e+00> : vector<32x256xf32>
    %2 = tpu.matmul %0, %1, %cst {dimension_numbers = #tpu.dot_dimension_numbers<[1], [0], [0], [1], [0, 0, 1, 1], [], []>} : vector<32x1152xbf16>, vector<1152x256xbf16>, vector<32x256xf32> -> vector<32x256xf32>
    %c0_3 = arith.constant 0 : index
    %c0_4 = arith.constant 0 : index
    %3 = vector.load %arg3[%c0_3, %c0_4] : memref<1x256xf32, #tpu.memory_space<vmem>>, vector<1x256xf32>
    %4 = vector.broadcast %3 : vector<1x256xf32> to vector<32x256xf32>
    %5 = arith.addf %2, %4 : vector<32x256xf32>
    %cst_5 = arith.constant 0.000000e+00 : f32
    %6 = vector.broadcast %cst_5 : f32 to vector<32x256xf32>
    %7 = arith.maximumf %5, %6 : vector<32x256xf32>
    %c0_6 = arith.constant 0 : index
    %c0_7 = arith.constant 0 : index
    %8 = vector.load %arg4[%c0_6, %c0_7] : memref<32x256xf32, #tpu.memory_space<vmem>>, vector<32x256xf32>
    tpu.vector_store %arg4[%c0_6, %c0_7], %7 {strides = array<i32>} : memref<32x256xf32, #tpu.memory_space<vmem>>, vector<32x256xf32>,
    %9 = tpu.iota {dimensions = array<i32: 0>} : vector<32x256xi32>
    %c32_i32 = arith.constant 32 : i32
    %10 = arith.muli %arg0, %c32_i32 : i32
    %11 = vector.broadcast %10 : i32 to vector<32x256xi32>
    %12 = arith.addi %9, %11 : vector<32x256xi32>
    %c32_i32_8 = arith.constant 32 : i32
    %13 = vector.broadcast %c32_i32_8 : i32 to vector<32x256xi32>
    %14 = arith.cmpi slt, %12, %13 : vector<32x256xi32>
    %cst_9 = arith.constant 0.000000e+00 : f32
    %15 = vector.broadcast %cst_9 : f32 to vector<32x256xf32>
    %16 = arith.select %14, %7, %15 : vector<32x256xi1>, vector<32x256xf32>
    %cst_10 = arith.constant dense<0.000000e+00> : vector<256xf32>
    %17 = vector.multi_reduction <add>, %16, %cst_10 [0] : vector<32x256xf32> to vector<256xf32>
    %18 = vector.shape_cast %17 : vector<256xf32> to vector<1x256xf32>
    %19 = arith.mulf %16, %16 : vector<32x256xf32>
    %cst_11 = arith.constant dense<0.000000e+00> : vector<256xf32>
    %20 = vector.multi_reduction <add>, %19, %cst_11 [0] : vector<32x256xf32> to vector<256xf32>
    %21 = vector.shape_cast %20 : vector<256xf32> to vector<1x256xf32>
    %22 = tpu.concatenate %18, %21 in 0 : vector<1x256xf32>, vector<1x256xf32> -> vector<2x256xf32>
    %23 = vector.shape_cast %22 : vector<2x256xf32> to vector<1x2x256xf32>
    %c0_12 = arith.constant 0 : index
    %c0_13 = arith.constant 0 : index
    %c0_14 = arith.constant 0 : index
    %24 = vector.load %arg5[%c0_12, %c0_13, %c0_14] : memref<1x2x256xf32, #tpu.memory_space<vmem>>, vector<1x2x256xf32>
    tpu.vector_store %arg5[%c0_12, %c0_13, %c0_14], %23 {strides = array<i32>} : memref<1x2x256xf32, #tpu.memory_space<vmem>>, vector<1x2x256xf32>,
    return
  }
  func.func @transform_0(%arg0: i32) -> (i32, i32) {
    %c0_i32 = arith.constant 0 : i32
    %c0_i32_0 = arith.constant 0 : i32
    return %arg0, %c0_i32 : i32, i32
  }
  func.func @transform_1(%arg0: i32) -> (i32, i32) {
    %c0_i32 = arith.constant 0 : i32
    %c0_i32_0 = arith.constant 0 : i32
    %c0_i32_1 = arith.constant 0 : i32
    return %c0_i32, %c0_i32_0 : i32, i32
  }
  func.func @transform_2(%arg0: i32) -> (i32, i32) {
    %c0_i32 = arith.constant 0 : i32
    %c0_i32_0 = arith.constant 0 : i32
    %c0_i32_1 = arith.constant 0 : i32
    return %c0_i32, %c0_i32_0 : i32, i32
  }
  func.func @transform_3(%arg0: i32) -> (i32, i32) {
    %c0_i32 = arith.constant 0 : i32
    %c0_i32_0 = arith.constant 0 : i32
    return %arg0, %c0_i32 : i32, i32
  }
  func.func @transform_4(%arg0: i32) -> (i32, i32, i32) {
    %c0_i32 = arith.constant 0 : i32
    %c0_i32_0 = arith.constant 0 : i32
    %c0_i32_1 = arith.constant 0 : i32
    return %arg0, %c0_i32, %c0_i32_0 : i32, i32, i32
  }
}

module attributes {stable_mosaic.version = 11 : i64} {
  func.func @_scale_shift_kernel(%arg0: i32, %arg1: memref<32x256xf32, #tpu.memory_space<vmem>>, %arg2: memref<1x256xf32, #tpu.memory_space<vmem>>, %arg3: memref<1x256xf32, #tpu.memory_space<vmem>>, %arg4: memref<32x256xbf16, #tpu.memory_space<vmem>>) attributes {dimension_semantics = [#tpu.dimension_semantics<parallel>], iteration_bounds = array<i64: 1>, scalar_prefetch = 0 : i64, scratch_operands = 0 : i64, tpu.core_type = #tpu.core_type<tc>, window_params = [{transform_indices = @transform_0, window_bounds = array<i64: 32, 256>}, {pipeline_mode = #tpu.pipeline_mode<synchronous>, transform_indices = @transform_1, window_bounds = array<i64: 1, 256>}, {pipeline_mode = #tpu.pipeline_mode<synchronous>, transform_indices = @transform_2, window_bounds = array<i64: 1, 256>}, {transform_indices = @transform_3, window_bounds = array<i64: 32, 256>}]} {
    %c0 = arith.constant 0 : index
    %c0_0 = arith.constant 0 : index
    %0 = vector.load %arg1[%c0, %c0_0] : memref<32x256xf32, #tpu.memory_space<vmem>>, vector<32x256xf32>
    %c0_1 = arith.constant 0 : index
    %c0_2 = arith.constant 0 : index
    %1 = vector.load %arg2[%c0_1, %c0_2] : memref<1x256xf32, #tpu.memory_space<vmem>>, vector<1x256xf32>
    %2 = vector.broadcast %1 : vector<1x256xf32> to vector<32x256xf32>
    %3 = arith.mulf %0, %2 : vector<32x256xf32>
    %c0_3 = arith.constant 0 : index
    %c0_4 = arith.constant 0 : index
    %4 = vector.load %arg3[%c0_3, %c0_4] : memref<1x256xf32, #tpu.memory_space<vmem>>, vector<1x256xf32>
    %5 = vector.broadcast %4 : vector<1x256xf32> to vector<32x256xf32>
    %6 = arith.addf %3, %5 : vector<32x256xf32>
    %7 = arith.truncf %6 : vector<32x256xf32> to vector<32x256xbf16>
    %c0_5 = arith.constant 0 : index
    %c0_6 = arith.constant 0 : index
    %8 = vector.load %arg4[%c0_5, %c0_6] : memref<32x256xbf16, #tpu.memory_space<vmem>>, vector<32x256xbf16>
    tpu.vector_store %arg4[%c0_5, %c0_6], %7 {strides = array<i32>} : memref<32x256xbf16, #tpu.memory_space<vmem>>, vector<32x256xbf16>,
    return
  }
  func.func @transform_0(%arg0: i32) -> (i32, i32) {
    %c0_i32 = arith.constant 0 : i32
    %c0_i32_0 = arith.constant 0 : i32
    return %arg0, %c0_i32 : i32, i32
  }
  func.func @transform_1(%arg0: i32) -> (i32, i32) {
    %c0_i32 = arith.constant 0 : i32
    %c0_i32_0 = arith.constant 0 : i32
    %c0_i32_1 = arith.constant 0 : i32
    return %c0_i32, %c0_i32_0 : i32, i32
  }
  func.func @transform_2(%arg0: i32) -> (i32, i32) {
    %c0_i32 = arith.constant 0 : i32
    %c0_i32_0 = arith.constant 0 : i32
    %c0_i32_1 = arith.constant 0 : i32
    return %c0_i32, %c0_i32_0 : i32, i32
  }
  func.func @transform_3(%arg0: i32) -> (i32, i32) {
    %c0_i32 = arith.constant 0 : i32
    %c0_i32_0 = arith.constant 0 : i32
    return %arg0, %c0_i32 : i32, i32
  }
}

module attributes {stable_mosaic.version = 11 : i64} {
  func.func @_matmul_bias_act_kernel(%arg0: i32, %arg1: memref<256x384xbf16, #tpu.memory_space<vmem>>, %arg2: memref<384x128xbf16, #tpu.memory_space<vmem>>, %arg3: memref<1x128xf32, #tpu.memory_space<vmem>>, %arg4: memref<256x128xf32, #tpu.memory_space<vmem>>, %arg5: memref<1x2x128xf32, #tpu.memory_space<vmem>>) attributes {dimension_semantics = [#tpu.dimension_semantics<parallel>], iteration_bounds = array<i64: 2>, scalar_prefetch = 0 : i64, scratch_operands = 0 : i64, tpu.core_type = #tpu.core_type<tc>, window_params = [{transform_indices = @transform_0, window_bounds = array<i64: 256, 384>}, {pipeline_mode = #tpu.pipeline_mode<synchronous>, transform_indices = @transform_1, window_bounds = array<i64: 384, 128>}, {pipeline_mode = #tpu.pipeline_mode<synchronous>, transform_indices = @transform_2, window_bounds = array<i64: 1, 128>}, {transform_indices = @transform_3, window_bounds = array<i64: 256, 128>}, {transform_indices = @transform_4, window_bounds = array<i64: 1, 2, 128>}]} {
    %c0 = arith.constant 0 : index
    %c0_0 = arith.constant 0 : index
    %0 = vector.load %arg1[%c0, %c0_0] : memref<256x384xbf16, #tpu.memory_space<vmem>>, vector<256x384xbf16>
    %c0_1 = arith.constant 0 : index
    %c0_2 = arith.constant 0 : index
    %1 = vector.load %arg2[%c0_1, %c0_2] : memref<384x128xbf16, #tpu.memory_space<vmem>>, vector<384x128xbf16>
    %cst = arith.constant dense<0.000000e+00> : vector<256x128xf32>
    %2 = tpu.matmul %0, %1, %cst {dimension_numbers = #tpu.dot_dimension_numbers<[1], [0], [0], [1], [0, 0, 1, 1], [], []>} : vector<256x384xbf16>, vector<384x128xbf16>, vector<256x128xf32> -> vector<256x128xf32>
    %c0_3 = arith.constant 0 : index
    %c0_4 = arith.constant 0 : index
    %3 = vector.load %arg3[%c0_3, %c0_4] : memref<1x128xf32, #tpu.memory_space<vmem>>, vector<1x128xf32>
    %4 = vector.broadcast %3 : vector<1x128xf32> to vector<256x128xf32>
    %5 = arith.addf %2, %4 : vector<256x128xf32>
    %cst_5 = arith.constant 0.000000e+00 : f32
    %6 = vector.broadcast %cst_5 : f32 to vector<256x128xf32>
    %7 = arith.maximumf %5, %6 : vector<256x128xf32>
    %c0_6 = arith.constant 0 : index
    %c0_7 = arith.constant 0 : index
    %8 = vector.load %arg4[%c0_6, %c0_7] : memref<256x128xf32, #tpu.memory_space<vmem>>, vector<256x128xf32>
    tpu.vector_store %arg4[%c0_6, %c0_7], %7 {strides = array<i32>} : memref<256x128xf32, #tpu.memory_space<vmem>>, vector<256x128xf32>,
    %9 = tpu.iota {dimensions = array<i32: 0>} : vector<256x128xi32>
    %c256_i32 = arith.constant 256 : i32
    %10 = arith.muli %arg0, %c256_i32 : i32
    %11 = vector.broadcast %10 : i32 to vector<256x128xi32>
    %12 = arith.addi %9, %11 : vector<256x128xi32>
    %c512_i32 = arith.constant 512 : i32
    %13 = vector.broadcast %c512_i32 : i32 to vector<256x128xi32>
    %14 = arith.cmpi slt, %12, %13 : vector<256x128xi32>
    %cst_8 = arith.constant 0.000000e+00 : f32
    %15 = vector.broadcast %cst_8 : f32 to vector<256x128xf32>
    %16 = arith.select %14, %7, %15 : vector<256x128xi1>, vector<256x128xf32>
    %cst_9 = arith.constant dense<0.000000e+00> : vector<128xf32>
    %17 = vector.multi_reduction <add>, %16, %cst_9 [0] : vector<256x128xf32> to vector<128xf32>
    %18 = vector.shape_cast %17 : vector<128xf32> to vector<1x128xf32>
    %19 = arith.mulf %16, %16 : vector<256x128xf32>
    %cst_10 = arith.constant dense<0.000000e+00> : vector<128xf32>
    %20 = vector.multi_reduction <add>, %19, %cst_10 [0] : vector<256x128xf32> to vector<128xf32>
    %21 = vector.shape_cast %20 : vector<128xf32> to vector<1x128xf32>
    %22 = tpu.concatenate %18, %21 in 0 : vector<1x128xf32>, vector<1x128xf32> -> vector<2x128xf32>
    %23 = vector.shape_cast %22 : vector<2x128xf32> to vector<1x2x128xf32>
    %c0_11 = arith.constant 0 : index
    %c0_12 = arith.constant 0 : index
    %c0_13 = arith.constant 0 : index
    %24 = vector.load %arg5[%c0_11, %c0_12, %c0_13] : memref<1x2x128xf32, #tpu.memory_space<vmem>>, vector<1x2x128xf32>
    tpu.vector_store %arg5[%c0_11, %c0_12, %c0_13], %23 {strides = array<i32>} : memref<1x2x128xf32, #tpu.memory_space<vmem>>, vector<1x2x128xf32>,
    return
  }
  func.func @transform_0(%arg0: i32) -> (i32, i32) {
    %c0_i32 = arith.constant 0 : i32
    %c0_i32_0 = arith.constant 0 : i32
    return %arg0, %c0_i32 : i32, i32
  }
  func.func @transform_1(%arg0: i32) -> (i32, i32) {
    %c0_i32 = arith.constant 0 : i32
    %c0_i32_0 = arith.constant 0 : i32
    %c0_i32_1 = arith.constant 0 : i32
    return %c0_i32, %c0_i32_0 : i32, i32
  }
  func.func @transform_2(%arg0: i32) -> (i32, i32) {
    %c0_i32 = arith.constant 0 : i32
    %c0_i32_0 = arith.constant 0 : i32
    %c0_i32_1 = arith.constant 0 : i32
    return %c0_i32, %c0_i32_0 : i32, i32
  }
  func.func @transform_3(%arg0: i32) -> (i32, i32) {
    %c0_i32 = arith.constant 0 : i32
    %c0_i32_0 = arith.constant 0 : i32
    return %arg0, %c0_i32 : i32, i32
  }
  func.func @transform_4(%arg0: i32) -> (i32, i32, i32) {
    %c0_i32 = arith.constant 0 : i32
    %c0_i32_0 = arith.constant 0 : i32
    %c0_i32_1 = arith.constant 0 : i32
    return %arg0, %c0_i32, %c0_i32_0 : i32, i32, i32
  }
}

module attributes {stable_mosaic.version = 11 : i64} {
  func.func @_matmul_bias_act_kernel(%arg0: i32, %arg1: memref<256x384xbf16, #tpu.memory_space<vmem>>, %arg2: memref<384x128xbf16, #tpu.memory_space<vmem>>, %arg3: memref<1x128xf32, #tpu.memory_space<vmem>>, %arg4: memref<256x128xf32, #tpu.memory_space<vmem>>) attributes {dimension_semantics = [#tpu.dimension_semantics<parallel>], iteration_bounds = array<i64: 2>, scalar_prefetch = 0 : i64, scratch_operands = 0 : i64, tpu.core_type = #tpu.core_type<tc>, window_params = [{transform_indices = @transform_0, window_bounds = array<i64: 256, 384>}, {pipeline_mode = #tpu.pipeline_mode<synchronous>, transform_indices = @transform_1, window_bounds = array<i64: 384, 128>}, {pipeline_mode = #tpu.pipeline_mode<synchronous>, transform_indices = @transform_2, window_bounds = array<i64: 1, 128>}, {transform_indices = @transform_3, window_bounds = array<i64: 256, 128>}]} {
    %c0 = arith.constant 0 : index
    %c0_0 = arith.constant 0 : index
    %0 = vector.load %arg1[%c0, %c0_0] : memref<256x384xbf16, #tpu.memory_space<vmem>>, vector<256x384xbf16>
    %c0_1 = arith.constant 0 : index
    %c0_2 = arith.constant 0 : index
    %1 = vector.load %arg2[%c0_1, %c0_2] : memref<384x128xbf16, #tpu.memory_space<vmem>>, vector<384x128xbf16>
    %cst = arith.constant dense<0.000000e+00> : vector<256x128xf32>
    %2 = tpu.matmul %0, %1, %cst {dimension_numbers = #tpu.dot_dimension_numbers<[1], [0], [0], [1], [0, 0, 1, 1], [], []>} : vector<256x384xbf16>, vector<384x128xbf16>, vector<256x128xf32> -> vector<256x128xf32>
    %c0_3 = arith.constant 0 : index
    %c0_4 = arith.constant 0 : index
    %3 = vector.load %arg3[%c0_3, %c0_4] : memref<1x128xf32, #tpu.memory_space<vmem>>, vector<1x128xf32>
    %4 = vector.broadcast %3 : vector<1x128xf32> to vector<256x128xf32>
    %5 = arith.addf %2, %4 : vector<256x128xf32>
    %6 = arith.negf %5 : vector<256x128xf32>
    %7 = math.exp %6 : vector<256x128xf32>
    %cst_5 = arith.constant 1.000000e+00 : f32
    %8 = vector.broadcast %cst_5 : f32 to vector<256x128xf32>
    %9 = arith.addf %8, %7 : vector<256x128xf32>
    %10 = arith.divf %8, %9 : vector<256x128xf32>
    %c0_6 = arith.constant 0 : index
    %c0_7 = arith.constant 0 : index
    %11 = vector.load %arg4[%c0_6, %c0_7] : memref<256x128xf32, #tpu.memory_space<vmem>>, vector<256x128xf32>
    tpu.vector_store %arg4[%c0_6, %c0_7], %10 {strides = array<i32>} : memref<256x128xf32, #tpu.memory_space<vmem>>, vector<256x128xf32>,
    return
  }
  func.func @transform_0(%arg0: i32) -> (i32, i32) {
    %c0_i32 = arith.constant 0 : i32
    %c0_i32_0 = arith.constant 0 : i32
    return %arg0, %c0_i32 : i32, i32
  }
  func.func @transform_1(%arg0: i32) -> (i32, i32) {
    %c0_i32 = arith.constant 0 : i32
    %c0_i32_0 = arith.constant 0 : i32
    %c0_i32_1 = arith.constant 0 : i32
    return %c0_i32, %c0_i32_0 : i32, i32
  }
  func.func @transform_2(%arg0: i32) -> (i32, i32) {
    %c0_i32 = arith.constant 0 : i32
    %c0_i32_0 = arith.constant 0 : i32
    %c0_i32_1 = arith.constant 0 : i32
    return %c0_i32, %c0_i32_0 : i32, i32
  }
  func.func @transform_3(%arg0: i32) -> (i32, i32) {
    %c0_i32 = arith.constant 0 : i32
    %c0_i32_0 = arith.constant 0 : i32
    return %arg0, %c0_i32 : i32, i32
  }
}

</mosaic_0001>

<bundles_post_ra>
// kernel: completion_forward.34
= control target key start
LH: loop header
LB: loop body
LE: loop exit
PB: predicated region body
PF: predicated region fallthrough
CT: control target
= control target key end

     0   :  { %s542_s12 = smov 0   ;;  %s685_s0 = inlined_call_operand.vmem [shape: f32[512,128], index: 0, kind: input, shape index: {}]   ;;  %s686_s1 = inlined_call_operand.vmem [shape: f32[1,128], index: 1, kind: input, shape index: {}]   ;;  %s687_s2 = inlined_call_operand.vmem [shape: f32[1,128], index: 2, kind: input, shape index: {}]   ;;  %s688_s3 = inlined_call_operand.vmem [shape: bf16[512,128], index: 3, kind: output, shape index: {}]  }
   0x1 LB: > { %s398_s13 = sadd.s32 4294967295, %s520_s12   ;;  %p402_p0 = scmp.ge.s32.totalorder %s520_s12, 1  ;;  %s520_s12 = sphi %s542_s12, %s13_s12  }
   0x2   : > { %p138_p1 = scmp.lt.s32.totalorder %s520_s12, 3 }
   0x4   : > { %p139_p2 = pnand %p402_p0, %p138_p1 }
   0x5   : > { %s403_s14 = sshll.u32 (!%p139_p2), %s398_s13, 5 }
   0x6   : > { %142 = sbr.rel (%p139_p2) target bundleno = 40 (0x28), region = 32  ;;  %p163_p3 = scmp.lt.s32.totalorder (!%p139_p2), %s403_s14, 63 }
   0xb   : > { %s690_s14 = smov (!%p163_p3, %s403_s14), 63  ;;  %v553_v0 = vld [vmem:[%s686_s1] ss:$0 sm:$0xff] }
   0xc   : > { %s404_s17 = sshll.u32 %s690_s14, 3  ;;  %v563_v1 = vld [vmem:[%s687_s2] ss:$0 sm:$0xff]  ;;  %s406_s23 = sshll.u32 %s690_s14, 2 }
   0xd   : > { %s558_s20 = scalar_lea.vmem %s685_s0, %s404_s17  ;;  %s589_s26 = scalar_lea.vmem %s688_s3, %s406_s23 }
   0xe   : > { %v174_v2 = vld [vmem:[%s558_s20] sm:$0xff]  ;;  %v175_v3 = vld [vmem:[%s558_s20 + $0x8] sm:$0xff]  ;;  %v176_v4 = vld [vmem:[%s558_s20 + $0x10] sm:$0xff] }
   0xf   : > { %v210_v5 = vmul.f32 %v553_v0, %v174_v2  ;;  %v211_v6 = vmul.f32 %v553_v0, %v175_v3  ;;  %v177_v7 = vld [vmem:[%s558_s20 + $0x18] sm:$0xff]  ;;  %v212_v8 = vmul.f32 %v553_v0, %v176_v4  ;;  %v178_v9 = vld [vmem:[%s558_s20 + $0x20] sm:$0xff]  ;;  %v179_v10 = vld [vmem:[%s558_s20 + $0x28] sm:$0xff] }
  0x10   : > { %v213_v11 = vmul.f32 %v553_v0, %v177_v7  ;;  %v214_v12 = vmul.f32 %v553_v0, %v178_v9  ;;  %v215_v13 = vmul.f32 %v553_v0, %v179_v10  ;;  %v180_v14 = vld [vmem:[%s558_s20 + $0x30] sm:$0xff]  ;;  %v181_v15 = vld [vmem:[%s558_s20 + $0x38] sm:$0xff]  ;;  %v182_v16 = vld [vmem:[%s558_s20 + $0x40] sm:$0xff] }
  0x11   : > { %v246_v17 = vadd.f32 %v563_v1, %v210_v5  ;;  %v247_v18 = vadd.f32 %v563_v1, %v211_v6  ;;  %v248_v19 = vadd.f32 %v563_v1, %v212_v8  ;;  %v216_v20 = vmul.f32 %v553_v0, %v180_v14  ;;  %v183_v21 = vld [vmem:[%s558_s20 + $0x48] sm:$0xff]  ;;  %v184_v22 = vld [vmem:[%s558_s20 + $0x50] sm:$0xff]  ;;  %v185_v27 = vld [vmem:[%s558_s20 + $0x58] sm:$0xff] }
  0x12   : > { %v249_v23 = vadd.f32 %v563_v1, %v213_v11  ;;  %v250_v24 = vadd.f32 %v563_v1, %v214_v12  ;;  %v251_v25 = vadd.f32 %v563_v1, %v215_v13  ;;  %v217_v26 = vmul.f32 %v553_v0, %v181_v15  ;;  %v186_v28 = vld [vmem:[%s558_s20 + $0x60] sm:$0xff]  ;;  %v187_v33 = vld [vmem:[%s558_s20 + $0x68] sm:$0xff]  ;;  %v188_v34 = vld [vmem:[%s558_s20 + $0x70] sm:$0xff] }
  0x13   : > { %v412_v29 = vpack.c.bf16 %v247_v18, %v246_v17  ;;  %v252_v30 = vadd.f32 %v563_v1, %v216_v20  ;;  %v218_v31 = vmul.f32 %v553_v0, %v182_v16  ;;  %v219_v32 = vmul.f32 %v553_v0, %v183_v21  ;;  %v189_v39 = vld [vmem:[%s558_s20 + $0x78] sm:$0xff]  ;;  %v190_v44 = vld [vmem:[%s558_s20 + $0x80] sm:$0xff]  ;;  %v191_v45 = vld [vmem:[%s558_s20 + $0x88] sm:$0xff] }
  0x14   : > { %v417_v35 = vpack.c.bf16 %v249_v23, %v248_v19  ;;  %v422_v36 = vpack.c.bf16 %v251_v25, %v250_v24  ;;  %v253_v37 = vadd.f32 %v563_v1, %v217_v26  ;;  %v220_v38 = vmul.f32 %v553_v0, %v184_v22  ;;  %v192_v50 = vld [vmem:[%s558_s20 + $0x90] sm:$0xff]  ;;  %v193_v51 = vld [vmem:[%s558_s20 + $0x98] sm:$0xff]  ;;  %v194_v56 = vld [vmem:[%s558_s20 + $0xa0] sm:$0xff] }
  0x15   : > { %413 = vst [vmem:[%s589_s26] sm:$0xff] %v412_v29   ;;  %v254_v40 = vadd.f32 %v563_v1, %v218_v31  ;;  %v255_v41 = vadd.f32 %v563_v1, %v219_v32  ;;  %v221_v42 = vmul.f32 %v553_v0, %v185_v27  ;;  %v222_v43 = vmul.f32 %v553_v0, %v186_v28  ;;  %v195_v61 = vld [vmem:[%s558_s20 + $0xa8] sm:$0xff]  ;;  %v196_v4 = vld [vmem:[%s558_s20 + $0xb0] sm:$0xff]  ;;  %v197_v5 = vld [vmem:[%s558_s20 + $0xb8] sm:$0xff] }
  0x16   : > { %489 = vst [vmem:[%s589_s26 + $0x8] sm:$0xff] %v417_v35   ;;  %v427_v46 = vpack.c.bf16 %v253_v37, %v252_v30  ;;  %v256_v47 = vadd.f32 %v563_v1, %v220_v38  ;;  %v223_v48 = vmul.f32 %v553_v0, %v187_v33  ;;  %v224_v49 = vmul.f32 %v553_v0, %v188_v34  ;;  %v198_v10 = vld [vmem:[%s558_s20 + $0xc0] sm:$0xff]  ;;  %v199_v11 = vld [vmem:[%s558_s20 + $0xc8] sm:$0xff]  ;;  %v200_v16 = vld [vmem:[%s558_s20 + $0xd0] sm:$0xff] }
  0x17   : > { %490 = vst [vmem:[%s589_s26 + $0x10] sm:$0xff] %v422_v36   ;;  %v432_v52 = vpack.c.bf16 %v255_v41, %v254_v40  ;;  %v257_v53 = vadd.f32 %v563_v1, %v221_v42  ;;  %v258_v54 = vadd.f32 %v563_v1, %v222_v43  ;;  %v225_v55 = vmul.f32 %v553_v0, %v189_v39  ;;  %v201_v17 = vld [vmem:[%s558_s20 + $0xd8] sm:$0xff]  ;;  %v202_v22 = vld [vmem:[%s558_s20 + $0xe0] sm:$0xff]  ;;  %v203_v27 = vld [vmem:[%s558_s20 + $0xe8] sm:$0xff] }
  0x18   : > { %491 = vst [vmem:[%s589_s26 + $0x18] sm:$0xff] %v427_v46   ;;  %v259_v57 = vadd.f32 %v563_v1, %v223_v48  ;;  %v260_v58 = vadd.f32 %v563_v1, %v224_v49  ;;  %v226_v59 = vmul.f32 %v553_v0, %v190_v44  ;;  %v227_v60 = vmul.f32 %v553_v0, %v191_v45  ;;  %v204_v32 = vld [vmem:[%s558_s20 + $0xf0] sm:$0xff]  ;;  %v205_v33 = vld [vmem:[%s558_s20 + $0xf8] sm:$0xff] }
  0x19   : > { %492 = vst [vmem:[%s589_s26 + $0x20] sm:$0xff] %v432_v52   ;;  %v437_v62 = vpack.c.bf16 %v257_v53, %v256_v47  ;;  %v261_v63 = vadd.f32 %v563_v1, %v225_v55  ;;  %v228_v2 = vmul.f32 %v553_v0, %v192_v50  ;;  %v229_v3 = vmul.f32 %v553_v0, %v193_v51 }
  0x1a   : > { %v442_v6 = vpack.c.bf16 %v259_v57, %v258_v54  ;;  %v262_v7 = vadd.f32 %v563_v1, %v226_v59  ;;  %v263_v8 = vadd.f32 %v563_v1, %v227_v60  ;;  %v230_v9 = vmul.f32 %v553_v0, %v194_v56 }
  0x1b   : > { %493 = vst [vmem:[%s589_s26 + $0x28] sm:$0xff] %v437_v62   ;;  %v447_v12 = vpack.c.bf16 %v261_v63, %v260_v58  ;;  %v264_v13 = vadd.f32 %v563_v1, %v228_v2  ;;  %v265_v14 = vadd.f32 %v563_v1, %v229_v3  ;;  %v231_v15 = vmul.f32 %v553_v0, %v195_v61 }
  0x1c   : > { %494 = vst [vmem:[%s589_s26 + $0x30] sm:$0xff] %v442_v6   ;;  %v452_v18 = vpack.c.bf16 %v263_v8, %v262_v7  ;;  %v266_v19 = vadd.f32 %v563_v1, %v230_v9  ;;  %v232_v20 = vmul.f32 %v553_v0, %v196_v4  ;;  %v233_v21 = vmul.f32 %v553_v0, %v197_v5 }
  0x1d   : > { %495 = vst [vmem:[%s589_s26 + $0x38] sm:$0xff] %v447_v12   ;;  %v457_v23 = vpack.c.bf16 %v265_v14, %v264_v13  ;;  %v267_v24 = vadd.f32 %v563_v1, %v231_v15  ;;  %v234_v25 = vmul.f32 %v553_v0, %v198_v10  ;;  %v235_v26 = vmul.f32 %v553_v0, %v199_v11 }
  0x1e   : > { %496 = vst [vmem:[%s589_s26 + $0x40] sm:$0xff] %v452_v18   ;;  %v268_v28 = vadd.f32 %v563_v1, %v232_v20  ;;  %v269_v29 = vadd.f32 %v563_v1, %v233_v21  ;;  %v236_v30 = vmul.f32 %v553_v0, %v200_v16  ;;  %v237_v31 = vmul.f32 %v553_v0, %v201_v17 }
  0x1f   : > { %497 = vst [vmem:[%s589_s26 + $0x48] sm:$0xff] %v457_v23   ;;  %v462_v34 = vpack.c.bf16 %v267_v24, %v266_v19  ;;  %v270_v35 = vadd.f32 %v563_v1, %v234_v25  ;;  %v271_v36 = vadd.f32 %v563_v1, %v235_v26  ;;  %v238_v37 = vmul.f32 %v553_v0, %v202_v22 }
  0x20   : > { %v467_v38 = vpack.c.bf16 %v269_v29, %v268_v28  ;;  %v272_v39 = vadd.f32 %v563_v1, %v236_v30  ;;  %v273_v40 = vadd.f32 %v563_v1, %v237_v31  ;;  %v239_v41 = vmul.f32 %v553_v0, %v203_v27 }
  0x21   : > { %498 = vst [vmem:[%s589_s26 + $0x50] sm:$0xff] %v462_v34   ;;  %v472_v42 = vpack.c.bf16 %v271_v36, %v270_v35  ;;  %v274_v43 = vadd.f32 %v563_v1, %v238_v37  ;;  %v240_v44 = vmul.f32 %v553_v0, %v204_v32  ;;  %v241_v45 = vmul.f32 %v553_v0, %v205_v33 }
  0x22   : > { %499 = vst [vmem:[%s589_s26 + $0x58] sm:$0xff] %v467_v38   ;;  %v477_v46 = vpack.c.bf16 %v273_v40, %v272_v39  ;;  %v275_v47 = vadd.f32 %v563_v1, %v239_v41 }
  0x23   : > { %500 = vst [vmem:[%s589_s26 + $0x60] sm:$0xff] %v472_v42   ;;  %v276_v48 = vadd.f32 %v563_v1, %v240_v44  ;;  %v277_v49 = vadd.f32 %v563_v1, %v241_v45 }
  0x24   : > { %501 = vst [vmem:[%s589_s26 + $0x68] sm:$0xff] %v477_v46   ;;  %v482_v50 = vpack.c.bf16 %v275_v47, %v274_v43 }
  0x25   : > { %v487_v51 = vpack.c.bf16 %v277_v49, %v276_v48 }
  0x26   : > { %502 = vst [vmem:[%s589_s26 + $0x70] sm:$0xff] %v482_v50  }
  0x27   : > { %503 = vst [vmem:[%s589_s26 + $0x78] sm:$0xff] %v487_v51  }
  0x28 PF: > { %s13_s12 = sadd.s32 1, %s520_s12  }
  0x29   : > { %p10_p4 = scmp.ge.s32.totalorder %s13_s12, 4  }
  0x2b   :  { %12 = sbr.rel (!%p10_p4) target bundleno = 1 (0x1), region = 62 }

// kernel: completion_forward.33
= control target key start
LH: loop header
LB: loop body
LE: loop exit
PB: predicated region body
PF: predicated region fallthrough
CT: control target
= control target key end

     0   :  { %s1087_s15 = smov 0   ;;  %s1521_s0 = inlined_call_operand.vmem [shape: bf16[512,128], index: 0, kind: input, shape index: {}]   ;;  %s1522_s1 = inlined_call_operand.vmem [shape: bf16[128,128], index: 1, kind: input, shape index: {}]   ;;  %s1523_s2 = inlined_call_operand.vmem [shape: f32[1,128], index: 2, kind: input, shape index: {}]   ;;  %s1524_s3 = inlined_call_operand.vmem [shape: f32[512,128], index: 3, kind: output, shape index: {0}]   ;;  %s1525_s4 = inlined_call_operand.vmem [shape: f32[2,2,128], index: 4, kind: output, shape index: {1}]  }
   0x1 LB: > { %s1093_s16 = sadd.s32 4294967295, %s1060_s15   ;;  %p892_p0 = scmp.ge.s32.totalorder %s1060_s15, 1  ;;  %s1060_s15 = sphi %s1087_s15, %s15_s15  }
   0x2   : > { %p166_p1 = scmp.lt.s32.totalorder %s1060_s15, 3 }
   0x4   : > { %p167_p2 = pnand %p892_p0, %p166_p1 }
   0x5   : > { %s893_s25 = sshll.u32 (!%p167_p2), %s1093_s16, 5  ;;  %s994_s20 = sshll.u32 (!%p167_p2), %s1093_s16, 8 }
   0x6   : > { %170 = sbr.rel (%p167_p2) target bundleno = 296 (0x128), region = 32  ;;  %p197_p3 = scmp.lt.s32.totalorder (!%p167_p2), %s893_s25, 63 }
   0x7   : > { %p208_p4 = scmp.lt.s32.totalorder (!%p167_p2), %s1093_s16, 1 }
   0xb   : > { %v1020_v0 = vld [vmem:[%s1522_s1 + $0x38] sm:$0xff]  ;;  %v1019_v1 = vld [vmem:[%s1522_s1 + $0x30] sm:$0xff]  ;;  %v1018_v2 = vld [vmem:[%s1522_s1 + $0x28] sm:$0xff]  ;;  %s1535_s25 = smov (!%p197_p3, %s893_s25), 63  ;;  %v561_v61 = vlaneseq  ;;  %s1537_s16 = smov (!%p208_p4, %s1093_s16), 1 }
   0xc   : > { %408 = vmatpush.bf16.msra.mxu0 %v1020_v0  ;;  %1021 = vmatpush.bf16.msra.mxu1 %v1020_v0  ;;  %v1017_v3 = vld [vmem:[%s1522_s1 + $0x20] sm:$0xff]  ;;  %v1016_v4 = vld [vmem:[%s1522_s1 + $0x18] sm:$0xff]  ;;  %v1015_v5 = vld [vmem:[%s1522_s1 + $0x10] sm:$0xff]  ;;  %s894_s6 = sshll.u32 %s1535_s25, 2  ;;  %s896_s14 = sshll.u32 %s1535_s25, 3 }
   0xd   : > { %1022 = vmatpush.bf16.msra.mxu2 %v1020_v0  ;;  %1023 = vmatpush.bf16.msra.mxu3 %v1020_v0  ;;  %v1014_v6 = vld [vmem:[%s1522_s1 + $0x8] sm:$0xff]  ;;  %v1013_v7 = vld [vmem:[%s1522_s1] sm:$0xff]  ;;  %s1128_s11 = scalar_lea.vmem %s1521_s0, %s894_s6  ;;  %s1161_s19 = scalar_lea.vmem %s1524_s3, %s896_s14 }
   0xe   : > { %v997_v8 = vld [vmem:[%s1128_s11] sm:$0xff]  ;;  %v998_v12 = vld [vmem:[%s1128_s11 + $0x8] sm:$0xff]  ;;  %v999_v16 = vld [vmem:[%s1128_s11 + $0x10] sm:$0xff]  ;;  %s897_s21 = sshll.u32 %s1537_s16, 1 }
   0xf   : > { %v1001_v9 = vld [vmem:[%s1128_s11 + $0x20] sm:$0xff]  ;;  %v1002_v13 = vld [vmem:[%s1128_s11 + $0x28] sm:$0xff]  ;;  %v1003_v17 = vld [vmem:[%s1128_s11 + $0x30] sm:$0xff]  ;;  %s211_s24 = scalar_lea.vmem %s1525_s4, %s897_s21 }
  0x10   : > { %409 = vmatpush.bf16.msra.mxu0 %v1019_v1  ;;  %1024 = vmatpush.bf16.msra.mxu1 %v1019_v1  ;;  %v1005_v10 = vld [vmem:[%s1128_s11 + $0x40] sm:$0xff]  ;;  %v1006_v14 = vld [vmem:[%s1128_s11 + $0x48] sm:$0xff]  ;;  %v1007_v18 = vld [vmem:[%s1128_s11 + $0x50] sm:$0xff] }
  0x11   : > { %1025 = vmatpush.bf16.msra.mxu2 %v1019_v1  ;;  %1026 = vmatpush.bf16.msra.mxu3 %v1019_v1  ;;  %v1009_v11 = vld [vmem:[%s1128_s11 + $0x60] sm:$0xff]  ;;  %v1010_v15 = vld [vmem:[%s1128_s11 + $0x68] sm:$0xff]  ;;  %v1011_v19 = vld [vmem:[%s1128_s11 + $0x70] sm:$0xff] }
  0x12   : > { %v1000_v20 = vld [vmem:[%s1128_s11 + $0x18] sm:$0xff]  ;;  %v1149_v24 = vld [vmem:[%s1523_s2] ss:$0 sm:$0xff] }
  0x13   : > { %v1004_v21 = vld [vmem:[%s1128_s11 + $0x38] sm:$0xff] }
  0x14   : > { %410 = vmatpush.bf16.msra.mxu0 %v1018_v2  ;;  %1027 = vmatpush.bf16.msra.mxu1 %v1018_v2  ;;  %v1008_v22 = vld [vmem:[%s1128_s11 + $0x58] sm:$0xff] }
  0x15   : > { %1028 = vmatpush.bf16.msra.mxu2 %v1018_v2  ;;  %1029 = vmatpush.bf16.msra.mxu3 %v1018_v2  ;;  %v1012_v23 = vld [vmem:[%s1128_s11 + $0x78] sm:$0xff]  ;;  %v1242_v2 = vshrl.u32 %v561_v61, 7 }
  0x18   : > { %411 = vmatpush.bf16.msra.mxu0 %v1017_v3  ;;  %1030 = vmatpush.bf16.msra.mxu1 %v1017_v3 }
  0x19   : > { %1031 = vmatpush.bf16.msra.mxu2 %v1017_v3  ;;  %1032 = vmatpush.bf16.msra.mxu3 %v1017_v3 }
  0x1c   : > { %412 = vmatpush.bf16.msra.mxu0 %v1016_v4  ;;  %1033 = vmatpush.bf16.msra.mxu1 %v1016_v4 }
  0x1d   : > { %1034 = vmatpush.bf16.msra.mxu2 %v1016_v4  ;;  %1035 = vmatpush.bf16.msra.mxu3 %v1016_v4  ;;  %v563_v4 = vadd.s32 8, %v1242_v2 }
  0x20   : > { %413 = vmatpush.bf16.msra.mxu0 %v1015_v5  ;;  %1036 = vmatpush.bf16.msra.mxu1 %v1015_v5 }
  0x21   : > { %1037 = vmatpush.bf16.msra.mxu2 %v1015_v5  ;;  %1038 = vmatpush.bf16.msra.mxu3 %v1015_v5 }
  0x24   : > { %414 = vmatpush.bf16.msra.mxu0 %v1014_v6  ;;  %1039 = vmatpush.bf16.msra.mxu1 %v1014_v6 }
  0x25   : > { %1040 = vmatpush.bf16.msra.mxu2 %v1014_v6  ;;  %1041 = vmatpush.bf16.msra.mxu3 %v1014_v6 }
  0x28   : > { %415 = vmatpush.bf16.msra.mxu0 %v1013_v7  ;;  %1042 = vmatpush.bf16.msra.mxu1 %v1013_v7 }
  0x29   : > { %1043 = vmatpush.bf16.msra.mxu2 %v1013_v7  ;;  %1044 = vmatpush.bf16.msra.mxu3 %v1013_v7 }
  0x2b   : > { %416 = vmatmul.bf16.vlgmr.msra.gmra.mxu0 %v997_v8  ;;  %436 = vmatmul.bf16.vlgmr.msra.gmra.mxu1 %v1001_v9  ;;  %v1255_v8 = vstv %s994_s20 }
  0x2c   : > { %456 = vmatmul.bf16.vlgmr.msra.gmra.mxu2 %v1005_v10  ;;  %476 = vmatmul.bf16.vlgmr.msra.gmra.mxu3 %v1009_v11 }
  0x3b   : > { %421 = vmatmul.bf16.gmra.mxu0 %v998_v12  ;;  %441 = vmatmul.bf16.gmra.mxu1 %v1002_v13 }
  0x3c   : > { %461 = vmatmul.bf16.gmra.mxu2 %v1006_v14  ;;  %481 = vmatmul.bf16.gmra.mxu3 %v1010_v15 }
  0x4b   : > { %426 = vmatmul.bf16.gmra.mxu0 %v999_v16  ;;  %446 = vmatmul.bf16.gmra.mxu1 %v1003_v17  ;;  %v596_v17 = vadd.s32 %v1255_v8, %v1242_v2 }
  0x4c   : > { %466 = vmatmul.bf16.gmra.mxu2 %v1007_v18  ;;  %486 = vmatmul.bf16.gmra.mxu3 %v1011_v19  ;;  %v597_v18 = vadd.s32 %v1255_v8, %v563_v4  ;;  %v564_v19 = vadd.s32 16, %v1242_v2 }
  0x4d   : > { %vm628_vm0 = vcmp.lt.s32.totalorder %v596_v17, 512 }
  0x4e   : > { %vm629_vm1 = vcmp.lt.s32.totalorder %v597_v18, 512 }
  0x5b   : > { %431 = vmatmul.bf16.gmra.mxu0 %v1000_v20  ;;  %451 = vmatmul.bf16.gmra.mxu1 %v1004_v21  ;;  %v565_v20 = vadd.s32 24, %v1242_v2  ;;  %v566_v21 = vadd.s32 32, %v1242_v2 }
  0x5c   : > { %471 = vmatmul.bf16.gmra.mxu2 %v1008_v22  ;;  %491 = vmatmul.bf16.gmra.mxu3 %v1012_v23  ;;  %v567_v22 = vadd.s32 40, %v1242_v2 }
  0x5e   : > { %v601_v4 = vadd.s32 %v1255_v8, %v567_v22 }
  0x60   : > { %vm633_vm5 = vcmp.lt.s32.totalorder %v601_v4, 512 }
  0xa8   : > { %v417_v25 = vpop.f32.mrf.mxu0  ;;  %v437_v26 = vpop.f32.mrf.mxu1 }
  0xa9   : > { %v1153_v27 = vadd.f32 %v1149_v24, %v417_v25  ;;  %v1156_v28 = vadd.f32 %v1149_v24, %v437_v26  ;;  %v598_v26 = vadd.s32 %v1255_v8, %v564_v19  ;;  %v572_v19 = vadd.s32 80, %v1242_v2 }
  0xab   : > { %v497_v29 = vmax.f32 %v1153_v27, 0.0  ;;  %v505_v30 = vmax.f32 %v1156_v28, 0.0  ;;  %vm630_vm2 = vcmp.lt.s32.totalorder %v598_v26, 512 }
  0xad   : > { %529 = vst [vmem:[%s1161_s19] sm:$0xff] %v497_v29 }
  0xae   : > { %537 = vst [vmem:[%s1161_s19 + $0x40] sm:$0xff] %v505_v30 }
  0xaf   : > { %v457_v31 = vpop.f32.mrf.mxu2  ;;  %v477_v37 = vpop.f32.mrf.mxu3 }
  0xb0   : > { %v419_v32 = vpop.f32.mrf.mxu0  ;;  %v439_v33 = vpop.f32.mrf.mxu1  ;;  %v1172_v34 = vadd.f32 %v1149_v24, %v457_v31  ;;  %v1202_v47 = vadd.f32 %v1149_v24, %v477_v37  ;;  %v570_v37 = vadd.s32 64, %v1242_v2 }
  0xb1   : > { %v1175_v35 = vadd.f32 %v1149_v24, %v419_v32  ;;  %v1178_v36 = vadd.f32 %v1149_v24, %v439_v33 }
  0xb2   : > { %v513_v38 = vmax.f32 %v1172_v34, 0.0  ;;  %v521_v52 = vmax.f32 %v1202_v47, 0.0 }
  0xb3   : > { %v498_v39 = vmax.f32 %v1175_v35, 0.0  ;;  %v506_v40 = vmax.f32 %v1178_v36, 0.0  ;;  %v1321_v35 = vadd.s32 %v1255_v8, %v570_v37 }
  0xb4   : > { %545 = vst [vmem:[%s1161_s19 + $0x80] sm:$0xff] %v513_v38 }
  0xb5   : > { %530 = vst [vmem:[%s1161_s19 + $0x8] sm:$0xff] %v498_v39  ;;  %v661_v61 = vsel %vm629_vm1, %v498_v39, 0.0  ;;  %vm636_vm7 = vcmp.lt.s32.totalorder %v1321_v35, 512 }
  0xb6   : > { %538 = vst [vmem:[%s1161_s19 + $0x48] sm:$0xff] %v506_v40  ;;  %v730_v39 = vmul.f32 %v661_v61, %v661_v61 }
  0xb7   : > { %v459_v41 = vpop.f32.mrf.mxu2  ;;  %v479_v48 = vpop.f32.mrf.mxu3  ;;  %553 = vst [vmem:[%s1161_s19 + $0xc0] sm:$0xff] %v521_v52 }
  0xb8   : > { %v422_v42 = vpop.f32.mrf.mxu0  ;;  %v442_v43 = vpop.f32.mrf.mxu1  ;;  %v1193_v44 = vadd.f32 %v1149_v24, %v459_v41  ;;  %v1224_v57 = vadd.f32 %v1149_v24, %v479_v48 }
  0xb9   : > { %v1196_v45 = vadd.f32 %v1149_v24, %v422_v42  ;;  %v1199_v46 = vadd.f32 %v1149_v24, %v442_v43 }
  0xba   : > { %v514_v49 = vmax.f32 %v1193_v44, 0.0  ;;  %v522_v1 = vmax.f32 %v1224_v57, 0.0  ;;  %v585_v44 = vadd.s32 184, %v1242_v2 }
  0xbb   : > { %v499_v50 = vmax.f32 %v1196_v45, 0.0  ;;  %v507_v51 = vmax.f32 %v1199_v46, 0.0 }
  0xbc   : > { %546 = vst [vmem:[%s1161_s19 + $0x88] sm:$0xff] %v514_v49 }
  0xbd   : > { %531 = vst [vmem:[%s1161_s19 + $0x10] sm:$0xff] %v499_v50 }
  0xbe   : > { %539 = vst [vmem:[%s1161_s19 + $0x50] sm:$0xff] %v507_v51 }
  0xbf   : > { %v462_v53 = vpop.f32.mrf.mxu2  ;;  %v482_v60 = vpop.f32.mrf.mxu3  ;;  %554 = vst [vmem:[%s1161_s19 + $0xc8] sm:$0xff] %v522_v1 }
  0xc0   : > { %v424_v54 = vpop.f32.mrf.mxu0  ;;  %v444_v55 = vpop.f32.mrf.mxu1  ;;  %v1221_v56 = vadd.f32 %v1149_v24, %v462_v53  ;;  %v1264_v11 = vadd.f32 %v1149_v24, %v482_v60  ;;  %v571_v53 = vadd.s32 72, %v1242_v2 }
  0xc1   : > { %v1227_v58 = vadd.f32 %v1149_v24, %v424_v54  ;;  %v1230_v59 = vadd.f32 %v1149_v24, %v444_v55  ;;  %v599_v54 = vadd.s32 %v1255_v8, %v565_v20  ;;  %v600_v55 = vadd.s32 %v1255_v8, %v566_v21 }
  0xc2   : > { %v515_v62 = vmax.f32 %v1221_v56, 0.0  ;;  %v1529_v16 = vmax.f32 %v1264_v11, 0.0  ;;  %v1325_v18 = vadd.s32 %v1255_v8, %v571_v53 }
  0xc3   : > { %v500_v63 = vmax.f32 %v1227_v58, 0.0  ;;  %v508_v0 = vmax.f32 %v1230_v59, 0.0  ;;  %vm631_vm3 = vcmp.lt.s32.totalorder %v599_v54, 512  ;;  %vm632_vm4 = vcmp.lt.s32.totalorder %v600_v55, 512 }
  0xc4   : > { %547 = vst [vmem:[%s1161_s19 + $0x90] sm:$0xff] %v515_v62  ;;  %vm637_vm8 = vcmp.lt.s32.totalorder %v1325_v18, 512 }
  0xc5   : > { %532 = vst [vmem:[%s1161_s19 + $0x18] sm:$0xff] %v500_v63 }
  0xc6   : > { %540 = vst [vmem:[%s1161_s19 + $0x58] sm:$0xff] %v508_v0 }
  0xc7   : > { %v464_v3 = vpop.f32.mrf.mxu2  ;;  %v484_v12 = vpop.f32.mrf.mxu3  ;;  %555 = vst [vmem:[%s1161_s19 + $0xd0] sm:$0xff] %v1529_v16 }
  0xc8   : > { %v427_v5 = vpop.f32.mrf.mxu0  ;;  %v447_v6 = vpop.f32.mrf.mxu1  ;;  %v1253_v7 = vadd.f32 %v1149_v24, %v464_v3  ;;  %v1290_v25 = vadd.f32 %v1149_v24, %v484_v12  ;;  %v568_v12 = vadd.s32 48, %v1242_v2 }
  0xc9   : > { %v1258_v9 = vadd.f32 %v1149_v24, %v427_v5  ;;  %v1261_v10 = vadd.f32 %v1149_v24, %v447_v6  ;;  %v660_v6 = vsel %vm628_vm0, %v497_v29, 0.0  ;;  %v662_v29 = vsel %vm630_vm2, %v499_v50, 0.0 }
  0xca   : > { %v516_v13 = vmax.f32 %v1253_v7, 0.0  ;;  %v1526_v43 = vmax.f32 %v1290_v25, 0.0  ;;  %v729_v27 = vmul.f32 %v660_v6, %v660_v6  ;;  %v692_v20 = vadd.f32 %v661_v61, %v660_v6 }
  0xcb   : > { %v501_v14 = vmax.f32 %v1258_v9, 0.0  ;;  %v509_v15 = vmax.f32 %v1261_v10, 0.0  ;;  %v602_v22 = vadd.s32 %v1255_v8, %v568_v12  ;;  %v731_v54 = vmul.f32 %v662_v29, %v662_v29 }
  0xcc   : > { %548 = vst [vmem:[%s1161_s19 + $0x98] sm:$0xff] %v516_v13  ;;  %v761_v53 = vadd.f32 %v730_v39, %v729_v27 }
  0xcd   : > { %533 = vst [vmem:[%s1161_s19 + $0x20] sm:$0xff] %v501_v14  ;;  %v664_v58 = vsel %vm632_vm4, %v501_v14, 0.0  ;;  %vm634_vm6 = vcmp.lt.s32.totalorder %v602_v22, 512 }
  0xce   : > { %541 = vst [vmem:[%s1161_s19 + $0x60] sm:$0xff] %v509_v15  ;;  %v762_v55 = vadd.f32 %v761_v53, %v731_v54 }
  0xcf   : > { %v467_v23 = vpop.f32.mrf.mxu2  ;;  %v487_v48 = vpop.f32.mrf.mxu3  ;;  %556 = vst [vmem:[%s1161_s19 + $0xd8] sm:$0xff] %v1526_v43 }
  0xd0   : > { %v429_v31 = vpop.f32.mrf.mxu0  ;;  %v449_v32 = vpop.f32.mrf.mxu1  ;;  %v1294_v33 = vadd.f32 %v1149_v24, %v467_v23  ;;  %v569_v23 = vadd.s32 56, %v1242_v2  ;;  %v1345_v37 = vadd.f32 %v1149_v24, %v487_v48 }
  0xd1   : > { %v430_v41 = vadd.f32 %v1149_v24, %v429_v31  ;;  %v1299_v42 = vadd.f32 %v1149_v24, %v449_v32  ;;  %v663_v32 = vsel %vm631_vm3, %v500_v63, 0.0 }
  0xd2   : > { %v517_v60 = vmax.f32 %v1294_v33, 0.0  ;;  %v1527_v48 = vmax.f32 %v1345_v37, 0.0  ;;  %v603_v14 = vadd.s32 %v1255_v8, %v569_v23 }
  0xd3   : > { %v502_v3 = vmax.f32 %v430_v41, 0.0  ;;  %v510_v5 = vmax.f32 %v1299_v42, 0.0 }
  0xd4   : > { %549 = vst [vmem:[%s1161_s19 + $0xa0] sm:$0xff] %v517_v60  ;;  %vm635_vm9 = vcmp.lt.s32.totalorder %v603_v14, 512 }
  0xd5   : > { %534 = vst [vmem:[%s1161_s19 + $0x28] sm:$0xff] %v502_v3  ;;  %v665_v9 = vsel %vm633_vm5, %v502_v3, 0.0 }
  0xd6   : > { %542 = vst [vmem:[%s1161_s19 + $0x68] sm:$0xff] %v510_v5  ;;  %v734_v53 = vmul.f32 %v665_v9, %v665_v9 }
  0xd7   : > { %v469_v17 = vpop.f32.mrf.mxu2  ;;  %v489_v41 = vpop.f32.mrf.mxu3  ;;  %557 = vst [vmem:[%s1161_s19 + $0xe0] sm:$0xff] %v1527_v48 }
  0xd8   : > { %v432_v21 = vpop.f32.mrf.mxu0  ;;  %v452_v26 = vpop.f32.mrf.mxu1  ;;  %v1336_v31 = vadd.f32 %v1149_v24, %v469_v17  ;;  %v1349_v6 = vadd.f32 %v1149_v24, %v489_v41  ;;  %v693_v17 = vadd.f32 %v692_v20, %v662_v29  ;;  %v578_v29 = vadd.s32 128, %v1242_v2 }
  0xd9   : > { %v433_v45 = vadd.f32 %v1149_v24, %v432_v21  ;;  %v1342_v50 = vadd.f32 %v1149_v24, %v452_v26  ;;  %v732_v21 = vmul.f32 %v663_v32, %v663_v32  ;;  %v733_v20 = vmul.f32 %v664_v58, %v664_v58 }
  0xda   : > { %v518_v61 = vmax.f32 %v1336_v31, 0.0  ;;  %v1528_v39 = vmax.f32 %v1349_v6, 0.0  ;;  %v694_v27 = vadd.f32 %v693_v17, %v663_v32  ;;  %v606_v26 = vadd.s32 %v1255_v8, %v572_v19 }
  0xdb   : > { %v503_v63 = vmax.f32 %v433_v45, 0.0  ;;  %v511_v12 = vmax.f32 %v1342_v50, 0.0  ;;  %v573_v45 = vadd.s32 88, %v1242_v2  ;;  %v1372_v41 = vadd.s32 136, %v1242_v2 }
  0xdc   : > { %550 = vst [vmem:[%s1161_s19 + $0xa8] sm:$0xff] %v518_v61  ;;  %v763_v23 = vadd.f32 %v762_v55, %v732_v21  ;;  %v695_v32 = vadd.f32 %v694_v27, %v664_v58  ;;  %v574_v19 = vadd.s32 96, %v1242_v2  ;;  %vm638_vm10 = vcmp.lt.s32.totalorder %v606_v26, 512 }
  0xdd   : > { %535 = vst [vmem:[%s1161_s19 + $0x30] sm:$0xff] %v503_v63  ;;  %v666_v3 = vsel %vm634_vm6, %v503_v63, 0.0  ;;  %v607_v48 = vadd.s32 %v1255_v8, %v573_v45  ;;  %v612_v45 = vadd.s32 %v1255_v8, %v578_v29  ;;  %v670_v36 = vsel %vm638_vm10, %v507_v51, 0.0 }
  0xde   : > { %543 = vst [vmem:[%s1161_s19 + $0x70] sm:$0xff] %v511_v12  ;;  %v764_v58 = vadd.f32 %v763_v23, %v733_v20  ;;  %v696_v55 = vadd.f32 %v695_v32, %v665_v9  ;;  %v735_v27 = vmul.f32 %v666_v3, %v666_v3  ;;  %v669_v9 = vsel %vm637_vm8, %v506_v40, 0.0 }
  0xdf   : > { %v472_v4 = vpop.f32.mrf.mxu2  ;;  %558 = vst [vmem:[%s1161_s19 + $0xe8] sm:$0xff] %v1528_v39  ;;  %v492_v21 = vpop.f32.mrf.mxu3  ;;  %v575_v39 = vadd.s32 104, %v1242_v2  ;;  %v608_v32 = vadd.s32 %v1255_v8, %v574_v19  ;;  %vm639_vm11 = vcmp.lt.s32.totalorder %v607_v48, 512  ;;  %vm644_vm15 = vcmp.lt.s32.totalorder %v612_v45, 512 }
  0xe0   : > { %v434_v54 = vpop.f32.mrf.mxu0  ;;  %v454_v17 = vpop.f32.mrf.mxu1  ;;  %v1379_v43 = vadd.f32 %v1149_v24, %v472_v4  ;;  %v765_v20 = vadd.f32 %v764_v58, %v734_v53  ;;  %v697_v23 = vadd.f32 %v696_v55, %v666_v3  ;;  %v576_v3 = vadd.s32 112, %v1242_v2 }
  0xe1   : > { %v435_v22 = vadd.f32 %v1149_v24, %v434_v54  ;;  %v1387_v63 = vadd.f32 %v1149_v24, %v454_v17  ;;  %v668_v17 = vsel %vm636_vm7, %v505_v30, 0.0  ;;  %v609_v40 = vadd.s32 %v1255_v8, %v575_v39 }
  0xe2   : > { %v519_v4 = vmax.f32 %v1379_v43, 0.0  ;;  %v766_v35 = vadd.f32 %v765_v20, %v735_v27  ;;  %v737_v53 = vmul.f32 %v668_v17, %v668_v17  ;;  %vm640_vm12 = vcmp.lt.s32.totalorder %v608_v32, 512 }
  0xe3   : > { %v504_v16 = vmax.f32 %v435_v22, 0.0  ;;  %v512_v54 = vmax.f32 %v1387_v63, 0.0  ;;  %v738_v22 = vmul.f32 %v669_v9, %v669_v9  ;;  %v580_v58 = vadd.s32 144, %v1242_v2 }
  0xe4   : > { %551 = vst [vmem:[%s1161_s19 + $0xb0] sm:$0xff] %v519_v4  ;;  %v1421_v55 = vadd.f32 %v1149_v24, %v492_v21  ;;  %v610_v27 = vadd.s32 %v1255_v8, %v576_v3  ;;  %v739_v20 = vmul.f32 %v670_v36, %v670_v36  ;;  %vm641_vm13 = vcmp.lt.s32.totalorder %v609_v40, 512 }
  0xe5   : > { %536 = vst [vmem:[%s1161_s19 + $0x38] sm:$0xff] %v504_v16  ;;  %v667_v28 = vsel %vm635_vm9, %v504_v16, 0.0  ;;  %v577_v16 = vadd.s32 120, %v1242_v2  ;;  %v672_v59 = vsel %vm640_vm12, %v509_v15, 0.0  ;;  %v676_v42 = vsel %vm644_vm15, %v513_v38, 0.0 }
  0xe6   : > { %v698_v30 = vadd.f32 %v697_v23, %v667_v28  ;;  %v736_v26 = vmul.f32 %v667_v28, %v667_v28  ;;  %544 = vst [vmem:[%s1161_s19 + $0x78] sm:$0xff] %v512_v54  ;;  %v671_v23 = vsel %vm639_vm11, %v508_v0, 0.0  ;;  %v527_v28 = vmax.f32 %v1421_v55, 0.0 }
  0xe7   : > { %v474_v18 = vpop.f32.mrf.mxu2  ;;  %v494_v46 = vpop.f32.mrf.mxu3  ;;  %v740_v0 = vmul.f32 %v671_v23, %v671_v23  ;;  %vm642_vm14 = vcmp.lt.s32.totalorder %v610_v27, 512  ;;  %v741_v10 = vmul.f32 %v672_v59, %v672_v59  ;;  %v583_v50 = vadd.s32 168, %v1242_v2 }
  0xe8   : > { %v699_v29 = vadd.f32 %v698_v30, %v668_v17  ;;  %v767_v19 = vadd.f32 %v766_v35, %v736_v26  ;;  %v1417_v14 = vadd.f32 %v1149_v24, %v474_v18  ;;  %v1430_v35 = vadd.f32 %v1149_v24, %v494_v46  ;;  %559 = vst [vmem:[%s1161_s19 + $0xf0] sm:$0xff] %v527_v28 }
  0xe9   : > { %v613_v26 = vadd.s32 %v1255_v8, %v1372_v41  ;;  %v581_v41 = vadd.s32 152, %v1242_v2  ;;  %v674_v40 = vsel %vm642_vm14, %v511_v12, 0.0  ;;  %v582_v18 = vadd.s32 160, %v1242_v2 }
  0xea   : > { %v700_v51 = vadd.f32 %v699_v29, %v669_v9  ;;  %v768_v39 = vadd.f32 %v767_v19, %v737_v53  ;;  %v520_v17 = vmax.f32 %v1417_v14, 0.0  ;;  %v611_v9 = vadd.s32 %v1255_v8, %v577_v16 }
  0xeb   : > { %v528_v24 = vmax.f32 %v1430_v35, 0.0  ;;  %v614_v53 = vadd.s32 %v1255_v8, %v580_v58  ;;  %vm645_vm1 = vcmp.lt.s32.totalorder %v613_v26, 512  ;;  %v743_v58 = vmul.f32 %v674_v40, %v674_v40 }
  0xec   : > { %v701_v21 = vadd.f32 %v700_v51, %v670_v36  ;;  %v769_v30 = vadd.f32 %v768_v39, %v738_v22  ;;  %552 = vst [vmem:[%s1161_s19 + $0xb8] sm:$0xff] %v520_v17  ;;  %v673_v36 = vsel %vm641_vm13, %v510_v5, 0.0  ;;  %vm643_vm0 = vcmp.lt.s32.totalorder %v611_v9, 512 }
  0xed   : > { %560 = vst [vmem:[%s1161_s19 + $0xf8] sm:$0xff] %v528_v24  ;;  %v742_v45 = vmul.f32 %v673_v36, %v673_v36  ;;  %vm646_vm2 = vcmp.lt.s32.totalorder %v614_v53, 512  ;;  %v615_v5 = vadd.s32 %v1255_v8, %v581_v41  ;;  %v675_v16 = vsel %vm643_vm0, %v512_v54, 0.0 }
  0xee   : > { %v770_v48 = vadd.f32 %v769_v30, %v739_v20  ;;  %v702_v3 = vadd.f32 %v701_v21, %v671_v23  ;;  %v677_v12 = vsel %vm645_vm1, %v514_v49, 0.0  ;;  %v616_v51 = vadd.s32 %v1255_v8, %v582_v18 }
  0xef   : > { %v744_v34 = vmul.f32 %v675_v16, %v675_v16  ;;  %v584_v38 = vadd.s32 176, %v1242_v2  ;;  %v745_v20 = vmul.f32 %v676_v42, %v676_v42  ;;  %v678_v63 = vsel %vm646_vm2, %v515_v62, 0.0 }
  0xf0   : > { %v703_v15 = vadd.f32 %v702_v3, %v672_v59  ;;  %v771_v32 = vadd.f32 %v770_v48, %v740_v0  ;;  %v586_v54 = vadd.s32 192, %v1242_v2  ;;  %vm647_vm3 = vcmp.lt.s32.totalorder %v615_v5, 512 }
  0xf1   : > { %v617_v30 = vadd.s32 %v1255_v8, %v583_v50  ;;  %v746_v49 = vmul.f32 %v677_v12, %v677_v12  ;;  %v587_v9 = vadd.s32 200, %v1242_v2  ;;  %vm648_vm4 = vcmp.lt.s32.totalorder %v616_v51, 512 }
  0xf2   : > { %v704_v29 = vadd.f32 %v703_v15, %v673_v36  ;;  %v772_v19 = vadd.f32 %v771_v32, %v741_v10  ;;  %v618_v0 = vadd.s32 %v1255_v8, %v584_v38  ;;  %v747_v48 = vmul.f32 %v678_v63, %v678_v63 }
  0xf3   : > { %v620_v56 = vadd.s32 %v1255_v8, %v586_v54  ;;  %v679_v62 = vsel %vm647_vm3, %v516_v13, 0.0  ;;  %v588_v3 = vadd.s32 208, %v1242_v2  ;;  %vm649_vm5 = vcmp.lt.s32.totalorder %v617_v30, 512 }
  0xf4   : > { %v705_v22 = vadd.f32 %v704_v29, %v674_v40  ;;  %v773_v46 = vadd.f32 %v772_v19, %v742_v45  ;;  %v619_v41 = vadd.s32 %v1255_v8, %v585_v44  ;;  %v621_v10 = vadd.s32 %v1255_v8, %v587_v9 }
  0xf5   : > { %v680_v15 = vsel %vm648_vm4, %v517_v60, 0.0  ;;  %v748_v32 = vmul.f32 %v679_v62, %v679_v62  ;;  %vm650_vm6 = vcmp.lt.s32.totalorder %v618_v0, 512  ;;  %vm652_vm7 = vcmp.lt.s32.totalorder %v620_v56, 512 }
  0xf6   : > { %v774_v39 = vadd.f32 %v773_v46, %v743_v58  ;;  %v706_v27 = vadd.f32 %v705_v22, %v675_v16  ;;  %v622_v7 = vadd.s32 %v1255_v8, %v588_v3  ;;  %v681_v13 = vsel %vm649_vm5, %v518_v61, 0.0 }
  0xf7   : > { %v589_v45 = vadd.s32 216, %v1242_v2  ;;  %v749_v29 = vmul.f32 %v680_v15, %v680_v15  ;;  %vm651_vm8 = vcmp.lt.s32.totalorder %v619_v41, 512  ;;  %v682_v33 = vsel %vm650_vm6, %v519_v4, 0.0 }
  0xf8   : > { %v707_v23 = vadd.f32 %v706_v27, %v676_v42  ;;  %v775_v21 = vadd.f32 %v774_v39, %v744_v34  ;;  %v590_v60 = vadd.s32 224, %v1242_v2  ;;  %vm653_vm9 = vcmp.lt.s32.totalorder %v621_v10, 512 }
  0xf9   : > { %v750_v16 = vmul.f32 %v681_v13, %v681_v13  ;;  %v684_v58 = vsel %vm652_vm7, %v521_v52, 0.0  ;;  %vm654_vm10 = vcmp.lt.s32.totalorder %v622_v7, 512  ;;  %v623_v31 = vadd.s32 %v1255_v8, %v589_v45 }
  0xfa   : > { %v708_v26 = vadd.f32 %v707_v23, %v677_v12  ;;  %v776_v59 = vadd.f32 %v775_v21, %v745_v20  ;;  %v683_v61 = vsel %vm651_vm8, %v520_v17, 0.0  ;;  %v751_v12 = vmul.f32 %v682_v33, %v682_v33 }
  0xfb   : > { %v591_v43 = vadd.s32 232, %v1242_v2  ;;  %v685_v4 = vsel %vm653_vm9, %v522_v1, 0.0  ;;  %v624_v51 = vadd.s32 %v1255_v8, %v590_v60  ;;  %v752_v47 = vmul.f32 %v683_v61, %v683_v61 }
  0xfc   : > { %v777_v53 = vadd.f32 %v776_v59, %v746_v49  ;;  %v709_v36 = vadd.f32 %v708_v26, %v678_v63  ;;  %v592_v52 = vadd.s32 240, %v1242_v2  ;;  %v753_v34 = vmul.f32 %v684_v58, %v684_v58 }
  0xfd   : > { %v1530_v38 = vmax.f32 %v1264_v11, 0.0  ;;  %vm655_vm11 = vcmp.lt.s32.totalorder %v623_v31, 512  ;;  %v625_v63 = vadd.s32 %v1255_v8, %v591_v43  ;;  %v593_v54 = vadd.s32 248, %v1242_v2 }
  0xfe   : > { %v710_v40 = vadd.f32 %v709_v36, %v679_v62  ;;  %v778_v18 = vadd.f32 %v777_v53, %v747_v48  ;;  %v754_v57 = vmul.f32 %v685_v4, %v685_v4  ;;  %vm656_vm12 = vcmp.lt.s32.totalorder %v624_v51, 512 }
  0xff   : > { %v686_v14 = vsel %vm654_vm10, %v1530_v38, 0.0  ;;  %v626_v21 = vadd.s32 %v1255_v8, %v592_v52  ;;  %v1531_v44 = vmax.f32 %v1290_v25, 0.0  ;;  %vm657_vm13 = vcmp.lt.s32.totalorder %v625_v63, 512 }
 0x100   : > { %v711_v19 = vadd.f32 %v710_v40, %v680_v15  ;;  %v779_v42 = vadd.f32 %v778_v18, %v748_v32  ;;  %v755_v30 = vmul.f32 %v686_v14, %v686_v14  ;;  %v627_v26 = vadd.s32 %v1255_v8, %v593_v54 }
 0x101   : > { %v687_v49 = vsel %vm655_vm11, %v1531_v44, 0.0  ;;  %v1532_v59 = vmax.f32 %v1345_v37, 0.0  ;;  %vm658_vm14 = vcmp.lt.s32.totalorder %v626_v21, 512  ;;  %v1533_v62 = vmax.f32 %v1349_v6, 0.0 }
 0x102   : > { %v712_v5 = vadd.f32 %v711_v19, %v681_v13  ;;  %v780_v22 = vadd.f32 %v779_v42, %v749_v29  ;;  %v756_v48 = vmul.f32 %v687_v49, %v687_v49  ;;  %vm659_vm15 = vcmp.lt.s32.totalorder %v627_v26, 512 }
 0x103   : > { %v688_v0 = vsel %vm656_vm12, %v1532_v59, 0.0  ;;  %v689_v3 = vsel %vm657_vm13, %v1533_v62, 0.0  ;;  %v690_v41 = vsel %vm658_vm14, %v527_v28, 0.0  ;;  %v691_v15 = vsel %vm659_vm15, %v528_v24, 0.0 }
 0x104   : > { %v781_v46 = vadd.f32 %v780_v22, %v750_v16  ;;  %v713_v50 = vadd.f32 %v712_v5, %v682_v33  ;;  %v757_v53 = vmul.f32 %v688_v0, %v688_v0  ;;  %v758_v8 = vmul.f32 %v689_v3, %v689_v3 }
 0x105   : > { %v759_v18 = vmul.f32 %v690_v41, %v690_v41  ;;  %v760_v13 = vmul.f32 %v691_v15, %v691_v15  ;;  %vm798_vm0 = vcmask 1040384  }
 0x106   : > { %v782_v39 = vadd.f32 %v781_v46, %v751_v12  ;;  %v714_v27 = vadd.f32 %v713_v50, %v683_v61 }
 0x108   : > { %v715_v17 = vadd.f32 %v714_v27, %v684_v58  ;;  %v783_v20 = vadd.f32 %v782_v39, %v752_v47 }
 0x10a   : > { %v716_v1 = vadd.f32 %v715_v17, %v685_v4  ;;  %v784_v23 = vadd.f32 %v783_v20, %v753_v34 }
 0x10c   : > { %v785_v9 = vadd.f32 %v784_v23, %v754_v57  ;;  %v717_v11 = vadd.f32 %v716_v1, %v686_v14 }
 0x10e   : > { %v718_v2 = vadd.f32 %v717_v11, %v687_v49  ;;  %v786_v56 = vadd.f32 %v785_v9, %v755_v30 }
 0x110   : > { %v719_v36 = vadd.f32 %v718_v2, %v688_v0  ;;  %v787_v25 = vadd.f32 %v786_v56, %v756_v48 }
 0x112   : > { %v720_v10 = vadd.f32 %v719_v36, %v689_v3  ;;  %v788_v37 = vadd.f32 %v787_v25, %v757_v53 }
 0x114   : > { %v789_v32 = vadd.f32 %v788_v37, %v758_v8  ;;  %v721_v40 = vadd.f32 %v720_v10, %v690_v41 }
 0x116   : > { %v790_v6 = vadd.f32 %v789_v32, %v759_v18  ;;  %v722_v7 = vadd.f32 %v721_v40, %v691_v15 }
 0x118   : > { %v723_v45 = vrot.slane %v722_v7, 4  ;;  %v791_v29 = vadd.f32 %v790_v6, %v760_v13 }
 0x11a   : > { %v724_v19 = vadd.f32 %v723_v45, %v722_v7  ;;  %v792_v42 = vrot.slane %v791_v29, 4 }
 0x11c   : > { %v725_v55 = vrot.slane %v724_v19, 2  ;;  %v793_v28 = vadd.f32 %v792_v42, %v791_v29 }
 0x11e   : > { %v726_v33 = vadd.f32 %v725_v55, %v724_v19  ;;  %v794_v60 = vrot.slane %v793_v28, 2 }
 0x120   : > { %v727_v5 = vrot.slane %v726_v33, 1  ;;  %v795_v16 = vadd.f32 %v794_v60, %v793_v28 }
 0x122   : > { %v796_v35 = vrot.slane %v795_v16, 1  ;;  %v728_v24 = vadd.f32 %v727_v5, %v726_v33 }
 0x124   : > { %v797_v22 = vadd.f32 %v796_v35, %v795_v16 }
 0x126   : > { %v799_v58 = vsel %vm798_vm0, %v728_v24, %v797_v22 }
 0x127   : > { %800 = vst [vmem:[%s211_s24] sm:$0x3] %v799_v58 }
 0x128 PF: > { %s15_s15 = sadd.s32 1, %s1060_s15  }
 0x129   : > { %p12_p5 = scmp.ge.s32.totalorder %s15_s15, 4  }
 0x12b   :  { %14 = sbr.rel (!%p12_p5) target bundleno = 1 (0x1), region = 74 }

// kernel: completion_forward.36
= control target key start
LH: loop header
LB: loop body
LE: loop exit
PB: predicated region body
PF: predicated region fallthrough
CT: control target
= control target key end

     0   :  { %s253_s0 = inlined_call_operand.vmem [shape: f32[128,128], index: 0, kind: input, shape index: {}]   ;;  %s254_s1 = inlined_call_operand.vmem [shape: f32[1,128], index: 1, kind: input, shape index: {}]   ;;  %s255_s2 = inlined_call_operand.vmem [shape: f32[1,128], index: 2, kind: input, shape index: {}]   ;;  %s256_s3 = inlined_call_operand.vmem [shape: bf16[128,128], index: 3, kind: output, shape index: {}]  }
   0x1   :  { %v14_v0 = vld [vmem:[%s253_s0] sm:$0xff]  ;;  %v15_v1 = vld [vmem:[%s253_s0 + $0x8] sm:$0xff]  ;;  %v16_v4 = vld [vmem:[%s253_s0 + $0x10] sm:$0xff] }
   0x2   :  { %v153_v2 = vld [vmem:[%s254_s1] ss:$0 sm:$0xff]  ;;  %v17_v5 = vld [vmem:[%s253_s0 + $0x18] sm:$0xff]  ;;  %v19_v11 = vld [vmem:[%s253_s0 + $0x28] sm:$0xff] }
   0x3   :  { %v154_v3 = vld [vmem:[%s255_s2] ss:$0 sm:$0xff]  ;;  %v34_v7 = vmul.f32 %v153_v2, %v14_v0  ;;  %v35_v8 = vmul.f32 %v153_v2, %v15_v1  ;;  %v36_v9 = vmul.f32 %v153_v2, %v16_v4  ;;  %v37_v10 = vmul.f32 %v153_v2, %v17_v5  ;;  %v20_v12 = vld [vmem:[%s253_s0 + $0x30] sm:$0xff]  ;;  %v21_v13 = vld [vmem:[%s253_s0 + $0x38] sm:$0xff] }
   0x4   :  { %v18_v6 = vld [vmem:[%s253_s0 + $0x20] sm:$0xff]  ;;  %v39_v15 = vmul.f32 %v153_v2, %v19_v11  ;;  %v40_v16 = vmul.f32 %v153_v2, %v20_v12  ;;  %v41_v17 = vmul.f32 %v153_v2, %v21_v13  ;;  %v23_v19 = vld [vmem:[%s253_s0 + $0x48] sm:$0xff]  ;;  %v24_v24 = vld [vmem:[%s253_s0 + $0x50] sm:$0xff] }
   0x5   :  { %v38_v14 = vmul.f32 %v153_v2, %v18_v6  ;;  %v22_v18 = vld [vmem:[%s253_s0 + $0x40] sm:$0xff]  ;;  %v54_v20 = vadd.f32 %v154_v3, %v34_v7  ;;  %v55_v21 = vadd.f32 %v154_v3, %v35_v8  ;;  %v56_v22 = vadd.f32 %v154_v3, %v36_v9  ;;  %v25_v25 = vld [vmem:[%s253_s0 + $0x58] sm:$0xff]  ;;  %v27_v31 = vld [vmem:[%s253_s0 + $0x68] sm:$0xff] }
   0x6   :  { %v57_v23 = vadd.f32 %v154_v3, %v37_v10  ;;  %v59_v27 = vadd.f32 %v154_v3, %v39_v15  ;;  %v60_v28 = vadd.f32 %v154_v3, %v40_v16  ;;  %v61_v29 = vadd.f32 %v154_v3, %v41_v17  ;;  %v26_v30 = vld [vmem:[%s253_s0 + $0x60] sm:$0xff]  ;;  %v28_v36 = vld [vmem:[%s253_s0 + $0x70] sm:$0xff]  ;;  %v29_v37 = vld [vmem:[%s253_s0 + $0x78] sm:$0xff] }
   0x7   :  { %v58_v26 = vadd.f32 %v154_v3, %v38_v14  ;;  %v109_v32 = vpack.c.bf16 %v55_v21, %v54_v20  ;;  %v42_v34 = vmul.f32 %v153_v2, %v22_v18  ;;  %v43_v35 = vmul.f32 %v153_v2, %v23_v19 }
   0x8   :  { %v114_v33 = vpack.c.bf16 %v57_v23, %v56_v22  ;;  %v124_v39 = vpack.c.bf16 %v61_v29, %v60_v28  ;;  %v44_v40 = vmul.f32 %v153_v2, %v24_v24  ;;  %v45_v41 = vmul.f32 %v153_v2, %v25_v25 }
   0x9   :  { %v119_v38 = vpack.c.bf16 %v59_v27, %v58_v26  ;;  %110 = vst [vmem:[%s256_s3] sm:$0xff] %v109_v32   ;;  %v62_v42 = vadd.f32 %v154_v3, %v42_v34  ;;  %v63_v43 = vadd.f32 %v154_v3, %v43_v35  ;;  %v46_v44 = vmul.f32 %v153_v2, %v26_v30 }
   0xa   :  { %v47_v45 = vmul.f32 %v153_v2, %v27_v31  ;;  %146 = vst [vmem:[%s256_s3 + $0x8] sm:$0xff] %v114_v33   ;;  %v64_v46 = vadd.f32 %v154_v3, %v44_v40  ;;  %v65_v47 = vadd.f32 %v154_v3, %v45_v41  ;;  %v48_v48 = vmul.f32 %v153_v2, %v28_v36 }
   0xb   :  { %v49_v49 = vmul.f32 %v153_v2, %v29_v37  ;;  %147 = vst [vmem:[%s256_s3 + $0x10] sm:$0xff] %v119_v38   ;;  %v129_v50 = vpack.c.bf16 %v63_v43, %v62_v42  ;;  %v66_v51 = vadd.f32 %v154_v3, %v46_v44 }
   0xc   :  { %v67_v52 = vadd.f32 %v154_v3, %v47_v45  ;;  %148 = vst [vmem:[%s256_s3 + $0x18] sm:$0xff] %v124_v39   ;;  %v134_v53 = vpack.c.bf16 %v65_v47, %v64_v46  ;;  %v68_v54 = vadd.f32 %v154_v3, %v48_v48 }
   0xd   :  { %v69_v55 = vadd.f32 %v154_v3, %v49_v49  ;;  %149 = vst [vmem:[%s256_s3 + $0x20] sm:$0xff] %v129_v50  }
   0xe   :  { %v139_v56 = vpack.c.bf16 %v67_v52, %v66_v51  ;;  %150 = vst [vmem:[%s256_s3 + $0x28] sm:$0xff] %v134_v53  }
   0xf   :  { %v144_v57 = vpack.c.bf16 %v69_v55, %v68_v54 }
  0x10   :  { %151 = vst [vmem:[%s256_s3 + $0x30] sm:$0xff] %v139_v56  }
  0x11   :  { %152 = vst [vmem:[%s256_s3 + $0x38] sm:$0xff] %v144_v57  }

// kernel: completion_forward.35
= control target key start
LH: loop header
LB: loop body
LE: loop exit
PB: predicated region body
PF: predicated region fallthrough
CT: control target
= control target key end

     0   :  { %vm676_vm0 = vcmask 1040384   ;;  %s1380_s1 = inlined_call_operand.vmem [shape: bf16[384,128], index: 1, kind: input, shape index: {}]   ;;  %s1381_s2 = inlined_call_operand.vmem [shape: f32[1,128], index: 2, kind: input, shape index: {}]   ;;  %s1382_s0 = inlined_call_operand.vmem [shape: bf16[128,384], index: 0, kind: input, shape index: {}]   ;;  %s1383_s3 = inlined_call_operand.vmem [shape: f32[128,128], index: 3, kind: output, shape index: {0}]   ;;  %s1384_s4 = inlined_call_operand.vmem [shape: f32[1,2,128], index: 4, kind: output, shape index: {1}]  }
   0x1   :  { %v910_v0 = vld [vmem:[%s1380_s1 + $0x38] sm:$0xff]  ;;  %v909_v3 = vld [vmem:[%s1380_s1 + $0x30] sm:$0xff]  ;;  %v908_v6 = vld [vmem:[%s1380_s1 + $0x28] sm:$0xff] }
   0x2   :  { %v983_v1 = vld [vmem:[%s1380_s1 + $0x78] sm:$0xff]  ;;  %372 = vmatpush.bf16.msra.mxu0 %v910_v0  ;;  %927 = vmatpush.bf16.msra.mxu3 %v910_v0  ;;  %v998_v4 = vld [vmem:[%s1380_s1 + $0x70] sm:$0xff]  ;;  %v916_v7 = vld [vmem:[%s1380_s1 + $0x68] sm:$0xff] }
   0x3   :  { %v988_v2 = vld [vmem:[%s1380_s1 + $0xb8] sm:$0xff]  ;;  %421 = vmatpush.bf16.msra.mxu1 %v983_v1  ;;  %v1003_v5 = vld [vmem:[%s1380_s1 + $0xb0] sm:$0xff]  ;;  %v1016_v8 = vld [vmem:[%s1380_s1 + $0xa8] sm:$0xff] }
   0x4   :  { %470 = vmatpush.bf16.msra.mxu2 %v988_v2  ;;  %v907_v9 = vld [vmem:[%s1380_s1 + $0x20] sm:$0xff]  ;;  %v906_v12 = vld [vmem:[%s1380_s1 + $0x18] sm:$0xff]  ;;  %v905_v15 = vld [vmem:[%s1380_s1 + $0x10] sm:$0xff] }
   0x5   :  { %v915_v10 = vld [vmem:[%s1380_s1 + $0x60] sm:$0xff]  ;;  %v914_v13 = vld [vmem:[%s1380_s1 + $0x58] sm:$0xff]  ;;  %v913_v16 = vld [vmem:[%s1380_s1 + $0x50] sm:$0xff] }
   0x6   :  { %373 = vmatpush.bf16.msra.mxu0 %v909_v3  ;;  %928 = vmatpush.bf16.msra.mxu3 %v909_v3  ;;  %v1028_v11 = vld [vmem:[%s1380_s1 + $0xa0] sm:$0xff]  ;;  %v1040_v14 = vld [vmem:[%s1380_s1 + $0x98] sm:$0xff]  ;;  %v1052_v17 = vld [vmem:[%s1380_s1 + $0x90] sm:$0xff] }
   0x7   :  { %422 = vmatpush.bf16.msra.mxu1 %v998_v4  ;;  %v904_v18 = vld [vmem:[%s1380_s1 + $0x8] sm:$0xff]  ;;  %v903_v21 = vld [vmem:[%s1380_s1] sm:$0xff]  ;;  %v761_v26 = vld [vmem:[%s1382_s0 + $0x90] sm:$0xf] }
   0x8   :  { %471 = vmatpush.bf16.msra.mxu2 %v1003_v5  ;;  %v912_v19 = vld [vmem:[%s1380_s1 + $0x48] sm:$0xff]  ;;  %v911_v22 = vld [vmem:[%s1380_s1 + $0x40] sm:$0xff]  ;;  %v898_v27 = vld [vmem:[%s1382_s0 + $0x98] sm:$0xf0] }
   0x9   :  { %v1064_v20 = vld [vmem:[%s1380_s1 + $0x88] sm:$0xff]  ;;  %v1075_v23 = vld [vmem:[%s1380_s1 + $0x80] sm:$0xff]  ;;  %v691_v29 = vld [vmem:[%s1382_s0 + $0xc] sm:$0xf0]  ;;  %v762_v33 = vor.u32 %v898_v27, %v761_v26 }
   0xa   :  { %374 = vmatpush.bf16.msra.mxu0 %v908_v6  ;;  %929 = vmatpush.bf16.msra.mxu3 %v908_v6  ;;  %v689_v24 = vld [vmem:[%s1382_s0] sm:$0xf]  ;;  %v880_v25 = vld [vmem:[%s1382_s0 + $0x8] sm:$0xf0]  ;;  %v879_v28 = vld [vmem:[%s1382_s0 + $0x4] sm:$0xf] }
   0xb   :  { %423 = vmatpush.bf16.msra.mxu1 %v916_v7  ;;  %v697_v30 = vld [vmem:[%s1382_s0 + $0x8] sm:$0xf]  ;;  %v881_v31 = vld [vmem:[%s1382_s0 + $0x10] sm:$0xf0]  ;;  %v690_v32 = vor.u32 %v880_v25, %v689_v24  ;;  %v694_v34 = vor.u32 %v879_v28, %v691_v29  ;;  %v701_v36 = vld [vmem:[%s1382_s0 + $0x18] sm:$0xf] }
   0xc   :  { %472 = vmatpush.bf16.msra.mxu2 %v1016_v8  ;;  %v698_v35 = vor.u32 %v881_v31, %v697_v30  ;;  %v883_v37 = vld [vmem:[%s1382_s0 + $0x20] sm:$0xf0]  ;;  %v773_v38 = vld [vmem:[%s1382_s0 + $0xa8] sm:$0xf]  ;;  %v901_v39 = vld [vmem:[%s1382_s0 + $0xb0] sm:$0xf0] }
   0xd   :  { %v882_v40 = vld [vmem:[%s1382_s0 + $0x1c] sm:$0xf]  ;;  %v703_v41 = vld [vmem:[%s1382_s0 + $0x24] sm:$0xf0]  ;;  %v709_v42 = vld [vmem:[%s1382_s0 + $0x20] sm:$0xf]  ;;  %v702_v44 = vor.u32 %v883_v37, %v701_v36  ;;  %v774_v45 = vor.u32 %v901_v39, %v773_v38 }
   0xe   :  { %375 = vmatpush.bf16.msra.mxu0 %v907_v9  ;;  %930 = vmatpush.bf16.msra.mxu3 %v907_v9  ;;  %v884_v43 = vld [vmem:[%s1382_s0 + $0x28] sm:$0xf0]  ;;  %v706_v46 = vor.u32 %v882_v40, %v703_v41  ;;  %v713_v48 = vld [vmem:[%s1382_s0 + $0x30] sm:$0xf]  ;;  %v886_v49 = vld [vmem:[%s1382_s0 + $0x38] sm:$0xf0] }
   0xf   :  { %424 = vmatpush.bf16.msra.mxu1 %v915_v10  ;;  %v710_v47 = vor.u32 %v884_v43, %v709_v42  ;;  %v885_v50 = vld [vmem:[%s1382_s0 + $0x34] sm:$0xf]  ;;  %v763_v52 = vld [vmem:[%s1382_s0 + $0x9c] sm:$0xf0]  ;;  %v721_v54 = vld [vmem:[%s1382_s0 + $0x38] sm:$0xf]  ;;  %v714_v56 = vor.u32 %v886_v49, %v713_v48 }
  0x10   :  { %473 = vmatpush.bf16.msra.mxu2 %v1028_v11  ;;  %v897_v51 = vld [vmem:[%s1382_s0 + $0x94] sm:$0xf]  ;;  %v715_v53 = vld [vmem:[%s1382_s0 + $0x3c] sm:$0xf0]  ;;  %v887_v55 = vld [vmem:[%s1382_s0 + $0x40] sm:$0xf0] }
  0x11   :  { %v766_v57 = vor.u32 %v897_v51, %v763_v52  ;;  %v718_v58 = vor.u32 %v885_v50, %v715_v53  ;;  %v722_v59 = vor.u32 %v887_v55, %v721_v54  ;;  %v725_v60 = vld [vmem:[%s1382_s0 + $0x48] sm:$0xf]  ;;  %v889_v61 = vld [vmem:[%s1382_s0 + $0x50] sm:$0xf0]  ;;  %v888_v62 = vld [vmem:[%s1382_s0 + $0x4c] sm:$0xf] }
  0x12   :  { %376 = vmatpush.bf16.msra.mxu0 %v906_v12  ;;  %931 = vmatpush.bf16.msra.mxu3 %v906_v12  ;;  %v900_v63 = vld [vmem:[%s1382_s0 + $0xac] sm:$0xf]  ;;  %v775_v0 = vld [vmem:[%s1382_s0 + $0xb4] sm:$0xf0]  ;;  %v890_v3 = vld [vmem:[%s1382_s0 + $0x58] sm:$0xf0] }
  0x13   :  { %425 = vmatpush.bf16.msra.mxu1 %v914_v13  ;;  %v892_v9 = vld [vmem:[%s1382_s0 + $0x68] sm:$0xf0]  ;;  %v899_v12 = vld [vmem:[%s1382_s0 + $0xa0] sm:$0xf0]  ;;  %v902_v24 = vld [vmem:[%s1382_s0 + $0xb8] sm:$0xf0] }
  0x14   :  { %474 = vmatpush.bf16.msra.mxu2 %v1040_v14  ;;  %v751_v25 = vld [vmem:[%s1382_s0 + $0x84] sm:$0xf0]  ;;  %v757_v26 = vld [vmem:[%s1382_s0 + $0x80] sm:$0xf]  ;;  %v896_v27 = vld [vmem:[%s1382_s0 + $0x88] sm:$0xf0] }
  0x15   :  { %v758_v31 = vor.u32 %v896_v27, %v757_v26 }
  0x16   :  { %377 = vmatpush.bf16.msra.mxu0 %v905_v15  ;;  %932 = vmatpush.bf16.msra.mxu3 %v905_v15  ;;  %v893_v15 = vld [vmem:[%s1382_s0 + $0x70] sm:$0xf0] }
  0x17   :  { %426 = vmatpush.bf16.msra.mxu1 %v913_v16 }
  0x18   :  { %475 = vmatpush.bf16.msra.mxu2 %v1052_v17 }
  0x1a   :  { %378 = vmatpush.bf16.msra.mxu0 %v904_v18  ;;  %933 = vmatpush.bf16.msra.mxu3 %v904_v18 }
  0x1b   :  { %427 = vmatpush.bf16.msra.mxu1 %v912_v19 }
  0x1c   :  { %476 = vmatpush.bf16.msra.mxu2 %v1064_v20 }
  0x1e   :  { %379 = vmatpush.bf16.msra.mxu0 %v903_v21  ;;  %934 = vmatpush.bf16.msra.mxu3 %v903_v21  ;;  %v895_v21 = vld [vmem:[%s1382_s0 + $0x80] sm:$0xf0] }
  0x1f   :  { %428 = vmatpush.bf16.msra.mxu1 %v911_v22 }
  0x20   :  { %477 = vmatpush.bf16.msra.mxu2 %v1075_v23 }
  0x21   :  { %380 = vmatmul.bf16.vlgmr.msra.gmra.mxu0 %v690_v32  ;;  %410 = vmatmul.bf16.vlgmr.msra.gmra.mxu3 %v762_v33  ;;  %v1236_v32 = vld [vmem:[%s1381_s2] ss:$0 sm:$0xff] }
  0x22   :  { %935 = vmatpush.bf16.msrb.mxu3 %v983_v1  ;;  %429 = vmatmul.bf16.vlgmr.msra.gmra.mxu1 %v694_v34  ;;  %v727_v1 = vld [vmem:[%s1382_s0 + $0x54] sm:$0xf0] }
  0x23   :  { %478 = vmatmul.bf16.vlgmr.msra.gmra.mxu2 %v698_v35  ;;  %v730_v6 = vor.u32 %v888_v62, %v727_v1 }
  0x26   :  { %936 = vmatpush.bf16.msrb.mxu3 %v998_v4  ;;  %v726_v4 = vor.u32 %v889_v61, %v725_v60 }
  0x2a   :  { %937 = vmatpush.bf16.msrb.mxu3 %v916_v7 }
  0x2e   :  { %938 = vmatpush.bf16.msrb.mxu3 %v915_v10  ;;  %v891_v10 = vld [vmem:[%s1382_s0 + $0x64] sm:$0xf] }
  0x31   :  { %385 = vmatmul.bf16.gmra.mxu0 %v702_v44  ;;  %415 = vmatmul.bf16.gmra.mxu3 %v774_v45 }
  0x32   :  { %939 = vmatpush.bf16.msrb.mxu3 %v914_v13  ;;  %434 = vmatmul.bf16.gmra.mxu1 %v706_v46  ;;  %v739_v13 = vld [vmem:[%s1382_s0 + $0x6c] sm:$0xf0] }
  0x33   :  { %483 = vmatmul.bf16.gmra.mxu2 %v710_v47  ;;  %v742_v18 = vor.u32 %v891_v10, %v739_v13 }
  0x36   :  { %940 = vmatpush.bf16.msrb.mxu3 %v913_v16 }
  0x3a   :  { %941 = vmatpush.bf16.msrb.mxu3 %v912_v19 }
  0x3e   :  { %942 = vmatpush.bf16.msrb.mxu3 %v911_v22  ;;  %v894_v22 = vld [vmem:[%s1382_s0 + $0x7c] sm:$0xf] }
  0x3f   :  { %v754_v30 = vor.u32 %v894_v22, %v751_v25 }
  0x41   :  { %390 = vmatmul.bf16.gmra.mxu0 %v714_v56  ;;  %459 = vmatmul.bf16.vlgmr.msrb.gmra.mxu3 %v766_v57 }
  0x42   :  { %943 = vmatpush.bf16.msra.mxu3 %v988_v2  ;;  %439 = vmatmul.bf16.gmra.mxu1 %v718_v58  ;;  %v733_v2 = vld [vmem:[%s1382_s0 + $0x50] sm:$0xf] }
  0x43   :  { %488 = vmatmul.bf16.gmra.mxu2 %v722_v59  ;;  %v734_v7 = vor.u32 %v890_v3, %v733_v2 }
  0x46   :  { %944 = vmatpush.bf16.msra.mxu3 %v1003_v5  ;;  %v778_v5 = vor.u32 %v900_v63, %v775_v0 }
  0x4a   :  { %945 = vmatpush.bf16.msra.mxu3 %v1016_v8  ;;  %v737_v8 = vld [vmem:[%s1382_s0 + $0x60] sm:$0xf] }
  0x4b   :  { %v738_v16 = vor.u32 %v892_v9, %v737_v8 }
  0x4e   :  { %946 = vmatpush.bf16.msra.mxu3 %v1028_v11  ;;  %v769_v11 = vld [vmem:[%s1382_s0 + $0x98] sm:$0xf] }
  0x51   :  { %395 = vmatmul.bf16.gmra.mxu0 %v726_v4  ;;  %464 = vmatmul.bf16.gmra.mxu3 %v778_v5 }
  0x52   :  { %947 = vmatpush.bf16.msra.mxu3 %v1040_v14  ;;  %444 = vmatmul.bf16.gmra.mxu1 %v730_v6  ;;  %v745_v14 = vld [vmem:[%s1382_s0 + $0x68] sm:$0xf] }
  0x53   :  { %493 = vmatmul.bf16.gmra.mxu2 %v734_v7  ;;  %v746_v19 = vor.u32 %v893_v15, %v745_v14 }
  0x56   :  { %948 = vmatpush.bf16.msra.mxu3 %v1052_v17  ;;  %v770_v17 = vor.u32 %v899_v12, %v769_v11 }
  0x5a   :  { %949 = vmatpush.bf16.msra.mxu3 %v1064_v20  ;;  %v749_v20 = vld [vmem:[%s1382_s0 + $0x78] sm:$0xf] }
  0x5b   :  { %v750_v28 = vor.u32 %v895_v21, %v749_v20 }
  0x5e   :  { %950 = vmatpush.bf16.msra.mxu3 %v1075_v23  ;;  %v781_v23 = vld [vmem:[%s1382_s0 + $0xb0] sm:$0xf] }
  0x5f   :  { %v782_v29 = vor.u32 %v902_v24, %v781_v23 }
  0x61   :  { %400 = vmatmul.bf16.gmra.mxu0 %v738_v16  ;;  %508 = vmatmul.bf16.vlgmr.msra.gmra.mxu3 %v770_v17 }
  0x62   :  { %449 = vmatmul.bf16.gmra.mxu1 %v742_v18 }
  0x63   :  { %498 = vmatmul.bf16.gmra.mxu2 %v746_v19 }
  0x71   :  { %405 = vmatmul.bf16.gmra.mxu0 %v750_v28  ;;  %513 = vmatmul.bf16.gmra.mxu3 %v782_v29 }
  0x72   :  { %454 = vmatmul.bf16.gmra.mxu1 %v754_v30 }
  0x73   :  { %503 = vmatmul.bf16.gmra.mxu2 %v758_v31 }
  0x9e   :  { %v381_v33 = vpop.f32.mrf.mxu0 }
  0x9f   :  { %v382_v34 = vadd.f32 %v1236_v32, %v381_v33  ;;  %v430_v35 = vpop.f32.mrf.mxu1 }
  0xa1   :  { %v431_v36 = vadd.f32 %v430_v35, %v382_v34 }
  0xa4   :  { %v1239_v37 = vpop.f32.mrf.mxu3 }
  0xa6   :  { %v479_v38 = vpop.f32.mrf.mxu2  ;;  %v383_v40 = vpop.f32.mrf.mxu0 }
  0xa7   :  { %v480_v39 = vadd.f32 %v479_v38, %v431_v36  ;;  %v432_v41 = vpop.f32.mrf.mxu1  ;;  %v384_v43 = vadd.f32 %v1236_v32, %v383_v40  ;;  %v412_v38 = vadd.f32 %v1236_v32, %v1239_v37 }
  0xa9   :  { %v1241_v42 = vmax.f32 %v480_v39, 0.0  ;;  %v433_v44 = vadd.f32 %v432_v41, %v384_v43 }
  0xab   :  { %535 = vst [vmem:[%s1383_s3] sm:$0xff] %v1241_v42 }
  0xac   :  { %v1248_v45 = vpop.f32.mrf.mxu3 }
  0xad   :  { %v414_v37 = vadd.f32 %v1236_v32, %v1248_v45 }
  0xae   :  { %v481_v46 = vpop.f32.mrf.mxu2  ;;  %v386_v48 = vpop.f32.mrf.mxu0 }
  0xaf   :  { %v482_v47 = vadd.f32 %v481_v46, %v433_v44  ;;  %v387_v49 = vadd.f32 %v1236_v32, %v386_v48  ;;  %v435_v50 = vpop.f32.mrf.mxu1 }
  0xb1   :  { %v1251_v51 = vmax.f32 %v482_v47, 0.0  ;;  %v436_v52 = vadd.f32 %v435_v50, %v387_v49 }
  0xb3   :  { %536 = vst [vmem:[%s1383_s3 + $0x8] sm:$0xff] %v1251_v51 }
  0xb4   :  { %v1257_v53 = vpop.f32.mrf.mxu3 }
  0xb6   :  { %v484_v54 = vpop.f32.mrf.mxu2  ;;  %v388_v56 = vpop.f32.mrf.mxu0 }
  0xb7   :  { %v485_v55 = vadd.f32 %v484_v54, %v436_v52  ;;  %v437_v57 = vpop.f32.mrf.mxu1  ;;  %v389_v59 = vadd.f32 %v1236_v32, %v388_v56  ;;  %v640_v54 = vmul.f32 %v1251_v51, %v1251_v51 }
  0xb9   :  { %v1259_v58 = vmax.f32 %v485_v55, 0.0  ;;  %v438_v60 = vadd.f32 %v437_v57, %v389_v59  ;;  %v639_v59 = vmul.f32 %v1241_v42, %v1241_v42 }
  0xbb   :  { %537 = vst [vmem:[%s1383_s3 + $0x10] sm:$0xff] %v1259_v58  ;;  %v641_v45 = vmul.f32 %v1259_v58, %v1259_v58 }
  0xbc   :  { %v1266_v61 = vpop.f32.mrf.mxu3 }
  0xbe   :  { %v486_v62 = vpop.f32.mrf.mxu2  ;;  %v391_v0 = vpop.f32.mrf.mxu0 }
  0xbf   :  { %v487_v63 = vadd.f32 %v486_v62, %v438_v60  ;;  %v392_v1 = vadd.f32 %v1236_v32, %v391_v0  ;;  %v440_v2 = vpop.f32.mrf.mxu1 }
  0xc1   :  { %v1269_v3 = vmax.f32 %v487_v63, 0.0  ;;  %v441_v4 = vadd.f32 %v440_v2, %v392_v1  ;;  %v618_v63 = vadd.f32 %v1251_v51, %v1241_v42  ;;  %v655_v2 = vadd.f32 %v640_v54, %v639_v59 }
  0xc3   :  { %538 = vst [vmem:[%s1383_s3 + $0x18] sm:$0xff] %v1269_v3 }
  0xc4   :  { %v460_v5 = vpop.f32.mrf.mxu3 }
  0xc5   :  { %v461_v40 = vadd.f32 %v460_v5, %v412_v38 }
  0xc6   :  { %v489_v6 = vpop.f32.mrf.mxu2  ;;  %v393_v8 = vpop.f32.mrf.mxu0 }
  0xc7   :  { %v490_v7 = vadd.f32 %v489_v6, %v441_v4  ;;  %v442_v9 = vpop.f32.mrf.mxu1  ;;  %v394_v11 = vadd.f32 %v1236_v32, %v393_v8  ;;  %v642_v4 = vmul.f32 %v1269_v3, %v1269_v3 }
  0xc9   :  { %v1275_v10 = vmax.f32 %v490_v7, 0.0  ;;  %v443_v12 = vadd.f32 %v442_v9, %v394_v11  ;;  %v619_v7 = vadd.f32 %v618_v63, %v1259_v58  ;;  %v417_v9 = vadd.f32 %v1236_v32, %v1257_v53 }
  0xca   :  { %v656_v11 = vadd.f32 %v655_v2, %v641_v45 }
  0xcb   :  { %539 = vst [vmem:[%s1383_s3 + $0x20] sm:$0xff] %v1275_v10  ;;  %v643_v42 = vmul.f32 %v1275_v10, %v1275_v10 }
  0xcc   :  { %v462_v13 = vpop.f32.mrf.mxu3 }
  0xcd   :  { %v463_v55 = vadd.f32 %v462_v13, %v414_v37  ;;  %v657_v13 = vadd.f32 %v656_v11, %v642_v4 }
  0xce   :  { %v491_v14 = vpop.f32.mrf.mxu2  ;;  %v396_v16 = vpop.f32.mrf.mxu0 }
  0xcf   :  { %v492_v15 = vadd.f32 %v491_v14, %v443_v12  ;;  %v397_v17 = vadd.f32 %v1236_v32, %v396_v16  ;;  %v445_v18 = vpop.f32.mrf.mxu1  ;;  %v620_v12 = vadd.f32 %v619_v7, %v1269_v3 }
  0xd1   :  { %v1283_v19 = vmax.f32 %v492_v15, 0.0  ;;  %v446_v20 = vadd.f32 %v445_v18, %v397_v17  ;;  %v621_v15 = vadd.f32 %v620_v12, %v1275_v10  ;;  %v658_v17 = vadd.f32 %v657_v13, %v643_v42 }
  0xd3   :  { %540 = vst [vmem:[%s1383_s3 + $0x28] sm:$0xff] %v1283_v19  ;;  %v644_v53 = vmul.f32 %v1283_v19, %v1283_v19 }
  0xd4   :  { %v465_v21 = vpop.f32.mrf.mxu3 }
  0xd5   :  { %v466_v14 = vadd.f32 %v465_v21, %v417_v9 }
  0xd6   :  { %v494_v22 = vpop.f32.mrf.mxu2  ;;  %v398_v24 = vpop.f32.mrf.mxu0 }
  0xd7   :  { %v495_v23 = vadd.f32 %v494_v22, %v446_v20  ;;  %v447_v25 = vpop.f32.mrf.mxu1  ;;  %v399_v27 = vadd.f32 %v1236_v32, %v398_v24  ;;  %v622_v22 = vadd.f32 %v621_v15, %v1283_v19 }
  0xd9   :  { %v1289_v26 = vmax.f32 %v495_v23, 0.0  ;;  %v448_v28 = vadd.f32 %v447_v25, %v399_v27  ;;  %v659_v25 = vadd.f32 %v658_v17, %v644_v53 }
  0xdb   :  { %541 = vst [vmem:[%s1383_s3 + $0x30] sm:$0xff] %v1289_v26  ;;  %v645_v3 = vmul.f32 %v1289_v26, %v1289_v26 }
  0xdc   :  { %v1296_v29 = vpop.f32.mrf.mxu3 }
  0xdd   :  { %v660_v19 = vadd.f32 %v659_v25, %v645_v3 }
  0xde   :  { %v496_v30 = vpop.f32.mrf.mxu2  ;;  %v401_v33 = vpop.f32.mrf.mxu0 }
  0xdf   :  { %v497_v31 = vadd.f32 %v496_v30, %v448_v28  ;;  %v402_v34 = vadd.f32 %v1236_v32, %v401_v33  ;;  %v450_v35 = vpop.f32.mrf.mxu1  ;;  %v623_v28 = vadd.f32 %v622_v22, %v1289_v26 }
  0xe1   :  { %v1299_v36 = vmax.f32 %v497_v31, 0.0  ;;  %v451_v39 = vadd.f32 %v450_v35, %v402_v34  ;;  %v419_v31 = vadd.f32 %v1236_v32, %v1266_v61 }
  0xe3   :  { %542 = vst [vmem:[%s1383_s3 + $0x38] sm:$0xff] %v1299_v36  ;;  %v646_v21 = vmul.f32 %v1299_v36, %v1299_v36  ;;  %v624_v33 = vadd.f32 %v623_v28, %v1299_v36  ;;  %v468_v26 = vadd.f32 %v1296_v29, %v419_v31 }
  0xe4   :  { %v509_v41 = vpop.f32.mrf.mxu3 }
  0xe5   :  { %v510_v44 = vadd.f32 %v509_v41, %v461_v40  ;;  %v661_v38 = vadd.f32 %v660_v19, %v646_v21 }
  0xe6   :  { %v499_v43 = vpop.f32.mrf.mxu2  ;;  %v403_v47 = vpop.f32.mrf.mxu0 }
  0xe7   :  { %v500_v46 = vadd.f32 %v499_v43, %v451_v39  ;;  %v1307_v48 = vmax.f32 %v510_v44, 0.0  ;;  %v452_v49 = vpop.f32.mrf.mxu1  ;;  %v404_v52 = vadd.f32 %v1236_v32, %v403_v47 }
  0xe9   :  { %v527_v50 = vmax.f32 %v500_v46, 0.0  ;;  %547 = vst [vmem:[%s1383_s3 + $0x60] sm:$0xff] %v1307_v48  ;;  %v453_v56 = vadd.f32 %v452_v49, %v404_v52 }
  0xeb   :  { %543 = vst [vmem:[%s1383_s3 + $0x40] sm:$0xff] %v527_v50  ;;  %v647_v34 = vmul.f32 %v527_v50, %v527_v50  ;;  %v625_v39 = vadd.f32 %v624_v33, %v527_v50 }
  0xec   :  { %v511_v57 = vpop.f32.mrf.mxu3 }
  0xed   :  { %v512_v62 = vadd.f32 %v511_v57, %v463_v55  ;;  %v662_v44 = vadd.f32 %v661_v38, %v647_v34 }
  0xee   :  { %v501_v60 = vpop.f32.mrf.mxu2  ;;  %v406_v1 = vpop.f32.mrf.mxu0 }
  0xef   :  { %v502_v0 = vadd.f32 %v501_v60, %v453_v56  ;;  %v1329_v5 = vmax.f32 %v512_v62, 0.0  ;;  %v407_v6 = vadd.f32 %v1236_v32, %v406_v1  ;;  %v455_v51 = vpop.f32.mrf.mxu1  ;;  %v651_v56 = vmul.f32 %v1307_v48, %v1307_v48 }
  0xf1   :  { %v528_v8 = vmax.f32 %v502_v0, 0.0  ;;  %548 = vst [vmem:[%s1383_s3 + $0x68] sm:$0xff] %v1329_v5  ;;  %v456_v58 = vadd.f32 %v455_v51, %v407_v6  ;;  %v652_v45 = vmul.f32 %v1329_v5, %v1329_v5 }
  0xf3   :  { %544 = vst [vmem:[%s1383_s3 + $0x48] sm:$0xff] %v528_v8  ;;  %v648_v40 = vmul.f32 %v528_v8, %v528_v8  ;;  %v626_v46 = vadd.f32 %v625_v39, %v528_v8 }
  0xf4   :  { %v514_v16 = vpop.f32.mrf.mxu3 }
  0xf5   :  { %v515_v20 = vadd.f32 %v514_v16, %v466_v14  ;;  %v663_v52 = vadd.f32 %v662_v44, %v648_v40 }
  0xf6   :  { %v504_v18 = vpop.f32.mrf.mxu2  ;;  %v408_v24 = vpop.f32.mrf.mxu0 }
  0xf7   :  { %v505_v23 = vadd.f32 %v504_v18, %v456_v58  ;;  %v533_v27 = vmax.f32 %v515_v20, 0.0  ;;  %v409_v10 = vadd.f32 %v1236_v32, %v408_v24  ;;  %v457_v35 = vpop.f32.mrf.mxu1 }
  0xf9   :  { %v529_v30 = vmax.f32 %v505_v23, 0.0  ;;  %549 = vst [vmem:[%s1383_s3 + $0x70] sm:$0xff] %v533_v27  ;;  %v458_v41 = vadd.f32 %v457_v35, %v409_v10  ;;  %v653_v63 = vmul.f32 %v533_v27, %v533_v27 }
  0xfb   :  { %545 = vst [vmem:[%s1383_s3 + $0x50] sm:$0xff] %v529_v30  ;;  %v649_v47 = vmul.f32 %v529_v30, %v529_v30  ;;  %v627_v37 = vadd.f32 %v626_v46, %v529_v30 }
  0xfc   :  { %v516_v32 = vpop.f32.mrf.mxu3 }
  0xfd   :  { %v517_v43 = vadd.f32 %v516_v32, %v468_v26  ;;  %v664_v29 = vadd.f32 %v663_v52, %v649_v47 }
  0xfe   :  { %v506_v61 = vpop.f32.mrf.mxu2 }
  0xff   :  { %v507_v49 = vadd.f32 %v506_v61, %v458_v41  ;;  %v534_v36 = vmax.f32 %v517_v43, 0.0 }
 0x101   :  { %v530_v54 = vmax.f32 %v507_v49, 0.0  ;;  %550 = vst [vmem:[%s1383_s3 + $0x78] sm:$0xff] %v534_v36  ;;  %v654_v4 = vmul.f32 %v534_v36, %v534_v36 }
 0x103   :  { %546 = vst [vmem:[%s1383_s3 + $0x58] sm:$0xff] %v530_v54  ;;  %v628_v50 = vadd.f32 %v627_v37, %v530_v54  ;;  %v650_v55 = vmul.f32 %v530_v54, %v530_v54 }
 0x105   :  { %v629_v57 = vadd.f32 %v628_v50, %v1307_v48  ;;  %v665_v59 = vadd.f32 %v664_v29, %v650_v55 }
 0x107   :  { %v666_v60 = vadd.f32 %v665_v59, %v651_v56  ;;  %v630_v62 = vadd.f32 %v629_v57, %v1329_v5 }
 0x109   :  { %v631_v0 = vadd.f32 %v630_v62, %v533_v27  ;;  %v667_v1 = vadd.f32 %v666_v60, %v652_v45 }
 0x10b   :  { %v632_v2 = vadd.f32 %v631_v0, %v534_v36  ;;  %v668_v6 = vadd.f32 %v667_v1, %v653_v63 }
 0x10d   :  { %v633_v7 = vrot.slane %v632_v2, 4  ;;  %v669_v8 = vadd.f32 %v668_v6, %v654_v4 }
 0x10f   :  { %v634_v9 = vadd.f32 %v633_v7, %v632_v2  ;;  %v670_v11 = vrot.slane %v669_v8, 4 }
 0x111   :  { %v635_v42 = vrot.slane %v634_v9, 2  ;;  %v671_v51 = vadd.f32 %v670_v11, %v669_v8 }
 0x113   :  { %v636_v48 = vadd.f32 %v635_v42, %v634_v9  ;;  %v672_v12 = vrot.slane %v671_v51, 2 }
 0x115   :  { %v637_v58 = vrot.slane %v636_v48, 1  ;;  %v673_v13 = vadd.f32 %v672_v12, %v671_v51 }
 0x117   :  { %v674_v53 = vrot.slane %v673_v13, 1  ;;  %v638_v14 = vadd.f32 %v637_v58, %v636_v48 }
 0x119   :  { %v675_v5 = vadd.f32 %v674_v53, %v673_v13 }
 0x11b   :  { %v677_v15 = vsel %vm676_vm0, %v638_v14, %v675_v5 }
 0x11c   :  { %678 = vst [vmem:[%s1384_s4] sm:$0x3] %v677_v15 }

// kernel: completion_forward.37
= control target key start
LH: loop header
LB: loop body
LE: loop exit
PB: predicated region body
PF: predicated region fallthrough
CT: control target
= control target key end

     0   :  { %vm998_vm0 = vcmask 1040384   ;;  %s1927_s1 = inlined_call_operand.vmem [shape: bf16[640,128], index: 1, kind: input, shape index: {}]   ;;  %s1928_s2 = inlined_call_operand.vmem [shape: f32[1,128], index: 2, kind: input, shape index: {}]   ;;  %s1929_s0 = inlined_call_operand.vmem [shape: bf16[128,640], index: 0, kind: input, shape index: {}]   ;;  %s1930_s3 = inlined_call_operand.vmem [shape: f32[128,128], index: 3, kind: output, shape index: {0}]   ;;  %s1931_s4 = inlined_call_operand.vmem [shape: f32[1,2,128], index: 4, kind: output, shape index: {1}]  }
   0x1   :  { %v1376_v0 = vld [vmem:[%s1927_s1 + $0x38] sm:$0xff]  ;;  %v1375_v1 = vld [vmem:[%s1927_s1 + $0x30] sm:$0xff]  ;;  %v1374_v2 = vld [vmem:[%s1927_s1 + $0x28] sm:$0xff] }
   0x2   :  { %1409 = vmatpush.bf16.msra.mxu1 %v1376_v0  ;;  %1410 = vmatpush.bf16.msra.mxu2 %v1376_v0  ;;  %v1373_v3 = vld [vmem:[%s1927_s1 + $0x20] sm:$0xff]  ;;  %v1372_v4 = vld [vmem:[%s1927_s1 + $0x18] sm:$0xff]  ;;  %v1371_v5 = vld [vmem:[%s1927_s1 + $0x10] sm:$0xff] }
   0x3   :  { %1411 = vmatpush.bf16.msra.mxu3 %v1376_v0  ;;  %596 = vmatpush.bf16.msra.mxu0 %v1376_v0  ;;  %v1370_v6 = vld [vmem:[%s1927_s1 + $0x8] sm:$0xff]  ;;  %v1369_v7 = vld [vmem:[%s1927_s1] sm:$0xff]  ;;  %v1051_v8 = vld [vmem:[%s1929_s0 + $0x50] sm:$0xf] }
   0x4   :  { %v1341_v9 = vld [vmem:[%s1929_s0 + $0x60] sm:$0xf0]  ;;  %v1091_v10 = vld [vmem:[%s1929_s0 + $0xa0] sm:$0xf]  ;;  %v1351_v11 = vld [vmem:[%s1929_s0 + $0xb0] sm:$0xf0] }
   0x5   :  { %v1131_v12 = vld [vmem:[%s1929_s0 + $0xf0] sm:$0xf]  ;;  %v1361_v13 = vld [vmem:[%s1929_s0 + $0x100] sm:$0xf0]  ;;  %v1011_v14 = vld [vmem:[%s1929_s0] sm:$0xf]  ;;  %v1052_v18 = vor.u32 %v1341_v9, %v1051_v8  ;;  %v1092_v19 = vor.u32 %v1351_v11, %v1091_v10 }
   0x6   :  { %1412 = vmatpush.bf16.msra.mxu1 %v1375_v1  ;;  %1413 = vmatpush.bf16.msra.mxu2 %v1375_v1  ;;  %v1331_v15 = vld [vmem:[%s1929_s0 + $0x10] sm:$0xf0]  ;;  %v1392_v16 = vld [vmem:[%s1927_s1 + $0xb8] sm:$0xff]  ;;  %v1132_v20 = vor.u32 %v1361_v13, %v1131_v12  ;;  %v1390_v28 = vld [vmem:[%s1927_s1 + $0xa8] sm:$0xff] }
   0x7   :  { %1414 = vmatpush.bf16.msra.mxu3 %v1375_v1  ;;  %597 = vmatpush.bf16.msra.mxu0 %v1375_v1  ;;  %v1384_v17 = vld [vmem:[%s1927_s1 + $0x78] sm:$0xff]  ;;  %v1012_v21 = vor.u32 %v1331_v15, %v1011_v14  ;;  %v1391_v24 = vld [vmem:[%s1927_s1 + $0xb0] sm:$0xff]  ;;  %v1382_v29 = vld [vmem:[%s1927_s1 + $0x68] sm:$0xff] }
   0x8   :  { %v1400_v22 = vld [vmem:[%s1927_s1 + $0xf8] sm:$0xff]  ;;  %v1383_v25 = vld [vmem:[%s1927_s1 + $0x70] sm:$0xff]  ;;  %v1398_v30 = vld [vmem:[%s1927_s1 + $0xe8] sm:$0xff] }
   0x9   :  { %v1408_v23 = vld [vmem:[%s1927_s1 + $0x138] sm:$0xff]  ;;  %v1399_v26 = vld [vmem:[%s1927_s1 + $0xf0] sm:$0xff]  ;;  %v1406_v31 = vld [vmem:[%s1927_s1 + $0x128] sm:$0xff] }
   0xa   :  { %1415 = vmatpush.bf16.msra.mxu1 %v1374_v2  ;;  %1416 = vmatpush.bf16.msra.mxu2 %v1374_v2  ;;  %v1407_v27 = vld [vmem:[%s1927_s1 + $0x130] sm:$0xff]  ;;  %v1389_v32 = vld [vmem:[%s1927_s1 + $0xa0] sm:$0xff]  ;;  %v1071_v36 = vld [vmem:[%s1929_s0 + $0x78] sm:$0xf] }
   0xb   :  { %1417 = vmatpush.bf16.msra.mxu3 %v1374_v2  ;;  %598 = vmatpush.bf16.msra.mxu0 %v1374_v2  ;;  %v1381_v33 = vld [vmem:[%s1927_s1 + $0x60] sm:$0xff]  ;;  %v1346_v37 = vld [vmem:[%s1929_s0 + $0x88] sm:$0xf0]  ;;  %v1111_v38 = vld [vmem:[%s1929_s0 + $0xc8] sm:$0xf] }
   0xc   :  { %v1397_v34 = vld [vmem:[%s1927_s1 + $0xe0] sm:$0xff]  ;;  %v1356_v39 = vld [vmem:[%s1929_s0 + $0xd8] sm:$0xf0]  ;;  %v1151_v40 = vld [vmem:[%s1929_s0 + $0x118] sm:$0xf]  ;;  %v1072_v46 = vor.u32 %v1346_v37, %v1071_v36 }
   0xd   :  { %v1405_v35 = vld [vmem:[%s1927_s1 + $0x120] sm:$0xff]  ;;  %v1366_v41 = vld [vmem:[%s1929_s0 + $0x128] sm:$0xf0]  ;;  %v1031_v42 = vld [vmem:[%s1929_s0 + $0x28] sm:$0xf]  ;;  %v1112_v47 = vor.u32 %v1356_v39, %v1111_v38 }
   0xe   :  { %1418 = vmatpush.bf16.msra.mxu1 %v1373_v3  ;;  %1419 = vmatpush.bf16.msra.mxu2 %v1373_v3  ;;  %v1336_v43 = vld [vmem:[%s1929_s0 + $0x38] sm:$0xf0]  ;;  %v1152_v48 = vor.u32 %v1366_v41, %v1151_v40  ;;  %v1387_v52 = vld [vmem:[%s1927_s1 + $0x90] sm:$0xff]  ;;  %v1386_v56 = vld [vmem:[%s1927_s1 + $0x88] sm:$0xff] }
   0xf   :  { %1420 = vmatpush.bf16.msra.mxu3 %v1373_v3  ;;  %599 = vmatpush.bf16.msra.mxu0 %v1373_v3  ;;  %v1388_v44 = vld [vmem:[%s1927_s1 + $0x98] sm:$0xff]  ;;  %v1032_v49 = vor.u32 %v1336_v43, %v1031_v42  ;;  %v1379_v53 = vld [vmem:[%s1927_s1 + $0x50] sm:$0xff]  ;;  %v1378_v57 = vld [vmem:[%s1927_s1 + $0x48] sm:$0xff] }
  0x10   :  { %v1380_v45 = vld [vmem:[%s1927_s1 + $0x58] sm:$0xff]  ;;  %v1395_v54 = vld [vmem:[%s1927_s1 + $0xd0] sm:$0xff]  ;;  %v1394_v58 = vld [vmem:[%s1927_s1 + $0xc8] sm:$0xff] }
  0x11   :  { %v1396_v50 = vld [vmem:[%s1927_s1 + $0xd8] sm:$0xff]  ;;  %v1403_v55 = vld [vmem:[%s1927_s1 + $0x110] sm:$0xff]  ;;  %v1402_v59 = vld [vmem:[%s1927_s1 + $0x108] sm:$0xff] }
  0x12   :  { %1421 = vmatpush.bf16.msra.mxu1 %v1372_v4  ;;  %1422 = vmatpush.bf16.msra.mxu2 %v1372_v4  ;;  %v1404_v51 = vld [vmem:[%s1927_s1 + $0x118] sm:$0xff]  ;;  %v1385_v60 = vld [vmem:[%s1927_s1 + $0x80] sm:$0xff]  ;;  %v1019_v2 = vld [vmem:[%s1929_s0 + $0x8] sm:$0xf] }
  0x13   :  { %1423 = vmatpush.bf16.msra.mxu3 %v1372_v4  ;;  %600 = vmatpush.bf16.msra.mxu0 %v1372_v4  ;;  %v1377_v61 = vld [vmem:[%s1927_s1 + $0x40] sm:$0xff]  ;;  %v1013_v1 = vld [vmem:[%s1929_s0 + $0x14] sm:$0xf0]  ;;  %v1332_v3 = vld [vmem:[%s1929_s0 + $0x18] sm:$0xf0] }
  0x14   :  { %v1393_v62 = vld [vmem:[%s1927_s1 + $0xc0] sm:$0xff]  ;;  %v1330_v4 = vld [vmem:[%s1929_s0 + $0xc] sm:$0xf]  ;;  %v1020_v9 = vor.u32 %v1332_v3, %v1019_v2  ;;  %v1039_v14 = vld [vmem:[%s1929_s0 + $0x30] sm:$0xf] }
  0x15   :  { %v1401_v63 = vld [vmem:[%s1927_s1 + $0x100] sm:$0xff]  ;;  %v1334_v12 = vld [vmem:[%s1929_s0 + $0x2c] sm:$0xf]  ;;  %v1344_v36 = vld [vmem:[%s1929_s0 + $0x7c] sm:$0xf] }
  0x16   :  { %1424 = vmatpush.bf16.msra.mxu1 %v1371_v5  ;;  %1425 = vmatpush.bf16.msra.mxu2 %v1371_v5  ;;  %v1329_v0 = vld [vmem:[%s1929_s0 + $0x4] sm:$0xf]  ;;  %v1033_v13 = vld [vmem:[%s1929_s0 + $0x3c] sm:$0xf0]  ;;  %v1073_v37 = vld [vmem:[%s1929_s0 + $0x8c] sm:$0xf0] }
  0x17   :  { %1426 = vmatpush.bf16.msra.mxu3 %v1371_v5  ;;  %601 = vmatpush.bf16.msra.mxu0 %v1371_v5  ;;  %v1021_v5 = vld [vmem:[%s1929_s0 + $0x1c] sm:$0xf0]  ;;  %v1016_v8 = vor.u32 %v1329_v0, %v1013_v1  ;;  %v1337_v15 = vld [vmem:[%s1929_s0 + $0x40] sm:$0xf0]  ;;  %v1347_v39 = vld [vmem:[%s1929_s0 + $0x90] sm:$0xf0] }
  0x18   :  { %v1024_v10 = vor.u32 %v1330_v4, %v1021_v5  ;;  %v1079_v38 = vld [vmem:[%s1929_s0 + $0x80] sm:$0xf]  ;;  %v1345_v40 = vld [vmem:[%s1929_s0 + $0x84] sm:$0xf]  ;;  %v1081_v41 = vld [vmem:[%s1929_s0 + $0x94] sm:$0xf0] }
  0x19   :  { %v1087_v42 = vld [vmem:[%s1929_s0 + $0x88] sm:$0xf]  ;;  %v1348_v43 = vld [vmem:[%s1929_s0 + $0x98] sm:$0xf0]  ;;  %v1355_v0 = vld [vmem:[%s1929_s0 + $0xd4] sm:$0xf] }
  0x1a   :  { %1427 = vmatpush.bf16.msra.mxu1 %v1370_v6  ;;  %1428 = vmatpush.bf16.msra.mxu2 %v1370_v6  ;;  %v1121_v1 = vld [vmem:[%s1929_s0 + $0xe4] sm:$0xf0]  ;;  %v1127_v2 = vld [vmem:[%s1929_s0 + $0xd8] sm:$0xf]  ;;  %v1358_v3 = vld [vmem:[%s1929_s0 + $0xe8] sm:$0xf0] }
  0x1b   :  { %1429 = vmatpush.bf16.msra.mxu3 %v1370_v6  ;;  %602 = vmatpush.bf16.msra.mxu0 %v1370_v6  ;;  %v1027_v6 = vld [vmem:[%s1929_s0 + $0x10] sm:$0xf] }
  0x1e   :  { %1430 = vmatpush.bf16.msra.mxu1 %v1369_v7  ;;  %1431 = vmatpush.bf16.msra.mxu2 %v1369_v7 }
  0x1f   :  { %1432 = vmatpush.bf16.msra.mxu3 %v1369_v7  ;;  %603 = vmatpush.bf16.msra.mxu0 %v1369_v7  ;;  %v1333_v7 = vld [vmem:[%s1929_s0 + $0x20] sm:$0xf0] }
  0x20   :  { %v1028_v11 = vor.u32 %v1333_v7, %v1027_v6  ;;  %v1124_v6 = vor.u32 %v1355_v0, %v1121_v1  ;;  %v1128_v7 = vor.u32 %v1358_v3, %v1127_v2 }
  0x21   :  { %614 = vmatmul.bf16.vlgmr.msra.gmra.mxu1 %v1052_v18  ;;  %624 = vmatmul.bf16.vlgmr.msra.gmra.mxu2 %v1092_v19  ;;  %v1047_v18 = vld [vmem:[%s1929_s0 + $0x38] sm:$0xf]  ;;  %v1338_v19 = vld [vmem:[%s1929_s0 + $0x48] sm:$0xf0] }
  0x22   :  { %694 = vmatpush.bf16.msrb.mxu2 %v1392_v16  ;;  %645 = vmatpush.bf16.msrb.mxu1 %v1384_v17  ;;  %v1335_v16 = vld [vmem:[%s1929_s0 + $0x34] sm:$0xf]  ;;  %v1041_v17 = vld [vmem:[%s1929_s0 + $0x44] sm:$0xf0] }
  0x23   :  { %634 = vmatmul.bf16.vlgmr.msra.gmra.mxu3 %v1132_v20  ;;  %604 = vmatmul.bf16.vlgmr.msra.gmra.mxu0 %v1012_v21  ;;  %v1036_v20 = vor.u32 %v1334_v12, %v1033_v13  ;;  %v1040_v21 = vor.u32 %v1337_v15, %v1039_v14  ;;  %v1360_v12 = vld [vmem:[%s1929_s0 + $0xfc] sm:$0xf]  ;;  %v1141_v13 = vld [vmem:[%s1929_s0 + $0x10c] sm:$0xf0]  ;;  %v1147_v14 = vld [vmem:[%s1929_s0 + $0x100] sm:$0xf] }
  0x24   :  { %743 = vmatpush.bf16.msrb.mxu3 %v1400_v22  ;;  %792 = vmatpush.bf16.msrb.mxu0 %v1408_v23  ;;  %v1044_v22 = vor.u32 %v1335_v16, %v1041_v17  ;;  %v1048_v23 = vor.u32 %v1338_v19, %v1047_v18  ;;  %v1363_v15 = vld [vmem:[%s1929_s0 + $0x110] sm:$0xf0]  ;;  %v1144_v19 = vor.u32 %v1360_v12, %v1141_v13 }
  0x26   :  { %695 = vmatpush.bf16.msrb.mxu2 %v1391_v24  ;;  %646 = vmatpush.bf16.msrb.mxu1 %v1383_v25  ;;  %v1339_v24 = vld [vmem:[%s1929_s0 + $0x54] sm:$0xf]  ;;  %v1053_v25 = vld [vmem:[%s1929_s0 + $0x64] sm:$0xf0] }
  0x28   :  { %744 = vmatpush.bf16.msrb.mxu3 %v1399_v26  ;;  %793 = vmatpush.bf16.msrb.mxu0 %v1407_v27  ;;  %v1059_v26 = vld [vmem:[%s1929_s0 + $0x58] sm:$0xf]  ;;  %v1342_v27 = vld [vmem:[%s1929_s0 + $0x68] sm:$0xf0] }
  0x2a   :  { %696 = vmatpush.bf16.msrb.mxu2 %v1390_v28  ;;  %647 = vmatpush.bf16.msrb.mxu1 %v1382_v29  ;;  %v1340_v28 = vld [vmem:[%s1929_s0 + $0x5c] sm:$0xf]  ;;  %v1061_v29 = vld [vmem:[%s1929_s0 + $0x6c] sm:$0xf0] }
  0x2c   :  { %745 = vmatpush.bf16.msrb.mxu3 %v1398_v30  ;;  %794 = vmatpush.bf16.msrb.mxu0 %v1406_v31  ;;  %v1067_v30 = vld [vmem:[%s1929_s0 + $0x60] sm:$0xf]  ;;  %v1343_v31 = vld [vmem:[%s1929_s0 + $0x70] sm:$0xf0] }
  0x2e   :  { %697 = vmatpush.bf16.msrb.mxu2 %v1389_v32  ;;  %648 = vmatpush.bf16.msrb.mxu1 %v1381_v33  ;;  %v1056_v32 = vor.u32 %v1339_v24, %v1053_v25  ;;  %v1060_v33 = vor.u32 %v1342_v27, %v1059_v26 }
  0x30   :  { %746 = vmatpush.bf16.msrb.mxu3 %v1397_v34  ;;  %795 = vmatpush.bf16.msrb.mxu0 %v1405_v35  ;;  %v1064_v34 = vor.u32 %v1340_v28, %v1061_v29  ;;  %v1068_v35 = vor.u32 %v1343_v31, %v1067_v30  ;;  %v1364_v29 = vld [vmem:[%s1929_s0 + $0x11c] sm:$0xf]  ;;  %v1153_v30 = vld [vmem:[%s1929_s0 + $0x12c] sm:$0xf0]  ;;  %v1159_v31 = vld [vmem:[%s1929_s0 + $0x120] sm:$0xf] }
  0x31   :  { %619 = vmatmul.bf16.gmra.mxu1 %v1072_v46  ;;  %629 = vmatmul.bf16.gmra.mxu2 %v1112_v47  ;;  %v1084_v46 = vor.u32 %v1345_v40, %v1081_v41  ;;  %v1088_v47 = vor.u32 %v1348_v43, %v1087_v42  ;;  %v1156_v40 = vor.u32 %v1364_v29, %v1153_v30 }
  0x32   :  { %698 = vmatpush.bf16.msrb.mxu2 %v1388_v44  ;;  %649 = vmatpush.bf16.msrb.mxu1 %v1380_v45  ;;  %v1076_v44 = vor.u32 %v1344_v36, %v1073_v37  ;;  %v1080_v45 = vor.u32 %v1347_v39, %v1079_v38  ;;  %v1368_v36 = vld [vmem:[%s1929_s0 + $0x138] sm:$0xf0] }
  0x33   :  { %639 = vmatmul.bf16.gmra.mxu3 %v1152_v48  ;;  %609 = vmatmul.bf16.gmra.mxu0 %v1032_v49  ;;  %v1349_v48 = vld [vmem:[%s1929_s0 + $0xa4] sm:$0xf]  ;;  %v1093_v49 = vld [vmem:[%s1929_s0 + $0xb4] sm:$0xf0] }
  0x34   :  { %747 = vmatpush.bf16.msrb.mxu3 %v1396_v50  ;;  %796 = vmatpush.bf16.msrb.mxu0 %v1404_v51  ;;  %v1099_v50 = vld [vmem:[%s1929_s0 + $0xa8] sm:$0xf]  ;;  %v1352_v51 = vld [vmem:[%s1929_s0 + $0xb8] sm:$0xf0] }
  0x36   :  { %699 = vmatpush.bf16.msrb.mxu2 %v1387_v52  ;;  %650 = vmatpush.bf16.msrb.mxu1 %v1379_v53  ;;  %v1350_v52 = vld [vmem:[%s1929_s0 + $0xac] sm:$0xf]  ;;  %v1101_v53 = vld [vmem:[%s1929_s0 + $0xbc] sm:$0xf0] }
  0x38   :  { %748 = vmatpush.bf16.msrb.mxu3 %v1395_v54  ;;  %797 = vmatpush.bf16.msrb.mxu0 %v1403_v55  ;;  %v1107_v54 = vld [vmem:[%s1929_s0 + $0xb0] sm:$0xf]  ;;  %v1353_v55 = vld [vmem:[%s1929_s0 + $0xc0] sm:$0xf0] }
  0x3a   :  { %700 = vmatpush.bf16.msrb.mxu2 %v1386_v56  ;;  %651 = vmatpush.bf16.msrb.mxu1 %v1378_v57  ;;  %v1096_v56 = vor.u32 %v1349_v48, %v1093_v49  ;;  %v1100_v57 = vor.u32 %v1352_v51, %v1099_v50 }
  0x3c   :  { %749 = vmatpush.bf16.msrb.mxu3 %v1394_v58  ;;  %798 = vmatpush.bf16.msrb.mxu0 %v1402_v59  ;;  %v1104_v58 = vor.u32 %v1350_v52, %v1101_v53  ;;  %v1108_v59 = vor.u32 %v1353_v55, %v1107_v54 }
  0x3e   :  { %701 = vmatpush.bf16.msrb.mxu2 %v1385_v60  ;;  %652 = vmatpush.bf16.msrb.mxu1 %v1377_v61  ;;  %v1354_v60 = vld [vmem:[%s1929_s0 + $0xcc] sm:$0xf]  ;;  %v1113_v61 = vld [vmem:[%s1929_s0 + $0xdc] sm:$0xf0] }
  0x3f   :  { %v1116_v4 = vor.u32 %v1354_v60, %v1113_v61 }
  0x40   :  { %750 = vmatpush.bf16.msrb.mxu3 %v1393_v62  ;;  %799 = vmatpush.bf16.msrb.mxu0 %v1401_v63  ;;  %v1119_v62 = vld [vmem:[%s1929_s0 + $0xd0] sm:$0xf]  ;;  %v1357_v63 = vld [vmem:[%s1929_s0 + $0xe0] sm:$0xf0] }
  0x41   :  { %653 = vmatmul.bf16.vlgmr.msrb.gmra.mxu1 %v1016_v8  ;;  %702 = vmatmul.bf16.vlgmr.msrb.gmra.mxu2 %v1020_v9  ;;  %v1120_v5 = vor.u32 %v1357_v63, %v1119_v62  ;;  %v1359_v8 = vld [vmem:[%s1929_s0 + $0xf4] sm:$0xf]  ;;  %v1133_v9 = vld [vmem:[%s1929_s0 + $0x104] sm:$0xf0] }
  0x42   :  { %v1136_v16 = vor.u32 %v1359_v8, %v1133_v9 }
  0x43   :  { %751 = vmatmul.bf16.vlgmr.msrb.gmra.mxu3 %v1024_v10  ;;  %800 = vmatmul.bf16.vlgmr.msrb.gmra.mxu0 %v1028_v11  ;;  %v1139_v10 = vld [vmem:[%s1929_s0 + $0xf8] sm:$0xf]  ;;  %v1362_v11 = vld [vmem:[%s1929_s0 + $0x108] sm:$0xf0] }
  0x44   :  { %v1140_v17 = vor.u32 %v1362_v11, %v1139_v10 }
  0x51   :  { %658 = vmatmul.bf16.gmra.mxu1 %v1036_v20  ;;  %707 = vmatmul.bf16.gmra.mxu2 %v1040_v21  ;;  %v1148_v20 = vor.u32 %v1363_v15, %v1147_v14 }
  0x53   :  { %756 = vmatmul.bf16.gmra.mxu3 %v1044_v22  ;;  %805 = vmatmul.bf16.gmra.mxu0 %v1048_v23  ;;  %v1800_v22 = vld [vmem:[%s1928_s2] ss:$0 sm:$0xff] }
  0x61   :  { %663 = vmatmul.bf16.gmra.mxu1 %v1056_v32  ;;  %712 = vmatmul.bf16.gmra.mxu2 %v1060_v33  ;;  %v1367_v32 = vld [vmem:[%s1929_s0 + $0x130] sm:$0xf0]  ;;  %v1365_v33 = vld [vmem:[%s1929_s0 + $0x124] sm:$0xf] }
  0x62   :  { %v1160_v41 = vor.u32 %v1367_v32, %v1159_v31 }
  0x63   :  { %761 = vmatmul.bf16.gmra.mxu3 %v1064_v34  ;;  %810 = vmatmul.bf16.gmra.mxu0 %v1068_v35  ;;  %v1161_v34 = vld [vmem:[%s1929_s0 + $0x134] sm:$0xf0]  ;;  %v1167_v35 = vld [vmem:[%s1929_s0 + $0x128] sm:$0xf] }
  0x71   :  { %668 = vmatmul.bf16.gmra.mxu1 %v1076_v44  ;;  %717 = vmatmul.bf16.gmra.mxu2 %v1080_v45  ;;  %v1164_v44 = vor.u32 %v1365_v33, %v1161_v34  ;;  %v1168_v45 = vor.u32 %v1368_v36, %v1167_v35 }
  0x73   :  { %766 = vmatmul.bf16.gmra.mxu3 %v1084_v46  ;;  %815 = vmatmul.bf16.gmra.mxu0 %v1088_v47 }
  0x81   :  { %673 = vmatmul.bf16.gmra.mxu1 %v1096_v56  ;;  %722 = vmatmul.bf16.gmra.mxu2 %v1100_v57 }
  0x83   :  { %771 = vmatmul.bf16.gmra.mxu3 %v1104_v58  ;;  %820 = vmatmul.bf16.gmra.mxu0 %v1108_v59 }
  0x91   :  { %678 = vmatmul.bf16.gmra.mxu1 %v1116_v4  ;;  %727 = vmatmul.bf16.gmra.mxu2 %v1120_v5 }
  0x93   :  { %776 = vmatmul.bf16.gmra.mxu3 %v1124_v6  ;;  %825 = vmatmul.bf16.gmra.mxu0 %v1128_v7 }
  0x9e   :  { %v1795_v18 = vpop.f32.mrf.mxu1 }
  0xa0   :  { %v605_v21 = vpop.f32.mrf.mxu0 }
  0xa1   :  { %683 = vmatmul.bf16.gmra.mxu1 %v1136_v16  ;;  %732 = vmatmul.bf16.gmra.mxu2 %v1140_v17  ;;  %v606_v59 = vadd.f32 %v1800_v22, %v605_v21 }
  0xa3   :  { %781 = vmatmul.bf16.gmra.mxu3 %v1144_v19  ;;  %830 = vmatmul.bf16.gmra.mxu0 %v1148_v20 }
  0xa4   :  { %v625_v23 = vpop.f32.mrf.mxu2 }
  0xa5   :  { %v1803_v24 = vadd.f32 %v1800_v22, %v625_v23 }
  0xa6   :  { %v635_v25 = vpop.f32.mrf.mxu3  ;;  %v1808_v27 = vpop.f32.mrf.mxu1 }
  0xa7   :  { %v1806_v26 = vadd.f32 %v1800_v22, %v635_v25 }
  0xa8   :  { %v607_v28 = vpop.f32.mrf.mxu0 }
  0xa9   :  { %v608_v3 = vadd.f32 %v1800_v22, %v607_v28 }
  0xac   :  { %v627_v37 = vpop.f32.mrf.mxu2 }
  0xad   :  { %v1835_v38 = vadd.f32 %v1800_v22, %v627_v37 }
  0xae   :  { %v637_v39 = vpop.f32.mrf.mxu3  ;;  %v1840_v43 = vpop.f32.mrf.mxu1 }
  0xaf   :  { %v1838_v42 = vadd.f32 %v1800_v22, %v637_v39 }
  0xb0   :  { %v610_v46 = vpop.f32.mrf.mxu0 }
  0xb1   :  { %688 = vmatmul.bf16.gmra.mxu1 %v1156_v40  ;;  %737 = vmatmul.bf16.gmra.mxu2 %v1160_v41  ;;  %v611_v13 = vadd.f32 %v1800_v22, %v610_v46 }
  0xb3   :  { %786 = vmatmul.bf16.gmra.mxu3 %v1164_v44  ;;  %835 = vmatmul.bf16.gmra.mxu0 %v1168_v45 }
  0xb4   :  { %v630_v47 = vpop.f32.mrf.mxu2 }
  0xb5   :  { %v1843_v48 = vadd.f32 %v1800_v22, %v630_v47 }
  0xb6   :  { %v640_v49 = vpop.f32.mrf.mxu3  ;;  %v1848_v51 = vpop.f32.mrf.mxu1 }
  0xb7   :  { %v1846_v50 = vadd.f32 %v1800_v22, %v640_v49  ;;  %v616_v49 = vadd.f32 %v1800_v22, %v1795_v18 }
  0xb8   :  { %v612_v52 = vpop.f32.mrf.mxu0 }
  0xb9   :  { %v613_v32 = vadd.f32 %v1800_v22, %v612_v52 }
  0xbc   :  { %v632_v53 = vpop.f32.mrf.mxu2 }
  0xbd   :  { %v1851_v54 = vadd.f32 %v1800_v22, %v632_v53 }
  0xbe   :  { %v642_v55 = vpop.f32.mrf.mxu3  ;;  %v654_v57 = vpop.f32.mrf.mxu1 }
  0xbf   :  { %v1854_v56 = vadd.f32 %v1800_v22, %v642_v55  ;;  %v655_v60 = vadd.f32 %v654_v57, %v606_v59 }
  0xc0   :  { %v801_v58 = vpop.f32.mrf.mxu0 }
  0xc4   :  { %v703_v61 = vpop.f32.mrf.mxu2 }
  0xc5   :  { %v704_v62 = vadd.f32 %v703_v61, %v655_v60 }
  0xc6   :  { %v752_v63 = vpop.f32.mrf.mxu3  ;;  %v656_v0 = vpop.f32.mrf.mxu1 }
  0xc7   :  { %v753_v1 = vadd.f32 %v752_v63, %v704_v62  ;;  %v657_v6 = vadd.f32 %v656_v0, %v608_v3 }
  0xc8   :  { %v803_v2 = vpop.f32.mrf.mxu0 }
  0xc9   :  { %v802_v4 = vadd.f32 %v801_v58, %v753_v1 }
  0xcb   :  { %v841_v5 = vmax.f32 %v802_v4, 0.0 }
  0xcc   :  { %v705_v7 = vpop.f32.mrf.mxu2 }
  0xcd   :  { %857 = vst [vmem:[%s1930_s3] sm:$0xff] %v841_v5  ;;  %v706_v8 = vadd.f32 %v705_v7, %v657_v6  ;;  %v961_v19 = vmul.f32 %v841_v5, %v841_v5 }
  0xce   :  { %v754_v9 = vpop.f32.mrf.mxu3  ;;  %v659_v10 = vpop.f32.mrf.mxu1 }
  0xcf   :  { %v755_v11 = vadd.f32 %v754_v9, %v706_v8  ;;  %v660_v16 = vadd.f32 %v659_v10, %v611_v13 }
  0xd0   :  { %v806_v12 = vpop.f32.mrf.mxu0 }
  0xd1   :  { %v804_v14 = vadd.f32 %v803_v2, %v755_v11  ;;  %v618_v2 = vadd.f32 %v1800_v22, %v1808_v27 }
  0xd3   :  { %v842_v15 = vmax.f32 %v804_v14, 0.0  ;;  %v621_v14 = vadd.f32 %v1800_v22, %v1840_v43 }
  0xd4   :  { %v708_v17 = vpop.f32.mrf.mxu2 }
  0xd5   :  { %858 = vst [vmem:[%s1930_s3 + $0x8] sm:$0xff] %v842_v15  ;;  %v940_v20 = vadd.f32 %v842_v15, %v841_v5  ;;  %v962_v21 = vmul.f32 %v842_v15, %v842_v15  ;;  %v709_v23 = vadd.f32 %v708_v17, %v660_v16 }
  0xd6   :  { %v757_v25 = vpop.f32.mrf.mxu3  ;;  %v661_v28 = vpop.f32.mrf.mxu1 }
  0xd7   :  { %v977_v29 = vadd.f32 %v962_v21, %v961_v19  ;;  %v758_v30 = vadd.f32 %v757_v25, %v709_v23  ;;  %v662_v35 = vadd.f32 %v661_v28, %v613_v32  ;;  %v623_v28 = vadd.f32 %v1800_v22, %v1848_v51 }
  0xd8   :  { %v808_v31 = vpop.f32.mrf.mxu0 }
  0xd9   :  { %v807_v33 = vadd.f32 %v806_v12, %v758_v30 }
  0xdb   :  { %v843_v34 = vmax.f32 %v807_v33, 0.0 }
  0xdc   :  { %v710_v36 = vpop.f32.mrf.mxu2 }
  0xdd   :  { %859 = vst [vmem:[%s1930_s3 + $0x10] sm:$0xff] %v843_v34  ;;  %v941_v37 = vadd.f32 %v940_v20, %v843_v34  ;;  %v963_v39 = vmul.f32 %v843_v34, %v843_v34  ;;  %v711_v40 = vadd.f32 %v710_v36, %v662_v35 }
  0xde   :  { %v759_v41 = vpop.f32.mrf.mxu3  ;;  %v664_v44 = vpop.f32.mrf.mxu1 }
  0xdf   :  { %v978_v45 = vadd.f32 %v977_v29, %v963_v39  ;;  %v760_v46 = vadd.f32 %v759_v41, %v711_v40  ;;  %v665_v55 = vadd.f32 %v664_v44, %v616_v49 }
  0xe0   :  { %v811_v47 = vpop.f32.mrf.mxu0 }
  0xe1   :  { %v809_v52 = vadd.f32 %v808_v31, %v760_v46 }
  0xe3   :  { %v844_v53 = vmax.f32 %v809_v52, 0.0 }
  0xe4   :  { %v713_v57 = vpop.f32.mrf.mxu2 }
  0xe5   :  { %860 = vst [vmem:[%s1930_s3 + $0x18] sm:$0xff] %v844_v53  ;;  %v942_v58 = vadd.f32 %v941_v37, %v844_v53  ;;  %v964_v59 = vmul.f32 %v844_v53, %v844_v53  ;;  %v714_v60 = vadd.f32 %v713_v57, %v665_v55 }
  0xe6   :  { %v762_v61 = vpop.f32.mrf.mxu3  ;;  %v666_v62 = vpop.f32.mrf.mxu1 }
  0xe7   :  { %v979_v63 = vadd.f32 %v978_v45, %v964_v59  ;;  %v763_v0 = vadd.f32 %v762_v61, %v714_v60  ;;  %v667_v4 = vadd.f32 %v666_v62, %v618_v2 }
  0xe8   :  { %v813_v1 = vpop.f32.mrf.mxu0 }
  0xe9   :  { %v812_v18 = vadd.f32 %v811_v47, %v763_v0 }
  0xeb   :  { %v845_v3 = vmax.f32 %v812_v18, 0.0 }
  0xec   :  { %v715_v5 = vpop.f32.mrf.mxu2 }
  0xed   :  { %861 = vst [vmem:[%s1930_s3 + $0x20] sm:$0xff] %v845_v3  ;;  %v943_v6 = vadd.f32 %v942_v58, %v845_v3  ;;  %v965_v7 = vmul.f32 %v845_v3, %v845_v3  ;;  %v716_v8 = vadd.f32 %v715_v5, %v667_v4 }
  0xee   :  { %v764_v9 = vpop.f32.mrf.mxu3  ;;  %v669_v10 = vpop.f32.mrf.mxu1 }
  0xef   :  { %v980_v11 = vadd.f32 %v979_v63, %v965_v7  ;;  %v765_v12 = vadd.f32 %v764_v9, %v716_v8  ;;  %v670_v16 = vadd.f32 %v669_v10, %v621_v14 }
  0xf0   :  { %v816_v13 = vpop.f32.mrf.mxu0 }
  0xf1   :  { %v814_v27 = vadd.f32 %v813_v1, %v765_v12 }
  0xf3   :  { %v846_v15 = vmax.f32 %v814_v27, 0.0 }
  0xf4   :  { %v718_v17 = vpop.f32.mrf.mxu2 }
  0xf5   :  { %862 = vst [vmem:[%s1930_s3 + $0x28] sm:$0xff] %v846_v15  ;;  %v719_v19 = vadd.f32 %v718_v17, %v670_v16  ;;  %v966_v44 = vmul.f32 %v846_v15, %v846_v15  ;;  %v944_v46 = vadd.f32 %v943_v6, %v846_v15 }
  0xf6   :  { %v767_v20 = vpop.f32.mrf.mxu3  ;;  %v671_v21 = vpop.f32.mrf.mxu1 }
  0xf7   :  { %v768_v23 = vadd.f32 %v767_v20, %v719_v19  ;;  %v672_v31 = vadd.f32 %v671_v21, %v623_v28  ;;  %v981_v53 = vadd.f32 %v980_v11, %v966_v44 }
  0xf8   :  { %v818_v25 = vpop.f32.mrf.mxu0 }
  0xf9   :  { %v817_v29 = vadd.f32 %v816_v13, %v768_v23 }
  0xfb   :  { %v847_v30 = vmax.f32 %v817_v29, 0.0 }
  0xfc   :  { %v720_v43 = vpop.f32.mrf.mxu2 }
  0xfd   :  { %863 = vst [vmem:[%s1930_s3 + $0x30] sm:$0xff] %v847_v30  ;;  %v721_v32 = vadd.f32 %v720_v43, %v672_v31  ;;  %v967_v47 = vmul.f32 %v847_v30, %v847_v30  ;;  %v945_v55 = vadd.f32 %v944_v46, %v847_v30 }
  0xfe   :  { %v769_v33 = vpop.f32.mrf.mxu3  ;;  %v674_v34 = vpop.f32.mrf.mxu1 }
  0xff   :  { %v770_v35 = vadd.f32 %v769_v33, %v721_v32  ;;  %v675_v40 = vadd.f32 %v674_v34, %v1803_v24  ;;  %v982_v59 = vadd.f32 %v981_v53, %v967_v47 }
 0x100   :  { %v821_v36 = vpop.f32.mrf.mxu0 }
 0x101   :  { %v819_v37 = vadd.f32 %v818_v25, %v770_v35 }
 0x103   :  { %v848_v39 = vmax.f32 %v819_v37, 0.0 }
 0x104   :  { %v723_v41 = vpop.f32.mrf.mxu2 }
 0x105   :  { %864 = vst [vmem:[%s1930_s3 + $0x38] sm:$0xff] %v848_v39  ;;  %v724_v22 = vadd.f32 %v723_v41, %v675_v40  ;;  %v968_v57 = vmul.f32 %v848_v39, %v848_v39  ;;  %v946_v60 = vadd.f32 %v945_v55, %v848_v39 }
 0x106   :  { %v772_v51 = vpop.f32.mrf.mxu3  ;;  %v676_v45 = vpop.f32.mrf.mxu1 }
 0x107   :  { %v773_v49 = vadd.f32 %v772_v51, %v724_v22  ;;  %v677_v61 = vadd.f32 %v676_v45, %v1835_v38  ;;  %v983_v63 = vadd.f32 %v982_v59, %v968_v57 }
 0x108   :  { %v823_v52 = vpop.f32.mrf.mxu0 }
 0x109   :  { %v822_v58 = vadd.f32 %v821_v36, %v773_v49 }
 0x10b   :  { %v849_v24 = vmax.f32 %v822_v58, 0.0 }
 0x10c   :  { %v725_v62 = vpop.f32.mrf.mxu2 }
 0x10d   :  { %865 = vst [vmem:[%s1930_s3 + $0x40] sm:$0xff] %v849_v24  ;;  %v947_v0 = vadd.f32 %v946_v60, %v849_v24  ;;  %v969_v1 = vmul.f32 %v849_v24, %v849_v24  ;;  %v726_v2 = vadd.f32 %v725_v62, %v677_v61 }
 0x10e   :  { %v774_v18 = vpop.f32.mrf.mxu3  ;;  %v679_v3 = vpop.f32.mrf.mxu1 }
 0x10f   :  { %v984_v4 = vadd.f32 %v983_v63, %v969_v1  ;;  %v775_v5 = vadd.f32 %v774_v18, %v726_v2  ;;  %v680_v9 = vadd.f32 %v679_v3, %v1843_v48 }
 0x110   :  { %v826_v6 = vpop.f32.mrf.mxu0 }
 0x111   :  { %v824_v7 = vadd.f32 %v823_v52, %v775_v5 }
 0x113   :  { %v850_v8 = vmax.f32 %v824_v7, 0.0 }
 0x114   :  { %v728_v10 = vpop.f32.mrf.mxu2 }
 0x115   :  { %866 = vst [vmem:[%s1930_s3 + $0x48] sm:$0xff] %v850_v8  ;;  %v948_v38 = vadd.f32 %v947_v0, %v850_v8  ;;  %v970_v11 = vmul.f32 %v850_v8, %v850_v8  ;;  %v729_v12 = vadd.f32 %v728_v10, %v680_v9 }
 0x116   :  { %v777_v13 = vpop.f32.mrf.mxu3  ;;  %v681_v14 = vpop.f32.mrf.mxu1 }
 0x117   :  { %v985_v27 = vadd.f32 %v984_v4, %v970_v11  ;;  %v778_v15 = vadd.f32 %v777_v13, %v729_v12  ;;  %v682_v20 = vadd.f32 %v681_v14, %v1851_v54 }
 0x118   :  { %v828_v16 = vpop.f32.mrf.mxu0 }
 0x119   :  { %v827_v17 = vadd.f32 %v826_v6, %v778_v15 }
 0x11b   :  { %v851_v19 = vmax.f32 %v827_v17, 0.0 }
 0x11c   :  { %v730_v21 = vpop.f32.mrf.mxu2 }
 0x11d   :  { %867 = vst [vmem:[%s1930_s3 + $0x50] sm:$0xff] %v851_v19  ;;  %v949_v48 = vadd.f32 %v948_v38, %v851_v19  ;;  %v971_v23 = vmul.f32 %v851_v19, %v851_v19  ;;  %v731_v25 = vadd.f32 %v730_v21, %v682_v20 }
 0x11e   :  { %v779_v28 = vpop.f32.mrf.mxu3  ;;  %v684_v29 = vpop.f32.mrf.mxu1 }
 0x11f   :  { %v986_v30 = vadd.f32 %v985_v27, %v971_v23  ;;  %v780_v31 = vadd.f32 %v779_v28, %v731_v25  ;;  %v685_v34 = vadd.f32 %v684_v29, %v1806_v26 }
 0x120   :  { %v831_v32 = vpop.f32.mrf.mxu0 }
 0x121   :  { %v829_v43 = vadd.f32 %v828_v16, %v780_v31 }
 0x123   :  { %v852_v33 = vmax.f32 %v829_v43, 0.0 }
 0x124   :  { %v733_v35 = vpop.f32.mrf.mxu2 }
 0x125   :  { %868 = vst [vmem:[%s1930_s3 + $0x58] sm:$0xff] %v852_v33  ;;  %v950_v54 = vadd.f32 %v949_v48, %v852_v33  ;;  %v972_v36 = vmul.f32 %v852_v33, %v852_v33  ;;  %v734_v37 = vadd.f32 %v733_v35, %v685_v34 }
 0x126   :  { %v782_v39 = vpop.f32.mrf.mxu3  ;;  %v686_v40 = vpop.f32.mrf.mxu1 }
 0x127   :  { %v987_v41 = vadd.f32 %v986_v30, %v972_v36  ;;  %v783_v44 = vadd.f32 %v782_v39, %v734_v37  ;;  %v687_v45 = vadd.f32 %v686_v40, %v1838_v42 }
 0x128   :  { %v833_v46 = vpop.f32.mrf.mxu0 }
 0x129   :  { %v832_v22 = vadd.f32 %v831_v32, %v783_v44 }
 0x12b   :  { %v853_v51 = vmax.f32 %v832_v22, 0.0 }
 0x12c   :  { %v735_v47 = vpop.f32.mrf.mxu2 }
 0x12d   :  { %869 = vst [vmem:[%s1930_s3 + $0x60] sm:$0xff] %v853_v51  ;;  %v951_v26 = vadd.f32 %v950_v54, %v853_v51  ;;  %v973_v49 = vmul.f32 %v853_v51, %v853_v51  ;;  %v736_v52 = vadd.f32 %v735_v47, %v687_v45 }
 0x12e   :  { %v784_v53 = vpop.f32.mrf.mxu3  ;;  %v689_v55 = vpop.f32.mrf.mxu1 }
 0x12f   :  { %v988_v57 = vadd.f32 %v987_v41, %v973_v49  ;;  %v785_v58 = vadd.f32 %v784_v53, %v736_v52  ;;  %v690_v24 = vadd.f32 %v689_v55, %v1846_v50 }
 0x130   :  { %v836_v1 = vpop.f32.mrf.mxu0 }
 0x131   :  { %v834_v59 = vadd.f32 %v833_v46, %v785_v58 }
 0x133   :  { %v854_v60 = vmax.f32 %v834_v59, 0.0 }
 0x134   :  { %v738_v61 = vpop.f32.mrf.mxu2 }
 0x135   :  { %870 = vst [vmem:[%s1930_s3 + $0x68] sm:$0xff] %v854_v60  ;;  %v952_v42 = vadd.f32 %v951_v26, %v854_v60  ;;  %v974_v62 = vmul.f32 %v854_v60, %v854_v60  ;;  %v739_v63 = vadd.f32 %v738_v61, %v690_v24 }
 0x136   :  { %v787_v0 = vpop.f32.mrf.mxu3  ;;  %v691_v3 = vpop.f32.mrf.mxu1 }
 0x137   :  { %v989_v2 = vadd.f32 %v988_v57, %v974_v62  ;;  %v788_v18 = vadd.f32 %v787_v0, %v739_v63  ;;  %v692_v6 = vadd.f32 %v691_v3, %v1854_v56 }
 0x138   :  { %v838_v12 = vpop.f32.mrf.mxu0 }
 0x139   :  { %v837_v4 = vadd.f32 %v836_v1, %v788_v18 }
 0x13b   :  { %v855_v5 = vmax.f32 %v837_v4, 0.0 }
 0x13c   :  { %v740_v7 = vpop.f32.mrf.mxu2 }
 0x13d   :  { %871 = vst [vmem:[%s1930_s3 + $0x70] sm:$0xff] %v855_v5  ;;  %v953_v50 = vadd.f32 %v952_v42, %v855_v5  ;;  %v975_v8 = vmul.f32 %v855_v5, %v855_v5  ;;  %v741_v9 = vadd.f32 %v740_v7, %v692_v6 }
 0x13e   :  { %v789_v10 = vpop.f32.mrf.mxu3 }
 0x13f   :  { %v990_v38 = vadd.f32 %v989_v2, %v975_v8  ;;  %v790_v11 = vadd.f32 %v789_v10, %v741_v9 }
 0x141   :  { %v839_v13 = vadd.f32 %v838_v12, %v790_v11 }
 0x143   :  { %v856_v14 = vmax.f32 %v839_v13, 0.0 }
 0x145   :  { %872 = vst [vmem:[%s1930_s3 + $0x78] sm:$0xff] %v856_v14  ;;  %v954_v27 = vadd.f32 %v953_v50, %v856_v14  ;;  %v976_v56 = vmul.f32 %v856_v14, %v856_v14 }
 0x147   :  { %v955_v15 = vrot.slane %v954_v27, 4  ;;  %v991_v16 = vadd.f32 %v990_v38, %v976_v56 }
 0x149   :  { %v956_v17 = vadd.f32 %v955_v15, %v954_v27  ;;  %v992_v19 = vrot.slane %v991_v16, 4 }
 0x14b   :  { %v957_v20 = vrot.slane %v956_v17, 2  ;;  %v993_v21 = vadd.f32 %v992_v19, %v991_v16 }
 0x14d   :  { %v958_v48 = vadd.f32 %v957_v20, %v956_v17  ;;  %v994_v23 = vrot.slane %v993_v21, 2 }
 0x14f   :  { %v959_v25 = vrot.slane %v958_v48, 1  ;;  %v995_v28 = vadd.f32 %v994_v23, %v993_v21 }
 0x151   :  { %v996_v29 = vrot.slane %v995_v28, 1  ;;  %v960_v30 = vadd.f32 %v959_v25, %v958_v48 }
 0x153   :  { %v997_v31 = vadd.f32 %v996_v29, %v995_v28 }
 0x155   :  { %v999_v43 = vsel %vm998_vm0, %v960_v30, %v997_v31 }
 0x156   :  { %1000 = vst [vmem:[%s1931_s4] sm:$0x3] %v999_v43 }

// kernel: completion_forward.40
= control target key start
LH: loop header
LB: loop body
LE: loop exit
PB: predicated region body
PF: predicated region fallthrough
CT: control target
= control target key end

     0   :  { %s103_s0 = inlined_call_operand.vmem [shape: f32[32,128], index: 0, kind: input, shape index: {}]   ;;  %s104_s1 = inlined_call_operand.vmem [shape: f32[1,128], index: 1, kind: input, shape index: {}]   ;;  %s105_s2 = inlined_call_operand.vmem [shape: f32[1,128], index: 2, kind: input, shape index: {}]   ;;  %s106_s3 = inlined_call_operand.vmem [shape: bf16[32,128], index: 3, kind: output, shape index: {}]  }
   0x1   :  { %v14_v0 = vld [vmem:[%s103_s0] sm:$0xff]  ;;  %v15_v1 = vld [vmem:[%s103_s0 + $0x8] sm:$0xff]  ;;  %v16_v4 = vld [vmem:[%s103_s0 + $0x10] sm:$0xff] }
   0x2   :  { %v57_v2 = vld [vmem:[%s104_s1] ss:$0 sm:$0xff]  ;;  %v17_v5 = vld [vmem:[%s103_s0 + $0x18] sm:$0xff] }
   0x3   :  { %v58_v3 = vld [vmem:[%s105_s2] ss:$0 sm:$0xff]  ;;  %v22_v6 = vmul.f32 %v57_v2, %v14_v0  ;;  %v23_v7 = vmul.f32 %v57_v2, %v15_v1  ;;  %v24_v8 = vmul.f32 %v57_v2, %v16_v4  ;;  %v25_v9 = vmul.f32 %v57_v2, %v17_v5 }
   0x5   :  { %v30_v10 = vadd.f32 %v58_v3, %v22_v6  ;;  %v31_v11 = vadd.f32 %v58_v3, %v23_v7  ;;  %v32_v12 = vadd.f32 %v58_v3, %v24_v8  ;;  %v33_v13 = vadd.f32 %v58_v3, %v25_v9 }
   0x7   :  { %v49_v14 = vpack.c.bf16 %v31_v11, %v30_v10  ;;  %v54_v15 = vpack.c.bf16 %v33_v13, %v32_v12 }
   0x9   :  { %50 = vst [vmem:[%s106_s3] sm:$0xff] %v49_v14  }
   0xa   :  { %56 = vst [vmem:[%s106_s3 + $0x8] sm:$0xff] %v54_v15  }

// kernel: completion_forward.39
= control target key start
LH: loop header
LB: loop body
LE: loop exit
PB: predicated region body
PF: predicated region fallthrough
CT: control target
= control target key end

     0   :  { %vm548_vm0 = vcmask 1040384   ;;  %s1041_s1 = inlined_call_operand.vmem [shape: bf16[640,128], index: 1, kind: input, shape index: {}]   ;;  %s1042_s2 = inlined_call_operand.vmem [shape: f32[1,128], index: 2, kind: input, shape index: {}]   ;;  %s1043_s0 = inlined_call_operand.vmem [shape: bf16[32,640], index: 0, kind: input, shape index: {}]   ;;  %s1044_s3 = inlined_call_operand.vmem [shape: f32[32,128], index: 3, kind: output, shape index: {0}]   ;;  %s1045_s4 = inlined_call_operand.vmem [shape: f32[1,2,128], index: 4, kind: output, shape index: {1}]  }
   0x1   :  { %v776_v0 = vld [vmem:[%s1041_s1 + $0x38] sm:$0xff]  ;;  %v775_v4 = vld [vmem:[%s1041_s1 + $0x30] sm:$0xff]  ;;  %v774_v8 = vld [vmem:[%s1041_s1 + $0x28] sm:$0xff] }
   0x2   :  { %v784_v1 = vld [vmem:[%s1041_s1 + $0x78] sm:$0xff]  ;;  %404 = vmatpush.bf16.msra.mxu0 %v776_v0  ;;  %v783_v5 = vld [vmem:[%s1041_s1 + $0x70] sm:$0xff]  ;;  %v782_v9 = vld [vmem:[%s1041_s1 + $0x68] sm:$0xff] }
   0x3   :  { %v792_v2 = vld [vmem:[%s1041_s1 + $0xb8] sm:$0xff]  ;;  %423 = vmatpush.bf16.msra.mxu1 %v784_v1  ;;  %v791_v6 = vld [vmem:[%s1041_s1 + $0xb0] sm:$0xff]  ;;  %v790_v10 = vld [vmem:[%s1041_s1 + $0xa8] sm:$0xff] }
   0x4   :  { %v800_v3 = vld [vmem:[%s1041_s1 + $0xf8] sm:$0xff]  ;;  %442 = vmatpush.bf16.msra.mxu2 %v792_v2  ;;  %v799_v7 = vld [vmem:[%s1041_s1 + $0xf0] sm:$0xff]  ;;  %v798_v11 = vld [vmem:[%s1041_s1 + $0xe8] sm:$0xff] }
   0x5   :  { %461 = vmatpush.bf16.msra.mxu3 %v800_v3  ;;  %v773_v12 = vld [vmem:[%s1041_s1 + $0x20] sm:$0xff]  ;;  %v772_v16 = vld [vmem:[%s1041_s1 + $0x18] sm:$0xff]  ;;  %v771_v20 = vld [vmem:[%s1041_s1 + $0x10] sm:$0xff] }
   0x6   :  { %405 = vmatpush.bf16.msra.mxu0 %v775_v4  ;;  %v781_v13 = vld [vmem:[%s1041_s1 + $0x60] sm:$0xff]  ;;  %v780_v17 = vld [vmem:[%s1041_s1 + $0x58] sm:$0xff]  ;;  %v779_v21 = vld [vmem:[%s1041_s1 + $0x50] sm:$0xff] }
   0x7   :  { %424 = vmatpush.bf16.msra.mxu1 %v783_v5  ;;  %v789_v14 = vld [vmem:[%s1041_s1 + $0xa0] sm:$0xff]  ;;  %v788_v18 = vld [vmem:[%s1041_s1 + $0x98] sm:$0xff]  ;;  %v787_v22 = vld [vmem:[%s1041_s1 + $0x90] sm:$0xff] }
   0x8   :  { %443 = vmatpush.bf16.msra.mxu2 %v791_v6  ;;  %v797_v15 = vld [vmem:[%s1041_s1 + $0xe0] sm:$0xff]  ;;  %v796_v19 = vld [vmem:[%s1041_s1 + $0xd8] sm:$0xff]  ;;  %v795_v23 = vld [vmem:[%s1041_s1 + $0xd0] sm:$0xff] }
   0x9   :  { %462 = vmatpush.bf16.msra.mxu3 %v799_v7  ;;  %v770_v24 = vld [vmem:[%s1041_s1 + $0x8] sm:$0xff]  ;;  %v769_v28 = vld [vmem:[%s1041_s1] sm:$0xff]  ;;  %v761_v33 = vld [vmem:[%s1043_s0 + $0x10] sm:$0xf0] }
   0xa   :  { %406 = vmatpush.bf16.msra.mxu0 %v774_v8  ;;  %v778_v25 = vld [vmem:[%s1041_s1 + $0x48] sm:$0xff]  ;;  %v777_v29 = vld [vmem:[%s1041_s1 + $0x40] sm:$0xff]  ;;  %v563_v35 = vld [vmem:[%s1043_s0 + $0x14] sm:$0xf0] }
   0xb   :  { %425 = vmatpush.bf16.msra.mxu1 %v782_v9  ;;  %v786_v26 = vld [vmem:[%s1041_s1 + $0x88] sm:$0xff]  ;;  %v785_v30 = vld [vmem:[%s1041_s1 + $0x80] sm:$0xff]  ;;  %v762_v37 = vld [vmem:[%s1043_s0 + $0x18] sm:$0xf0] }
   0xc   :  { %444 = vmatpush.bf16.msra.mxu2 %v790_v10  ;;  %v794_v27 = vld [vmem:[%s1041_s1 + $0xc8] sm:$0xff]  ;;  %v793_v31 = vld [vmem:[%s1041_s1 + $0xc0] sm:$0xff]  ;;  %v808_v40 = vld [vmem:[%s1041_s1 + $0x138] sm:$0xff] }
   0xd   :  { %463 = vmatpush.bf16.msra.mxu3 %v798_v11  ;;  %v561_v32 = vld [vmem:[%s1043_s0] sm:$0xf]  ;;  %v759_v34 = vld [vmem:[%s1043_s0 + $0x4] sm:$0xf]  ;;  %v569_v36 = vld [vmem:[%s1043_s0 + $0x8] sm:$0xf] }
   0xe   :  { %407 = vmatpush.bf16.msra.mxu0 %v773_v12  ;;  %v760_v38 = vld [vmem:[%s1043_s0 + $0xc] sm:$0xf]  ;;  %v571_v39 = vld [vmem:[%s1043_s0 + $0x1c] sm:$0xf0]  ;;  %v562_v41 = vor.u32 %v761_v33, %v561_v32  ;;  %v566_v42 = vor.u32 %v759_v34, %v563_v35  ;;  %v570_v43 = vor.u32 %v762_v37, %v569_v36  ;;  %v807_v45 = vld [vmem:[%s1041_s1 + $0x130] sm:$0xff] }
   0xf   :  { %426 = vmatpush.bf16.msra.mxu1 %v781_v13  ;;  %v574_v44 = vor.u32 %v760_v38, %v571_v39  ;;  %v806_v46 = vld [vmem:[%s1041_s1 + $0x128] sm:$0xff]  ;;  %v805_v47 = vld [vmem:[%s1041_s1 + $0x120] sm:$0xff]  ;;  %v766_v49 = vld [vmem:[%s1043_s0 + $0x38] sm:$0xf0] }
  0x10   :  { %445 = vmatpush.bf16.msra.mxu2 %v789_v14  ;;  %v581_v48 = vld [vmem:[%s1043_s0 + $0x28] sm:$0xf]  ;;  %v764_v50 = vld [vmem:[%s1043_s0 + $0x2c] sm:$0xf]  ;;  %v583_v51 = vld [vmem:[%s1043_s0 + $0x3c] sm:$0xf0] }
  0x11   :  { %464 = vmatpush.bf16.msra.mxu3 %v797_v15  ;;  %v589_v52 = vld [vmem:[%s1043_s0 + $0x30] sm:$0xf]  ;;  %v767_v53 = vld [vmem:[%s1043_s0 + $0x40] sm:$0xf0]  ;;  %v765_v54 = vld [vmem:[%s1043_s0 + $0x34] sm:$0xf]  ;;  %v582_v57 = vor.u32 %v766_v49, %v581_v48  ;;  %v586_v58 = vor.u32 %v764_v50, %v583_v51 }
  0x12   :  { %408 = vmatpush.bf16.msra.mxu0 %v772_v16  ;;  %v591_v55 = vld [vmem:[%s1043_s0 + $0x44] sm:$0xf0]  ;;  %v804_v56 = vld [vmem:[%s1041_s1 + $0x118] sm:$0xff]  ;;  %v590_v59 = vor.u32 %v767_v53, %v589_v52  ;;  %v803_v61 = vld [vmem:[%s1041_s1 + $0x110] sm:$0xff] }
  0x13   :  { %427 = vmatpush.bf16.msra.mxu1 %v780_v17  ;;  %v594_v60 = vor.u32 %v765_v54, %v591_v55  ;;  %v802_v62 = vld [vmem:[%s1041_s1 + $0x108] sm:$0xff]  ;;  %v801_v63 = vld [vmem:[%s1041_s1 + $0x100] sm:$0xff]  ;;  %v577_v0 = vld [vmem:[%s1043_s0 + $0x10] sm:$0xf] }
  0x14   :  { %446 = vmatpush.bf16.msra.mxu2 %v788_v18  ;;  %v763_v1 = vld [vmem:[%s1043_s0 + $0x20] sm:$0xf0]  ;;  %v597_v2 = vld [vmem:[%s1043_s0 + $0x38] sm:$0xf]  ;;  %v768_v3 = vld [vmem:[%s1043_s0 + $0x48] sm:$0xf0] }
  0x15   :  { %465 = vmatpush.bf16.msra.mxu3 %v796_v19  ;;  %v578_v4 = vor.u32 %v763_v1, %v577_v0  ;;  %v598_v5 = vor.u32 %v768_v3, %v597_v2  ;;  %v817_v16 = vld [vmem:[%s1042_s2] ss:$0 sm:$0xff] }
  0x16   :  { %409 = vmatpush.bf16.msra.mxu0 %v771_v20 }
  0x17   :  { %428 = vmatpush.bf16.msra.mxu1 %v779_v21 }
  0x18   :  { %447 = vmatpush.bf16.msra.mxu2 %v787_v22 }
  0x19   :  { %466 = vmatpush.bf16.msra.mxu3 %v795_v23 }
  0x1a   :  { %410 = vmatpush.bf16.msra.mxu0 %v770_v24 }
  0x1b   :  { %429 = vmatpush.bf16.msra.mxu1 %v778_v25 }
  0x1c   :  { %448 = vmatpush.bf16.msra.mxu2 %v786_v26 }
  0x1d   :  { %467 = vmatpush.bf16.msra.mxu3 %v794_v27 }
  0x1e   :  { %411 = vmatpush.bf16.msra.mxu0 %v769_v28 }
  0x1f   :  { %430 = vmatpush.bf16.msra.mxu1 %v777_v29 }
  0x20   :  { %449 = vmatpush.bf16.msra.mxu2 %v785_v30 }
  0x21   :  { %468 = vmatpush.bf16.msra.mxu3 %v793_v31  ;;  %412 = vmatmul.bf16.vlgmr.msra.gmra.mxu0 %v562_v41 }
  0x22   :  { %480 = vmatpush.bf16.msrb.mxu0 %v808_v40  ;;  %431 = vmatmul.bf16.vlgmr.msra.gmra.mxu1 %v566_v42 }
  0x23   :  { %809 = vmatpush.bf16.msrb.mxu1 %v808_v40  ;;  %450 = vmatmul.bf16.vlgmr.msra.gmra.mxu2 %v570_v43 }
  0x24   :  { %469 = vmatmul.bf16.vlgmr.msra.gmra.mxu3 %v574_v44 }
  0x26   :  { %481 = vmatpush.bf16.msrb.mxu0 %v807_v45 }
  0x27   :  { %810 = vmatpush.bf16.msrb.mxu1 %v807_v45 }
  0x2a   :  { %482 = vmatpush.bf16.msrb.mxu0 %v806_v46 }
  0x2b   :  { %811 = vmatpush.bf16.msrb.mxu1 %v806_v46 }
  0x2e   :  { %483 = vmatpush.bf16.msrb.mxu0 %v805_v47 }
  0x2f   :  { %812 = vmatpush.bf16.msrb.mxu1 %v805_v47 }
  0x31   :  { %417 = vmatmul.bf16.gmra.mxu0 %v582_v57 }
  0x32   :  { %484 = vmatpush.bf16.msrb.mxu0 %v804_v56  ;;  %436 = vmatmul.bf16.gmra.mxu1 %v586_v58 }
  0x33   :  { %813 = vmatpush.bf16.msrb.mxu1 %v804_v56  ;;  %455 = vmatmul.bf16.gmra.mxu2 %v590_v59 }
  0x34   :  { %474 = vmatmul.bf16.gmra.mxu3 %v594_v60 }
  0x36   :  { %485 = vmatpush.bf16.msrb.mxu0 %v803_v61 }
  0x37   :  { %814 = vmatpush.bf16.msrb.mxu1 %v803_v61 }
  0x3a   :  { %486 = vmatpush.bf16.msrb.mxu0 %v802_v62 }
  0x3b   :  { %815 = vmatpush.bf16.msrb.mxu1 %v802_v62 }
  0x3e   :  { %487 = vmatpush.bf16.msrb.mxu0 %v801_v63 }
  0x3f   :  { %816 = vmatpush.bf16.msrb.mxu1 %v801_v63 }
  0x41   :  { %488 = vmatmul.bf16.vlgmr.msrb.gmra.mxu0 %v578_v4 }
  0x42   :  { %493 = vmatmul.bf16.vlgmr.msrb.gmra.mxu1 %v598_v5 }
  0x9e   :  { %v413_v6 = vpop.f32.mrf.mxu0 }
  0x9f   :  { %v432_v7 = vpop.f32.mrf.mxu1  ;;  %v414_v17 = vadd.f32 %v817_v16, %v413_v6 }
  0xa1   :  { %v433_v22 = vadd.f32 %v432_v7, %v414_v17 }
  0xa6   :  { %v451_v8 = vpop.f32.mrf.mxu2  ;;  %v415_v10 = vpop.f32.mrf.mxu0 }
  0xa7   :  { %v470_v9 = vpop.f32.mrf.mxu3  ;;  %v434_v11 = vpop.f32.mrf.mxu1  ;;  %v452_v25 = vadd.f32 %v451_v8, %v433_v22  ;;  %v416_v27 = vadd.f32 %v817_v16, %v415_v10 }
  0xa9   :  { %v471_v29 = vadd.f32 %v470_v9, %v452_v25  ;;  %v435_v34 = vadd.f32 %v434_v11, %v416_v27 }
  0xae   :  { %v453_v12 = vpop.f32.mrf.mxu2  ;;  %v418_v14 = vpop.f32.mrf.mxu0 }
  0xaf   :  { %v472_v13 = vpop.f32.mrf.mxu3  ;;  %v437_v15 = vpop.f32.mrf.mxu1  ;;  %v419_v18 = vadd.f32 %v817_v16, %v418_v14  ;;  %v454_v38 = vadd.f32 %v453_v12, %v435_v34 }
  0xb1   :  { %v438_v23 = vadd.f32 %v437_v15, %v419_v18  ;;  %v473_v43 = vadd.f32 %v472_v13, %v454_v38 }
  0xb6   :  { %v456_v19 = vpop.f32.mrf.mxu2  ;;  %v420_v20 = vpop.f32.mrf.mxu0 }
  0xb7   :  { %v439_v21 = vpop.f32.mrf.mxu1  ;;  %v475_v24 = vpop.f32.mrf.mxu3  ;;  %v457_v26 = vadd.f32 %v456_v19, %v438_v23  ;;  %v421_v28 = vadd.f32 %v817_v16, %v420_v20 }
  0xb9   :  { %v476_v30 = vadd.f32 %v475_v24, %v457_v26  ;;  %v440_v35 = vadd.f32 %v439_v21, %v421_v28 }
  0xbe   :  { %v458_v31 = vpop.f32.mrf.mxu2  ;;  %v489_v32 = vpop.f32.mrf.mxu0 }
  0xbf   :  { %v494_v33 = vpop.f32.mrf.mxu1  ;;  %v490_v36 = vadd.f32 %v489_v32, %v471_v29  ;;  %v459_v39 = vadd.f32 %v458_v31, %v440_v35  ;;  %v477_v42 = vpop.f32.mrf.mxu3 }
  0xc0   :  { %v495_v37 = vadd.f32 %v494_v33, %v476_v30 }
  0xc1   :  { %v499_v40 = vmax.f32 %v490_v36, 0.0  ;;  %v478_v44 = vadd.f32 %v477_v42, %v459_v39 }
  0xc2   :  { %v501_v41 = vmax.f32 %v495_v37, 0.0 }
  0xc3   :  { %503 = vst [vmem:[%s1044_s3] sm:$0xff] %v499_v40  ;;  %v535_v51 = vmul.f32 %v499_v40, %v499_v40 }
  0xc4   :  { %505 = vst [vmem:[%s1044_s3 + $0x10] sm:$0xff] %v501_v41  ;;  %v537_v54 = vmul.f32 %v501_v41, %v501_v41 }
  0xc6   :  { %v491_v45 = vpop.f32.mrf.mxu0 }
  0xc7   :  { %v496_v46 = vpop.f32.mrf.mxu1  ;;  %v492_v47 = vadd.f32 %v491_v45, %v473_v43 }
  0xc8   :  { %v497_v48 = vadd.f32 %v496_v46, %v478_v44 }
  0xc9   :  { %v500_v49 = vmax.f32 %v492_v47, 0.0 }
  0xca   :  { %v502_v50 = vmax.f32 %v497_v48, 0.0 }
  0xcb   :  { %504 = vst [vmem:[%s1044_s3 + $0x8] sm:$0xff] %v500_v49  ;;  %v526_v52 = vadd.f32 %v500_v49, %v499_v40  ;;  %v536_v53 = vmul.f32 %v500_v49, %v500_v49 }
  0xcc   :  { %506 = vst [vmem:[%s1044_s3 + $0x18] sm:$0xff] %v502_v50  ;;  %v538_v58 = vmul.f32 %v502_v50, %v502_v50 }
  0xcd   :  { %v539_v55 = vadd.f32 %v536_v53, %v535_v51  ;;  %v527_v56 = vadd.f32 %v526_v52, %v501_v41 }
  0xcf   :  { %v528_v57 = vadd.f32 %v527_v56, %v502_v50  ;;  %v540_v59 = vadd.f32 %v539_v55, %v537_v54 }
  0xd1   :  { %v529_v60 = vrot.slane %v528_v57, 4  ;;  %v541_v61 = vadd.f32 %v540_v59, %v538_v58 }
  0xd3   :  { %v530_v62 = vadd.f32 %v529_v60, %v528_v57  ;;  %v542_v63 = vrot.slane %v541_v61, 4 }
  0xd5   :  { %v531_v0 = vrot.slane %v530_v62, 2  ;;  %v543_v1 = vadd.f32 %v542_v63, %v541_v61 }
  0xd7   :  { %v532_v2 = vadd.f32 %v531_v0, %v530_v62  ;;  %v544_v3 = vrot.slane %v543_v1, 2 }
  0xd9   :  { %v533_v4 = vrot.slane %v532_v2, 1  ;;  %v545_v5 = vadd.f32 %v544_v3, %v543_v1 }
  0xdb   :  { %v546_v6 = vrot.slane %v545_v5, 1  ;;  %v534_v7 = vadd.f32 %v533_v4, %v532_v2 }
  0xdd   :  { %v547_v8 = vadd.f32 %v546_v6, %v545_v5 }
  0xdf   :  { %v549_v9 = vsel %vm548_vm0, %v534_v7, %v547_v8 }
  0xe0   :  { %550 = vst [vmem:[%s1045_s4] sm:$0x3] %v549_v9 }

// kernel: completion_forward.41
= control target key start
LH: loop header
LB: loop body
LE: loop exit
PB: predicated region body
PF: predicated region fallthrough
CT: control target
= control target key end

     0   :  { %vm928_vm0 = vcmask 1040384   ;;  %s1765_s1 = inlined_call_operand.vmem [shape: bf16[1152,128], index: 1, kind: input, shape index: {}]   ;;  %s1766_s0 = inlined_call_operand.vmem [shape: bf16[32,1152], index: 0, kind: input, shape index: {}]   ;;  %s1767_s2 = inlined_call_operand.vmem [shape: f32[1,128], index: 2, kind: input, shape index: {}]   ;;  %s1768_s3 = inlined_call_operand.vmem [shape: f32[32,128], index: 3, kind: output, shape index: {0}]   ;;  %s1769_s4 = inlined_call_operand.vmem [shape: f32[1,2,128], index: 4, kind: output, shape index: {1}]  }
   0x1   :  { %v1324_v0 = vld [vmem:[%s1765_s1 + $0x38] sm:$0xff]  ;;  %v1323_v4 = vld [vmem:[%s1765_s1 + $0x30] sm:$0xff]  ;;  %v1322_v8 = vld [vmem:[%s1765_s1 + $0x28] sm:$0xff] }
   0x2   :  { %v1332_v1 = vld [vmem:[%s1765_s1 + $0x78] sm:$0xff]  ;;  %708 = vmatpush.bf16.msra.mxu0 %v1324_v0  ;;  %v1331_v5 = vld [vmem:[%s1765_s1 + $0x70] sm:$0xff]  ;;  %v1330_v9 = vld [vmem:[%s1765_s1 + $0x68] sm:$0xff] }
   0x3   :  { %v1340_v2 = vld [vmem:[%s1765_s1 + $0xb8] sm:$0xff]  ;;  %727 = vmatpush.bf16.msra.mxu1 %v1332_v1  ;;  %v1339_v6 = vld [vmem:[%s1765_s1 + $0xb0] sm:$0xff]  ;;  %v1338_v10 = vld [vmem:[%s1765_s1 + $0xa8] sm:$0xff] }
   0x4   :  { %v1348_v3 = vld [vmem:[%s1765_s1 + $0xf8] sm:$0xff]  ;;  %746 = vmatpush.bf16.msra.mxu2 %v1340_v2  ;;  %v1347_v7 = vld [vmem:[%s1765_s1 + $0xf0] sm:$0xff]  ;;  %v1346_v11 = vld [vmem:[%s1765_s1 + $0xe8] sm:$0xff] }
   0x5   :  { %765 = vmatpush.bf16.msra.mxu3 %v1348_v3  ;;  %v1321_v12 = vld [vmem:[%s1765_s1 + $0x20] sm:$0xff]  ;;  %v1320_v16 = vld [vmem:[%s1765_s1 + $0x18] sm:$0xff]  ;;  %v1319_v20 = vld [vmem:[%s1765_s1 + $0x10] sm:$0xff] }
   0x6   :  { %709 = vmatpush.bf16.msra.mxu0 %v1323_v4  ;;  %v1329_v13 = vld [vmem:[%s1765_s1 + $0x60] sm:$0xff]  ;;  %v1328_v17 = vld [vmem:[%s1765_s1 + $0x58] sm:$0xff]  ;;  %v1327_v21 = vld [vmem:[%s1765_s1 + $0x50] sm:$0xff] }
   0x7   :  { %728 = vmatpush.bf16.msra.mxu1 %v1331_v5  ;;  %v1337_v14 = vld [vmem:[%s1765_s1 + $0xa0] sm:$0xff]  ;;  %v1336_v18 = vld [vmem:[%s1765_s1 + $0x98] sm:$0xff]  ;;  %v1335_v22 = vld [vmem:[%s1765_s1 + $0x90] sm:$0xff] }
   0x8   :  { %747 = vmatpush.bf16.msra.mxu2 %v1339_v6  ;;  %v1345_v15 = vld [vmem:[%s1765_s1 + $0xe0] sm:$0xff]  ;;  %v1344_v19 = vld [vmem:[%s1765_s1 + $0xd8] sm:$0xff]  ;;  %v1343_v23 = vld [vmem:[%s1765_s1 + $0xd0] sm:$0xff] }
   0x9   :  { %766 = vmatpush.bf16.msra.mxu3 %v1347_v7  ;;  %v1318_v24 = vld [vmem:[%s1765_s1 + $0x8] sm:$0xff]  ;;  %v1317_v28 = vld [vmem:[%s1765_s1] sm:$0xff]  ;;  %v951_v39 = vld [vmem:[%s1766_s0 + $0x2c] sm:$0xf0] }
   0xa   :  { %710 = vmatpush.bf16.msra.mxu0 %v1322_v8  ;;  %v1326_v25 = vld [vmem:[%s1765_s1 + $0x48] sm:$0xff]  ;;  %v1325_v29 = vld [vmem:[%s1765_s1 + $0x40] sm:$0xff]  ;;  %v1356_v40 = vld [vmem:[%s1765_s1 + $0x138] sm:$0xff] }
   0xb   :  { %729 = vmatpush.bf16.msra.mxu1 %v1330_v9  ;;  %v1334_v26 = vld [vmem:[%s1765_s1 + $0x88] sm:$0xff]  ;;  %v1333_v30 = vld [vmem:[%s1765_s1 + $0x80] sm:$0xff]  ;;  %v1364_v41 = vld [vmem:[%s1765_s1 + $0x178] sm:$0xff] }
   0xc   :  { %748 = vmatpush.bf16.msra.mxu2 %v1338_v10  ;;  %v1342_v27 = vld [vmem:[%s1765_s1 + $0xc8] sm:$0xff]  ;;  %v1341_v31 = vld [vmem:[%s1765_s1 + $0xc0] sm:$0xff]  ;;  %v1372_v46 = vld [vmem:[%s1765_s1 + $0x1b8] sm:$0xff] }
   0xd   :  { %767 = vmatpush.bf16.msra.mxu3 %v1346_v11  ;;  %v941_v32 = vld [vmem:[%s1766_s0] sm:$0xf]  ;;  %v1303_v33 = vld [vmem:[%s1766_s0 + $0x20] sm:$0xf0]  ;;  %v943_v35 = vld [vmem:[%s1766_s0 + $0x24] sm:$0xf0] }
   0xe   :  { %711 = vmatpush.bf16.msra.mxu0 %v1321_v12  ;;  %v1299_v34 = vld [vmem:[%s1766_s0 + $0x4] sm:$0xf]  ;;  %v949_v36 = vld [vmem:[%s1766_s0 + $0x8] sm:$0xf]  ;;  %v1304_v37 = vld [vmem:[%s1766_s0 + $0x28] sm:$0xf0]  ;;  %v942_v42 = vor.u32 %v1303_v33, %v941_v32 }
   0xf   :  { %730 = vmatpush.bf16.msra.mxu1 %v1329_v13  ;;  %v1300_v38 = vld [vmem:[%s1766_s0 + $0xc] sm:$0xf]  ;;  %v946_v43 = vor.u32 %v1299_v34, %v943_v35  ;;  %v950_v44 = vor.u32 %v1304_v37, %v949_v36  ;;  %v1380_v47 = vld [vmem:[%s1765_s1 + $0x1f8] sm:$0xff]  ;;  %v1355_v48 = vld [vmem:[%s1765_s1 + $0x130] sm:$0xff] }
  0x10   :  { %749 = vmatpush.bf16.msra.mxu2 %v1337_v14  ;;  %v954_v45 = vor.u32 %v1300_v38, %v951_v39  ;;  %v1363_v49 = vld [vmem:[%s1765_s1 + $0x170] sm:$0xff]  ;;  %v1354_v52 = vld [vmem:[%s1765_s1 + $0x128] sm:$0xff]  ;;  %v1353_v56 = vld [vmem:[%s1765_s1 + $0x120] sm:$0xff] }
  0x11   :  { %768 = vmatpush.bf16.msra.mxu3 %v1345_v15  ;;  %v1371_v50 = vld [vmem:[%s1765_s1 + $0x1b0] sm:$0xff]  ;;  %v1362_v53 = vld [vmem:[%s1765_s1 + $0x168] sm:$0xff]  ;;  %v1361_v57 = vld [vmem:[%s1765_s1 + $0x160] sm:$0xff] }
  0x12   :  { %712 = vmatpush.bf16.msra.mxu0 %v1320_v16  ;;  %v1379_v51 = vld [vmem:[%s1765_s1 + $0x1f0] sm:$0xff]  ;;  %v1370_v54 = vld [vmem:[%s1765_s1 + $0x1a8] sm:$0xff]  ;;  %v1369_v58 = vld [vmem:[%s1765_s1 + $0x1a0] sm:$0xff] }
  0x13   :  { %731 = vmatpush.bf16.msra.mxu1 %v1328_v17  ;;  %v1378_v55 = vld [vmem:[%s1765_s1 + $0x1e8] sm:$0xff]  ;;  %v1377_v59 = vld [vmem:[%s1765_s1 + $0x1e0] sm:$0xff]  ;;  %v979_v63 = vld [vmem:[%s1766_s0 + $0x6c] sm:$0xf0] }
  0x14   :  { %750 = vmatpush.bf16.msra.mxu2 %v1336_v18  ;;  %v977_v60 = vld [vmem:[%s1766_s0 + $0x48] sm:$0xf]  ;;  %v1312_v61 = vld [vmem:[%s1766_s0 + $0x68] sm:$0xf0]  ;;  %v985_v0 = vld [vmem:[%s1766_s0 + $0x50] sm:$0xf] }
  0x15   :  { %769 = vmatpush.bf16.msra.mxu3 %v1344_v19  ;;  %v1308_v62 = vld [vmem:[%s1766_s0 + $0x4c] sm:$0xf]  ;;  %v1313_v1 = vld [vmem:[%s1766_s0 + $0x70] sm:$0xf0]  ;;  %v987_v3 = vld [vmem:[%s1766_s0 + $0x74] sm:$0xf0]  ;;  %v978_v6 = vor.u32 %v1312_v61, %v977_v60 }
  0x16   :  { %713 = vmatpush.bf16.msra.mxu0 %v1319_v20  ;;  %v1309_v2 = vld [vmem:[%s1766_s0 + $0x54] sm:$0xf]  ;;  %v1352_v4 = vld [vmem:[%s1765_s1 + $0x118] sm:$0xff]  ;;  %v982_v7 = vor.u32 %v1308_v62, %v979_v63  ;;  %v986_v8 = vor.u32 %v1313_v1, %v985_v0  ;;  %v1350_v16 = vld [vmem:[%s1765_s1 + $0x108] sm:$0xff] }
  0x17   :  { %732 = vmatpush.bf16.msra.mxu1 %v1327_v21  ;;  %v1360_v5 = vld [vmem:[%s1765_s1 + $0x158] sm:$0xff]  ;;  %v990_v9 = vor.u32 %v1309_v2, %v987_v3  ;;  %v1351_v12 = vld [vmem:[%s1765_s1 + $0x110] sm:$0xff]  ;;  %v1358_v17 = vld [vmem:[%s1765_s1 + $0x148] sm:$0xff] }
  0x18   :  { %751 = vmatpush.bf16.msra.mxu2 %v1335_v22  ;;  %v1368_v10 = vld [vmem:[%s1765_s1 + $0x198] sm:$0xff]  ;;  %v1359_v13 = vld [vmem:[%s1765_s1 + $0x150] sm:$0xff]  ;;  %v1366_v18 = vld [vmem:[%s1765_s1 + $0x188] sm:$0xff] }
  0x19   :  { %770 = vmatpush.bf16.msra.mxu3 %v1343_v23  ;;  %v1376_v11 = vld [vmem:[%s1765_s1 + $0x1d8] sm:$0xff]  ;;  %v1367_v14 = vld [vmem:[%s1765_s1 + $0x190] sm:$0xff]  ;;  %v1374_v19 = vld [vmem:[%s1765_s1 + $0x1c8] sm:$0xff] }
  0x1a   :  { %714 = vmatpush.bf16.msra.mxu0 %v1318_v24  ;;  %v1375_v15 = vld [vmem:[%s1765_s1 + $0x1d0] sm:$0xff]  ;;  %v1349_v20 = vld [vmem:[%s1765_s1 + $0x100] sm:$0xff]  ;;  %v1386_v38 = vld [vmem:[%s1765_s1 + $0x228] sm:$0xff] }
  0x1b   :  { %733 = vmatpush.bf16.msra.mxu1 %v1326_v25  ;;  %v1357_v21 = vld [vmem:[%s1765_s1 + $0x140] sm:$0xff]  ;;  %v957_v24 = vld [vmem:[%s1766_s0 + $0x10] sm:$0xf]  ;;  %v1305_v25 = vld [vmem:[%s1766_s0 + $0x30] sm:$0xf0] }
  0x1c   :  { %752 = vmatpush.bf16.msra.mxu2 %v1334_v26  ;;  %v1365_v22 = vld [vmem:[%s1765_s1 + $0x180] sm:$0xff]  ;;  %v1388_v26 = vld [vmem:[%s1765_s1 + $0x238] sm:$0xff]  ;;  %v958_v33 = vor.u32 %v1305_v25, %v957_v24  ;;  %v1387_v37 = vld [vmem:[%s1765_s1 + $0x230] sm:$0xff] }
  0x1d   :  { %771 = vmatpush.bf16.msra.mxu3 %v1342_v27  ;;  %v1373_v23 = vld [vmem:[%s1765_s1 + $0x1c0] sm:$0xff]  ;;  %v1301_v27 = vld [vmem:[%s1766_s0 + $0x14] sm:$0xf] }
  0x1e   :  { %715 = vmatpush.bf16.msra.mxu0 %v1317_v28  ;;  %v959_v28 = vld [vmem:[%s1766_s0 + $0x34] sm:$0xf0]  ;;  %v967_v32 = vld [vmem:[%s1766_s0 + $0x3c] sm:$0xf0] }
  0x1f   :  { %734 = vmatpush.bf16.msra.mxu1 %v1325_v29  ;;  %v965_v29 = vld [vmem:[%s1766_s0 + $0x18] sm:$0xf]  ;;  %v962_v34 = vor.u32 %v1301_v27, %v959_v28  ;;  %v1385_v39 = vld [vmem:[%s1765_s1 + $0x220] sm:$0xff] }
  0x20   :  { %753 = vmatpush.bf16.msra.mxu2 %v1333_v30  ;;  %v1306_v30 = vld [vmem:[%s1766_s0 + $0x38] sm:$0xf0] }
  0x21   :  { %772 = vmatpush.bf16.msra.mxu3 %v1341_v31  ;;  %716 = vmatmul.bf16.vlgmr.msra.gmra.mxu0 %v942_v42  ;;  %v1302_v31 = vld [vmem:[%s1766_s0 + $0x1c] sm:$0xf]  ;;  %v966_v35 = vor.u32 %v1306_v30, %v965_v29 }
  0x22   :  { %784 = vmatpush.bf16.msrb.mxu0 %v1356_v40  ;;  %735 = vmatmul.bf16.vlgmr.msra.gmra.mxu1 %v946_v43  ;;  %v970_v36 = vor.u32 %v1302_v31, %v967_v32  ;;  %v993_v40 = vld [vmem:[%s1766_s0 + $0x58] sm:$0xf]  ;;  %v1310_v42 = vld [vmem:[%s1766_s0 + $0x5c] sm:$0xf]  ;;  %v995_v43 = vld [vmem:[%s1766_s0 + $0x7c] sm:$0xf0] }
  0x23   :  { %803 = vmatpush.bf16.msrb.mxu1 %v1364_v41  ;;  %754 = vmatmul.bf16.vlgmr.msra.gmra.mxu2 %v950_v44  ;;  %v1314_v41 = vld [vmem:[%s1766_s0 + $0x78] sm:$0xf0]  ;;  %v1001_v44 = vld [vmem:[%s1766_s0 + $0x60] sm:$0xf] }
  0x24   :  { %773 = vmatmul.bf16.vlgmr.msra.gmra.mxu3 %v954_v45  ;;  %822 = vmatpush.bf16.msrb.mxu2 %v1372_v46  ;;  %v1315_v45 = vld [vmem:[%s1766_s0 + $0x80] sm:$0xf0]  ;;  %v1384_v46 = vld [vmem:[%s1765_s1 + $0x218] sm:$0xff] }
  0x25   :  { %841 = vmatpush.bf16.msrb.mxu3 %v1380_v47  ;;  %v1311_v47 = vld [vmem:[%s1766_s0 + $0x64] sm:$0xf] }
  0x26   :  { %785 = vmatpush.bf16.msrb.mxu0 %v1355_v48  ;;  %v1003_v48 = vld [vmem:[%s1766_s0 + $0x84] sm:$0xf0] }
  0x27   :  { %804 = vmatpush.bf16.msrb.mxu1 %v1363_v49  ;;  %v994_v49 = vor.u32 %v1314_v41, %v993_v40 }
  0x28   :  { %823 = vmatpush.bf16.msrb.mxu2 %v1371_v50  ;;  %v998_v50 = vor.u32 %v1310_v42, %v995_v43 }
  0x29   :  { %842 = vmatpush.bf16.msrb.mxu3 %v1379_v51  ;;  %v1002_v51 = vor.u32 %v1315_v45, %v1001_v44 }
  0x2a   :  { %786 = vmatpush.bf16.msrb.mxu0 %v1354_v52  ;;  %v1006_v52 = vor.u32 %v1311_v47, %v1003_v48 }
  0x2b   :  { %805 = vmatpush.bf16.msrb.mxu1 %v1362_v53  ;;  %v1383_v53 = vld [vmem:[%s1765_s1 + $0x210] sm:$0xff] }
  0x2c   :  { %824 = vmatpush.bf16.msrb.mxu2 %v1370_v54  ;;  %v1382_v54 = vld [vmem:[%s1765_s1 + $0x208] sm:$0xff] }
  0x2d   :  { %843 = vmatpush.bf16.msrb.mxu3 %v1378_v55  ;;  %v1381_v55 = vld [vmem:[%s1765_s1 + $0x200] sm:$0xff] }
  0x2e   :  { %787 = vmatpush.bf16.msrb.mxu0 %v1353_v56  ;;  %v973_v56 = vld [vmem:[%s1766_s0 + $0x20] sm:$0xf] }
  0x2f   :  { %806 = vmatpush.bf16.msrb.mxu1 %v1361_v57  ;;  %v1307_v57 = vld [vmem:[%s1766_s0 + $0x40] sm:$0xf0] }
  0x30   :  { %825 = vmatpush.bf16.msrb.mxu2 %v1369_v58  ;;  %v1009_v58 = vld [vmem:[%s1766_s0 + $0x68] sm:$0xf]  ;;  %v974_v60 = vor.u32 %v1307_v57, %v973_v56 }
  0x31   :  { %844 = vmatpush.bf16.msrb.mxu3 %v1377_v59  ;;  %721 = vmatmul.bf16.gmra.mxu0 %v978_v6  ;;  %v1316_v59 = vld [vmem:[%s1766_s0 + $0x88] sm:$0xf0] }
  0x32   :  { %788 = vmatpush.bf16.msrb.mxu0 %v1352_v4  ;;  %740 = vmatmul.bf16.gmra.mxu1 %v982_v7  ;;  %v1010_v61 = vor.u32 %v1316_v59, %v1009_v58 }
  0x33   :  { %807 = vmatpush.bf16.msrb.mxu1 %v1360_v5  ;;  %759 = vmatmul.bf16.gmra.mxu2 %v986_v8 }
  0x34   :  { %778 = vmatmul.bf16.gmra.mxu3 %v990_v9  ;;  %826 = vmatpush.bf16.msrb.mxu2 %v1368_v10 }
  0x35   :  { %845 = vmatpush.bf16.msrb.mxu3 %v1376_v11 }
  0x36   :  { %789 = vmatpush.bf16.msrb.mxu0 %v1351_v12 }
  0x37   :  { %808 = vmatpush.bf16.msrb.mxu1 %v1359_v13 }
  0x38   :  { %827 = vmatpush.bf16.msrb.mxu2 %v1367_v14 }
  0x39   :  { %846 = vmatpush.bf16.msrb.mxu3 %v1375_v15 }
  0x3a   :  { %790 = vmatpush.bf16.msrb.mxu0 %v1350_v16  ;;  %v1397_v16 = vld [vmem:[%s1767_s2] ss:$0 sm:$0xff] }
  0x3b   :  { %809 = vmatpush.bf16.msrb.mxu1 %v1358_v17 }
  0x3c   :  { %828 = vmatpush.bf16.msrb.mxu2 %v1366_v18 }
  0x3d   :  { %847 = vmatpush.bf16.msrb.mxu3 %v1374_v19 }
  0x3e   :  { %791 = vmatpush.bf16.msrb.mxu0 %v1349_v20 }
  0x3f   :  { %810 = vmatpush.bf16.msrb.mxu1 %v1357_v21 }
  0x40   :  { %829 = vmatpush.bf16.msrb.mxu2 %v1365_v22 }
  0x41   :  { %848 = vmatpush.bf16.msrb.mxu3 %v1373_v23  ;;  %792 = vmatmul.bf16.vlgmr.msrb.gmra.mxu0 %v958_v33 }
  0x42   :  { %860 = vmatpush.bf16.msra.mxu0 %v1388_v26  ;;  %811 = vmatmul.bf16.vlgmr.msrb.gmra.mxu1 %v962_v34 }
  0x43   :  { %1389 = vmatpush.bf16.msra.mxu1 %v1388_v26  ;;  %830 = vmatmul.bf16.vlgmr.msrb.gmra.mxu2 %v966_v35 }
  0x44   :  { %849 = vmatmul.bf16.vlgmr.msrb.gmra.mxu3 %v970_v36 }
  0x46   :  { %861 = vmatpush.bf16.msra.mxu0 %v1387_v37 }
  0x47   :  { %1390 = vmatpush.bf16.msra.mxu1 %v1387_v37 }
  0x4a   :  { %862 = vmatpush.bf16.msra.mxu0 %v1386_v38 }
  0x4b   :  { %1391 = vmatpush.bf16.msra.mxu1 %v1386_v38 }
  0x4e   :  { %863 = vmatpush.bf16.msra.mxu0 %v1385_v39 }
  0x4f   :  { %1392 = vmatpush.bf16.msra.mxu1 %v1385_v39 }
  0x51   :  { %797 = vmatmul.bf16.gmra.mxu0 %v994_v49 }
  0x52   :  { %864 = vmatpush.bf16.msra.mxu0 %v1384_v46  ;;  %816 = vmatmul.bf16.gmra.mxu1 %v998_v50 }
  0x53   :  { %1393 = vmatpush.bf16.msra.mxu1 %v1384_v46  ;;  %835 = vmatmul.bf16.gmra.mxu2 %v1002_v51 }
  0x54   :  { %854 = vmatmul.bf16.gmra.mxu3 %v1006_v52 }
  0x56   :  { %865 = vmatpush.bf16.msra.mxu0 %v1383_v53 }
  0x57   :  { %1394 = vmatpush.bf16.msra.mxu1 %v1383_v53 }
  0x5a   :  { %866 = vmatpush.bf16.msra.mxu0 %v1382_v54 }
  0x5b   :  { %1395 = vmatpush.bf16.msra.mxu1 %v1382_v54 }
  0x5e   :  { %867 = vmatpush.bf16.msra.mxu0 %v1381_v55 }
  0x5f   :  { %1396 = vmatpush.bf16.msra.mxu1 %v1381_v55 }
  0x61   :  { %868 = vmatmul.bf16.vlgmr.msra.gmra.mxu0 %v974_v60 }
  0x62   :  { %873 = vmatmul.bf16.vlgmr.msra.gmra.mxu1 %v1010_v61 }
  0x9e   :  { %v717_v62 = vpop.f32.mrf.mxu0 }
  0x9f   :  { %v736_v63 = vpop.f32.mrf.mxu1  ;;  %v718_v21 = vadd.f32 %v1397_v16, %v717_v62 }
  0xa1   :  { %v737_v23 = vadd.f32 %v736_v63, %v718_v21 }
  0xa6   :  { %v755_v0 = vpop.f32.mrf.mxu2  ;;  %v719_v2 = vpop.f32.mrf.mxu0 }
  0xa7   :  { %v774_v1 = vpop.f32.mrf.mxu3  ;;  %v738_v3 = vpop.f32.mrf.mxu1  ;;  %v756_v25 = vadd.f32 %v755_v0, %v737_v23  ;;  %v720_v31 = vadd.f32 %v1397_v16, %v719_v2 }
  0xa9   :  { %v775_v33 = vadd.f32 %v774_v1, %v756_v25  ;;  %v739_v35 = vadd.f32 %v738_v3, %v720_v31 }
  0xae   :  { %v757_v4 = vpop.f32.mrf.mxu2  ;;  %v722_v6 = vpop.f32.mrf.mxu0 }
  0xaf   :  { %v776_v5 = vpop.f32.mrf.mxu3  ;;  %v741_v7 = vpop.f32.mrf.mxu1  ;;  %v723_v22 = vadd.f32 %v1397_v16, %v722_v6  ;;  %v758_v39 = vadd.f32 %v757_v4, %v739_v35 }
  0xb1   :  { %v742_v24 = vadd.f32 %v741_v7, %v723_v22  ;;  %v777_v47 = vadd.f32 %v776_v5, %v758_v39 }
  0xb6   :  { %v760_v8 = vpop.f32.mrf.mxu2  ;;  %v724_v10 = vpop.f32.mrf.mxu0 }
  0xb7   :  { %v779_v9 = vpop.f32.mrf.mxu3  ;;  %v743_v11 = vpop.f32.mrf.mxu1  ;;  %v761_v26 = vadd.f32 %v760_v8, %v742_v24  ;;  %v725_v32 = vadd.f32 %v1397_v16, %v724_v10 }
  0xb9   :  { %v780_v34 = vadd.f32 %v779_v9, %v761_v26  ;;  %v744_v36 = vadd.f32 %v743_v11, %v725_v32 }
  0xbe   :  { %v762_v12 = vpop.f32.mrf.mxu2  ;;  %v793_v14 = vpop.f32.mrf.mxu0 }
  0xbf   :  { %v781_v13 = vpop.f32.mrf.mxu3  ;;  %v812_v15 = vpop.f32.mrf.mxu1  ;;  %v794_v37 = vadd.f32 %v793_v14, %v775_v33  ;;  %v763_v40 = vadd.f32 %v762_v12, %v744_v36 }
  0xc1   :  { %v813_v44 = vadd.f32 %v812_v15, %v794_v37  ;;  %v782_v48 = vadd.f32 %v781_v13, %v763_v40 }
  0xc6   :  { %v831_v17 = vpop.f32.mrf.mxu2  ;;  %v795_v19 = vpop.f32.mrf.mxu0 }
  0xc7   :  { %v850_v18 = vpop.f32.mrf.mxu3  ;;  %v814_v20 = vpop.f32.mrf.mxu1  ;;  %v832_v49 = vadd.f32 %v831_v17, %v813_v44  ;;  %v796_v51 = vadd.f32 %v795_v19, %v777_v47 }
  0xc9   :  { %v851_v53 = vadd.f32 %v850_v18, %v832_v49  ;;  %v815_v58 = vadd.f32 %v814_v20, %v796_v51 }
  0xce   :  { %v833_v27 = vpop.f32.mrf.mxu2  ;;  %v798_v29 = vpop.f32.mrf.mxu0 }
  0xcf   :  { %v852_v28 = vpop.f32.mrf.mxu3  ;;  %v817_v30 = vpop.f32.mrf.mxu1  ;;  %v799_v38 = vadd.f32 %v798_v29, %v780_v34  ;;  %v834_v62 = vadd.f32 %v833_v27, %v815_v58 }
  0xd1   :  { %v818_v45 = vadd.f32 %v817_v30, %v799_v38  ;;  %v853_v3 = vadd.f32 %v852_v28, %v834_v62 }
  0xd6   :  { %v836_v41 = vpop.f32.mrf.mxu2  ;;  %v800_v42 = vpop.f32.mrf.mxu0 }
  0xd7   :  { %v819_v43 = vpop.f32.mrf.mxu1  ;;  %v855_v46 = vpop.f32.mrf.mxu3  ;;  %v837_v50 = vadd.f32 %v836_v41, %v818_v45  ;;  %v801_v52 = vadd.f32 %v800_v42, %v782_v48 }
  0xd9   :  { %v856_v54 = vadd.f32 %v855_v46, %v837_v50  ;;  %v820_v59 = vadd.f32 %v819_v43, %v801_v52 }
  0xde   :  { %v838_v55 = vpop.f32.mrf.mxu2  ;;  %v869_v56 = vpop.f32.mrf.mxu0 }
  0xdf   :  { %v874_v57 = vpop.f32.mrf.mxu1  ;;  %v870_v60 = vadd.f32 %v869_v56, %v851_v53  ;;  %v839_v63 = vadd.f32 %v838_v55, %v820_v59  ;;  %v857_v2 = vpop.f32.mrf.mxu3 }
  0xe0   :  { %v875_v61 = vadd.f32 %v874_v57, %v856_v54 }
  0xe1   :  { %v879_v0 = vmax.f32 %v870_v60, 0.0  ;;  %v858_v4 = vadd.f32 %v857_v2, %v839_v63 }
  0xe2   :  { %v881_v1 = vmax.f32 %v875_v61, 0.0 }
  0xe3   :  { %883 = vst [vmem:[%s1768_s3] sm:$0xff] %v879_v0  ;;  %v915_v11 = vmul.f32 %v879_v0, %v879_v0 }
  0xe4   :  { %885 = vst [vmem:[%s1768_s3 + $0x10] sm:$0xff] %v881_v1  ;;  %v917_v14 = vmul.f32 %v881_v1, %v881_v1 }
  0xe6   :  { %v871_v5 = vpop.f32.mrf.mxu0 }
  0xe7   :  { %v876_v6 = vpop.f32.mrf.mxu1  ;;  %v872_v7 = vadd.f32 %v871_v5, %v853_v3 }
  0xe8   :  { %v877_v8 = vadd.f32 %v876_v6, %v858_v4 }
  0xe9   :  { %v880_v9 = vmax.f32 %v872_v7, 0.0 }
  0xea   :  { %v882_v10 = vmax.f32 %v877_v8, 0.0 }
  0xeb   :  { %884 = vst [vmem:[%s1768_s3 + $0x8] sm:$0xff] %v880_v9  ;;  %v906_v12 = vadd.f32 %v880_v9, %v879_v0  ;;  %v916_v13 = vmul.f32 %v880_v9, %v880_v9 }
  0xec   :  { %886 = vst [vmem:[%s1768_s3 + $0x18] sm:$0xff] %v882_v10  ;;  %v918_v18 = vmul.f32 %v882_v10, %v882_v10 }
  0xed   :  { %v919_v15 = vadd.f32 %v916_v13, %v915_v11  ;;  %v907_v16 = vadd.f32 %v906_v12, %v881_v1 }
  0xef   :  { %v908_v17 = vadd.f32 %v907_v16, %v882_v10  ;;  %v920_v19 = vadd.f32 %v919_v15, %v917_v14 }
  0xf1   :  { %v909_v20 = vrot.slane %v908_v17, 4  ;;  %v921_v21 = vadd.f32 %v920_v19, %v918_v18 }
  0xf3   :  { %v910_v22 = vadd.f32 %v909_v20, %v908_v17  ;;  %v922_v23 = vrot.slane %v921_v21, 4 }
  0xf5   :  { %v911_v24 = vrot.slane %v910_v22, 2  ;;  %v923_v25 = vadd.f32 %v922_v23, %v921_v21 }
  0xf7   :  { %v912_v26 = vadd.f32 %v911_v24, %v910_v22  ;;  %v924_v27 = vrot.slane %v923_v25, 2 }
  0xf9   :  { %v913_v28 = vrot.slane %v912_v26, 1  ;;  %v925_v29 = vadd.f32 %v924_v27, %v923_v25 }
  0xfb   :  { %v926_v30 = vrot.slane %v925_v29, 1  ;;  %v914_v31 = vadd.f32 %v913_v28, %v912_v26 }
  0xfd   :  { %v927_v32 = vadd.f32 %v926_v30, %v925_v29 }
  0xff   :  { %v929_v33 = vsel %vm928_vm0, %v914_v31, %v927_v32 }
 0x100   :  { %930 = vst [vmem:[%s1769_s4] sm:$0x3] %v929_v33 }

// kernel: tile.33
= control target key start
LH: loop header
LB: loop body
LE: loop exit
PB: predicated region body
PF: predicated region fallthrough
CT: control target
= control target key end

     0   :  { %s22_s0 = inlined_call_operand.vmem [shape: f32[64], index: 0, kind: input, shape index: {}]   ;;  %s23_s1 = inlined_call_operand.vmem [shape: f32[4,64], index: 1, kind: output, shape index: {}]  }
   0x1   :  { %v4_v0 = vld [vmem:[%s22_s0] ss:$0 sm:$0xff] }
   0x2   :  { %5 = vst [vmem:[%s23_s1] sm:$0xf] %v4_v0 }

// kernel: completion_forward.57
= control target key start
LH: loop header
LB: loop body
LE: loop exit
PB: predicated region body
PF: predicated region fallthrough
CT: control target
= control target key end

     0   :  { %vm1423_vm0 = vcmask 1040384   ;;  %vm1429_vm1 = vcmask 1041408   ;;  %s3390_s1 = inlined_call_operand.vmem [shape: bf16[1152,256], index: 1, kind: input, shape index: {}]   ;;  %s3391_s0 = inlined_call_operand.vmem [shape: bf16[32,1152], index: 0, kind: input, shape index: {}]   ;;  %s3392_s2 = inlined_call_operand.vmem [shape: f32[1,256], index: 2, kind: input, shape index: {}]   ;;  %s3393_s3 = inlined_call_operand.vmem [shape: f32[32,256], index: 3, kind: output, shape index: {0}]   ;;  %s3394_s4 = inlined_call_operand.vmem [shape: f32[1,2,256], index: 4, kind: output, shape index: {1}]  }
   0x1   :  { %v1571_v0 = vld [vmem:[%s3390_s1 + $0x70] sm:$0xf]  ;;  %v2122_v1 = vld [vmem:[%s3390_s1 + $0x74] sm:$0xf0]  ;;  %v1563_v11 = vld [vmem:[%s3390_s1 + $0x60] sm:$0xf] }
   0x2   :  { %v1635_v2 = vld [vmem:[%s3390_s1 + $0xf0] sm:$0xf]  ;;  %v1572_v3 = vor.u32 %v2122_v1, %v1571_v0  ;;  %v2138_v4 = vld [vmem:[%s3390_s1 + $0xf4] sm:$0xf0]  ;;  %v2120_v13 = vld [vmem:[%s3390_s1 + $0x64] sm:$0xf0] }
   0x3   :  { %v1699_v5 = vld [vmem:[%s3390_s1 + $0x170] sm:$0xf]  ;;  %v2154_v6 = vld [vmem:[%s3390_s1 + $0x174] sm:$0xf0]  ;;  %v1636_v7 = vor.u32 %v2138_v4, %v1635_v2  ;;  %v1627_v14 = vld [vmem:[%s3390_s1 + $0xe0] sm:$0xf]  ;;  %v1564_v16 = vor.u32 %v2120_v13, %v1563_v11 }
   0x4   :  { %v1700_v8 = vor.u32 %v2154_v6, %v1699_v5  ;;  %v1763_v9 = vld [vmem:[%s3390_s1 + $0x1f0] sm:$0xf]  ;;  %v2170_v10 = vld [vmem:[%s3390_s1 + $0x1f4] sm:$0xf0]  ;;  %998 = vmatpush.bf16.msra.mxu0 %v1572_v3  ;;  %v2136_v15 = vld [vmem:[%s3390_s1 + $0xe4] sm:$0xf0] }
   0x5   :  { %v1764_v12 = vor.u32 %v2170_v10, %v1763_v9  ;;  %1017 = vmatpush.bf16.msra.mxu1 %v1636_v7  ;;  %v1628_v17 = vor.u32 %v2136_v15, %v1627_v14  ;;  %v1691_v18 = vld [vmem:[%s3390_s1 + $0x160] sm:$0xf]  ;;  %v2152_v19 = vld [vmem:[%s3390_s1 + $0x164] sm:$0xf0]  ;;  %v1555_v23 = vld [vmem:[%s3390_s1 + $0x50] sm:$0xf] }
   0x6   :  { %1036 = vmatpush.bf16.msra.mxu2 %v1700_v8  ;;  %v1755_v20 = vld [vmem:[%s3390_s1 + $0x1e0] sm:$0xf]  ;;  %v1692_v21 = vor.u32 %v2152_v19, %v1691_v18  ;;  %v2168_v22 = vld [vmem:[%s3390_s1 + $0x1e4] sm:$0xf0]  ;;  %v2118_v24 = vld [vmem:[%s3390_s1 + $0x54] sm:$0xf0] }
   0x7   :  { %1055 = vmatpush.bf16.msra.mxu3 %v1764_v12  ;;  %v1756_v25 = vor.u32 %v2168_v22, %v1755_v20  ;;  %v1619_v26 = vld [vmem:[%s3390_s1 + $0xd0] sm:$0xf]  ;;  %v2134_v27 = vld [vmem:[%s3390_s1 + $0xd4] sm:$0xf0]  ;;  %v1556_v29 = vor.u32 %v2118_v24, %v1555_v23  ;;  %v1547_v35 = vld [vmem:[%s3390_s1 + $0x40] sm:$0xf] }
   0x8   :  { %v1683_v28 = vld [vmem:[%s3390_s1 + $0x150] sm:$0xf]  ;;  %999 = vmatpush.bf16.msra.mxu0 %v1564_v16  ;;  %v2150_v30 = vld [vmem:[%s3390_s1 + $0x154] sm:$0xf0]  ;;  %v1620_v33 = vor.u32 %v2134_v27, %v1619_v26  ;;  %v2116_v36 = vld [vmem:[%s3390_s1 + $0x44] sm:$0xf0] }
   0x9   :  { %v1747_v31 = vld [vmem:[%s3390_s1 + $0x1d0] sm:$0xf]  ;;  %v2166_v32 = vld [vmem:[%s3390_s1 + $0x1d4] sm:$0xf0]  ;;  %1018 = vmatpush.bf16.msra.mxu1 %v1628_v17  ;;  %v1684_v34 = vor.u32 %v2150_v30, %v1683_v28  ;;  %v1611_v37 = vld [vmem:[%s3390_s1 + $0xc0] sm:$0xf]  ;;  %v1548_v44 = vor.u32 %v2116_v36, %v1547_v35 }
   0xa   :  { %1037 = vmatpush.bf16.msra.mxu2 %v1692_v21  ;;  %v1748_v38 = vor.u32 %v2166_v32, %v1747_v31  ;;  %v2132_v39 = vld [vmem:[%s3390_s1 + $0xc4] sm:$0xf0]  ;;  %v1675_v40 = vld [vmem:[%s3390_s1 + $0x140] sm:$0xf]  ;;  %v1539_v47 = vld [vmem:[%s3390_s1 + $0x30] sm:$0xf] }
   0xb   :  { %1056 = vmatpush.bf16.msra.mxu3 %v1756_v25  ;;  %v2148_v41 = vld [vmem:[%s3390_s1 + $0x144] sm:$0xf0]  ;;  %v1739_v42 = vld [vmem:[%s3390_s1 + $0x1c0] sm:$0xf]  ;;  %v1612_v45 = vor.u32 %v2132_v39, %v1611_v37  ;;  %v2114_v48 = vld [vmem:[%s3390_s1 + $0x34] sm:$0xf0] }
   0xc   :  { %v2164_v43 = vld [vmem:[%s3390_s1 + $0x1c4] sm:$0xf0]  ;;  %1000 = vmatpush.bf16.msra.mxu0 %v1556_v29  ;;  %v1676_v46 = vor.u32 %v2148_v41, %v1675_v40  ;;  %v1603_v49 = vld [vmem:[%s3390_s1 + $0xb0] sm:$0xf]  ;;  %v2130_v51 = vld [vmem:[%s3390_s1 + $0xb4] sm:$0xf0]  ;;  %v1540_v56 = vor.u32 %v2114_v48, %v1539_v47 }
   0xd   :  { %1019 = vmatpush.bf16.msra.mxu1 %v1620_v33  ;;  %v1740_v50 = vor.u32 %v2164_v43, %v1739_v42  ;;  %v1667_v52 = vld [vmem:[%s3390_s1 + $0x130] sm:$0xf]  ;;  %v2146_v53 = vld [vmem:[%s3390_s1 + $0x134] sm:$0xf0]  ;;  %v1604_v57 = vor.u32 %v2130_v51, %v1603_v49  ;;  %v1531_v59 = vld [vmem:[%s3390_s1 + $0x20] sm:$0xf] }
   0xe   :  { %1038 = vmatpush.bf16.msra.mxu2 %v1684_v34  ;;  %v1731_v54 = vld [vmem:[%s3390_s1 + $0x1b0] sm:$0xf]  ;;  %v2162_v55 = vld [vmem:[%s3390_s1 + $0x1b4] sm:$0xf0]  ;;  %v1668_v58 = vor.u32 %v2146_v53, %v1667_v52  ;;  %v2112_v60 = vld [vmem:[%s3390_s1 + $0x24] sm:$0xf0] }
   0xf   :  { %1057 = vmatpush.bf16.msra.mxu3 %v1748_v38  ;;  %v1595_v61 = vld [vmem:[%s3390_s1 + $0xa0] sm:$0xf]  ;;  %v1732_v62 = vor.u32 %v2162_v55, %v1731_v54  ;;  %v2128_v63 = vld [vmem:[%s3390_s1 + $0xa4] sm:$0xf0]  ;;  %v1532_v4 = vor.u32 %v2112_v60, %v1531_v59  ;;  %v1523_v7 = vld [vmem:[%s3390_s1 + $0x10] sm:$0xf] }
  0x10   :  { %1001 = vmatpush.bf16.msra.mxu0 %v1548_v44  ;;  %v1659_v0 = vld [vmem:[%s3390_s1 + $0x120] sm:$0xf]  ;;  %v2144_v1 = vld [vmem:[%s3390_s1 + $0x124] sm:$0xf0]  ;;  %v1596_v5 = vor.u32 %v2128_v63, %v1595_v61  ;;  %v2110_v8 = vld [vmem:[%s3390_s1 + $0x14] sm:$0xf0] }
  0x11   :  { %1020 = vmatpush.bf16.msra.mxu1 %v1612_v45  ;;  %v1723_v2 = vld [vmem:[%s3390_s1 + $0x1a0] sm:$0xf]  ;;  %v2160_v3 = vld [vmem:[%s3390_s1 + $0x1a4] sm:$0xf0]  ;;  %v1660_v6 = vor.u32 %v2144_v1, %v1659_v0  ;;  %v1587_v9 = vld [vmem:[%s3390_s1 + $0x90] sm:$0xf]  ;;  %v1524_v17 = vor.u32 %v2110_v8, %v1523_v7 }
  0x12   :  { %1039 = vmatpush.bf16.msra.mxu2 %v1676_v46  ;;  %v1724_v10 = vor.u32 %v2160_v3, %v1723_v2  ;;  %v2126_v11 = vld [vmem:[%s3390_s1 + $0x94] sm:$0xf0]  ;;  %v1651_v12 = vld [vmem:[%s3390_s1 + $0x110] sm:$0xf]  ;;  %v1515_v16 = vld [vmem:[%s3390_s1] sm:$0xf] }
  0x13   :  { %1058 = vmatpush.bf16.msra.mxu3 %v1740_v50  ;;  %v2142_v13 = vld [vmem:[%s3390_s1 + $0x114] sm:$0xf0]  ;;  %v1715_v14 = vld [vmem:[%s3390_s1 + $0x190] sm:$0xf]  ;;  %v2108_v18 = vld [vmem:[%s3390_s1 + $0x4] sm:$0xf0]  ;;  %v1588_v21 = vor.u32 %v2126_v11, %v1587_v9 }
  0x14   :  { %1002 = vmatpush.bf16.msra.mxu0 %v1540_v56  ;;  %v2158_v15 = vld [vmem:[%s3390_s1 + $0x194] sm:$0xf0]  ;;  %v1579_v19 = vld [vmem:[%s3390_s1 + $0x80] sm:$0xf]  ;;  %v2124_v20 = vld [vmem:[%s3390_s1 + $0x84] sm:$0xf0]  ;;  %v1652_v22 = vor.u32 %v2142_v13, %v1651_v12  ;;  %v1516_v34 = vor.u32 %v2108_v18, %v1515_v16 }
  0x15   :  { %1021 = vmatpush.bf16.msra.mxu1 %v1604_v57  ;;  %v1643_v23 = vld [vmem:[%s3390_s1 + $0x100] sm:$0xf]  ;;  %v2140_v24 = vld [vmem:[%s3390_s1 + $0x104] sm:$0xf0]  ;;  %v1716_v26 = vor.u32 %v2158_v15, %v1715_v14  ;;  %v2093_v29 = vld [vmem:[%s3391_s0 + $0x20] sm:$0xf0]  ;;  %v1580_v38 = vor.u32 %v2124_v20, %v1579_v19 }
  0x16   :  { %1040 = vmatpush.bf16.msra.mxu2 %v1668_v58  ;;  %v1707_v25 = vld [vmem:[%s3390_s1 + $0x180] sm:$0xf]  ;;  %v2156_v27 = vld [vmem:[%s3390_s1 + $0x184] sm:$0xf0]  ;;  %v2089_v30 = vld [vmem:[%s3391_s0 + $0x4] sm:$0xf]  ;;  %v1644_v39 = vor.u32 %v2140_v24, %v1643_v23 }
  0x17   :  { %1059 = vmatpush.bf16.msra.mxu3 %v1732_v62  ;;  %v1443_v28 = vld [vmem:[%s3391_s0] sm:$0xf]  ;;  %v1445_v31 = vld [vmem:[%s3391_s0 + $0x24] sm:$0xf0]  ;;  %v1955_v32 = vld [vmem:[%s3390_s1 + $0x370] sm:$0xf]  ;;  %v1708_v43 = vor.u32 %v2156_v27, %v1707_v25 }
  0x18   :  { %1003 = vmatpush.bf16.msra.mxu0 %v1532_v4  ;;  %v2218_v33 = vld [vmem:[%s3390_s1 + $0x374] sm:$0xf0]  ;;  %v1451_v35 = vld [vmem:[%s3391_s0 + $0x8] sm:$0xf]  ;;  %v1891_v36 = vld [vmem:[%s3390_s1 + $0x2f0] sm:$0xf]  ;;  %v2529_v48 = vor.u32 %v2093_v29, %v1443_v28  ;;  %v2540_v53 = vor.u32 %v2089_v30, %v1445_v31 }
  0x19   :  { %1022 = vmatpush.bf16.msra.mxu1 %v1596_v5  ;;  %v2202_v37 = vld [vmem:[%s3390_s1 + $0x2f4] sm:$0xf0]  ;;  %v2094_v40 = vld [vmem:[%s3391_s0 + $0x28] sm:$0xf0]  ;;  %v1453_v42 = vld [vmem:[%s3391_s0 + $0x2c] sm:$0xf0]  ;;  %v1956_v44 = vor.u32 %v2218_v33, %v1955_v32 }
  0x1a   :  { %1041 = vmatpush.bf16.msra.mxu2 %v1660_v6  ;;  %v2090_v41 = vld [vmem:[%s3391_s0 + $0xc] sm:$0xf]  ;;  %v1827_v45 = vld [vmem:[%s3390_s1 + $0x270] sm:$0xf]  ;;  %v2186_v46 = vld [vmem:[%s3390_s1 + $0x274] sm:$0xf0]  ;;  %v1892_v49 = vor.u32 %v2202_v37, %v1891_v36  ;;  %v2542_v54 = vor.u32 %v2094_v40, %v1451_v35 }
  0x1b   :  { %1060 = vmatpush.bf16.msra.mxu3 %v1724_v10  ;;  %v2019_v47 = vld [vmem:[%s3390_s1 + $0x3f0] sm:$0xf]  ;;  %v2234_v50 = vld [vmem:[%s3390_s1 + $0x3f4] sm:$0xf0]  ;;  %v1947_v51 = vld [vmem:[%s3390_s1 + $0x360] sm:$0xf]  ;;  %v2550_v57 = vor.u32 %v2090_v41, %v1453_v42  ;;  %v1828_v58 = vor.u32 %v2186_v46, %v1827_v45 }
  0x1c   :  { %1004 = vmatpush.bf16.msra.mxu0 %v1524_v17  ;;  %v2216_v52 = vld [vmem:[%s3390_s1 + $0x364] sm:$0xf0]  ;;  %v1883_v55 = vld [vmem:[%s3390_s1 + $0x2e0] sm:$0xf]  ;;  %v2020_v59 = vor.u32 %v2234_v50, %v2019_v47  ;;  %v1939_v2 = vld [vmem:[%s3390_s1 + $0x350] sm:$0xf] }
  0x1d   :  { %1023 = vmatpush.bf16.msra.mxu1 %v1588_v21  ;;  %v2200_v56 = vld [vmem:[%s3390_s1 + $0x2e4] sm:$0xf0]  ;;  %v1948_v60 = vor.u32 %v2216_v52, %v1947_v51  ;;  %v1819_v61 = vld [vmem:[%s3390_s1 + $0x260] sm:$0xf]  ;;  %v2214_v3 = vld [vmem:[%s3390_s1 + $0x354] sm:$0xf0] }
  0x1e   :  { %1042 = vmatpush.bf16.msra.mxu2 %v1652_v22  ;;  %v2184_v62 = vld [vmem:[%s3390_s1 + $0x264] sm:$0xf0]  ;;  %v2011_v63 = vld [vmem:[%s3390_s1 + $0x3e0] sm:$0xf]  ;;  %v1884_v0 = vor.u32 %v2200_v56, %v1883_v55  ;;  %v1875_v4 = vld [vmem:[%s3390_s1 + $0x2d0] sm:$0xf]  ;;  %v1940_v8 = vor.u32 %v2214_v3, %v1939_v2 }
  0x1f   :  { %1061 = vmatpush.bf16.msra.mxu3 %v1716_v26  ;;  %v2232_v1 = vld [vmem:[%s3390_s1 + $0x3e4] sm:$0xf0]  ;;  %v2198_v5 = vld [vmem:[%s3390_s1 + $0x2d4] sm:$0xf0]  ;;  %v1820_v6 = vor.u32 %v2184_v62, %v1819_v61  ;;  %v1811_v9 = vld [vmem:[%s3390_s1 + $0x250] sm:$0xf] }
  0x20   :  { %1005 = vmatpush.bf16.msra.mxu0 %v1516_v34  ;;  %v2012_v7 = vor.u32 %v2232_v1, %v2011_v63  ;;  %v2182_v10 = vld [vmem:[%s3390_s1 + $0x254] sm:$0xf0]  ;;  %v2003_v11 = vld [vmem:[%s3390_s1 + $0x3d0] sm:$0xf]  ;;  %v1876_v12 = vor.u32 %v2198_v5, %v1875_v4  ;;  %v1931_v14 = vld [vmem:[%s3390_s1 + $0x340] sm:$0xf] }
  0x21   :  { %1024 = vmatpush.bf16.msra.mxu1 %v1580_v38  ;;  %v2230_v13 = vld [vmem:[%s3390_s1 + $0x3d4] sm:$0xf0]  ;;  %v2212_v15 = vld [vmem:[%s3390_s1 + $0x344] sm:$0xf0]  ;;  %v1867_v16 = vld [vmem:[%s3390_s1 + $0x2c0] sm:$0xf]  ;;  %v1812_v18 = vor.u32 %v2182_v10, %v1811_v9 }
  0x22   :  { %1043 = vmatpush.bf16.msra.mxu2 %v1644_v39  ;;  %v2196_v17 = vld [vmem:[%s3390_s1 + $0x2c4] sm:$0xf0]  ;;  %v1803_v19 = vld [vmem:[%s3390_s1 + $0x240] sm:$0xf]  ;;  %v2004_v22 = vor.u32 %v2230_v13, %v2003_v11  ;;  %v1932_v23 = vor.u32 %v2212_v15, %v1931_v14  ;;  %v2102_v26 = vld [vmem:[%s3391_s0 + $0x68] sm:$0xf0] }
  0x23   :  { %1062 = vmatpush.bf16.msra.mxu3 %v1708_v43  ;;  %1006 = vmatmul.bf16.vlgmr.msra.gmra.mxu0 %v2529_v48  ;;  %v2180_v20 = vld [vmem:[%s3390_s1 + $0x244] sm:$0xf0]  ;;  %v1995_v21 = vld [vmem:[%s3390_s1 + $0x3c0] sm:$0xf]  ;;  %v1868_v27 = vor.u32 %v2196_v17, %v1867_v16  ;;  %v2098_v28 = vld [vmem:[%s3391_s0 + $0x4c] sm:$0xf] }
  0x24   :  { %1025 = vmatmul.bf16.vlgmr.msra.gmra.mxu1 %v2540_v53  ;;  %1074 = vmatpush.bf16.msrb.mxu0 %v1828_v58  ;;  %v2228_v24 = vld [vmem:[%s3390_s1 + $0x3c4] sm:$0xf0]  ;;  %v1481_v29 = vld [vmem:[%s3391_s0 + $0x6c] sm:$0xf0]  ;;  %v2210_v31 = vld [vmem:[%s3390_s1 + $0x334] sm:$0xf0]  ;;  %v1804_v35 = vor.u32 %v2180_v20, %v1803_v19 }
  0x25   :  { %1093 = vmatpush.bf16.msrb.mxu1 %v1892_v49  ;;  %1044 = vmatmul.bf16.vlgmr.msra.gmra.mxu2 %v2542_v54  ;;  %v1479_v25 = vld [vmem:[%s3391_s0 + $0x48] sm:$0xf]  ;;  %v1923_v30 = vld [vmem:[%s3390_s1 + $0x330] sm:$0xf]  ;;  %v2194_v34 = vld [vmem:[%s3390_s1 + $0x2b4] sm:$0xf0]  ;;  %v1996_v39 = vor.u32 %v2228_v24, %v1995_v21  ;;  %v2672_v50 = vor.u32 %v2098_v28, %v1481_v29 }
  0x26   :  { %1112 = vmatpush.bf16.msrb.mxu2 %v1956_v44  ;;  %1063 = vmatmul.bf16.vlgmr.msra.gmra.mxu3 %v2550_v57  ;;  %v1487_v32 = vld [vmem:[%s3391_s0 + $0x50] sm:$0xf]  ;;  %v2103_v36 = vld [vmem:[%s3391_s0 + $0x70] sm:$0xf0]  ;;  %v1489_v38 = vld [vmem:[%s3391_s0 + $0x74] sm:$0xf0]  ;;  %v1924_v40 = vor.u32 %v2210_v31, %v1923_v30  ;;  %v2661_v44 = vor.u32 %v2102_v26, %v1479_v25 }
  0x27   :  { %1131 = vmatpush.bf16.msrb.mxu3 %v2020_v59  ;;  %v1859_v33 = vld [vmem:[%s3390_s1 + $0x2b0] sm:$0xf]  ;;  %v2099_v37 = vld [vmem:[%s3391_s0 + $0x54] sm:$0xf]  ;;  %v2178_v42 = vld [vmem:[%s3390_s1 + $0x234] sm:$0xf0]  ;;  %v2674_v51 = vor.u32 %v2103_v36, %v1487_v32 }
  0x28   :  { %1075 = vmatpush.bf16.msrb.mxu0 %v1820_v6  ;;  %v1795_v41 = vld [vmem:[%s3390_s1 + $0x230] sm:$0xf]  ;;  %v1860_v45 = vor.u32 %v2194_v34, %v1859_v33  ;;  %v2226_v46 = vld [vmem:[%s3390_s1 + $0x3b4] sm:$0xf0]  ;;  %v1915_v47 = vld [vmem:[%s3390_s1 + $0x320] sm:$0xf]  ;;  %v2682_v56 = vor.u32 %v2099_v37, %v1489_v38 }
  0x29   :  { %1094 = vmatpush.bf16.msrb.mxu1 %v1884_v0  ;;  %v1987_v43 = vld [vmem:[%s3390_s1 + $0x3b0] sm:$0xf]  ;;  %v2208_v49 = vld [vmem:[%s3390_s1 + $0x324] sm:$0xf0]  ;;  %v1851_v52 = vld [vmem:[%s3390_s1 + $0x2a0] sm:$0xf]  ;;  %v1796_v58 = vor.u32 %v2178_v42, %v1795_v41 }
  0x2a   :  { %1113 = vmatpush.bf16.msrb.mxu2 %v1948_v60  ;;  %v2192_v55 = vld [vmem:[%s3390_s1 + $0x2a4] sm:$0xf0]  ;;  %v1988_v59 = vor.u32 %v2226_v46, %v1987_v43  ;;  %v1916_v60 = vor.u32 %v2208_v49, %v1915_v47  ;;  %v1787_v61 = vld [vmem:[%s3390_s1 + $0x220] sm:$0xf]  ;;  %v1907_v2 = vld [vmem:[%s3390_s1 + $0x310] sm:$0xf] }
  0x2b   :  { %1132 = vmatpush.bf16.msrb.mxu3 %v2012_v7  ;;  %v2176_v62 = vld [vmem:[%s3390_s1 + $0x224] sm:$0xf0]  ;;  %v1979_v63 = vld [vmem:[%s3390_s1 + $0x3a0] sm:$0xf]  ;;  %v1852_v0 = vor.u32 %v2192_v55, %v1851_v52  ;;  %v2206_v3 = vld [vmem:[%s3390_s1 + $0x314] sm:$0xf0] }
  0x2c   :  { %1076 = vmatpush.bf16.msrb.mxu0 %v1812_v18  ;;  %v2224_v1 = vld [vmem:[%s3390_s1 + $0x3a4] sm:$0xf0]  ;;  %v1843_v4 = vld [vmem:[%s3390_s1 + $0x290] sm:$0xf]  ;;  %v2190_v5 = vld [vmem:[%s3390_s1 + $0x294] sm:$0xf0]  ;;  %v1788_v6 = vor.u32 %v2176_v62, %v1787_v61  ;;  %v1908_v9 = vor.u32 %v2206_v3, %v1907_v2 }
  0x2d   :  { %1095 = vmatpush.bf16.msrb.mxu1 %v1876_v12  ;;  %v1779_v7 = vld [vmem:[%s3390_s1 + $0x210] sm:$0xf]  ;;  %v2174_v10 = vld [vmem:[%s3390_s1 + $0x214] sm:$0xf0]  ;;  %v1844_v13 = vor.u32 %v2190_v5, %v1843_v4  ;;  %v1899_v14 = vld [vmem:[%s3390_s1 + $0x300] sm:$0xf] }
  0x2e   :  { %1114 = vmatpush.bf16.msrb.mxu2 %v1940_v8  ;;  %v1980_v8 = vor.u32 %v2224_v1, %v1979_v63  ;;  %v1971_v11 = vld [vmem:[%s3390_s1 + $0x390] sm:$0xf]  ;;  %v2222_v12 = vld [vmem:[%s3390_s1 + $0x394] sm:$0xf0]  ;;  %v2204_v15 = vld [vmem:[%s3390_s1 + $0x304] sm:$0xf0]  ;;  %v1780_v20 = vor.u32 %v2174_v10, %v1779_v7 }
  0x2f   :  { %1133 = vmatpush.bf16.msrb.mxu3 %v2004_v22  ;;  %v1835_v16 = vld [vmem:[%s3390_s1 + $0x280] sm:$0xf]  ;;  %v2188_v17 = vld [vmem:[%s3390_s1 + $0x284] sm:$0xf0]  ;;  %v2137_v18 = vld [vmem:[%s3390_s1 + $0xf4] sm:$0xf]  ;;  %v1972_v24 = vor.u32 %v2222_v12, %v1971_v11  ;;  %v1900_v25 = vor.u32 %v2204_v15, %v1899_v14 }
  0x30   :  { %1077 = vmatpush.bf16.msrb.mxu0 %v1804_v35  ;;  %v1637_v19 = vld [vmem:[%s3390_s1 + $0xf8] sm:$0xf0]  ;;  %v1771_v21 = vld [vmem:[%s3390_s1 + $0x200] sm:$0xf]  ;;  %v2121_v22 = vld [vmem:[%s3390_s1 + $0x74] sm:$0xf]  ;;  %v1836_v29 = vor.u32 %v2188_v17, %v1835_v16 }
  0x31   :  { %1096 = vmatpush.bf16.msrb.mxu1 %v1868_v27  ;;  %v2172_v26 = vld [vmem:[%s3390_s1 + $0x204] sm:$0xf0]  ;;  %v1963_v27 = vld [vmem:[%s3390_s1 + $0x380] sm:$0xf]  ;;  %v1459_v30 = vld [vmem:[%s3391_s0 + $0x10] sm:$0xf]  ;;  %v1640_v34 = vor.u32 %v2137_v18, %v1637_v19 }
  0x32   :  { %1115 = vmatpush.bf16.msrb.mxu2 %v1932_v23  ;;  %v1573_v23 = vld [vmem:[%s3390_s1 + $0x78] sm:$0xf0]  ;;  %v2220_v28 = vld [vmem:[%s3390_s1 + $0x384] sm:$0xf0]  ;;  %v2095_v31 = vld [vmem:[%s3391_s0 + $0x30] sm:$0xf0]  ;;  %v1772_v42 = vor.u32 %v2172_v26, %v1771_v21 }
  0x33   :  { %1134 = vmatpush.bf16.msrb.mxu3 %v1996_v39  ;;  %1011 = vmatmul.bf16.gmra.mxu0 %v2661_v44  ;;  %v2091_v32 = vld [vmem:[%s3391_s0 + $0x14] sm:$0xf]  ;;  %v1461_v33 = vld [vmem:[%s3391_s0 + $0x34] sm:$0xf0]  ;;  %v2083_v35 = vld [vmem:[%s3390_s1 + $0x470] sm:$0xf]  ;;  %v1576_v38 = vor.u32 %v2121_v22, %v1573_v23  ;;  %v1964_v47 = vor.u32 %v2220_v28, %v1963_v27 }
  0x34   :  { %1030 = vmatmul.bf16.gmra.mxu1 %v2672_v50  ;;  %1078 = vmatpush.bf16.msrb.mxu0 %v1796_v58  ;;  %v2250_v36 = vld [vmem:[%s3390_s1 + $0x474] sm:$0xf0]  ;;  %v2153_v37 = vld [vmem:[%s3390_s1 + $0x174] sm:$0xf]  ;;  %v1701_v39 = vld [vmem:[%s3390_s1 + $0x178] sm:$0xf0]  ;;  %v2819_v1 = vor.u32 %v2091_v32, %v1461_v33 }
  0x35   :  { %1097 = vmatpush.bf16.msrb.mxu1 %v1860_v45  ;;  %1049 = vmatmul.bf16.gmra.mxu2 %v2674_v51  ;;  %v1629_v41 = vld [vmem:[%s3390_s1 + $0xe8] sm:$0xf0]  ;;  %v1467_v43 = vld [vmem:[%s3391_s0 + $0x18] sm:$0xf]  ;;  %v2096_v45 = vld [vmem:[%s3391_s0 + $0x38] sm:$0xf0]  ;;  %v2084_v52 = vor.u32 %v2250_v36, %v2083_v35 }
  0x36   :  { %1116 = vmatpush.bf16.msrb.mxu2 %v1924_v40  ;;  %1068 = vmatmul.bf16.gmra.mxu3 %v2682_v56  ;;  %v2135_v40 = vld [vmem:[%s3390_s1 + $0xe4] sm:$0xf]  ;;  %v2092_v46 = vld [vmem:[%s3391_s0 + $0x1c] sm:$0xf]  ;;  %v1469_v49 = vld [vmem:[%s3391_s0 + $0x3c] sm:$0xf0]  ;;  %v2830_v5 = vor.u32 %v2096_v45, %v1467_v43 }
  0x37   :  { %1135 = vmatpush.bf16.msrb.mxu3 %v1988_v59  ;;  %v2075_v55 = vld [vmem:[%s3390_s1 + $0x460] sm:$0xf]  ;;  %v2248_v58 = vld [vmem:[%s3390_s1 + $0x464] sm:$0xf0]  ;;  %v1704_v59 = vor.u32 %v2153_v37, %v1701_v39  ;;  %v2119_v61 = vld [vmem:[%s3390_s1 + $0x64] sm:$0xf] }
  0x38   :  { %1079 = vmatpush.bf16.msrb.mxu0 %v1788_v6  ;;  %v1565_v62 = vld [vmem:[%s3390_s1 + $0x68] sm:$0xf0]  ;;  %v2151_v63 = vld [vmem:[%s3390_s1 + $0x164] sm:$0xf]  ;;  %v2133_v3 = vld [vmem:[%s3390_s1 + $0xd4] sm:$0xf]  ;;  %v2832_v6 = vor.u32 %v2092_v46, %v1469_v49  ;;  %v2076_v7 = vor.u32 %v2248_v58, %v2075_v55 }
  0x39   :  { %1098 = vmatpush.bf16.msrb.mxu1 %v1852_v0  ;;  %v2817_v0 = vor.u32 %v2095_v31, %v1459_v30  ;;  %v1693_v2 = vld [vmem:[%s3390_s1 + $0x168] sm:$0xf0]  ;;  %v1621_v4 = vld [vmem:[%s3390_s1 + $0xd8] sm:$0xf0]  ;;  %v2246_v10 = vld [vmem:[%s3390_s1 + $0x454] sm:$0xf0] }
  0x3a   :  { %1117 = vmatpush.bf16.msrb.mxu2 %v1916_v60  ;;  %v1632_v60 = vor.u32 %v2135_v40, %v1629_v41  ;;  %v1696_v11 = vor.u32 %v2151_v63, %v1693_v2  ;;  %v1624_v12 = vor.u32 %v2133_v3, %v1621_v4  ;;  %v1557_v14 = vld [vmem:[%s3390_s1 + $0x58] sm:$0xf0]  ;;  %v2149_v15 = vld [vmem:[%s3390_s1 + $0x154] sm:$0xf]  ;;  %v2131_v17 = vld [vmem:[%s3390_s1 + $0xc4] sm:$0xf] }
  0x3b   :  { %1136 = vmatpush.bf16.msrb.mxu3 %v1980_v8  ;;  %v1568_v8 = vor.u32 %v2119_v61, %v1565_v62  ;;  %v1685_v16 = vld [vmem:[%s3390_s1 + $0x158] sm:$0xf0]  ;;  %v1613_v18 = vld [vmem:[%s3390_s1 + $0xc8] sm:$0xf0]  ;;  %v2059_v21 = vld [vmem:[%s3390_s1 + $0x440] sm:$0xf] }
  0x3c   :  { %1080 = vmatpush.bf16.msrb.mxu0 %v1780_v20  ;;  %v2244_v22 = vld [vmem:[%s3390_s1 + $0x444] sm:$0xf0]  ;;  %v1688_v23 = vor.u32 %v2149_v15, %v1685_v16  ;;  %v1549_v26 = vld [vmem:[%s3390_s1 + $0x48] sm:$0xf0]  ;;  %v2147_v27 = vld [vmem:[%s3390_s1 + $0x144] sm:$0xf] }
  0x3d   :  { %1099 = vmatpush.bf16.msrb.mxu1 %v1844_v13  ;;  %v2117_v13 = vld [vmem:[%s3390_s1 + $0x54] sm:$0xf]  ;;  %v1677_v28 = vld [vmem:[%s3390_s1 + $0x148] sm:$0xf0]  ;;  %v1605_v30 = vld [vmem:[%s3390_s1 + $0xb8] sm:$0xf0]  ;;  %v2060_v31 = vor.u32 %v2244_v22, %v2059_v21 }
  0x3e   :  { %1118 = vmatpush.bf16.msrb.mxu2 %v1908_v9  ;;  %v2067_v9 = vld [vmem:[%s3390_s1 + $0x450] sm:$0xf]  ;;  %v1560_v20 = vor.u32 %v2117_v13, %v1557_v14  ;;  %v1680_v35 = vor.u32 %v2147_v27, %v1677_v28  ;;  %v1495_v36 = vld [vmem:[%s3391_s0 + $0x58] sm:$0xf]  ;;  %v2104_v37 = vld [vmem:[%s3391_s0 + $0x78] sm:$0xf0] }
  0x3f   :  { %1137 = vmatpush.bf16.msrb.mxu3 %v1972_v24  ;;  %v2068_v19 = vor.u32 %v2246_v10, %v2067_v9  ;;  %v1616_v24 = vor.u32 %v2131_v17, %v1613_v18  ;;  %v2051_v33 = vld [vmem:[%s3390_s1 + $0x430] sm:$0xf]  ;;  %v1497_v39 = vld [vmem:[%s3391_s0 + $0x7c] sm:$0xf0]  ;;  %v2113_v41 = vld [vmem:[%s3390_s1 + $0x34] sm:$0xf] }
  0x40   :  { %1081 = vmatpush.bf16.msrb.mxu0 %v1772_v42  ;;  %v1541_v42 = vld [vmem:[%s3390_s1 + $0x38] sm:$0xf0]  ;;  %v2145_v43 = vld [vmem:[%s3390_s1 + $0x134] sm:$0xf]  ;;  %v2127_v46 = vld [vmem:[%s3390_s1 + $0xa4] sm:$0xf] }
  0x41   :  { %1100 = vmatpush.bf16.msrb.mxu1 %v1836_v29  ;;  %v2129_v29 = vld [vmem:[%s3390_s1 + $0xb4] sm:$0xf]  ;;  %v1669_v45 = vld [vmem:[%s3390_s1 + $0x138] sm:$0xf0]  ;;  %v1503_v49 = vld [vmem:[%s3391_s0 + $0x60] sm:$0xf] }
  0x42   :  { %1119 = vmatpush.bf16.msrb.mxu2 %v1900_v25  ;;  %v2115_v25 = vld [vmem:[%s3390_s1 + $0x44] sm:$0xf]  ;;  %v1608_v40 = vor.u32 %v2129_v29, %v1605_v30  ;;  %v1505_v58 = vld [vmem:[%s3391_s0 + $0x84] sm:$0xf0]  ;;  %v2043_v61 = vld [vmem:[%s3390_s1 + $0x420] sm:$0xf]  ;;  %v1672_v63 = vor.u32 %v2145_v43, %v1669_v45 }
  0x43   :  { %1138 = vmatpush.bf16.msrb.mxu3 %v1964_v47  ;;  %1082 = vmatmul.bf16.vlgmr.msrb.gmra.mxu0 %v2817_v0  ;;  %v1552_v32 = vor.u32 %v2115_v25, %v1549_v26  ;;  %v1597_v47 = vld [vmem:[%s3390_s1 + $0xa8] sm:$0xf0]  ;;  %v2101_v55 = vld [vmem:[%s3391_s0 + $0x64] sm:$0xf]  ;;  %v2240_v62 = vld [vmem:[%s3390_s1 + $0x424] sm:$0xf0] }
  0x44   :  { %1150 = vmatpush.bf16.msra.mxu0 %v2084_v52  ;;  %1101 = vmatmul.bf16.vlgmr.msrb.gmra.mxu1 %v2819_v1  ;;  %v2105_v52 = vld [vmem:[%s3391_s0 + $0x80] sm:$0xf0]  ;;  %v1600_v2 = vor.u32 %v2127_v46, %v1597_v47  ;;  %v1533_v4 = vld [vmem:[%s3390_s1 + $0x28] sm:$0xf0]  ;;  %v2964_v14 = vor.u32 %v2101_v55, %v1505_v58  ;;  %v2044_v15 = vor.u32 %v2240_v62, %v2043_v61  ;;  %v2035_v17 = vld [vmem:[%s3390_s1 + $0x410] sm:$0xf] }
  0x45   :  { %1169 = vmatpush.bf16.msra.mxu1 %v1576_v38  ;;  %1120 = vmatmul.bf16.vlgmr.msrb.gmra.mxu2 %v2830_v5  ;;  %v2100_v38 = vld [vmem:[%s3391_s0 + $0x5c] sm:$0xf]  ;;  %v2111_v3 = vld [vmem:[%s3390_s1 + $0x24] sm:$0xf]  ;;  %v1661_v10 = vld [vmem:[%s3390_s1 + $0x128] sm:$0xf0]  ;;  %v2962_v13 = vor.u32 %v2105_v52, %v1503_v49 }
  0x46   :  { %1188 = vmatpush.bf16.msra.mxu2 %v1640_v34  ;;  %1139 = vmatmul.bf16.vlgmr.msrb.gmra.mxu3 %v2832_v6  ;;  %v2242_v34 = vld [vmem:[%s3390_s1 + $0x434] sm:$0xf0]  ;;  %v2951_v9 = vor.u32 %v2100_v38, %v1497_v39  ;;  %v1536_v16 = vor.u32 %v2111_v3, %v1533_v4  ;;  %v2109_v21 = vld [vmem:[%s3390_s1 + $0x14] sm:$0xf]  ;;  %v1525_v22 = vld [vmem:[%s3390_s1 + $0x18] sm:$0xf0] }
  0x47   :  { %1207 = vmatpush.bf16.msra.mxu3 %v1704_v59  ;;  %v2052_v59 = vor.u32 %v2242_v34, %v2051_v33  ;;  %v2238_v18 = vld [vmem:[%s3390_s1 + $0x414] sm:$0xf0]  ;;  %v2123_v25 = vld [vmem:[%s3390_s1 + $0x84] sm:$0xf]  ;;  %v1581_v26 = vld [vmem:[%s3390_s1 + $0x88] sm:$0xf0]  ;;  %v1528_v30 = vor.u32 %v2109_v21, %v1525_v22 }
  0x48   :  { %1151 = vmatpush.bf16.msra.mxu0 %v2076_v7  ;;  %v2143_v7 = vld [vmem:[%s3390_s1 + $0x124] sm:$0xf]  ;;  %v2201_v27 = vld [vmem:[%s3390_s1 + $0x2f4] sm:$0xf]  ;;  %v1893_v28 = vld [vmem:[%s3390_s1 + $0x2f8] sm:$0xf0]  ;;  %v2036_v29 = vor.u32 %v2238_v18, %v2035_v17 }
  0x49   :  { %1170 = vmatpush.bf16.msra.mxu1 %v1568_v8  ;;  %v2949_v8 = vor.u32 %v2104_v37, %v1495_v36  ;;  %v2107_v33 = vld [vmem:[%s3390_s1 + $0x4] sm:$0xf]  ;;  %v1517_v36 = vld [vmem:[%s3390_s1 + $0x8] sm:$0xf0]  ;;  %v1896_v39 = vor.u32 %v2201_v27, %v1893_v28  ;;  %v1829_v43 = vld [vmem:[%s3390_s1 + $0x278] sm:$0xf0] }
  0x4a   :  { %1189 = vmatpush.bf16.msra.mxu2 %v1632_v60  ;;  %v1544_v60 = vor.u32 %v2113_v41, %v1541_v42  ;;  %v2139_v37 = vld [vmem:[%s3390_s1 + $0x104] sm:$0xf]  ;;  %v1645_v38 = vld [vmem:[%s3390_s1 + $0x108] sm:$0xf0]  ;;  %v1765_v41 = vld [vmem:[%s3390_s1 + $0x1f8] sm:$0xf0]  ;;  %v1520_v49 = vor.u32 %v2107_v33, %v1517_v36 }
  0x4b   :  { %1208 = vmatpush.bf16.msra.mxu3 %v1696_v11  ;;  %v2125_v11 = vld [vmem:[%s3390_s1 + $0x94] sm:$0xf]  ;;  %v1957_v46 = vld [vmem:[%s3390_s1 + $0x378] sm:$0xf0]  ;;  %v2199_v52 = vld [vmem:[%s3390_s1 + $0x2e4] sm:$0xf]  ;;  %v1648_v58 = vor.u32 %v2139_v37, %v1645_v38 }
  0x4c   :  { %1152 = vmatpush.bf16.msra.mxu0 %v2068_v19  ;;  %v1664_v19 = vor.u32 %v2143_v7, %v1661_v10  ;;  %v2185_v42 = vld [vmem:[%s3390_s1 + $0x274] sm:$0xf]  ;;  %v1885_v55 = vld [vmem:[%s3390_s1 + $0x2e8] sm:$0xf0]  ;;  %v2167_v62 = vld [vmem:[%s3390_s1 + $0x1e4] sm:$0xf] }
  0x4d   :  { %1171 = vmatpush.bf16.msra.mxu1 %v1560_v20  ;;  %v2217_v45 = vld [vmem:[%s3390_s1 + $0x374] sm:$0xf]  ;;  %v2097_v3 = vld [vmem:[%s3391_s0 + $0x40] sm:$0xf0]  ;;  %v1888_v4 = vor.u32 %v2199_v52, %v1885_v55  ;;  %v1821_v10 = vld [vmem:[%s3390_s1 + $0x268] sm:$0xf0] }
  0x4e   :  { %1190 = vmatpush.bf16.msra.mxu2 %v1624_v12  ;;  %v1589_v12 = vld [vmem:[%s3390_s1 + $0x98] sm:$0xf0]  ;;  %v1960_v61 = vor.u32 %v2217_v45, %v1957_v46  ;;  %v2183_v7 = vld [vmem:[%s3390_s1 + $0x264] sm:$0xf]  ;;  %v2213_v27 = vld [vmem:[%s3390_s1 + $0x354] sm:$0xf] }
  0x4f   :  { %1209 = vmatpush.bf16.msra.mxu3 %v1688_v23  ;;  %v1592_v20 = vor.u32 %v2125_v11, %v1589_v12  ;;  %v2141_v23 = vld [vmem:[%s3390_s1 + $0x114] sm:$0xf]  ;;  %v2215_v12 = vld [vmem:[%s3390_s1 + $0x364] sm:$0xf]  ;;  %v1877_v18 = vld [vmem:[%s3390_s1 + $0x2d8] sm:$0xf0]  ;;  %v1824_v21 = vor.u32 %v2183_v7, %v1821_v10 }
  0x50   :  { %1153 = vmatpush.bf16.msra.mxu0 %v2060_v31  ;;  %v2027_v31 = vld [vmem:[%s3390_s1 + $0x400] sm:$0xf]  ;;  %v1941_v28 = vld [vmem:[%s3390_s1 + $0x358] sm:$0xf0]  ;;  %v2193_v38 = vld [vmem:[%s3390_s1 + $0x2b4] sm:$0xf] }
  0x51   :  { %1172 = vmatpush.bf16.msra.mxu1 %v1552_v32  ;;  %v2236_v32 = vld [vmem:[%s3390_s1 + $0x404] sm:$0xf0]  ;;  %v2177_v45 = vld [vmem:[%s3390_s1 + $0x234] sm:$0xf]  ;;  %v1797_v46 = vld [vmem:[%s3390_s1 + $0x238] sm:$0xf0] }
  0x52   :  { %1191 = vmatpush.bf16.msra.mxu2 %v1616_v24  ;;  %v1653_v24 = vld [vmem:[%s3390_s1 + $0x118] sm:$0xf0]  ;;  %v2028_v47 = vor.u32 %v2236_v32, %v2027_v31  ;;  %v2163_v31 = vld [vmem:[%s3390_s1 + $0x1c4] sm:$0xf]  ;;  %v1741_v32 = vld [vmem:[%s3390_s1 + $0x1c8] sm:$0xf0] }
  0x53   :  { %1210 = vmatpush.bf16.msra.mxu3 %v1680_v35  ;;  %1087 = vmatmul.bf16.gmra.mxu0 %v2949_v8  ;;  %v1656_v34 = vor.u32 %v2141_v23, %v1653_v24  ;;  %v1584_v35 = vor.u32 %v2123_v25, %v1581_v26  ;;  %v2181_v23 = vld [vmem:[%s3390_s1 + $0x254] sm:$0xf]  ;;  %v1813_v24 = vld [vmem:[%s3390_s1 + $0x258] sm:$0xf0]  ;;  %v1744_v37 = vor.u32 %v2163_v31, %v1741_v32  ;;  %v1789_v7 = vld [vmem:[%s3390_s1 + $0x228] sm:$0xf0] }
  0x54   :  { %1154 = vmatpush.bf16.msra.mxu0 %v2052_v59  ;;  %1106 = vmatmul.bf16.gmra.mxu1 %v2951_v9  ;;  %v1816_v33 = vor.u32 %v2181_v23, %v1813_v24  ;;  %v2209_v52 = vld [vmem:[%s3390_s1 + $0x334] sm:$0xf]  ;;  %v1925_v55 = vld [vmem:[%s3390_s1 + $0x338] sm:$0xf0]  ;;  %v1837_v31 = vld [vmem:[%s3390_s1 + $0x288] sm:$0xf0] }
  0x55   :  { %1173 = vmatpush.bf16.msra.mxu1 %v1544_v60  ;;  %1125 = vmatmul.bf16.gmra.mxu2 %v2962_v13  ;;  %v1832_v60 = vor.u32 %v2185_v42, %v1829_v43  ;;  %v2173_v24 = vld [vmem:[%s3390_s1 + $0x214] sm:$0xf]  ;;  %v2155_v32 = vld [vmem:[%s3390_s1 + $0x184] sm:$0xf] }
  0x56   :  { %1192 = vmatpush.bf16.msra.mxu2 %v1608_v40  ;;  %1144 = vmatmul.bf16.gmra.mxu3 %v2964_v14  ;;  %v2169_v40 = vld [vmem:[%s3390_s1 + $0x1f4] sm:$0xf] }
  0x57   :  { %1211 = vmatpush.bf16.msra.mxu3 %v1672_v63  ;;  %v1768_v59 = vor.u32 %v2169_v40, %v1765_v41  ;;  %v1757_v63 = vld [vmem:[%s3390_s1 + $0x1e8] sm:$0xf0]  ;;  %v2161_v40 = vld [vmem:[%s3390_s1 + $0x1b4] sm:$0xf]  ;;  %v1733_v41 = vld [vmem:[%s3390_s1 + $0x1b8] sm:$0xf0] }
  0x58   :  { %1155 = vmatpush.bf16.msra.mxu0 %v2044_v15  ;;  %v1760_v11 = vor.u32 %v2167_v62, %v1757_v63  ;;  %v1949_v15 = vld [vmem:[%s3390_s1 + $0x368] sm:$0xf0]  ;;  %v1511_v62 = vld [vmem:[%s3391_s0 + $0x68] sm:$0xf] }
  0x59   :  { %1174 = vmatpush.bf16.msra.mxu1 %v1536_v16  ;;  %v2197_v16 = vld [vmem:[%s3390_s1 + $0x2d4] sm:$0xf]  ;;  %v1952_v22 = vor.u32 %v2215_v12, %v1949_v15  ;;  %v2106_v63 = vld [vmem:[%s3391_s0 + $0x88] sm:$0xf0]  ;;  %v2207_v12 = vld [vmem:[%s3390_s1 + $0x324] sm:$0xf] }
  0x5a   :  { %1193 = vmatpush.bf16.msra.mxu2 %v1600_v2  ;;  %v1475_v2 = vld [vmem:[%s3391_s0 + $0x20] sm:$0xf]  ;;  %v1880_v25 = vor.u32 %v2197_v16, %v1877_v18  ;;  %v1917_v15 = vld [vmem:[%s3390_s1 + $0x328] sm:$0xf0]  ;;  %v2189_v16 = vld [vmem:[%s3390_s1 + $0x294] sm:$0xf]  ;;  %v3177_v18 = vor.u32 %v2106_v63, %v1511_v62 }
  0x5b   :  { %1212 = vmatpush.bf16.msra.mxu3 %v1664_v19  ;;  %v3069_v17 = vor.u32 %v2097_v3, %v1475_v2  ;;  %v2165_v19 = vld [vmem:[%s3390_s1 + $0x1d4] sm:$0xf]  ;;  %v1800_v2 = vor.u32 %v2177_v45, %v1797_v46  ;;  %v1928_v3 = vor.u32 %v2209_v52, %v1925_v55  ;;  %v1920_v23 = vor.u32 %v2207_v12, %v1917_v15  ;;  %v2077_v52 = vld [vmem:[%s3390_s1 + $0x468] sm:$0xf0] }
  0x5c   :  { %1156 = vmatpush.bf16.msra.mxu0 %v2036_v29  ;;  %v2195_v29 = vld [vmem:[%s3390_s1 + $0x2c4] sm:$0xf] }
  0x5d   :  { %1175 = vmatpush.bf16.msra.mxu1 %v1528_v30  ;;  %v1869_v30 = vld [vmem:[%s3390_s1 + $0x2c8] sm:$0xf0] }
  0x5e   :  { %1194 = vmatpush.bf16.msra.mxu2 %v1592_v20  ;;  %v1749_v20 = vld [vmem:[%s3390_s1 + $0x1d8] sm:$0xf0]  ;;  %v1872_v36 = vor.u32 %v2195_v29, %v1869_v30  ;;  %v2187_v30 = vld [vmem:[%s3390_s1 + $0x284] sm:$0xf] }
  0x5f   :  { %1213 = vmatpush.bf16.msra.mxu3 %v1656_v34  ;;  %v1752_v26 = vor.u32 %v2165_v19, %v1749_v20  ;;  %v2179_v34 = vld [vmem:[%s3390_s1 + $0x244] sm:$0xf]  ;;  %v1845_v19 = vld [vmem:[%s3390_s1 + $0x298] sm:$0xf0]  ;;  %v2157_v20 = vld [vmem:[%s3390_s1 + $0x194] sm:$0xf] }
  0x60   :  { %1157 = vmatpush.bf16.msra.mxu0 %v2028_v47  ;;  %v1909_v29 = vld [vmem:[%s3390_s1 + $0x318] sm:$0xf0] }
  0x61   :  { %1176 = vmatpush.bf16.msra.mxu1 %v1520_v49  ;;  %v1736_v49 = vor.u32 %v2161_v40, %v1733_v41  ;;  %v2085_v40 = vld [vmem:[%s3390_s1 + $0x478] sm:$0xf0]  ;;  %v2231_v41 = vld [vmem:[%s3390_s1 + $0x3e4] sm:$0xf] }
  0x62   :  { %1195 = vmatpush.bf16.msra.mxu2 %v1584_v35  ;;  %v1805_v35 = vld [vmem:[%s3390_s1 + $0x248] sm:$0xf0] }
  0x63   :  { %1214 = vmatpush.bf16.msra.mxu3 %v1648_v58  ;;  %1158 = vmatmul.bf16.vlgmr.msra.gmra.mxu0 %v3069_v17  ;;  %v1808_v42 = vor.u32 %v2179_v34, %v1805_v35  ;;  %v2191_v58 = vld [vmem:[%s3390_s1 + $0x2a4] sm:$0xf] }
  0x64   :  { %1226 = vmatpush.bf16.msrb.mxu0 %v1768_v59  ;;  %1177 = vmatmul.bf16.vlgmr.msra.gmra.mxu1 %v2529_v48  ;;  %v1944_v48 = vor.u32 %v2213_v27, %v1941_v28  ;;  %v1853_v59 = vld [vmem:[%s3390_s1 + $0x2a8] sm:$0xf0]  ;;  %v2205_v28 = vld [vmem:[%s3390_s1 + $0x314] sm:$0xf] }
  0x65   :  { %1245 = vmatpush.bf16.msrb.mxu1 %v1832_v60  ;;  %1196 = vmatmul.bf16.vlgmr.msra.gmra.mxu2 %v2540_v53  ;;  %v2211_v53 = vld [vmem:[%s3390_s1 + $0x344] sm:$0xf]  ;;  %v1856_v10 = vor.u32 %v2191_v58, %v1853_v59  ;;  %v1912_v35 = vor.u32 %v2205_v28, %v1909_v29  ;;  %v2229_v58 = vld [vmem:[%s3390_s1 + $0x3d4] sm:$0xf]  ;;  %v2005_v59 = vld [vmem:[%s3390_s1 + $0x3d8] sm:$0xf0] }
  0x66   :  { %1264 = vmatpush.bf16.msrb.mxu2 %v1896_v39  ;;  %1215 = vmatmul.bf16.vlgmr.msra.gmra.mxu3 %v2542_v54  ;;  %v1933_v54 = vld [vmem:[%s3390_s1 + $0x348] sm:$0xf0]  ;;  %v1861_v39 = vld [vmem:[%s3390_s1 + $0x2b8] sm:$0xf0]  ;;  %v2159_v60 = vld [vmem:[%s3390_s1 + $0x1a4] sm:$0xf]  ;;  %v2008_v62 = vor.u32 %v2229_v58, %v2005_v59 }
  0x67   :  { %1283 = vmatpush.bf16.msrb.mxu3 %v1960_v61  ;;  %v1936_v43 = vor.u32 %v2211_v53, %v1933_v54  ;;  %v1864_v47 = vor.u32 %v2193_v38, %v1861_v39  ;;  %v1725_v61 = vld [vmem:[%s3390_s1 + $0x1a8] sm:$0xf0]  ;;  %v2203_v53 = vld [vmem:[%s3390_s1 + $0x304] sm:$0xf]  ;;  %v2249_v39 = vld [vmem:[%s3390_s1 + $0x474] sm:$0xf] }
  0x68   :  { %1227 = vmatpush.bf16.msrb.mxu0 %v1760_v11  ;;  %v1728_v11 = vor.u32 %v2159_v60, %v1725_v61  ;;  %v1901_v54 = vld [vmem:[%s3390_s1 + $0x308] sm:$0xf0]  ;;  %v2088_v46 = vor.u32 %v2249_v39, %v2085_v40  ;;  %v2245_v60 = vld [vmem:[%s3390_s1 + $0x454] sm:$0xf]  ;;  %v2069_v61 = vld [vmem:[%s3390_s1 + $0x458] sm:$0xf0] }
  0x69   :  { %1246 = vmatpush.bf16.msrb.mxu1 %v1824_v21  ;;  %v1717_v21 = vld [vmem:[%s3390_s1 + $0x198] sm:$0xf0]  ;;  %v1904_v45 = vor.u32 %v2203_v53, %v1901_v54  ;;  %v2072_v63 = vor.u32 %v2245_v60, %v2069_v61 }
  0x6a   :  { %1265 = vmatpush.bf16.msrb.mxu2 %v1888_v4  ;;  %v2175_v4 = vld [vmem:[%s3390_s1 + $0x224] sm:$0xf]  ;;  %v1720_v27 = vor.u32 %v2157_v20, %v1717_v21  ;;  %v2045_v21 = vld [vmem:[%s3390_s1 + $0x428] sm:$0xf0] }
  0x6b   :  { %1284 = vmatpush.bf16.msrb.mxu3 %v1952_v22  ;;  %v1792_v22 = vor.u32 %v2175_v4, %v1789_v7  ;;  %v2243_v4 = vld [vmem:[%s3390_s1 + $0x444] sm:$0xf]  ;;  %v2061_v7 = vld [vmem:[%s3390_s1 + $0x448] sm:$0xf0] }
  0x6c   :  { %1228 = vmatpush.bf16.msrb.mxu0 %v1752_v26  ;;  %v1848_v26 = vor.u32 %v2189_v16, %v1845_v19  ;;  %v2223_v16 = vld [vmem:[%s3390_s1 + $0x3a4] sm:$0xf]  ;;  %v1981_v19 = vld [vmem:[%s3390_s1 + $0x3a8] sm:$0xf0] }
  0x6d   :  { %1247 = vmatpush.bf16.msrb.mxu1 %v1816_v33  ;;  %v1709_v33 = vld [vmem:[%s3390_s1 + $0x188] sm:$0xf0]  ;;  %v2239_v20 = vld [vmem:[%s3390_s1 + $0x424] sm:$0xf] }
  0x6e   :  { %1266 = vmatpush.bf16.msrb.mxu2 %v1880_v25  ;;  %v1781_v25 = vld [vmem:[%s3390_s1 + $0x218] sm:$0xf0] }
  0x6f   :  { %1285 = vmatpush.bf16.msrb.mxu3 %v1944_v48  ;;  %v2021_v48 = vld [vmem:[%s3390_s1 + $0x3f8] sm:$0xf0]  ;;  %v1784_v34 = vor.u32 %v2173_v24, %v1781_v25  ;;  %v2221_v24 = vld [vmem:[%s3390_s1 + $0x394] sm:$0xf] }
  0x70   :  { %1229 = vmatpush.bf16.msrb.mxu0 %v1744_v37  ;;  %v1773_v37 = vld [vmem:[%s3390_s1 + $0x208] sm:$0xf0]  ;;  %v1973_v25 = vld [vmem:[%s3390_s1 + $0x398] sm:$0xf0] }
  0x71   :  { %1248 = vmatpush.bf16.msrb.mxu1 %v1808_v42  ;;  %v2013_v42 = vld [vmem:[%s3390_s1 + $0x3e8] sm:$0xf0]  ;;  %v1976_v28 = vor.u32 %v2221_v24, %v1973_v25 }
  0x72   :  { %1267 = vmatpush.bf16.msrb.mxu2 %v1872_v36  ;;  %v2171_v36 = vld [vmem:[%s3390_s1 + $0x204] sm:$0xf] }
  0x73   :  { %1286 = vmatpush.bf16.msrb.mxu3 %v1936_v43  ;;  %1163 = vmatmul.bf16.gmra.mxu0 %v3177_v18  ;;  %v1776_v43 = vor.u32 %v2171_v36, %v1773_v37 }
  0x74   :  { %1230 = vmatpush.bf16.msrb.mxu0 %v1736_v49  ;;  %1182 = vmatmul.bf16.gmra.mxu1 %v2661_v44  ;;  %v2233_v44 = vld [vmem:[%s3390_s1 + $0x3f4] sm:$0xf]  ;;  %v2247_v49 = vld [vmem:[%s3390_s1 + $0x464] sm:$0xf] }
  0x75   :  { %1249 = vmatpush.bf16.msrb.mxu1 %v1800_v2  ;;  %1201 = vmatmul.bf16.gmra.mxu2 %v2672_v50  ;;  %v1840_v50 = vor.u32 %v2187_v30, %v1837_v31  ;;  %v2024_v38 = vor.u32 %v2233_v44, %v2021_v48  ;;  %v2080_v55 = vor.u32 %v2247_v49, %v2077_v52  ;;  %v2227_v2 = vld [vmem:[%s3390_s1 + $0x3c4] sm:$0xf]  ;;  %v1965_v31 = vld [vmem:[%s3390_s1 + $0x388] sm:$0xf0] }
  0x76   :  { %1268 = vmatpush.bf16.msrb.mxu2 %v1864_v47  ;;  %1220 = vmatmul.bf16.gmra.mxu3 %v2674_v51  ;;  %v1712_v51 = vor.u32 %v2155_v32, %v1709_v33  ;;  %v2016_v47 = vor.u32 %v2231_v41, %v2013_v42  ;;  %v2219_v30 = vld [vmem:[%s3390_s1 + $0x384] sm:$0xf]  ;;  %v2029_v33 = vld [vmem:[%s3390_s1 + $0x408] sm:$0xf0] }
  0x77   :  { %1287 = vmatpush.bf16.msrb.mxu3 %v1928_v3  ;;  %v1997_v3 = vld [vmem:[%s3390_s1 + $0x3c8] sm:$0xf0]  ;;  %v2235_v32 = vld [vmem:[%s3390_s1 + $0x404] sm:$0xf]  ;;  %v1968_v44 = vor.u32 %v2219_v30, %v1965_v31 }
  0x78   :  { %1231 = vmatpush.bf16.msrb.mxu0 %v1728_v11  ;;  %v1989_v11 = vld [vmem:[%s3390_s1 + $0x3b8] sm:$0xf0] }
  0x79   :  { %1250 = vmatpush.bf16.msrb.mxu1 %v1792_v22  ;;  %v1984_v22 = vor.u32 %v2223_v16, %v1981_v19 }
  0x7a   :  { %1269 = vmatpush.bf16.msrb.mxu2 %v1856_v10  ;;  %v2000_v10 = vor.u32 %v2227_v2, %v1997_v3 }
  0x7b   :  { %1288 = vmatpush.bf16.msrb.mxu3 %v1920_v23  ;;  %v2048_v23 = vor.u32 %v2239_v20, %v2045_v21 }
  0x7c   :  { %1232 = vmatpush.bf16.msrb.mxu0 %v1720_v27  ;;  %v2037_v27 = vld [vmem:[%s3390_s1 + $0x418] sm:$0xf0] }
  0x7d   :  { %1251 = vmatpush.bf16.msrb.mxu1 %v1784_v34 }
  0x7e   :  { %1270 = vmatpush.bf16.msrb.mxu2 %v1848_v26  ;;  %v2237_v26 = vld [vmem:[%s3390_s1 + $0x414] sm:$0xf] }
  0x7f   :  { %1289 = vmatpush.bf16.msrb.mxu3 %v1912_v35  ;;  %v2040_v29 = vor.u32 %v2237_v26, %v2037_v27 }
  0x80   :  { %1233 = vmatpush.bf16.msrb.mxu0 %v1712_v51 }
  0x81   :  { %1252 = vmatpush.bf16.msrb.mxu1 %v1776_v43 }
  0x82   :  { %1271 = vmatpush.bf16.msrb.mxu2 %v1840_v50 }
  0x83   :  { %1290 = vmatpush.bf16.msrb.mxu3 %v1904_v45  ;;  %1234 = vmatmul.bf16.vlgmr.msrb.gmra.mxu0 %v2550_v57  ;;  %v2064_v57 = vor.u32 %v2243_v4, %v2061_v7 }
  0x84   :  { %1302 = vmatpush.bf16.msra.mxu0 %v2024_v38  ;;  %1253 = vmatmul.bf16.vlgmr.msrb.gmra.mxu1 %v2817_v0  ;;  %v2225_v0 = vld [vmem:[%s3390_s1 + $0x3b4] sm:$0xf] }
  0x85   :  { %1321 = vmatpush.bf16.msra.mxu1 %v2088_v46  ;;  %1272 = vmatmul.bf16.vlgmr.msrb.gmra.mxu2 %v2819_v1  ;;  %v2241_v1 = vld [vmem:[%s3390_s1 + $0x434] sm:$0xf]  ;;  %v1992_v12 = vor.u32 %v2225_v0, %v1989_v11 }
  0x86   :  { %2251 = vmatpush.bf16.msra.mxu2 %v2024_v38  ;;  %1291 = vmatmul.bf16.vlgmr.msrb.gmra.mxu3 %v2830_v5  ;;  %v2053_v5 = vld [vmem:[%s3390_s1 + $0x438] sm:$0xf0] }
  0x87   :  { %2259 = vmatpush.bf16.msra.mxu3 %v2088_v46  ;;  %v2056_v15 = vor.u32 %v2241_v1, %v2053_v5 }
  0x88   :  { %1303 = vmatpush.bf16.msra.mxu0 %v2016_v47 }
  0x89   :  { %1322 = vmatpush.bf16.msra.mxu1 %v2080_v55 }
  0x8a   :  { %2252 = vmatpush.bf16.msra.mxu2 %v2016_v47 }
  0x8b   :  { %2260 = vmatpush.bf16.msra.mxu3 %v2080_v55 }
  0x8c   :  { %1304 = vmatpush.bf16.msra.mxu0 %v2008_v62 }
  0x8d   :  { %1323 = vmatpush.bf16.msra.mxu1 %v2072_v63 }
  0x8e   :  { %2253 = vmatpush.bf16.msra.mxu2 %v2008_v62 }
  0x8f   :  { %2261 = vmatpush.bf16.msra.mxu3 %v2072_v63 }
  0x90   :  { %1305 = vmatpush.bf16.msra.mxu0 %v2000_v10 }
  0x91   :  { %1324 = vmatpush.bf16.msra.mxu1 %v2064_v57 }
  0x92   :  { %2254 = vmatpush.bf16.msra.mxu2 %v2000_v10 }
  0x93   :  { %2262 = vmatpush.bf16.msra.mxu3 %v2064_v57  ;;  %1239 = vmatmul.bf16.gmra.mxu0 %v2682_v56  ;;  %v2032_v56 = vor.u32 %v2235_v32, %v2029_v33 }
  0x94   :  { %1306 = vmatpush.bf16.msra.mxu0 %v1992_v12  ;;  %1258 = vmatmul.bf16.gmra.mxu1 %v2949_v8 }
  0x95   :  { %1325 = vmatpush.bf16.msra.mxu1 %v2056_v15  ;;  %1277 = vmatmul.bf16.gmra.mxu2 %v2951_v9 }
  0x96   :  { %2255 = vmatpush.bf16.msra.mxu2 %v1992_v12  ;;  %1296 = vmatmul.bf16.gmra.mxu3 %v2962_v13 }
  0x97   :  { %2263 = vmatpush.bf16.msra.mxu3 %v2056_v15 }
  0x98   :  { %1307 = vmatpush.bf16.msra.mxu0 %v1984_v22 }
  0x99   :  { %1326 = vmatpush.bf16.msra.mxu1 %v2048_v23 }
  0x9a   :  { %2256 = vmatpush.bf16.msra.mxu2 %v1984_v22 }
  0x9b   :  { %2264 = vmatpush.bf16.msra.mxu3 %v2048_v23 }
  0x9c   :  { %1308 = vmatpush.bf16.msra.mxu0 %v1976_v28 }
  0x9d   :  { %1327 = vmatpush.bf16.msra.mxu1 %v2040_v29 }
  0x9e   :  { %2257 = vmatpush.bf16.msra.mxu2 %v1976_v28 }
  0x9f   :  { %2265 = vmatpush.bf16.msra.mxu3 %v2040_v29 }
  0xa0   :  { %1309 = vmatpush.bf16.msra.mxu0 %v1968_v44  ;;  %v1007_v8 = vpop.f32.mrf.mxu0 }
  0xa1   :  { %1328 = vmatpush.bf16.msra.mxu1 %v2032_v56  ;;  %v1026_v48 = vpop.f32.mrf.mxu1 }
  0xa2   :  { %2258 = vmatpush.bf16.msra.mxu2 %v1968_v44 }
  0xa3   :  { %2266 = vmatpush.bf16.msra.mxu3 %v2032_v56  ;;  %1310 = vmatmul.bf16.vlgmr.msra.gmra.mxu0 %v2832_v6 }
  0xa4   :  { %1329 = vmatmul.bf16.vlgmr.msra.gmra.mxu1 %v3069_v17 }
  0xa5   :  { %1315 = vmatmul.bf16.vlgmr.msra.gmra.mxu2 %v2964_v14  ;;  %v3339_v14 = vld [vmem:[%s3392_s2] sm:$0x3] }
  0xa6   :  { %1334 = vmatmul.bf16.vlgmr.msra.gmra.mxu3 %v3177_v18  ;;  %v182_v41 = vperm.slane %v3339_v14, 0 }
  0xa8   :  { %v1045_v9 = vpop.f32.mrf.mxu2  ;;  %v1009_v34 = vpop.f32.mrf.mxu0  ;;  %v1008_v42 = vadd.f32 %v1007_v8, %v182_v41 }
  0xa9   :  { %v1064_v13 = vpop.f32.mrf.mxu3  ;;  %v1028_v35 = vpop.f32.mrf.mxu1  ;;  %v1010_v61 = vadd.f32 %v1009_v34, %v182_v41 }
  0xaa   :  { %v1027_v49 = vadd.f32 %v1026_v48, %v1008_v42 }
  0xab   :  { %v1029_v63 = vadd.f32 %v1028_v35, %v1010_v61 }
  0xac   :  { %v1046_v52 = vadd.f32 %v1045_v9, %v1027_v49 }
  0xae   :  { %v1065_v62 = vadd.f32 %v1064_v13, %v1046_v52 }
  0xb0   :  { %v1047_v36 = vpop.f32.mrf.mxu2  ;;  %v1012_v51 = vpop.f32.mrf.mxu0 }
  0xb1   :  { %v1066_v50 = vpop.f32.mrf.mxu3  ;;  %v1031_v37 = vpop.f32.mrf.mxu1  ;;  %v1048_v3 = vadd.f32 %v1047_v36, %v1029_v63  ;;  %v1013_v4 = vadd.f32 %v1012_v51, %v182_v41 }
  0xb3   :  { %v1067_v1 = vadd.f32 %v1066_v50, %v1048_v3  ;;  %v1032_v5 = vadd.f32 %v1031_v37, %v1013_v4 }
  0xb8   :  { %v1050_v53 = vpop.f32.mrf.mxu2  ;;  %v1014_v38 = vpop.f32.mrf.mxu0 }
  0xb9   :  { %v1069_v54 = vpop.f32.mrf.mxu3  ;;  %v1033_v39 = vpop.f32.mrf.mxu1  ;;  %v1051_v16 = vadd.f32 %v1050_v53, %v1032_v5  ;;  %v1015_v24 = vadd.f32 %v1014_v38, %v182_v41 }
  0xbb   :  { %v1070_v27 = vadd.f32 %v1069_v54, %v1051_v16  ;;  %v1034_v30 = vadd.f32 %v1033_v39, %v1015_v24  ;;  %v183_v16 = vperm.slane %v3339_v14, 1 }
  0xc0   :  { %v1052_v40 = vpop.f32.mrf.mxu2  ;;  %v1083_v17 = vpop.f32.mrf.mxu0 }
  0xc1   :  { %v1071_v6 = vpop.f32.mrf.mxu3  ;;  %v1102_v18 = vpop.f32.mrf.mxu1  ;;  %v1084_v2 = vadd.f32 %v1083_v17, %v1065_v62  ;;  %v1053_v32 = vadd.f32 %v1052_v40, %v1034_v30 }
  0xc3   :  { %v1103_v11 = vadd.f32 %v1102_v18, %v1084_v2  ;;  %v1072_v34 = vadd.f32 %v1071_v6, %v1053_v32 }
  0xc8   :  { %v1121_v43 = vpop.f32.mrf.mxu2  ;;  %v1085_v46 = vpop.f32.mrf.mxu0 }
  0xc9   :  { %v1140_v45 = vpop.f32.mrf.mxu3  ;;  %v1104_v47 = vpop.f32.mrf.mxu1  ;;  %v1122_v12 = vadd.f32 %v1121_v43, %v1103_v11  ;;  %v1086_v15 = vadd.f32 %v1085_v46, %v1067_v1 }
  0xcb   :  { %v1141_v19 = vadd.f32 %v1140_v45, %v1122_v12  ;;  %v1105_v25 = vadd.f32 %v1104_v47, %v1086_v15 }
  0xd0   :  { %v1123_v55 = vpop.f32.mrf.mxu2  ;;  %v1088_v59 = vpop.f32.mrf.mxu0 }
  0xd1   :  { %v1142_v58 = vpop.f32.mrf.mxu3  ;;  %v1107_v60 = vpop.f32.mrf.mxu1  ;;  %v1124_v28 = vadd.f32 %v1123_v55, %v1105_v25  ;;  %v1089_v31 = vadd.f32 %v1088_v59, %v1070_v27 }
  0xd3   :  { %v1143_v33 = vadd.f32 %v1142_v58, %v1124_v28  ;;  %v1108_v9 = vadd.f32 %v1107_v60, %v1089_v31 }
  0xd8   :  { %v1126_v7 = vpop.f32.mrf.mxu2  ;;  %v1090_v57 = vpop.f32.mrf.mxu0 }
  0xd9   :  { %v1145_v10 = vpop.f32.mrf.mxu3  ;;  %v1109_v0 = vpop.f32.mrf.mxu1  ;;  %v1127_v35 = vadd.f32 %v1126_v7, %v1108_v9  ;;  %v1091_v50 = vadd.f32 %v1090_v57, %v1072_v34 }
  0xdb   :  { %v1146_v54 = vadd.f32 %v1145_v10, %v1127_v35  ;;  %v1110_v41 = vadd.f32 %v1109_v0, %v1091_v50 }
  0xe0   :  { %v1128_v20 = vpop.f32.mrf.mxu2  ;;  %v1159_v22 = vpop.f32.mrf.mxu0 }
  0xe1   :  { %v1147_v21 = vpop.f32.mrf.mxu3  ;;  %v3342_v23 = vpop.f32.mrf.mxu1  ;;  %v1160_v26 = vadd.f32 %v1159_v22, %v1141_v19  ;;  %v1129_v6 = vadd.f32 %v1128_v20, %v1110_v41 }
  0xe2   :  { %v1179_v27 = vadd.f32 %v3342_v23, %v183_v16 }
  0xe3   :  { %v1340_v29 = vmax.f32 %v1160_v26, 0.0  ;;  %v1148_v47 = vadd.f32 %v1147_v21, %v1129_v6 }
  0xe5   :  { %1348 = vst [vmem:[%s3393_s3] sm:$0xff] %v1340_v29  ;;  %v1397_v51 = vmul.f32 %v1340_v29, %v1340_v29 }
  0xe8   :  { %v3347_v44 = vpop.f32.mrf.mxu2  ;;  %v1161_v8 = vpop.f32.mrf.mxu0 }
  0xe9   :  { %v3349_v56 = vpop.f32.mrf.mxu3  ;;  %v3351_v48 = vpop.f32.mrf.mxu1  ;;  %v1162_v13 = vadd.f32 %v1161_v8, %v1143_v33  ;;  %v1198_v31 = vadd.f32 %v3347_v44, %v1179_v27 }
  0xea   :  { %v1181_v34 = vadd.f32 %v3351_v48, %v183_v16 }
  0xeb   :  { %v1342_v36 = vmax.f32 %v1162_v13, 0.0  ;;  %v1217_v13 = vadd.f32 %v3349_v56, %v1198_v31 }
  0xed   :  { %1350 = vst [vmem:[%s3393_s3 + $0x10] sm:$0xff] %v1342_v36  ;;  %v1379_v37 = vadd.f32 %v1342_v36, %v1340_v29  ;;  %v1399_v53 = vmul.f32 %v1342_v36, %v1342_v36 }
  0xef   :  { %v1405_v38 = vadd.f32 %v1399_v53, %v1397_v51 }
  0xf0   :  { %v1199_v39 = vpop.f32.mrf.mxu2  ;;  %v1164_v17 = vpop.f32.mrf.mxu0 }
  0xf1   :  { %v3356_v40 = vpop.f32.mrf.mxu3  ;;  %v1183_v18 = vpop.f32.mrf.mxu1  ;;  %v1165_v42 = vadd.f32 %v1164_v17, %v1146_v54  ;;  %v1200_v50 = vadd.f32 %v1199_v39, %v1181_v34 }
  0xf2   :  { %v1184_v9 = vadd.f32 %v1183_v18, %v183_v16 }
  0xf3   :  { %v1344_v43 = vmax.f32 %v1165_v42, 0.0  ;;  %v1219_v44 = vadd.f32 %v3356_v40, %v1200_v50 }
  0xf5   :  { %1352 = vst [vmem:[%s3393_s3 + $0x20] sm:$0xff] %v1344_v43  ;;  %v1380_v45 = vadd.f32 %v1379_v37, %v1344_v43  ;;  %v1401_v46 = vmul.f32 %v1344_v43, %v1344_v43 }
  0xf7   :  { %v1406_v49 = vadd.f32 %v1405_v38, %v1401_v46 }
  0xf8   :  { %v1202_v52 = vpop.f32.mrf.mxu2  ;;  %v1166_v58 = vpop.f32.mrf.mxu0 }
  0xf9   :  { %v1221_v55 = vpop.f32.mrf.mxu3  ;;  %v1185_v59 = vpop.f32.mrf.mxu1  ;;  %v1167_v60 = vadd.f32 %v1166_v58, %v1148_v47  ;;  %v1203_v36 = vadd.f32 %v1202_v52, %v1184_v9 }
  0xfa   :  { %v1186_v41 = vadd.f32 %v1185_v59, %v183_v16 }
  0xfb   :  { %v1346_v61 = vmax.f32 %v1167_v60, 0.0  ;;  %v1222_v38 = vadd.f32 %v1221_v55, %v1203_v36 }
  0xfd   :  { %1354 = vst [vmem:[%s3393_s3 + $0x30] sm:$0xff] %v1346_v61  ;;  %v1381_v62 = vadd.f32 %v1380_v45, %v1346_v61  ;;  %v1403_v63 = vmul.f32 %v1346_v61, %v1346_v61 }
  0xff   :  { %v1382_v2 = vrot.slane %v1381_v62, 4  ;;  %v1407_v3 = vadd.f32 %v1406_v49, %v1403_v63 }
 0x100   :  { %v1204_v4 = vpop.f32.mrf.mxu2  ;;  %v1235_v10 = vpop.f32.mrf.mxu0 }
 0x101   :  { %v1223_v7 = vpop.f32.mrf.mxu3  ;;  %v1254_v57 = vpop.f32.mrf.mxu1  ;;  %v1383_v0 = vadd.f32 %v1382_v2, %v1381_v62  ;;  %v1408_v11 = vrot.slane %v1407_v3, 4  ;;  %v1236_v35 = vadd.f32 %v1235_v10, %v1217_v13  ;;  %v1205_v18 = vadd.f32 %v1204_v4, %v1186_v41 }
 0x103   :  { %v1384_v1 = vrot.slane %v1383_v0, 2  ;;  %v1409_v5 = vadd.f32 %v1408_v11, %v1407_v3  ;;  %v1255_v54 = vadd.f32 %v1254_v57, %v1236_v35  ;;  %v1224_v52 = vadd.f32 %v1223_v7, %v1205_v18 }
 0x105   :  { %v1385_v12 = vadd.f32 %v1384_v1, %v1383_v0  ;;  %v1410_v15 = vrot.slane %v1409_v5, 2 }
 0x107   :  { %v1386_v19 = vrot.slane %v1385_v12, 1  ;;  %v1411_v20 = vadd.f32 %v1410_v15, %v1409_v5 }
 0x108   :  { %v1273_v21 = vpop.f32.mrf.mxu2  ;;  %v1237_v24 = vpop.f32.mrf.mxu0 }
 0x109   :  { %v1292_v22 = vpop.f32.mrf.mxu3  ;;  %v1256_v25 = vpop.f32.mrf.mxu1  ;;  %v1412_v26 = vrot.slane %v1411_v20, 1  ;;  %v1387_v28 = vadd.f32 %v1386_v19, %v1385_v12  ;;  %v1274_v17 = vadd.f32 %v1273_v21, %v1255_v54  ;;  %v1238_v6 = vadd.f32 %v1237_v24, %v1219_v44 }
 0x10b   :  { %v1413_v29 = vadd.f32 %v1412_v26, %v1411_v20  ;;  %v1293_v43 = vadd.f32 %v1292_v22, %v1274_v17  ;;  %v1257_v39 = vadd.f32 %v1256_v25, %v1238_v6 }
 0x10d   :  { %v3367_v30 = vsel %vm1423_vm0, %v1387_v28, %v1413_v29 }
 0x110   :  { %v1275_v32 = vpop.f32.mrf.mxu2  ;;  %v1240_v14 = vpop.f32.mrf.mxu0 }
 0x111   :  { %v1294_v33 = vpop.f32.mrf.mxu3  ;;  %v1259_v8 = vpop.f32.mrf.mxu1  ;;  %v1241_v42 = vadd.f32 %v1240_v14, %v1222_v38  ;;  %v1276_v60 = vadd.f32 %v1275_v32, %v1257_v39 }
 0x113   :  { %v1260_v48 = vadd.f32 %v1259_v8, %v1241_v42  ;;  %v1295_v63 = vadd.f32 %v1294_v33, %v1276_v60 }
 0x118   :  { %v1278_v23 = vpop.f32.mrf.mxu2  ;;  %v1242_v37 = vpop.f32.mrf.mxu0 }
 0x119   :  { %v1297_v51 = vpop.f32.mrf.mxu3  ;;  %v1261_v53 = vpop.f32.mrf.mxu1  ;;  %v1279_v58 = vadd.f32 %v1278_v23, %v1260_v48  ;;  %v1243_v55 = vadd.f32 %v1242_v37, %v1224_v52 }
 0x11b   :  { %v1298_v40 = vadd.f32 %v1297_v51, %v1279_v58  ;;  %v1262_v3 = vadd.f32 %v1261_v53, %v1243_v55 }
 0x120   :  { %v1280_v56 = vpop.f32.mrf.mxu2  ;;  %v1311_v46 = vpop.f32.mrf.mxu0 }
 0x121   :  { %v1299_v45 = vpop.f32.mrf.mxu3  ;;  %v1330_v47 = vpop.f32.mrf.mxu1  ;;  %v1312_v49 = vadd.f32 %v1311_v46, %v1293_v43  ;;  %v1281_v0 = vadd.f32 %v1280_v56, %v1262_v3 }
 0x123   :  { %v1331_v61 = vadd.f32 %v1330_v47, %v1312_v49  ;;  %v1300_v15 = vadd.f32 %v1299_v45, %v1281_v0 }
 0x125   :  { %v1341_v62 = vmax.f32 %v1331_v61, 0.0 }
 0x127   :  { %1349 = vst [vmem:[%s3393_s3 + $0x8] sm:$0xff] %v1341_v62  ;;  %v1398_v20 = vmul.f32 %v1341_v62, %v1341_v62 }
 0x128   :  { %v1316_v59 = vpop.f32.mrf.mxu2  ;;  %v1313_v10 = vpop.f32.mrf.mxu0 }
 0x129   :  { %v1335_v2 = vpop.f32.mrf.mxu3  ;;  %v1317_v4 = vadd.f32 %v1316_v59, %v1298_v40  ;;  %v1314_v57 = vadd.f32 %v1313_v10, %v1295_v63  ;;  %v1332_v7 = vpop.f32.mrf.mxu1 }
 0x12b   :  { %v1336_v11 = vadd.f32 %v1335_v2, %v1317_v4  ;;  %v1333_v1 = vadd.f32 %v1332_v7, %v1314_v57 }
 0x12d   :  { %v1345_v5 = vmax.f32 %v1336_v11, 0.0  ;;  %v1343_v12 = vmax.f32 %v1333_v1, 0.0 }
 0x12f   :  { %1353 = vst [vmem:[%s3393_s3 + $0x28] sm:$0xff] %v1345_v5  ;;  %v1400_v16 = vmul.f32 %v1343_v12, %v1343_v12  ;;  %v1388_v21 = vadd.f32 %v1343_v12, %v1341_v62  ;;  %v1402_v27 = vmul.f32 %v1345_v5, %v1345_v5 }
 0x130   :  { %1351 = vst [vmem:[%s3393_s3 + $0x18] sm:$0xff] %v1343_v12  ;;  %v1318_v19 = vpop.f32.mrf.mxu2 }
 0x131   :  { %v1319_v22 = vadd.f32 %v1318_v19, %v1300_v15  ;;  %v1337_v24 = vpop.f32.mrf.mxu3  ;;  %v1414_v25 = vadd.f32 %v1400_v16, %v1398_v20  ;;  %v1389_v29 = vadd.f32 %v1388_v21, %v1345_v5 }
 0x133   :  { %v1338_v26 = vadd.f32 %v1337_v24, %v1319_v22  ;;  %v1415_v33 = vadd.f32 %v1414_v25, %v1402_v27 }
 0x135   :  { %v1347_v28 = vmax.f32 %v1338_v26, 0.0 }
 0x137   :  { %1355 = vst [vmem:[%s3393_s3 + $0x38] sm:$0xff] %v1347_v28  ;;  %v1390_v31 = vadd.f32 %v1389_v29, %v1347_v28  ;;  %v1404_v32 = vmul.f32 %v1347_v28, %v1347_v28 }
 0x139   :  { %v1391_v14 = vrot.slane %v1390_v31, 4  ;;  %v1416_v8 = vadd.f32 %v1415_v33, %v1404_v32 }
 0x13b   :  { %v1392_v9 = vadd.f32 %v1391_v14, %v1390_v31  ;;  %v1417_v13 = vrot.slane %v1416_v8, 4 }
 0x13d   :  { %v1393_v34 = vrot.slane %v1392_v9, 2  ;;  %v1418_v35 = vadd.f32 %v1417_v13, %v1416_v8 }
 0x13f   :  { %v1394_v36 = vadd.f32 %v1393_v34, %v1392_v9  ;;  %v1419_v50 = vrot.slane %v1418_v35, 2 }
 0x141   :  { %v1395_v23 = vrot.slane %v1394_v36, 1  ;;  %v1420_v51 = vadd.f32 %v1419_v50, %v1418_v35 }
 0x143   :  { %v1421_v37 = vrot.slane %v1420_v51, 1  ;;  %v1396_v53 = vadd.f32 %v1395_v23, %v1394_v36 }
 0x145   :  { %v1422_v54 = vadd.f32 %v1421_v37, %v1420_v51 }
 0x147   :  { %v1425_v38 = vsel %vm1423_vm0, %v1396_v53, %v1422_v54 }
 0x148   :  { %v1428_v44 = vrot.slane %v1425_v38, 6 }
 0x14a   :  { %v1430_v17 = vsel %vm1429_vm1, %v3367_v30, %v1428_v44 }
 0x14b   :  { %1432 = vst [vmem:[%s3394_s4] sm:$0xf] %v1430_v17 }

// kernel: completion_forward.58
= control target key start
LH: loop header
LB: loop body
LE: loop exit
PB: predicated region body
PF: predicated region fallthrough
CT: control target
= control target key end

     0   :  { %s124_s0 = inlined_call_operand.vmem [shape: f32[32,256], index: 0, kind: input, shape index: {}]   ;;  %s125_s1 = inlined_call_operand.vmem [shape: f32[1,256], index: 1, kind: input, shape index: {}]   ;;  %s126_s2 = inlined_call_operand.vmem [shape: f32[1,256], index: 2, kind: input, shape index: {}]   ;;  %s127_s3 = inlined_call_operand.vmem [shape: bf16[32,256], index: 3, kind: output, shape index: {}]  }
   0x1   :  { %v14_v0 = vld [vmem:[%s124_s0] sm:$0xff]  ;;  %v15_v1 = vld [vmem:[%s124_s0 + $0x8] sm:$0xff]  ;;  %v16_v6 = vld [vmem:[%s124_s0 + $0x10] sm:$0xff] }
   0x2   :  { %v22_v2 = vld [vmem:[%s125_s1] sm:$0x3]  ;;  %v17_v7 = vld [vmem:[%s124_s0 + $0x18] sm:$0xff]  ;;  %v19_v11 = vld [vmem:[%s124_s0 + $0x28] sm:$0xff] }
   0x3   :  { %v24_v3 = vperm.slane %v22_v2, 0  ;;  %v25_v4 = vperm.slane %v22_v2, 1  ;;  %v36_v5 = vld [vmem:[%s126_s2] sm:$0x3]  ;;  %v20_v12 = vld [vmem:[%s124_s0 + $0x30] sm:$0xff]  ;;  %v21_v17 = vld [vmem:[%s124_s0 + $0x38] sm:$0xff] }
   0x4   :  { %v38_v8 = vperm.slane %v36_v5, 0  ;;  %v39_v9 = vperm.slane %v36_v5, 1  ;;  %v18_v10 = vld [vmem:[%s124_s0 + $0x20] sm:$0xff] }
   0x5   :  { %v28_v13 = vmul.f32 %v24_v3, %v14_v0  ;;  %v29_v14 = vmul.f32 %v25_v4, %v15_v1  ;;  %v30_v15 = vmul.f32 %v24_v3, %v16_v6  ;;  %v31_v16 = vmul.f32 %v25_v4, %v17_v7 }
   0x6   :  { %v32_v18 = vmul.f32 %v24_v3, %v18_v10  ;;  %v33_v19 = vmul.f32 %v25_v4, %v19_v11  ;;  %v34_v20 = vmul.f32 %v24_v3, %v20_v12  ;;  %v35_v21 = vmul.f32 %v25_v4, %v21_v17 }
   0x7   :  { %v42_v22 = vadd.f32 %v38_v8, %v28_v13  ;;  %v43_v23 = vadd.f32 %v39_v9, %v29_v14  ;;  %v44_v24 = vadd.f32 %v38_v8, %v30_v15  ;;  %v45_v25 = vadd.f32 %v39_v9, %v31_v16 }
   0x8   :  { %v46_v26 = vadd.f32 %v38_v8, %v32_v18  ;;  %v47_v27 = vadd.f32 %v39_v9, %v33_v19  ;;  %v48_v28 = vadd.f32 %v38_v8, %v34_v20  ;;  %v49_v29 = vadd.f32 %v39_v9, %v35_v21 }
   0x9   :  { %v50_v30 = vpack.c.bf16 %v43_v23, %v42_v22  ;;  %v51_v31 = vpack.c.bf16 %v45_v25, %v44_v24 }
   0xa   :  { %v52_v32 = vpack.c.bf16 %v47_v27, %v46_v26  ;;  %v53_v33 = vpack.c.bf16 %v49_v29, %v48_v28 }
   0xb   :  { %54 = vst [vmem:[%s127_s3] sm:$0xff] %v50_v30 }
   0xc   :  { %55 = vst [vmem:[%s127_s3 + $0x8] sm:$0xff] %v51_v31 }
   0xd   :  { %56 = vst [vmem:[%s127_s3 + $0x10] sm:$0xff] %v52_v32 }
   0xe   :  { %57 = vst [vmem:[%s127_s3 + $0x18] sm:$0xff] %v53_v33 }

// kernel: tile.48
= control target key start
LH: loop header
LB: loop body
LE: loop exit
PB: predicated region body
PF: predicated region fallthrough
CT: control target
= control target key end

     0   :  { %s22_s0 = inlined_call_operand.vmem [shape: f32[32], index: 0, kind: input, shape index: {}]   ;;  %s23_s1 = inlined_call_operand.vmem [shape: f32[4,32], index: 1, kind: output, shape index: {}]  }
   0x1   :  { %v4_v0 = vld [vmem:[%s22_s0] ss:$0 sm:$0xff] }
   0x2   :  { %5 = vst [vmem:[%s23_s1] sm:$0xf] %v4_v0 }

// kernel: completion_forward.63
= control target key start
LH: loop header
LB: loop body
LE: loop exit
PB: predicated region body
PF: predicated region fallthrough
CT: control target
= control target key end

     0   :  { %s1829_s15 = smov 0   ;;  %s2383_s0 = inlined_call_operand.vmem [shape: bf16[512,384], index: 0, kind: input, shape index: {}]   ;;  %s2384_s1 = inlined_call_operand.vmem [shape: bf16[384,128], index: 1, kind: input, shape index: {}]   ;;  %s2385_s2 = inlined_call_operand.vmem [shape: f32[1,128], index: 2, kind: input, shape index: {}]   ;;  %s2386_s3 = inlined_call_operand.vmem [shape: f32[512,128], index: 3, kind: output, shape index: {0}]   ;;  %s2387_s4 = inlined_call_operand.vmem [shape: f32[2,2,128], index: 4, kind: output, shape index: {1}]  }
   0x1 LB: > { %s1835_s16 = sadd.s32 4294967295, %s1802_s15   ;;  %p1393_p0 = scmp.ge.s32.totalorder %s1802_s15, 1  ;;  %s1802_s15 = sphi %s1829_s15, %s15_s15  }
   0x2   : > { %p167_p1 = scmp.lt.s32.totalorder %s1802_s15, 3 }
   0x4   : > { %p168_p2 = pnand %p1393_p0, %p167_p1 }
   0x5   : > { %s1394_s9 = sshll.u32 (!%p168_p2), %s1835_s16, 5  ;;  %s1687_s25 = sshll.u32 (!%p168_p2), %s1835_s16, 8 }
   0x6   : > { %171 = sbr.rel (%p168_p2) target bundleno = 400 (0x190), region = 32  ;;  %p199_p3 = scmp.lt.s32.totalorder (!%p168_p2), %s1394_s9, 63 }
   0x7   : > { %p211_p4 = scmp.lt.s32.totalorder (!%p168_p2), %s1835_s16, 1 }
   0xb   : > { %v1745_v0 = vld [vmem:[%s2384_s1 + $0x38] sm:$0xff]  ;;  %v1744_v3 = vld [vmem:[%s2384_s1 + $0x30] sm:$0xff]  ;;  %v1743_v6 = vld [vmem:[%s2384_s1 + $0x28] sm:$0xff]  ;;  %s2389_s9 = smov (!%p199_p3, %s1394_s9), 63  ;;  %s2391_s16 = smov (!%p211_p4, %s1835_s16), 1 }
   0xc   : > { %v1845_v1 = vld [vmem:[%s2384_s1 + $0x78] sm:$0xff]  ;;  %731 = vmatpush.bf16.msra.mxu0 %v1745_v0  ;;  %1762 = vmatpush.bf16.msra.mxu3 %v1745_v0  ;;  %v1860_v4 = vld [vmem:[%s2384_s1 + $0x70] sm:$0xff]  ;;  %v1875_v7 = vld [vmem:[%s2384_s1 + $0x68] sm:$0xff]  ;;  %s1786_s26 = smul.u32 12, %s2389_s9 }
   0xd   : > { %v1850_v2 = vld [vmem:[%s2384_s1 + $0xb8] sm:$0xff]  ;;  %820 = vmatpush.bf16.msra.mxu1 %v1845_v1  ;;  %v1865_v5 = vld [vmem:[%s2384_s1 + $0xb0] sm:$0xff]  ;;  %v1880_v8 = vld [vmem:[%s2384_s1 + $0xa8] sm:$0xff] }
   0xe   : > { %909 = vmatpush.bf16.msra.mxu2 %v1850_v2  ;;  %v1742_v9 = vld [vmem:[%s2384_s1 + $0x20] sm:$0xff]  ;;  %v1741_v12 = vld [vmem:[%s2384_s1 + $0x18] sm:$0xff]  ;;  %v1740_v15 = vld [vmem:[%s2384_s1 + $0x10] sm:$0xff]  ;;  %s1932_s10 = scalar_lea.vmem %s2383_s0, %s1786_s26  ;;  %s1397_s26 = sshll.u32 %s2389_s9, 3 }
   0xf   : > { %v1891_v10 = vld [vmem:[%s2384_s1 + $0x60] sm:$0xff]  ;;  %v1749_v13 = vld [vmem:[%s2384_s1 + $0x58] sm:$0xff]  ;;  %v1748_v16 = vld [vmem:[%s2384_s1 + $0x50] sm:$0xff]  ;;  %s2057_s29 = scalar_lea.vmem %s2386_s3, %s1397_s26  ;;  %s1398_s9 = sshll.u32 %s2391_s16, 1 }
  0x10   : > { %732 = vmatpush.bf16.msra.mxu0 %v1744_v3  ;;  %1763 = vmatpush.bf16.msra.mxu3 %v1744_v3  ;;  %v1896_v11 = vld [vmem:[%s2384_s1 + $0xa0] sm:$0xff]  ;;  %v1911_v14 = vld [vmem:[%s2384_s1 + $0x98] sm:$0xff]  ;;  %v1924_v17 = vld [vmem:[%s2384_s1 + $0x90] sm:$0xff]  ;;  %s214_s6 = scalar_lea.vmem %s2387_s4, %s1398_s9 }
  0x11   : > { %821 = vmatpush.bf16.msra.mxu1 %v1860_v4  ;;  %v1739_v18 = vld [vmem:[%s2384_s1 + $0x8] sm:$0xff]  ;;  %v1738_v21 = vld [vmem:[%s2384_s1] sm:$0xff]  ;;  %v1403_v29 = vld [vmem:[%s1932_s10 + $0xc] sm:$0xf0] }
  0x12   : > { %910 = vmatpush.bf16.msra.mxu2 %v1865_v5  ;;  %v1747_v19 = vld [vmem:[%s2384_s1 + $0x48] sm:$0xff]  ;;  %v1746_v22 = vld [vmem:[%s2384_s1 + $0x40] sm:$0xff]  ;;  %v1692_v31 = vld [vmem:[%s1932_s10 + $0x10] sm:$0xf0] }
  0x13   : > { %v1941_v20 = vld [vmem:[%s2384_s1 + $0x88] sm:$0xff]  ;;  %v1952_v23 = vld [vmem:[%s2384_s1 + $0x80] sm:$0xff]  ;;  %v1413_v36 = vld [vmem:[%s1932_s10 + $0x18] sm:$0xf] }
  0x14   : > { %733 = vmatpush.bf16.msra.mxu0 %v1743_v6  ;;  %1764 = vmatpush.bf16.msra.mxu3 %v1743_v6  ;;  %v1401_v24 = vld [vmem:[%s1932_s10] sm:$0xf]  ;;  %v1691_v25 = vld [vmem:[%s1932_s10 + $0x8] sm:$0xf0]  ;;  %v1690_v28 = vld [vmem:[%s1932_s10 + $0x4] sm:$0xf] }
  0x15   : > { %822 = vmatpush.bf16.msra.mxu1 %v1875_v7  ;;  %v1545_v26 = vld [vmem:[%s1932_s10 + $0x120] sm:$0xf]  ;;  %v1727_v27 = vld [vmem:[%s1932_s10 + $0x128] sm:$0xf0]  ;;  %v1409_v30 = vld [vmem:[%s1932_s10 + $0x8] sm:$0xf]  ;;  %v1402_v32 = vor.u32 %v1691_v25, %v1401_v24  ;;  %v1406_v34 = vor.u32 %v1690_v28, %v1403_v29 }
  0x16   : > { %911 = vmatpush.bf16.msra.mxu2 %v1880_v8  ;;  %v1546_v33 = vor.u32 %v1727_v27, %v1545_v26  ;;  %v1410_v35 = vor.u32 %v1692_v31, %v1409_v30  ;;  %v1694_v37 = vld [vmem:[%s1932_s10 + $0x20] sm:$0xf0]  ;;  %v1557_v38 = vld [vmem:[%s1932_s10 + $0x138] sm:$0xf]  ;;  %v1693_v40 = vld [vmem:[%s1932_s10 + $0x1c] sm:$0xf] }
  0x17   : > { %v1730_v39 = vld [vmem:[%s1932_s10 + $0x140] sm:$0xf0]  ;;  %v1415_v41 = vld [vmem:[%s1932_s10 + $0x24] sm:$0xf0]  ;;  %v1421_v42 = vld [vmem:[%s1932_s10 + $0x20] sm:$0xf]  ;;  %v1414_v44 = vor.u32 %v1694_v37, %v1413_v36 }
  0x18   : > { %734 = vmatpush.bf16.msra.mxu0 %v1742_v9  ;;  %1765 = vmatpush.bf16.msra.mxu3 %v1742_v9  ;;  %v1695_v43 = vld [vmem:[%s1932_s10 + $0x28] sm:$0xf0]  ;;  %v1558_v45 = vor.u32 %v1730_v39, %v1557_v38  ;;  %v1418_v46 = vor.u32 %v1693_v40, %v1415_v41  ;;  %v1425_v48 = vld [vmem:[%s1932_s10 + $0x30] sm:$0xf]  ;;  %v1697_v49 = vld [vmem:[%s1932_s10 + $0x38] sm:$0xf0] }
  0x19   : > { %823 = vmatpush.bf16.msra.mxu1 %v1891_v10  ;;  %v1422_v47 = vor.u32 %v1695_v43, %v1421_v42  ;;  %v1569_v50 = vld [vmem:[%s1932_s10 + $0x150] sm:$0xf]  ;;  %v1733_v51 = vld [vmem:[%s1932_s10 + $0x158] sm:$0xf0]  ;;  %v1696_v52 = vld [vmem:[%s1932_s10 + $0x34] sm:$0xf]  ;;  %v1426_v56 = vor.u32 %v1697_v49, %v1425_v48 }
  0x1a   : > { %912 = vmatpush.bf16.msra.mxu2 %v1896_v11  ;;  %v1427_v53 = vld [vmem:[%s1932_s10 + $0x3c] sm:$0xf0]  ;;  %v1433_v54 = vld [vmem:[%s1932_s10 + $0x38] sm:$0xf]  ;;  %v1698_v55 = vld [vmem:[%s1932_s10 + $0x40] sm:$0xf0]  ;;  %v1570_v57 = vor.u32 %v1733_v51, %v1569_v50 }
  0x1b   : > { %v1430_v58 = vor.u32 %v1696_v52, %v1427_v53  ;;  %v1434_v59 = vor.u32 %v1698_v55, %v1433_v54  ;;  %v1437_v60 = vld [vmem:[%s1932_s10 + $0x48] sm:$0xf]  ;;  %v1700_v61 = vld [vmem:[%s1932_s10 + $0x50] sm:$0xf0]  ;;  %v1699_v0 = vld [vmem:[%s1932_s10 + $0x4c] sm:$0xf] }
  0x1c   : > { %735 = vmatpush.bf16.msra.mxu0 %v1741_v12  ;;  %1766 = vmatpush.bf16.msra.mxu3 %v1741_v12  ;;  %v1581_v62 = vld [vmem:[%s1932_s10 + $0x168] sm:$0xf]  ;;  %v1736_v63 = vld [vmem:[%s1932_s10 + $0x170] sm:$0xf0]  ;;  %v1701_v3 = vld [vmem:[%s1932_s10 + $0x58] sm:$0xf0] }
  0x1d   : > { %824 = vmatpush.bf16.msra.mxu1 %v1749_v13  ;;  %v1703_v9 = vld [vmem:[%s1932_s10 + $0x68] sm:$0xf0]  ;;  %v1547_v12 = vld [vmem:[%s1932_s10 + $0x12c] sm:$0xf0]  ;;  %v1729_v24 = vld [vmem:[%s1932_s10 + $0x13c] sm:$0xf] }
  0x1e   : > { %913 = vmatpush.bf16.msra.mxu2 %v1911_v14  ;;  %v1559_v25 = vld [vmem:[%s1932_s10 + $0x144] sm:$0xf0]  ;;  %v1469_v26 = vld [vmem:[%s1932_s10 + $0x80] sm:$0xf]  ;;  %v1707_v27 = vld [vmem:[%s1932_s10 + $0x88] sm:$0xf0] }
  0x1f   : > { %v1562_v29 = vor.u32 %v1729_v24, %v1559_v25  ;;  %v1470_v31 = vor.u32 %v1707_v27, %v1469_v26  ;;  %v1571_v36 = vld [vmem:[%s1932_s10 + $0x15c] sm:$0xf0]  ;;  %v1481_v38 = vld [vmem:[%s1932_s10 + $0x98] sm:$0xf]  ;;  %v1710_v39 = vld [vmem:[%s1932_s10 + $0xa0] sm:$0xf0] }
  0x20   : > { %736 = vmatpush.bf16.msra.mxu0 %v1740_v15  ;;  %1767 = vmatpush.bf16.msra.mxu3 %v1740_v15  ;;  %v1704_v15 = vld [vmem:[%s1932_s10 + $0x70] sm:$0xf0]  ;;  %v1475_v37 = vld [vmem:[%s1932_s10 + $0x9c] sm:$0xf0]  ;;  %v1482_v43 = vor.u32 %v1710_v39, %v1481_v38  ;;  %v1583_v48 = vld [vmem:[%s1932_s10 + $0x174] sm:$0xf0] }
  0x21   : > { %825 = vmatpush.bf16.msra.mxu1 %v1748_v16  ;;  %v1487_v49 = vld [vmem:[%s1932_s10 + $0xb4] sm:$0xf0]  ;;  %v1493_v50 = vld [vmem:[%s1932_s10 + $0xb0] sm:$0xf]  ;;  %v1713_v51 = vld [vmem:[%s1932_s10 + $0xb8] sm:$0xf0] }
  0x22   : > { %914 = vmatpush.bf16.msra.mxu2 %v1924_v17  ;;  %v1494_v55 = vor.u32 %v1713_v51, %v1493_v50  ;;  %v1717_v24 = vld [vmem:[%s1932_s10 + $0xdc] sm:$0xf]  ;;  %v1565_v25 = vld [vmem:[%s1932_s10 + $0x140] sm:$0xf]  ;;  %v1511_v27 = vld [vmem:[%s1932_s10 + $0xe4] sm:$0xf0] }
  0x24   : > { %737 = vmatpush.bf16.msra.mxu0 %v1739_v18  ;;  %1768 = vmatpush.bf16.msra.mxu3 %v1739_v18 }
  0x25   : > { %826 = vmatpush.bf16.msra.mxu1 %v1747_v19 }
  0x26   : > { %915 = vmatpush.bf16.msra.mxu2 %v1941_v20 }
  0x28   : > { %738 = vmatpush.bf16.msra.mxu0 %v1738_v21  ;;  %1769 = vmatpush.bf16.msra.mxu3 %v1738_v21  ;;  %v1706_v21 = vld [vmem:[%s1932_s10 + $0x80] sm:$0xf0] }
  0x29   : > { %827 = vmatpush.bf16.msra.mxu1 %v1746_v22 }
  0x2a   : > { %916 = vmatpush.bf16.msra.mxu2 %v1952_v23 }
  0x2b   : > { %739 = vmatmul.bf16.vlgmr.msra.gmra.mxu0 %v1402_v32  ;;  %799 = vmatmul.bf16.vlgmr.msra.gmra.mxu3 %v1546_v33  ;;  %v1473_v32 = vld [vmem:[%s1932_s10 + $0x90] sm:$0xf]  ;;  %v1709_v33 = vld [vmem:[%s1932_s10 + $0x98] sm:$0xf0] }
  0x2c   : > { %1770 = vmatpush.bf16.msrb.mxu3 %v1845_v1  ;;  %828 = vmatmul.bf16.vlgmr.msra.gmra.mxu1 %v1406_v34  ;;  %v1439_v1 = vld [vmem:[%s1932_s10 + $0x54] sm:$0xf0]  ;;  %v1708_v34 = vld [vmem:[%s1932_s10 + $0x94] sm:$0xf]  ;;  %v1474_v40 = vor.u32 %v1709_v33, %v1473_v32 }
  0x2d   : > { %917 = vmatmul.bf16.vlgmr.msra.gmra.mxu2 %v1410_v35  ;;  %v1442_v6 = vor.u32 %v1699_v0, %v1439_v1  ;;  %v1732_v35 = vld [vmem:[%s1932_s10 + $0x154] sm:$0xf]  ;;  %v1478_v42 = vor.u32 %v1708_v34, %v1475_v37  ;;  %v1514_v37 = vor.u32 %v1717_v24, %v1511_v27 }
  0x2e   : > { %v1574_v41 = vor.u32 %v1732_v35, %v1571_v36  ;;  %v1716_v0 = vld [vmem:[%s1932_s10 + $0xd0] sm:$0xf0] }
  0x30   : > { %1771 = vmatpush.bf16.msrb.mxu3 %v1860_v4  ;;  %v1438_v4 = vor.u32 %v1700_v61, %v1437_v60  ;;  %v1553_v60 = vld [vmem:[%s1932_s10 + $0x128] sm:$0xf]  ;;  %v1728_v61 = vld [vmem:[%s1932_s10 + $0x130] sm:$0xf0] }
  0x34   : > { %1772 = vmatpush.bf16.msrb.mxu3 %v1875_v7 }
  0x38   : > { %1773 = vmatpush.bf16.msrb.mxu3 %v1891_v10  ;;  %v1702_v10 = vld [vmem:[%s1932_s10 + $0x64] sm:$0xf] }
  0x3b   : > { %744 = vmatmul.bf16.gmra.mxu0 %v1414_v44  ;;  %804 = vmatmul.bf16.gmra.mxu3 %v1558_v45  ;;  %v1485_v44 = vld [vmem:[%s1932_s10 + $0xa8] sm:$0xf]  ;;  %v1712_v45 = vld [vmem:[%s1932_s10 + $0xb0] sm:$0xf0] }
  0x3c   : > { %1774 = vmatpush.bf16.msrb.mxu3 %v1749_v13  ;;  %833 = vmatmul.bf16.gmra.mxu1 %v1418_v46  ;;  %v1451_v13 = vld [vmem:[%s1932_s10 + $0x6c] sm:$0xf0]  ;;  %v1711_v46 = vld [vmem:[%s1932_s10 + $0xac] sm:$0xf]  ;;  %v1486_v52 = vor.u32 %v1712_v45, %v1485_v44 }
  0x3d   : > { %922 = vmatmul.bf16.gmra.mxu2 %v1422_v47  ;;  %v1454_v18 = vor.u32 %v1702_v10, %v1451_v13  ;;  %v1735_v47 = vld [vmem:[%s1932_s10 + $0x16c] sm:$0xf]  ;;  %v1490_v54 = vor.u32 %v1711_v46, %v1487_v49 }
  0x3e   : > { %v1586_v53 = vor.u32 %v1735_v47, %v1583_v48 }
  0x40   : > { %1775 = vmatpush.bf16.msrb.mxu3 %v1748_v16 }
  0x44   : > { %1776 = vmatpush.bf16.msrb.mxu3 %v1747_v19 }
  0x48   : > { %1777 = vmatpush.bf16.msrb.mxu3 %v1746_v22  ;;  %v1705_v22 = vld [vmem:[%s1932_s10 + $0x7c] sm:$0xf] }
  0x4b   : > { %749 = vmatmul.bf16.gmra.mxu0 %v1426_v56  ;;  %809 = vmatmul.bf16.gmra.mxu3 %v1570_v57  ;;  %v2035_v56 = vld [vmem:[%s2385_s2] ss:$0 sm:$0xff] }
  0x4c   : > { %1778 = vmatpush.bf16.msra.mxu3 %v1850_v2  ;;  %838 = vmatmul.bf16.gmra.mxu1 %v1430_v58  ;;  %v1445_v2 = vld [vmem:[%s1932_s10 + $0x50] sm:$0xf]  ;;  %v1497_v57 = vld [vmem:[%s1932_s10 + $0xc0] sm:$0xf]  ;;  %v1715_v58 = vld [vmem:[%s1932_s10 + $0xc8] sm:$0xf0] }
  0x4d   : > { %927 = vmatmul.bf16.gmra.mxu2 %v1434_v59  ;;  %v1446_v7 = vor.u32 %v1701_v3, %v1445_v2  ;;  %v1714_v59 = vld [vmem:[%s1932_s10 + $0xc4] sm:$0xf]  ;;  %v1498_v1 = vor.u32 %v1715_v58, %v1497_v57  ;;  %v1554_v2 = vor.u32 %v1728_v61, %v1553_v60  ;;  %v1521_v60 = vld [vmem:[%s1932_s10 + $0xf0] sm:$0xf]  ;;  %v1721_v61 = vld [vmem:[%s1932_s10 + $0xf8] sm:$0xf0] }
  0x50   : > { %1779 = vmatpush.bf16.msra.mxu3 %v1865_v5  ;;  %v1582_v5 = vor.u32 %v1736_v63, %v1581_v62  ;;  %v1499_v62 = vld [vmem:[%s1932_s10 + $0xcc] sm:$0xf0]  ;;  %v1505_v63 = vld [vmem:[%s1932_s10 + $0xc8] sm:$0xf] }
  0x54   : > { %1780 = vmatpush.bf16.msra.mxu3 %v1880_v8  ;;  %v1449_v8 = vld [vmem:[%s1932_s10 + $0x60] sm:$0xf] }
  0x55   : > { %v1450_v16 = vor.u32 %v1703_v9, %v1449_v8  ;;  %v1062_v8 = vlaneseq }
  0x58   : > { %1781 = vmatpush.bf16.msra.mxu3 %v1896_v11  ;;  %v1726_v11 = vld [vmem:[%s1932_s10 + $0x124] sm:$0xf] }
  0x5b   : > { %754 = vmatmul.bf16.gmra.mxu0 %v1438_v4  ;;  %814 = vmatmul.bf16.gmra.mxu3 %v1582_v5  ;;  %v1502_v4 = vor.u32 %v1714_v59, %v1499_v62  ;;  %v1506_v5 = vor.u32 %v1716_v0, %v1505_v63  ;;  %v1720_v62 = vld [vmem:[%s1932_s10 + $0xf4] sm:$0xf]  ;;  %v1577_v0 = vld [vmem:[%s1932_s10 + $0x158] sm:$0xf] }
  0x5c   : > { %1782 = vmatpush.bf16.msra.mxu3 %v1911_v14  ;;  %843 = vmatmul.bf16.gmra.mxu1 %v1442_v6  ;;  %v1457_v14 = vld [vmem:[%s1932_s10 + $0x68] sm:$0xf] }
  0x5d   : > { %932 = vmatmul.bf16.gmra.mxu2 %v1446_v7  ;;  %v1458_v19 = vor.u32 %v1704_v15, %v1457_v14  ;;  %v2052_v14 = vstv %s1687_s25 }
  0x60   : > { %1783 = vmatpush.bf16.msra.mxu3 %v1924_v17  ;;  %v1550_v17 = vor.u32 %v1726_v11, %v1547_v12  ;;  %v2050_v12 = vshrl.u32 %v1062_v8, 7 }
  0x62   : > { %v1066_v57 = vadd.s32 24, %v2050_v12  ;;  %v1067_v24 = vadd.s32 32, %v2050_v12 }
  0x64   : > { %1784 = vmatpush.bf16.msra.mxu3 %v1941_v20  ;;  %v1461_v20 = vld [vmem:[%s1932_s10 + $0x78] sm:$0xf] }
  0x65   : > { %v1462_v28 = vor.u32 %v1706_v21, %v1461_v20  ;;  %v1097_v20 = vadd.s32 %v2052_v14, %v2050_v12  ;;  %v1509_v21 = vld [vmem:[%s1932_s10 + $0xd8] sm:$0xf] }
  0x67   : > { %vm1129_vm0 = vcmp.lt.s32.totalorder %v1097_v20, 512 }
  0x68   : > { %1785 = vmatpush.bf16.msra.mxu3 %v1952_v23  ;;  %v1463_v23 = vld [vmem:[%s1932_s10 + $0x84] sm:$0xf0] }
  0x69   : > { %v1466_v30 = vor.u32 %v1705_v22, %v1463_v23  ;;  %v1718_v22 = vld [vmem:[%s1932_s10 + $0xe0] sm:$0xf0]  ;;  %v1731_v23 = vld [vmem:[%s1932_s10 + $0x148] sm:$0xf0] }
  0x6a   : > { %v1510_v33 = vor.u32 %v1718_v22, %v1509_v21  ;;  %v1566_v34 = vor.u32 %v1731_v23, %v1565_v25 }
  0x6b   : > { %759 = vmatmul.bf16.gmra.mxu0 %v1450_v16  ;;  %888 = vmatmul.bf16.vlgmr.msrb.gmra.mxu3 %v1550_v17  ;;  %v1064_v17 = vadd.s32 8, %v2050_v12 }
  0x6c   : > { %848 = vmatmul.bf16.gmra.mxu1 %v1454_v18 }
  0x6d   : > { %937 = vmatmul.bf16.gmra.mxu2 %v1458_v19  ;;  %v1098_v26 = vadd.s32 %v2052_v14, %v1064_v17 }
  0x6f   : > { %vm1130_vm1 = vcmp.lt.s32.totalorder %v1098_v26, 512 }
  0x7b   : > { %764 = vmatmul.bf16.gmra.mxu0 %v1462_v28  ;;  %893 = vmatmul.bf16.gmra.mxu3 %v1562_v29  ;;  %v1517_v28 = vld [vmem:[%s1932_s10 + $0xe0] sm:$0xf]  ;;  %v1719_v29 = vld [vmem:[%s1932_s10 + $0xe8] sm:$0xf0] }
  0x7c   : > { %853 = vmatmul.bf16.gmra.mxu1 %v1466_v30  ;;  %v1518_v38 = vor.u32 %v1719_v29, %v1517_v28  ;;  %v1101_v29 = vadd.s32 %v2052_v14, %v1067_v24 }
  0x7d   : > { %942 = vmatmul.bf16.gmra.mxu2 %v1470_v31 }
  0x7e   : > { %vm1133_vm4 = vcmp.lt.s32.totalorder %v1101_v29, 512 }
  0x8b   : > { %769 = vmatmul.bf16.gmra.mxu0 %v1474_v40  ;;  %898 = vmatmul.bf16.gmra.mxu3 %v1574_v41  ;;  %v1065_v41 = vadd.s32 16, %v2050_v12 }
  0x8c   : > { %858 = vmatmul.bf16.gmra.mxu1 %v1478_v42 }
  0x8d   : > { %947 = vmatmul.bf16.gmra.mxu2 %v1482_v43  ;;  %v1099_v49 = vadd.s32 %v2052_v14, %v1065_v41  ;;  %v1724_v41 = vld [vmem:[%s1932_s10 + $0x110] sm:$0xf0] }
  0x8f   : > { %vm1131_vm2 = vcmp.lt.s32.totalorder %v1099_v49, 512  ;;  %v1535_v49 = vld [vmem:[%s1932_s10 + $0x114] sm:$0xf0] }
  0x9b   : > { %774 = vmatmul.bf16.gmra.mxu0 %v1486_v52  ;;  %903 = vmatmul.bf16.gmra.mxu3 %v1586_v53 }
  0x9c   : > { %863 = vmatmul.bf16.gmra.mxu1 %v1490_v54 }
  0x9d   : > { %952 = vmatmul.bf16.gmra.mxu2 %v1494_v55 }
  0xa8   : > { %v740_v3 = vpop.f32.mrf.mxu0 }
  0xa9   : > { %v741_v6 = vadd.f32 %v2035_v56, %v740_v3  ;;  %v829_v7 = vpop.f32.mrf.mxu1 }
  0xab   : > { %779 = vmatmul.bf16.gmra.mxu0 %v1498_v1  ;;  %977 = vmatmul.bf16.vlgmr.msra.gmra.mxu3 %v1554_v2  ;;  %v830_v9 = vadd.f32 %v829_v7, %v741_v6  ;;  %v1734_v1 = vld [vmem:[%s1932_s10 + $0x160] sm:$0xf0]  ;;  %v1529_v6 = vld [vmem:[%s1932_s10 + $0xf8] sm:$0xf] }
  0xac   : > { %868 = vmatmul.bf16.gmra.mxu1 %v1502_v4  ;;  %v1100_v4 = vadd.s32 %v2052_v14, %v1066_v57  ;;  %v1722_v7 = vld [vmem:[%s1932_s10 + $0x100] sm:$0xf0] }
  0xad   : > { %957 = vmatmul.bf16.gmra.mxu2 %v1506_v5  ;;  %v1523_v5 = vld [vmem:[%s1932_s10 + $0xfc] sm:$0xf0]  ;;  %v1530_v20 = vor.u32 %v1722_v7, %v1529_v6 }
  0xae   : > { %v2047_v10 = vpop.f32.mrf.mxu3  ;;  %vm1132_vm3 = vcmp.lt.s32.totalorder %v1100_v4, 512 }
  0xb0   : > { %v918_v11 = vpop.f32.mrf.mxu2  ;;  %v742_v15 = vpop.f32.mrf.mxu0 }
  0xb1   : > { %v919_v13 = vadd.f32 %v918_v11, %v830_v9  ;;  %v831_v16 = vpop.f32.mrf.mxu1  ;;  %v743_v19 = vadd.f32 %v2035_v56, %v742_v15  ;;  %v1522_v15 = vor.u32 %v1721_v61, %v1521_v60 }
  0xb3   : > { %v998_v18 = vmax.f32 %v919_v13, 0.0  ;;  %v832_v30 = vadd.f32 %v831_v16, %v743_v19  ;;  %v1578_v16 = vor.u32 %v1734_v1, %v1577_v0  ;;  %v1526_v19 = vor.u32 %v1720_v62, %v1523_v5 }
  0xb5   : > { %1030 = vst [vmem:[%s2057_s29] sm:$0xff] %v998_v18  ;;  %v1161_v42 = vsel %vm1129_vm0, %v998_v18, 0.0 }
  0xb6   : > { %v2073_v31 = vpop.f32.mrf.mxu3  ;;  %v1230_v46 = vmul.f32 %v1161_v42, %v1161_v42 }
  0xb8   : > { %v920_v32 = vpop.f32.mrf.mxu2  ;;  %v745_v36 = vpop.f32.mrf.mxu0 }
  0xb9   : > { %v921_v35 = vadd.f32 %v920_v32, %v832_v30  ;;  %v746_v39 = vadd.f32 %v2035_v56, %v745_v36  ;;  %v834_v40 = vpop.f32.mrf.mxu1 }
  0xbb   : > { %v999_v43 = vmax.f32 %v921_v35, 0.0  ;;  %784 = vmatmul.bf16.gmra.mxu0 %v1510_v33  ;;  %982 = vmatmul.bf16.gmra.mxu3 %v1566_v34  ;;  %v835_v45 = vadd.f32 %v834_v40, %v746_v39  ;;  %v1533_v40 = vld [vmem:[%s1932_s10 + $0x108] sm:$0xf] }
  0xbc   : > { %873 = vmatmul.bf16.gmra.mxu1 %v1514_v37  ;;  %v1068_v37 = vadd.s32 40, %v2050_v12 }
  0xbd   : > { %1031 = vst [vmem:[%s2057_s29 + $0x8] sm:$0xff] %v999_v43  ;;  %v1162_v44 = vsel %vm1130_vm1, %v999_v43, 0.0  ;;  %962 = vmatmul.bf16.gmra.mxu2 %v1518_v38 }
  0xbe   : > { %v1193_v47 = vadd.f32 %v1162_v44, %v1161_v42  ;;  %v1231_v48 = vmul.f32 %v1162_v44, %v1162_v44  ;;  %v2079_v50 = vpop.f32.mrf.mxu3  ;;  %v1723_v42 = vld [vmem:[%s1932_s10 + $0x10c] sm:$0xf]  ;;  %v1589_v44 = vld [vmem:[%s1932_s10 + $0x170] sm:$0xf] }
  0xbf   : > { %v1538_v62 = vor.u32 %v1723_v42, %v1535_v49  ;;  %v1072_v49 = vadd.s32 72, %v2050_v12 }
  0xc0   : > { %v1262_v51 = vadd.f32 %v1231_v48, %v1230_v46  ;;  %v923_v52 = vpop.f32.mrf.mxu2  ;;  %v747_v54 = vpop.f32.mrf.mxu0  ;;  %v1102_v48 = vadd.s32 %v2052_v14, %v1068_v37 }
  0xc1   : > { %v924_v53 = vadd.f32 %v923_v52, %v835_v45  ;;  %v836_v55 = vpop.f32.mrf.mxu1  ;;  %v748_v59 = vadd.f32 %v2035_v56, %v747_v54  ;;  %v1737_v45 = vld [vmem:[%s1932_s10 + $0x178] sm:$0xf0] }
  0xc2   : > { %v1725_v52 = vld [vmem:[%s1932_s10 + $0x118] sm:$0xf0]  ;;  %vm1134_vm5 = vcmp.lt.s32.totalorder %v1102_v48, 512 }
  0xc3   : > { %v1000_v58 = vmax.f32 %v924_v53, 0.0  ;;  %v837_v8 = vadd.f32 %v836_v55, %v748_v59  ;;  %v1590_v59 = vor.u32 %v1737_v45, %v1589_v44 }
  0xc5   : > { %1032 = vst [vmem:[%s2057_s29 + $0x10] sm:$0xff] %v1000_v58  ;;  %v1163_v63 = vsel %vm1131_vm2, %v1000_v58, 0.0  ;;  %v1534_v58 = vor.u32 %v1724_v41, %v1533_v40 }
  0xc6   : > { %v1194_v2 = vadd.f32 %v1193_v47, %v1163_v63  ;;  %v1232_v3 = vmul.f32 %v1163_v63, %v1163_v63  ;;  %v2093_v9 = vpop.f32.mrf.mxu3 }
  0xc8   : > { %v1263_v11 = vadd.f32 %v1262_v51, %v1232_v3  ;;  %v925_v13 = vpop.f32.mrf.mxu2  ;;  %v750_v18 = vpop.f32.mrf.mxu0  ;;  %v1541_v51 = vld [vmem:[%s1932_s10 + $0x110] sm:$0xf] }
  0xc9   : > { %v926_v17 = vadd.f32 %v925_v13, %v837_v8  ;;  %v751_v21 = vadd.f32 %v2035_v56, %v750_v18  ;;  %v839_v22 = vpop.f32.mrf.mxu1  ;;  %v1542_v63 = vor.u32 %v1725_v52, %v1541_v51 }
  0xcb   : > { %v1001_v25 = vmax.f32 %v926_v17, 0.0  ;;  %789 = vmatmul.bf16.gmra.mxu0 %v1522_v15  ;;  %987 = vmatmul.bf16.gmra.mxu3 %v1578_v16  ;;  %v840_v26 = vadd.f32 %v839_v22, %v751_v21 }
  0xcc   : > { %878 = vmatmul.bf16.gmra.mxu1 %v1526_v19  ;;  %v1070_v19 = vadd.s32 56, %v2050_v12 }
  0xcd   : > { %1033 = vst [vmem:[%s2057_s29 + $0x18] sm:$0xff] %v1001_v25  ;;  %v1164_v23 = vsel %vm1132_vm3, %v1001_v25, 0.0  ;;  %967 = vmatmul.bf16.gmra.mxu2 %v1530_v20 }
  0xce   : > { %v1195_v27 = vadd.f32 %v1194_v2, %v1164_v23  ;;  %v1233_v28 = vmul.f32 %v1164_v23, %v1164_v23  ;;  %v2099_v30 = vpop.f32.mrf.mxu3  ;;  %v1069_v2 = vadd.s32 48, %v2050_v12  ;;  %v1104_v23 = vadd.s32 %v2052_v14, %v1070_v19 }
  0xd0   : > { %v1264_v32 = vadd.f32 %v1263_v11, %v1233_v28  ;;  %v928_v33 = vpop.f32.mrf.mxu2  ;;  %v752_v35 = vpop.f32.mrf.mxu0  ;;  %v1103_v8 = vadd.s32 %v2052_v14, %v1069_v2  ;;  %vm1136_vm7 = vcmp.lt.s32.totalorder %v1104_v23, 512 }
  0xd1   : > { %v929_v34 = vadd.f32 %v928_v33, %v840_v26  ;;  %v841_v36 = vpop.f32.mrf.mxu1  ;;  %v753_v39 = vadd.f32 %v2035_v56, %v752_v35 }
  0xd2   : > { %vm1135_vm6 = vcmp.lt.s32.totalorder %v1103_v8, 512 }
  0xd3   : > { %v1002_v38 = vmax.f32 %v929_v34, 0.0  ;;  %v842_v53 = vadd.f32 %v841_v36, %v753_v39  ;;  %v1071_v36 = vadd.s32 64, %v2050_v12 }
  0xd5   : > { %1034 = vst [vmem:[%s2057_s29 + $0x20] sm:$0xff] %v1002_v38  ;;  %v1165_v43 = vsel %vm1133_vm4, %v1002_v38, 0.0  ;;  %v1105_v42 = vadd.s32 %v2052_v14, %v1071_v36 }
  0xd6   : > { %v1196_v46 = vadd.f32 %v1195_v27, %v1165_v43  ;;  %v1234_v47 = vmul.f32 %v1165_v43, %v1165_v43  ;;  %v2113_v54 = vpop.f32.mrf.mxu3 }
  0xd7   : > { %vm1137_vm8 = vcmp.lt.s32.totalorder %v1105_v42, 512 }
  0xd8   : > { %v1265_v55 = vadd.f32 %v1264_v32, %v1234_v47  ;;  %v930_v57 = vpop.f32.mrf.mxu2  ;;  %v755_v61 = vpop.f32.mrf.mxu0 }
  0xd9   : > { %v931_v60 = vadd.f32 %v930_v57, %v842_v53  ;;  %v756_v0 = vadd.f32 %v2035_v56, %v755_v61  ;;  %v844_v1 = vpop.f32.mrf.mxu1 }
  0xdb   : > { %v1003_v3 = vmax.f32 %v931_v60, 0.0  ;;  %794 = vmatmul.bf16.gmra.mxu0 %v1534_v58  ;;  %992 = vmatmul.bf16.gmra.mxu3 %v1590_v59  ;;  %v845_v5 = vadd.f32 %v844_v1, %v756_v0  ;;  %v1106_v58 = vadd.s32 %v2052_v14, %v1072_v49 }
  0xdc   : > { %883 = vmatmul.bf16.gmra.mxu1 %v1538_v62 }
  0xdd   : > { %1035 = vst [vmem:[%s2057_s29 + $0x28] sm:$0xff] %v1003_v3  ;;  %v1166_v4 = vsel %vm1134_vm5, %v1003_v3, 0.0  ;;  %972 = vmatmul.bf16.gmra.mxu2 %v1542_v63  ;;  %vm1138_vm9 = vcmp.lt.s32.totalorder %v1106_v58, 512  ;;  %v1073_v3 = vadd.s32 80, %v2050_v12 }
  0xde   : > { %v1197_v6 = vadd.f32 %v1196_v46, %v1166_v4  ;;  %v1235_v7 = vmul.f32 %v1166_v4, %v1166_v4  ;;  %v2119_v11 = vpop.f32.mrf.mxu3 }
  0xe0   : > { %v1266_v13 = vadd.f32 %v1265_v55, %v1235_v7  ;;  %v933_v15 = vpop.f32.mrf.mxu2  ;;  %v757_v17 = vpop.f32.mrf.mxu0 }
  0xe1   : > { %v934_v16 = vadd.f32 %v933_v15, %v845_v5  ;;  %v846_v18 = vpop.f32.mrf.mxu1  ;;  %v758_v21 = vadd.f32 %v2035_v56, %v757_v17 }
  0xe3   : > { %v1004_v20 = vmax.f32 %v934_v16, 0.0  ;;  %v847_v26 = vadd.f32 %v846_v18, %v758_v21  ;;  %v1074_v21 = vadd.s32 88, %v2050_v12 }
  0xe5   : > { %1036 = vst [vmem:[%s2057_s29 + $0x30] sm:$0xff] %v1004_v20  ;;  %v1167_v22 = vsel %vm1135_vm6, %v1004_v20, 0.0 }
  0xe6   : > { %v1198_v24 = vadd.f32 %v1197_v6, %v1167_v22  ;;  %v1236_v25 = vmul.f32 %v1167_v22, %v1167_v22  ;;  %v2125_v27 = vpop.f32.mrf.mxu3 }
  0xe8   : > { %v1267_v28 = vadd.f32 %v1266_v13, %v1236_v25  ;;  %v935_v29 = vpop.f32.mrf.mxu2  ;;  %v760_v33 = vpop.f32.mrf.mxu0  ;;  %v1107_v13 = vadd.s32 %v2052_v14, %v1073_v3 }
  0xe9   : > { %v936_v32 = vadd.f32 %v935_v29, %v847_v26  ;;  %v761_v34 = vadd.f32 %v2035_v56, %v760_v33  ;;  %v849_v35 = vpop.f32.mrf.mxu1 }
  0xea   : > { %vm1139_vm10 = vcmp.lt.s32.totalorder %v1107_v13, 512 }
  0xeb   : > { %v1005_v37 = vmax.f32 %v936_v32, 0.0  ;;  %v850_v39 = vadd.f32 %v849_v35, %v761_v34 }
  0xed   : > { %1037 = vst [vmem:[%s2057_s29 + $0x38] sm:$0xff] %v1005_v37  ;;  %v1168_v38 = vsel %vm1136_vm7, %v1005_v37, 0.0 }
  0xee   : > { %v1199_v40 = vadd.f32 %v1198_v24, %v1168_v38  ;;  %v1237_v41 = vmul.f32 %v1168_v38, %v1168_v38  ;;  %v2131_v43 = vpop.f32.mrf.mxu3 }
  0xf0   : > { %v1268_v44 = vadd.f32 %v1267_v28, %v1237_v41  ;;  %v938_v45 = vpop.f32.mrf.mxu2  ;;  %v762_v47 = vpop.f32.mrf.mxu0  ;;  %v1108_v28 = vadd.s32 %v2052_v14, %v1074_v21 }
  0xf1   : > { %v939_v46 = vadd.f32 %v938_v45, %v850_v39  ;;  %v851_v48 = vpop.f32.mrf.mxu1  ;;  %v763_v52 = vadd.f32 %v2035_v56, %v762_v47  ;;  %v1075_v39 = vadd.s32 96, %v2050_v12 }
  0xf2   : > { %vm1140_vm11 = vcmp.lt.s32.totalorder %v1108_v28, 512 }
  0xf3   : > { %v1006_v51 = vmax.f32 %v939_v46, 0.0  ;;  %v852_v59 = vadd.f32 %v851_v48, %v763_v52  ;;  %v1109_v46 = vadd.s32 %v2052_v14, %v1075_v39 }
  0xf5   : > { %1038 = vst [vmem:[%s2057_s29 + $0x40] sm:$0xff] %v1006_v51  ;;  %v1169_v53 = vsel %vm1137_vm8, %v1006_v51, 0.0  ;;  %vm1141_vm12 = vcmp.lt.s32.totalorder %v1109_v46, 512 }
  0xf6   : > { %v1200_v55 = vadd.f32 %v1199_v40, %v1169_v53  ;;  %v1238_v57 = vmul.f32 %v1169_v53, %v1169_v53  ;;  %v2137_v60 = vpop.f32.mrf.mxu3 }
  0xf8   : > { %v1269_v61 = vadd.f32 %v1268_v44, %v1238_v57  ;;  %v940_v62 = vpop.f32.mrf.mxu2  ;;  %v765_v0 = vpop.f32.mrf.mxu0 }
  0xf9   : > { %v941_v63 = vadd.f32 %v940_v62, %v852_v59  ;;  %v766_v1 = vadd.f32 %v2035_v56, %v765_v0  ;;  %v854_v2 = vpop.f32.mrf.mxu1 }
  0xfb   : > { %v1007_v4 = vmax.f32 %v941_v63, 0.0  ;;  %v855_v6 = vadd.f32 %v854_v2, %v766_v1 }
  0xfd   : > { %1039 = vst [vmem:[%s2057_s29 + $0x48] sm:$0xff] %v1007_v4  ;;  %v1170_v5 = vsel %vm1138_vm9, %v1007_v4, 0.0 }
  0xfe   : > { %v1201_v7 = vadd.f32 %v1200_v55, %v1170_v5  ;;  %v1239_v8 = vmul.f32 %v1170_v5, %v1170_v5  ;;  %v2143_v15 = vpop.f32.mrf.mxu3 }
 0x100   : > { %v1270_v16 = vadd.f32 %v1269_v61, %v1239_v8  ;;  %v943_v17 = vpop.f32.mrf.mxu2  ;;  %v767_v19 = vpop.f32.mrf.mxu0 }
 0x101   : > { %v944_v18 = vadd.f32 %v943_v17, %v855_v6  ;;  %v856_v20 = vpop.f32.mrf.mxu1  ;;  %v768_v24 = vadd.f32 %v2035_v56, %v767_v19 }
 0x103   : > { %v1008_v22 = vmax.f32 %v944_v18, 0.0  ;;  %v857_v29 = vadd.f32 %v856_v20, %v768_v24 }
 0x105   : > { %1040 = vst [vmem:[%s2057_s29 + $0x50] sm:$0xff] %v1008_v22  ;;  %v1171_v25 = vsel %vm1139_vm10, %v1008_v22, 0.0 }
 0x106   : > { %v1202_v23 = vadd.f32 %v1201_v7, %v1171_v25  ;;  %v1240_v26 = vmul.f32 %v1171_v25, %v1171_v25  ;;  %v2149_v32 = vpop.f32.mrf.mxu3 }
 0x108   : > { %v1271_v33 = vadd.f32 %v1270_v16, %v1240_v26  ;;  %v945_v34 = vpop.f32.mrf.mxu2  ;;  %v770_v36 = vpop.f32.mrf.mxu0 }
 0x109   : > { %v946_v35 = vadd.f32 %v945_v34, %v857_v29  ;;  %v771_v37 = vadd.f32 %v2035_v56, %v770_v36  ;;  %v859_v38 = vpop.f32.mrf.mxu1 }
 0x10b   : > { %v1009_v40 = vmax.f32 %v946_v35, 0.0  ;;  %v860_v42 = vadd.f32 %v859_v38, %v771_v37 }
 0x10d   : > { %1041 = vst [vmem:[%s2057_s29 + $0x58] sm:$0xff] %v1009_v40  ;;  %v1172_v41 = vsel %vm1140_vm11, %v1009_v40, 0.0 }
 0x10e   : > { %v1203_v44 = vadd.f32 %v1202_v23, %v1172_v41  ;;  %v1241_v45 = vmul.f32 %v1172_v41, %v1172_v41  ;;  %v2155_v47 = vpop.f32.mrf.mxu3 }
 0x110   : > { %v1272_v48 = vadd.f32 %v1271_v33, %v1241_v45  ;;  %v948_v49 = vpop.f32.mrf.mxu2  ;;  %v772_v52 = vpop.f32.mrf.mxu0  ;;  %v801_v33 = vadd.f32 %v2035_v56, %v2047_v10  ;;  %v803_v45 = vadd.f32 %v2035_v56, %v2073_v31 }
 0x111   : > { %v949_v51 = vadd.f32 %v948_v49, %v860_v42  ;;  %v861_v53 = vpop.f32.mrf.mxu1  ;;  %v773_v57 = vadd.f32 %v2035_v56, %v772_v52 }
 0x112   : > { %v890_v35 = vadd.f32 %v2131_v43, %v801_v33  ;;  %v892_v43 = vadd.f32 %v2137_v60, %v803_v45 }
 0x113   : > { %v1010_v55 = vmax.f32 %v949_v51, 0.0  ;;  %v862_v62 = vadd.f32 %v861_v53, %v773_v57 }
 0x115   : > { %1042 = vst [vmem:[%s2057_s29 + $0x60] sm:$0xff] %v1010_v55  ;;  %v1173_v58 = vsel %vm1141_vm12, %v1010_v55, 0.0 }
 0x116   : > { %v2159_v59 = vadd.f32 %v1203_v44, %v1173_v58  ;;  %v1242_v61 = vmul.f32 %v1173_v58, %v1173_v58  ;;  %v2161_v63 = vpop.f32.mrf.mxu3 }
 0x118   : > { %v2163_v0 = vadd.f32 %v1272_v48, %v1242_v61  ;;  %v950_v1 = vpop.f32.mrf.mxu2  ;;  %v775_v3 = vpop.f32.mrf.mxu0  ;;  %v806_v61 = vadd.f32 %v2035_v56, %v2079_v50 }
 0x119   : > { %v2165_v2 = vadd.f32 %v950_v1, %v862_v62  ;;  %v776_v4 = vadd.f32 %v2035_v56, %v775_v3  ;;  %v864_v5 = vpop.f32.mrf.mxu1 }
 0x11a   : > { %v895_v62 = vadd.f32 %v2143_v15, %v806_v61 }
 0x11b   : > { %v1011_v6 = vmax.f32 %v2165_v2, 0.0  ;;  %v865_v7 = vadd.f32 %v864_v5, %v776_v4 }
 0x11d   : > { %1043 = vst [vmem:[%s2057_s29 + $0x68] sm:$0xff] %v1011_v6 }
 0x11e   : > { %v2172_v8 = vpop.f32.mrf.mxu3 }
 0x120   : > { %v953_v13 = vpop.f32.mrf.mxu2  ;;  %v777_v17 = vpop.f32.mrf.mxu0 }
 0x121   : > { %v2174_v16 = vadd.f32 %v953_v13, %v865_v7  ;;  %v866_v18 = vpop.f32.mrf.mxu1  ;;  %v778_v20 = vadd.f32 %v2035_v56, %v777_v17 }
 0x123   : > { %v1012_v19 = vmax.f32 %v2174_v16, 0.0  ;;  %v867_v21 = vadd.f32 %v866_v18, %v778_v20  ;;  %v808_v20 = vadd.f32 %v2035_v56, %v2093_v9 }
 0x125   : > { %1044 = vst [vmem:[%s2057_s29 + $0x70] sm:$0xff] %v1012_v19  ;;  %v897_v15 = vadd.f32 %v2149_v32, %v808_v20 }
 0x126   : > { %v2181_v22 = vpop.f32.mrf.mxu3 }
 0x128   : > { %v955_v24 = vpop.f32.mrf.mxu2  ;;  %v780_v23 = vpop.f32.mrf.mxu0 }
 0x129   : > { %v2183_v25 = vadd.f32 %v955_v24, %v867_v21  ;;  %v781_v26 = vadd.f32 %v2035_v56, %v780_v23  ;;  %v869_v28 = vpop.f32.mrf.mxu1 }
 0x12b   : > { %v1013_v29 = vmax.f32 %v2183_v25, 0.0  ;;  %v870_v34 = vadd.f32 %v869_v28, %v781_v26  ;;  %v1076_v28 = vadd.s32 104, %v2050_v12  ;;  %v1084_v25 = vadd.s32 168, %v2050_v12 }
 0x12d   : > { %1045 = vst [vmem:[%s2057_s29 + $0x78] sm:$0xff] %v1013_v29 }
 0x12e   : > { %v978_v36 = vpop.f32.mrf.mxu3 }
 0x12f   : > { %v2193_v38 = vadd.f32 %v978_v36, %v890_v35 }
 0x130   : > { %v958_v37 = vpop.f32.mrf.mxu2  ;;  %v782_v40 = vpop.f32.mrf.mxu0 }
 0x131   : > { %v2195_v39 = vadd.f32 %v958_v37, %v870_v34  ;;  %v1022_v41 = vmax.f32 %v2193_v38, 0.0  ;;  %v871_v42 = vpop.f32.mrf.mxu1  ;;  %v783_v10 = vadd.f32 %v2035_v56, %v782_v40  ;;  %v1077_v37 = vadd.s32 112, %v2050_v12 }
 0x132   : > { %v811_v40 = vadd.f32 %v2035_v56, %v2099_v30  ;;  %v1080_v30 = vadd.s32 136, %v2050_v12 }
 0x133   : > { %v1014_v44 = vmax.f32 %v2195_v39, 0.0  ;;  %1054 = vst [vmem:[%s2057_s29 + $0xc0] sm:$0xff] %v1022_v41  ;;  %v872_v46 = vadd.f32 %v871_v42, %v783_v10  ;;  %v1110_v42 = vadd.s32 %v2052_v14, %v1076_v28  ;;  %v1078_v10 = vadd.s32 120, %v2050_v12 }
 0x134   : > { %v1114_v20 = vadd.s32 %v2052_v14, %v1080_v30  ;;  %v1083_v28 = vadd.s32 160, %v2050_v12  ;;  %v818_v30 = vadd.f32 %v2035_v56, %v2125_v27  ;;  %v1118_v27 = vadd.s32 %v2052_v14, %v1084_v25 }
 0x135   : > { %1046 = vst [vmem:[%s2057_s29 + $0x80] sm:$0xff] %v1014_v44  ;;  %vm1142_vm13 = vcmp.lt.s32.totalorder %v1110_v42, 512 }
 0x136   : > { %v980_v48 = vpop.f32.mrf.mxu3  ;;  %vm1146_vm1 = vcmp.lt.s32.totalorder %v1114_v20, 512  ;;  %vm1150_vm5 = vcmp.lt.s32.totalorder %v1118_v27, 512 }
 0x137   : > { %v2209_v51 = vadd.f32 %v980_v48, %v892_v43  ;;  %v900_v43 = vadd.f32 %v2155_v47, %v811_v40  ;;  %v1079_v48 = vadd.s32 128, %v2050_v12 }
 0x138   : > { %v960_v49 = vpop.f32.mrf.mxu2  ;;  %v785_v53 = vpop.f32.mrf.mxu0 }
 0x139   : > { %v2211_v52 = vadd.f32 %v960_v49, %v872_v46  ;;  %v1023_v55 = vmax.f32 %v2209_v51, 0.0  ;;  %v786_v31 = vadd.f32 %v2035_v56, %v785_v53  ;;  %v874_v57 = vpop.f32.mrf.mxu1  ;;  %v1111_v46 = vadd.s32 %v2052_v14, %v1077_v37 }
 0x13b   : > { %v1015_v58 = vmax.f32 %v2211_v52, 0.0  ;;  %1055 = vst [vmem:[%s2057_s29 + $0xc8] sm:$0xff] %v1023_v55  ;;  %v875_v60 = vadd.f32 %v874_v57, %v786_v31  ;;  %v1112_v57 = vadd.s32 %v2052_v14, %v1078_v10  ;;  %vm1143_vm14 = vcmp.lt.s32.totalorder %v1111_v46, 512 }
 0x13c   : > { %v1175_v2 = vsel %vm1143_vm14, %v1012_v19, 0.0 }
 0x13d   : > { %1047 = vst [vmem:[%s2057_s29 + $0x88] sm:$0xff] %v1015_v58  ;;  %vm1144_vm15 = vcmp.lt.s32.totalorder %v1112_v57, 512  ;;  %v1244_v16 = vmul.f32 %v1175_v2, %v1175_v2 }
 0x13e   : > { %v983_v1 = vpop.f32.mrf.mxu3 }
 0x13f   : > { %v2225_v4 = vadd.f32 %v983_v1, %v895_v62  ;;  %v1113_v1 = vadd.s32 %v2052_v14, %v1079_v48 }
 0x140   : > { %v963_v3 = vpop.f32.mrf.mxu2  ;;  %v787_v7 = vpop.f32.mrf.mxu0 }
 0x141   : > { %v2227_v5 = vadd.f32 %v963_v3, %v875_v60  ;;  %v1024_v13 = vmax.f32 %v2225_v4, 0.0  ;;  %v876_v50 = vpop.f32.mrf.mxu1  ;;  %v788_v18 = vadd.f32 %v2035_v56, %v787_v7  ;;  %vm1145_vm0 = vcmp.lt.s32.totalorder %v1113_v1, 512 }
 0x143   : > { %v1016_v17 = vmax.f32 %v2227_v5, 0.0  ;;  %1056 = vst [vmem:[%s2057_s29 + $0xd0] sm:$0xff] %v1024_v13  ;;  %v877_v21 = vadd.f32 %v876_v50, %v788_v18  ;;  %v813_v50 = vadd.f32 %v2035_v56, %v2113_v54  ;;  %v1174_v18 = vsel %vm1142_vm13, %v1011_v6, 0.0 }
 0x144   : > { %v1087_v6 = vadd.s32 192, %v2050_v12 }
 0x145   : > { %1048 = vst [vmem:[%s2057_s29 + $0x90] sm:$0xff] %v1016_v17  ;;  %v902_v54 = vadd.f32 %v2161_v63, %v813_v50  ;;  %v1205_v63 = vadd.f32 %v2159_v59, %v1174_v18  ;;  %v1117_v59 = vadd.s32 %v2052_v14, %v1083_v28  ;;  %v1086_v28 = vadd.s32 184, %v2050_v12 }
 0x146   : > { %v985_v24 = vpop.f32.mrf.mxu3 }
 0x147   : > { %v2241_v26 = vadd.f32 %v985_v24, %v897_v15  ;;  %v1081_v15 = vadd.s32 144, %v2050_v12  ;;  %v816_v24 = vadd.f32 %v2035_v56, %v2119_v11  ;;  %vm1149_vm4 = vcmp.lt.s32.totalorder %v1117_v59, 512 }
 0x148   : > { %v965_v23 = vpop.f32.mrf.mxu2  ;;  %v790_v9 = vpop.f32.mrf.mxu0 }
 0x149   : > { %v2244_v33 = vadd.f32 %v965_v23, %v877_v21  ;;  %v1025_v34 = vmax.f32 %v2241_v26, 0.0  ;;  %v791_v35 = vadd.f32 %v2035_v56, %v790_v9  ;;  %v879_v36 = vpop.f32.mrf.mxu1  ;;  %v1082_v21 = vadd.s32 152, %v2050_v12 }
 0x14a   : > { %v1243_v23 = vmul.f32 %v1174_v18, %v1174_v18  ;;  %v1115_v37 = vadd.s32 %v2052_v14, %v1081_v15  ;;  %v905_v1 = vadd.f32 %v2172_v8, %v816_v24  ;;  %v2320_v18 = vadd.s32 %v2052_v14, %v1087_v6 }
 0x14b   : > { %v1017_v32 = vmax.f32 %v2244_v33, 0.0  ;;  %1057 = vst [vmem:[%s2057_s29 + $0xd8] sm:$0xff] %v1025_v34  ;;  %v880_v45 = vadd.f32 %v879_v36, %v791_v35  ;;  %v1176_v36 = vsel %vm1144_vm15, %v1013_v29, 0.0  ;;  %v1116_v19 = vadd.s32 %v2052_v14, %v1082_v21 }
 0x14c   : > { %v1274_v46 = vadd.f32 %v2163_v0, %v1243_v23  ;;  %v1245_v48 = vmul.f32 %v1176_v36, %v1176_v36  ;;  %vm1147_vm2 = vcmp.lt.s32.totalorder %v1115_v37, 512  ;;  %v1178_v0 = vsel %vm1146_vm1, %v1015_v58, 0.0 }
 0x14d   : > { %1049 = vst [vmem:[%s2057_s29 + $0x98] sm:$0xff] %v1017_v32  ;;  %vm1148_vm3 = vcmp.lt.s32.totalorder %v1116_v19, 512  ;;  %v1179_v15 = vsel %vm1147_vm2, %v1016_v17, 0.0  ;;  %v1247_v20 = vmul.f32 %v1178_v0, %v1178_v0  ;;  %vm1153_vm7 = vcmp.lt.s32.totalorder %v2320_v18, 512 }
 0x14e   : > { %v988_v49 = vpop.f32.mrf.mxu3  ;;  %v1275_v57 = vadd.f32 %v1274_v46, %v1244_v16  ;;  %v1180_v24 = vsel %vm1148_vm3, %v1017_v32, 0.0  ;;  %v1248_v17 = vmul.f32 %v1179_v15, %v1179_v15  ;;  %v1089_v16 = vadd.s32 208, %v2050_v12 }
 0x14f   : > { %v2264_v31 = vadd.f32 %v988_v49, %v900_v43 }
 0x150   : > { %v968_v53 = vpop.f32.mrf.mxu2  ;;  %v792_v60 = vpop.f32.mrf.mxu0  ;;  %v1276_v50 = vadd.f32 %v1275_v57, %v1245_v48 }
 0x151   : > { %v2267_v61 = vadd.f32 %v968_v53, %v880_v45  ;;  %v1026_v47 = vmax.f32 %v2264_v31, 0.0  ;;  %v881_v62 = vpop.f32.mrf.mxu1  ;;  %v793_v7 = vadd.f32 %v2035_v56, %v792_v60  ;;  %v1177_v45 = vsel %vm1145_vm0, %v1014_v44, 0.0 }
 0x152   : > { %v1206_v53 = vadd.f32 %v1205_v63, %v1175_v2  ;;  %v1085_v44 = vadd.s32 176, %v2050_v12  ;;  %v1246_v60 = vmul.f32 %v1177_v45, %v1177_v45  ;;  %v1249_v63 = vmul.f32 %v1180_v24, %v1180_v24 }
 0x153   : > { %v1018_v3 = vmax.f32 %v2267_v61, 0.0  ;;  %1058 = vst [vmem:[%s2057_s29 + $0xe0] sm:$0xff] %v1026_v47  ;;  %v882_v9 = vadd.f32 %v881_v62, %v793_v7  ;;  %v1120_v61 = vadd.s32 %v2052_v14, %v1086_v28  ;;  %vm1299_vm0 = vcmask 1040384  }
 0x154   : > { %v1207_v7 = vadd.f32 %v1206_v53, %v1176_v36  ;;  %v1277_v8 = vadd.f32 %v1276_v50, %v1246_v60  ;;  %v1123_v60 = vadd.s32 %v2052_v14, %v1089_v16  ;;  %v1092_v50 = vadd.s32 232, %v2050_v12 }
 0x155   : > { %1050 = vst [vmem:[%s2057_s29 + $0xa0] sm:$0xff] %v1018_v3  ;;  %v1181_v36 = vsel %vm1149_vm4, %v1018_v3, 0.0  ;;  %v907_v3 = vadd.f32 %v2181_v22, %v818_v30  ;;  %v1091_v22 = vadd.s32 224, %v2050_v12  ;;  %vm1152_vm8 = vcmp.lt.s32.totalorder %v1120_v61, 512 }
 0x156   : > { %v990_v35 = vpop.f32.mrf.mxu3  ;;  %v1208_v52 = vadd.f32 %v1207_v7, %v1177_v45  ;;  %v1278_v32 = vadd.f32 %v1277_v8, %v1247_v20  ;;  %v1185_v20 = vsel %vm1153_vm7, %v1022_v41, 0.0  ;;  %vm1155_vm10 = vcmp.lt.s32.totalorder %v1123_v60, 512 }
 0x157   : > { %v2296_v40 = vadd.f32 %v990_v35, %v902_v54  ;;  %v1119_v54 = vadd.s32 %v2052_v14, %v1085_v44  ;;  %v1088_v35 = vadd.s32 200, %v2050_v12  ;;  %v1126_v38 = vadd.s32 %v2052_v14, %v1092_v50 }
 0x158   : > { %v970_v11 = vpop.f32.mrf.mxu2  ;;  %v795_v10 = vpop.f32.mrf.mxu0  ;;  %v1209_v5 = vadd.f32 %v1208_v52, %v1178_v0 }
 0x159   : > { %v971_v42 = vadd.f32 %v970_v11, %v882_v9  ;;  %v1027_v29 = vmax.f32 %v2296_v40, 0.0  ;;  %v796_v43 = vadd.f32 %v2035_v56, %v795_v10  ;;  %v884_v39 = vpop.f32.mrf.mxu1  ;;  %vm1151_vm6 = vcmp.lt.s32.totalorder %v1119_v54, 512 }
 0x15a   : > { %v1210_v11 = vadd.f32 %v1209_v5, %v1179_v15  ;;  %v1122_v25 = vadd.s32 %v2052_v14, %v1088_v35  ;;  %v1254_v5 = vmul.f32 %v1185_v20, %v1185_v20  ;;  %v1187_v35 = vsel %vm1155_vm10, %v1024_v13, 0.0 }
 0x15b   : > { %v1019_v49 = vmax.f32 %v971_v42, 0.0  ;;  %1059 = vst [vmem:[%s2057_s29 + $0xe8] sm:$0xff] %v1027_v29  ;;  %v885_v62 = vadd.f32 %v884_v39, %v796_v43  ;;  %v1279_v42 = vadd.f32 %v1278_v32, %v1248_v17  ;;  %v1090_v43 = vadd.s32 216, %v2050_v12 }
 0x15c   : > { %v1211_v10 = vadd.f32 %v1210_v11, %v1180_v24  ;;  %vm1154_vm9 = vcmp.lt.s32.totalorder %v1122_v25, 512  ;;  %v1093_v24 = vadd.s32 240, %v2050_v12  ;;  %v1094_v17 = vadd.s32 248, %v2050_v12 }
 0x15d   : > { %1051 = vst [vmem:[%s2057_s29 + $0xa8] sm:$0xff] %v1019_v49  ;;  %v1182_v19 = vsel %vm1150_vm5, %v1019_v49, 0.0  ;;  %v1280_v53 = vadd.f32 %v1279_v42, %v1249_v63  ;;  %v1124_v27 = vadd.s32 %v2052_v14, %v1090_v43  ;;  %v1186_v28 = vsel %vm1154_vm9, %v1023_v55, 0.0 }
 0x15e   : > { %v993_v21 = vpop.f32.mrf.mxu3  ;;  %v1212_v39 = vadd.f32 %v1211_v10, %v1181_v36  ;;  %v1251_v44 = vmul.f32 %v1182_v19, %v1182_v19  ;;  %vm1158_vm13 = vcmp.lt.s32.totalorder %v1126_v38, 512  ;;  %v1256_v55 = vmul.f32 %v1187_v35, %v1187_v35 }
 0x15f   : > { %v2325_v2 = vadd.f32 %v993_v21, %v905_v1  ;;  %vm1156_vm11 = vcmp.lt.s32.totalorder %v1124_v27, 512  ;;  %v1128_v16 = vadd.s32 %v2052_v14, %v1094_v17  ;;  %v1190_v61 = vsel %vm1158_vm13, %v1027_v29, 0.0 }
 0x160   : > { %v973_v58 = vpop.f32.mrf.mxu2  ;;  %v797_v6 = vpop.f32.mrf.mxu0  ;;  %v1188_v51 = vsel %vm1156_vm11, %v1025_v34, 0.0  ;;  %v1259_v10 = vmul.f32 %v1190_v61, %v1190_v61 }
 0x161   : > { %v974_v23 = vadd.f32 %v973_v58, %v885_v62  ;;  %v1028_v9 = vmax.f32 %v2325_v2, 0.0  ;;  %v798_v33 = vadd.f32 %v2035_v56, %v797_v6  ;;  %v1250_v56 = vmul.f32 %v1181_v36, %v1181_v36  ;;  %v886_v45 = vpop.f32.mrf.mxu1 }
 0x162   : > { %v1213_v62 = vadd.f32 %v1212_v39, %v1182_v19  ;;  %v1125_v58 = vadd.s32 %v2052_v14, %v1091_v22  ;;  %v1255_v36 = vmul.f32 %v1186_v28, %v1186_v28  ;;  %v1257_v4 = vmul.f32 %v1188_v51, %v1188_v51 }
 0x163   : > { %v1020_v37 = vmax.f32 %v974_v23, 0.0  ;;  %1060 = vst [vmem:[%s2057_s29 + $0xf0] sm:$0xff] %v1028_v9  ;;  %v887_v48 = vadd.f32 %v886_v45, %v798_v33  ;;  %v1281_v0 = vadd.f32 %v1280_v53, %v1250_v56  ;;  %vm1160_vm15 = vcmp.lt.s32.totalorder %v1128_v16, 512 }
 0x164   : > { %vm1157_vm12 = vcmp.lt.s32.totalorder %v1125_v58, 512 }
 0x165   : > { %1052 = vst [vmem:[%s2057_s29 + $0xb0] sm:$0xff] %v1020_v37  ;;  %v1183_v46 = vsel %vm1151_vm6, %v1020_v37, 0.0  ;;  %v1282_v21 = vadd.f32 %v1281_v0, %v1251_v44  ;;  %v1127_v37 = vadd.s32 %v2052_v14, %v1093_v24  ;;  %v1189_v12 = vsel %vm1157_vm12, %v1026_v47, 0.0 }
 0x166   : > { %v995_v59 = vpop.f32.mrf.mxu3  ;;  %v1252_v1 = vmul.f32 %v1183_v46, %v1183_v46  ;;  %v1214_v52 = vadd.f32 %v1213_v62, %v1183_v46 }
 0x167   : > { %v996_v57 = vadd.f32 %v995_v59, %v907_v3  ;;  %vm1159_vm14 = vcmp.lt.s32.totalorder %v1127_v37, 512  ;;  %v1258_v3 = vmul.f32 %v1189_v12, %v1189_v12 }
 0x168   : > { %v975_v49 = vpop.f32.mrf.mxu2  ;;  %v1283_v8 = vadd.f32 %v1282_v21, %v1252_v1  ;;  %v1191_v42 = vsel %vm1159_vm14, %v1028_v9, 0.0 }
 0x169   : > { %v976_v30 = vadd.f32 %v975_v49, %v887_v48  ;;  %v1029_v7 = vmax.f32 %v996_v57, 0.0  ;;  %v1260_v56 = vmul.f32 %v1191_v42, %v1191_v42 }
 0x16b   : > { %v1021_v15 = vmax.f32 %v976_v30, 0.0  ;;  %1061 = vst [vmem:[%s2057_s29 + $0xf8] sm:$0xff] %v1029_v7  ;;  %v1192_v47 = vsel %vm1160_vm15, %v1029_v7, 0.0 }
 0x16c   : > { %v1261_v46 = vmul.f32 %v1192_v47, %v1192_v47 }
 0x16d   : > { %1053 = vst [vmem:[%s2057_s29 + $0xb8] sm:$0xff] %v1021_v15  ;;  %v1184_v54 = vsel %vm1152_vm8, %v1021_v15, 0.0 }
 0x16e   : > { %v1215_v23 = vadd.f32 %v1214_v52, %v1184_v54  ;;  %v1253_v6 = vmul.f32 %v1184_v54, %v1184_v54 }
 0x170   : > { %v1216_v18 = vadd.f32 %v1215_v23, %v1185_v20  ;;  %v1284_v41 = vadd.f32 %v1283_v8, %v1253_v6 }
 0x172   : > { %v1217_v33 = vadd.f32 %v1216_v18, %v1186_v28  ;;  %v1285_v32 = vadd.f32 %v1284_v41, %v1254_v5 }
 0x174   : > { %v1218_v11 = vadd.f32 %v1217_v33, %v1187_v35  ;;  %v1286_v63 = vadd.f32 %v1285_v32, %v1255_v36 }
 0x176   : > { %v1287_v13 = vadd.f32 %v1286_v63, %v1256_v55  ;;  %v1219_v19 = vadd.f32 %v1218_v11, %v1188_v51 }
 0x178   : > { %v1220_v26 = vadd.f32 %v1219_v19, %v1189_v12  ;;  %v1288_v34 = vadd.f32 %v1287_v13, %v1257_v4 }
 0x17a   : > { %v1221_v14 = vadd.f32 %v1220_v26, %v1190_v61  ;;  %v1289_v31 = vadd.f32 %v1288_v34, %v1258_v3 }
 0x17c   : > { %v1222_v45 = vadd.f32 %v1221_v14, %v1191_v42  ;;  %v1290_v25 = vadd.f32 %v1289_v31, %v1259_v10 }
 0x17e   : > { %v1223_v43 = vadd.f32 %v1222_v45, %v1192_v47  ;;  %v1291_v40 = vadd.f32 %v1290_v25, %v1260_v56 }
 0x180   : > { %v1224_v29 = vrot.slane %v1223_v43, 4  ;;  %v1292_v48 = vadd.f32 %v1291_v40, %v1261_v46 }
 0x182   : > { %v1225_v59 = vadd.f32 %v1224_v29, %v1223_v43  ;;  %v1293_v53 = vrot.slane %v1292_v48, 4 }
 0x184   : > { %v1226_v39 = vrot.slane %v1225_v59, 2  ;;  %v1294_v44 = vadd.f32 %v1293_v53, %v1292_v48 }
 0x186   : > { %v1227_v2 = vadd.f32 %v1226_v39, %v1225_v59  ;;  %v1295_v9 = vrot.slane %v1294_v44, 2 }
 0x188   : > { %v1228_v49 = vrot.slane %v1227_v2, 1  ;;  %v1296_v57 = vadd.f32 %v1295_v9, %v1294_v44 }
 0x18a   : > { %v1297_v60 = vrot.slane %v1296_v57, 1  ;;  %v1229_v22 = vadd.f32 %v1228_v49, %v1227_v2 }
 0x18c   : > { %v1298_v30 = vadd.f32 %v1297_v60, %v1296_v57 }
 0x18e   : > { %v1300_v0 = vsel %vm1299_vm0, %v1229_v22, %v1298_v30 }
 0x18f   : > { %1301 = vst [vmem:[%s214_s6] sm:$0x3] %v1300_v0 }
 0x190 PF: > { %s15_s15 = sadd.s32 1, %s1802_s15  }
 0x191   : > { %p12_p5 = scmp.ge.s32.totalorder %s15_s15, 4  }
 0x193   :  { %14 = sbr.rel (!%p12_p5) target bundleno = 1 (0x1), region = 74 }

// kernel: completion_forward.65
= control target key start
LH: loop header
LB: loop body
LE: loop exit
PB: predicated region body
PF: predicated region fallthrough
CT: control target
= control target key end

     0   :  { %s2250_s12 = smov 0   ;;  %s2809_s0 = inlined_call_operand.vmem [shape: bf16[512,384], index: 0, kind: input, shape index: {}]   ;;  %s2810_s1 = inlined_call_operand.vmem [shape: bf16[384,128], index: 1, kind: input, shape index: {}]   ;;  %s2811_s2 = inlined_call_operand.vmem [shape: f32[1,128], index: 2, kind: input, shape index: {}]   ;;  %s2812_s3 = inlined_call_operand.vmem [shape: f32[512,128], index: 3, kind: output, shape index: {}]  }
   0x1 LB: > { %s1656_s13 = sadd.s32 4294967295, %s2228_s12   ;;  %p1660_p0 = scmp.ge.s32.totalorder %s2228_s12, 1  ;;  %s2228_s12 = sphi %s2250_s12, %s13_s12  }
   0x2   : > { %p139_p1 = scmp.lt.s32.totalorder %s2228_s12, 3 }
   0x4   : > { %p140_p2 = pnand %p1660_p0, %p139_p1 }
   0x5   : > { %s1661_s5 = sshll.u32 (!%p140_p2), %s1656_s13, 5 }
   0x6   : > { %143 = sbr.rel (%p140_p2) target bundleno = 393 (0x189), region = 32  ;;  %p165_p3 = scmp.lt.s32.totalorder (!%p140_p2), %s1661_s5, 63 }
   0xb   : > { %v2042_v0 = vld [vmem:[%s2810_s1 + $0x38] sm:$0xff]  ;;  %v2041_v3 = vld [vmem:[%s2810_s1 + $0x30] sm:$0xff]  ;;  %v2040_v6 = vld [vmem:[%s2810_s1 + $0x28] sm:$0xff]  ;;  %s2826_s5 = smov (!%p165_p3, %s1661_s5), 63 }
   0xc   : > { %v2264_v1 = vld [vmem:[%s2810_s1 + $0x78] sm:$0xff]  ;;  %693 = vmatpush.bf16.msra.mxu0 %v2042_v0  ;;  %2059 = vmatpush.bf16.msra.mxu3 %v2042_v0  ;;  %v2279_v4 = vld [vmem:[%s2810_s1 + $0x70] sm:$0xff]  ;;  %v2294_v7 = vld [vmem:[%s2810_s1 + $0x68] sm:$0xff]  ;;  %s2083_s21 = smul.u32 12, %s2826_s5  ;;  %s1664_s18 = sshll.u32 %s2826_s5, 3 }
   0xd   : > { %v2269_v2 = vld [vmem:[%s2810_s1 + $0xb8] sm:$0xff]  ;;  %782 = vmatpush.bf16.msra.mxu1 %v2264_v1  ;;  %v2284_v5 = vld [vmem:[%s2810_s1 + $0xb0] sm:$0xff]  ;;  %v2299_v8 = vld [vmem:[%s2810_s1 + $0xa8] sm:$0xff] }
   0xe   : > { %871 = vmatpush.bf16.msra.mxu2 %v2269_v2  ;;  %v2039_v9 = vld [vmem:[%s2810_s1 + $0x20] sm:$0xff]  ;;  %v2038_v12 = vld [vmem:[%s2810_s1 + $0x18] sm:$0xff]  ;;  %v2037_v15 = vld [vmem:[%s2810_s1 + $0x10] sm:$0xff]  ;;  %s2350_s30 = scalar_lea.vmem %s2809_s0, %s2083_s21  ;;  %s2499_s21 = scalar_lea.vmem %s2812_s3, %s1664_s18 }
   0xf   : > { %v2309_v10 = vld [vmem:[%s2810_s1 + $0x60] sm:$0xff]  ;;  %v2046_v13 = vld [vmem:[%s2810_s1 + $0x58] sm:$0xff]  ;;  %v2045_v16 = vld [vmem:[%s2810_s1 + $0x50] sm:$0xff] }
  0x10   : > { %694 = vmatpush.bf16.msra.mxu0 %v2041_v3  ;;  %2060 = vmatpush.bf16.msra.mxu3 %v2041_v3  ;;  %v2314_v11 = vld [vmem:[%s2810_s1 + $0xa0] sm:$0xff]  ;;  %v2329_v14 = vld [vmem:[%s2810_s1 + $0x98] sm:$0xff]  ;;  %v2342_v17 = vld [vmem:[%s2810_s1 + $0x90] sm:$0xff] }
  0x11   : > { %783 = vmatpush.bf16.msra.mxu1 %v2279_v4  ;;  %v2036_v18 = vld [vmem:[%s2810_s1 + $0x8] sm:$0xff]  ;;  %v2035_v21 = vld [vmem:[%s2810_s1] sm:$0xff]  ;;  %v1669_v29 = vld [vmem:[%s2350_s30 + $0xc] sm:$0xf0] }
  0x12   : > { %872 = vmatpush.bf16.msra.mxu2 %v2284_v5  ;;  %v2044_v19 = vld [vmem:[%s2810_s1 + $0x48] sm:$0xff]  ;;  %v2043_v22 = vld [vmem:[%s2810_s1 + $0x40] sm:$0xff]  ;;  %v1989_v31 = vld [vmem:[%s2350_s30 + $0x10] sm:$0xf0] }
  0x13   : > { %v2359_v20 = vld [vmem:[%s2810_s1 + $0x88] sm:$0xff]  ;;  %v2370_v23 = vld [vmem:[%s2810_s1 + $0x80] sm:$0xff]  ;;  %v1679_v36 = vld [vmem:[%s2350_s30 + $0x18] sm:$0xf] }
  0x14   : > { %695 = vmatpush.bf16.msra.mxu0 %v2040_v6  ;;  %2061 = vmatpush.bf16.msra.mxu3 %v2040_v6  ;;  %v1667_v24 = vld [vmem:[%s2350_s30] sm:$0xf]  ;;  %v1988_v25 = vld [vmem:[%s2350_s30 + $0x8] sm:$0xf0]  ;;  %v1987_v28 = vld [vmem:[%s2350_s30 + $0x4] sm:$0xf] }
  0x15   : > { %784 = vmatpush.bf16.msra.mxu1 %v2294_v7  ;;  %v1811_v26 = vld [vmem:[%s2350_s30 + $0x120] sm:$0xf]  ;;  %v2024_v27 = vld [vmem:[%s2350_s30 + $0x128] sm:$0xf0]  ;;  %v1675_v30 = vld [vmem:[%s2350_s30 + $0x8] sm:$0xf]  ;;  %v1668_v32 = vor.u32 %v1988_v25, %v1667_v24  ;;  %v1672_v34 = vor.u32 %v1987_v28, %v1669_v29 }
  0x16   : > { %873 = vmatpush.bf16.msra.mxu2 %v2299_v8  ;;  %v1812_v33 = vor.u32 %v2024_v27, %v1811_v26  ;;  %v1676_v35 = vor.u32 %v1989_v31, %v1675_v30  ;;  %v1991_v37 = vld [vmem:[%s2350_s30 + $0x20] sm:$0xf0]  ;;  %v1823_v38 = vld [vmem:[%s2350_s30 + $0x138] sm:$0xf]  ;;  %v1990_v40 = vld [vmem:[%s2350_s30 + $0x1c] sm:$0xf] }
  0x17   : > { %v2027_v39 = vld [vmem:[%s2350_s30 + $0x140] sm:$0xf0]  ;;  %v1681_v41 = vld [vmem:[%s2350_s30 + $0x24] sm:$0xf0]  ;;  %v1687_v42 = vld [vmem:[%s2350_s30 + $0x20] sm:$0xf]  ;;  %v1680_v44 = vor.u32 %v1991_v37, %v1679_v36 }
  0x18   : > { %696 = vmatpush.bf16.msra.mxu0 %v2039_v9  ;;  %2062 = vmatpush.bf16.msra.mxu3 %v2039_v9  ;;  %v1992_v43 = vld [vmem:[%s2350_s30 + $0x28] sm:$0xf0]  ;;  %v1824_v45 = vor.u32 %v2027_v39, %v1823_v38  ;;  %v1684_v46 = vor.u32 %v1990_v40, %v1681_v41  ;;  %v1691_v48 = vld [vmem:[%s2350_s30 + $0x30] sm:$0xf]  ;;  %v1994_v49 = vld [vmem:[%s2350_s30 + $0x38] sm:$0xf0] }
  0x19   : > { %785 = vmatpush.bf16.msra.mxu1 %v2309_v10  ;;  %v1688_v47 = vor.u32 %v1992_v43, %v1687_v42  ;;  %v1835_v50 = vld [vmem:[%s2350_s30 + $0x150] sm:$0xf]  ;;  %v2030_v51 = vld [vmem:[%s2350_s30 + $0x158] sm:$0xf0]  ;;  %v1993_v52 = vld [vmem:[%s2350_s30 + $0x34] sm:$0xf]  ;;  %v1692_v56 = vor.u32 %v1994_v49, %v1691_v48 }
  0x1a   : > { %874 = vmatpush.bf16.msra.mxu2 %v2314_v11  ;;  %v1693_v53 = vld [vmem:[%s2350_s30 + $0x3c] sm:$0xf0]  ;;  %v1699_v54 = vld [vmem:[%s2350_s30 + $0x38] sm:$0xf]  ;;  %v1995_v55 = vld [vmem:[%s2350_s30 + $0x40] sm:$0xf0]  ;;  %v1836_v57 = vor.u32 %v2030_v51, %v1835_v50 }
  0x1b   : > { %v1696_v58 = vor.u32 %v1993_v52, %v1693_v53  ;;  %v1700_v59 = vor.u32 %v1995_v55, %v1699_v54  ;;  %v1703_v60 = vld [vmem:[%s2350_s30 + $0x48] sm:$0xf]  ;;  %v1997_v61 = vld [vmem:[%s2350_s30 + $0x50] sm:$0xf0]  ;;  %v1996_v0 = vld [vmem:[%s2350_s30 + $0x4c] sm:$0xf] }
  0x1c   : > { %697 = vmatpush.bf16.msra.mxu0 %v2038_v12  ;;  %2063 = vmatpush.bf16.msra.mxu3 %v2038_v12  ;;  %v1847_v62 = vld [vmem:[%s2350_s30 + $0x168] sm:$0xf]  ;;  %v2033_v63 = vld [vmem:[%s2350_s30 + $0x170] sm:$0xf0]  ;;  %v1998_v3 = vld [vmem:[%s2350_s30 + $0x58] sm:$0xf0] }
  0x1d   : > { %786 = vmatpush.bf16.msra.mxu1 %v2046_v13  ;;  %v2000_v9 = vld [vmem:[%s2350_s30 + $0x68] sm:$0xf0]  ;;  %v1813_v12 = vld [vmem:[%s2350_s30 + $0x12c] sm:$0xf0]  ;;  %v2026_v24 = vld [vmem:[%s2350_s30 + $0x13c] sm:$0xf] }
  0x1e   : > { %875 = vmatpush.bf16.msra.mxu2 %v2329_v14  ;;  %v1825_v25 = vld [vmem:[%s2350_s30 + $0x144] sm:$0xf0]  ;;  %v1735_v26 = vld [vmem:[%s2350_s30 + $0x80] sm:$0xf]  ;;  %v2004_v27 = vld [vmem:[%s2350_s30 + $0x88] sm:$0xf0] }
  0x1f   : > { %v1828_v29 = vor.u32 %v2026_v24, %v1825_v25  ;;  %v1736_v31 = vor.u32 %v2004_v27, %v1735_v26  ;;  %v1837_v36 = vld [vmem:[%s2350_s30 + $0x15c] sm:$0xf0]  ;;  %v1747_v38 = vld [vmem:[%s2350_s30 + $0x98] sm:$0xf]  ;;  %v2007_v39 = vld [vmem:[%s2350_s30 + $0xa0] sm:$0xf0] }
  0x20   : > { %698 = vmatpush.bf16.msra.mxu0 %v2037_v15  ;;  %2064 = vmatpush.bf16.msra.mxu3 %v2037_v15  ;;  %v2001_v15 = vld [vmem:[%s2350_s30 + $0x70] sm:$0xf0]  ;;  %v1741_v37 = vld [vmem:[%s2350_s30 + $0x9c] sm:$0xf0]  ;;  %v1748_v43 = vor.u32 %v2007_v39, %v1747_v38  ;;  %v1849_v48 = vld [vmem:[%s2350_s30 + $0x174] sm:$0xf0] }
  0x21   : > { %787 = vmatpush.bf16.msra.mxu1 %v2045_v16  ;;  %v1753_v49 = vld [vmem:[%s2350_s30 + $0xb4] sm:$0xf0]  ;;  %v1759_v50 = vld [vmem:[%s2350_s30 + $0xb0] sm:$0xf]  ;;  %v2010_v51 = vld [vmem:[%s2350_s30 + $0xb8] sm:$0xf0] }
  0x22   : > { %876 = vmatpush.bf16.msra.mxu2 %v2342_v17  ;;  %v1760_v55 = vor.u32 %v2010_v51, %v1759_v50  ;;  %v2016_v24 = vld [vmem:[%s2350_s30 + $0xe8] sm:$0xf0]  ;;  %v2018_v50 = vld [vmem:[%s2350_s30 + $0xf8] sm:$0xf0]  ;;  %v2017_v51 = vld [vmem:[%s2350_s30 + $0xf4] sm:$0xf] }
  0x24   : > { %699 = vmatpush.bf16.msra.mxu0 %v2036_v18  ;;  %2065 = vmatpush.bf16.msra.mxu3 %v2036_v18 }
  0x25   : > { %788 = vmatpush.bf16.msra.mxu1 %v2044_v19 }
  0x26   : > { %877 = vmatpush.bf16.msra.mxu2 %v2359_v20 }
  0x28   : > { %700 = vmatpush.bf16.msra.mxu0 %v2035_v21  ;;  %2066 = vmatpush.bf16.msra.mxu3 %v2035_v21  ;;  %v2003_v21 = vld [vmem:[%s2350_s30 + $0x80] sm:$0xf0] }
  0x29   : > { %789 = vmatpush.bf16.msra.mxu1 %v2043_v22 }
  0x2a   : > { %878 = vmatpush.bf16.msra.mxu2 %v2370_v23 }
  0x2b   : > { %701 = vmatmul.bf16.vlgmr.msra.gmra.mxu0 %v1668_v32  ;;  %761 = vmatmul.bf16.vlgmr.msra.gmra.mxu3 %v1812_v33  ;;  %v1739_v32 = vld [vmem:[%s2350_s30 + $0x90] sm:$0xf]  ;;  %v2006_v33 = vld [vmem:[%s2350_s30 + $0x98] sm:$0xf0] }
  0x2c   : > { %2067 = vmatpush.bf16.msrb.mxu3 %v2264_v1  ;;  %790 = vmatmul.bf16.vlgmr.msra.gmra.mxu1 %v1672_v34  ;;  %v1705_v1 = vld [vmem:[%s2350_s30 + $0x54] sm:$0xf0]  ;;  %v2005_v34 = vld [vmem:[%s2350_s30 + $0x94] sm:$0xf]  ;;  %v1740_v40 = vor.u32 %v2006_v33, %v1739_v32 }
  0x2d   : > { %879 = vmatmul.bf16.vlgmr.msra.gmra.mxu2 %v1676_v35  ;;  %v1708_v6 = vor.u32 %v1996_v0, %v1705_v1  ;;  %v2029_v35 = vld [vmem:[%s2350_s30 + $0x154] sm:$0xf]  ;;  %v1744_v42 = vor.u32 %v2005_v34, %v1741_v37 }
  0x2e   : > { %v1840_v41 = vor.u32 %v2029_v35, %v1837_v36  ;;  %v2013_v0 = vld [vmem:[%s2350_s30 + $0xd0] sm:$0xf0] }
  0x30   : > { %2068 = vmatpush.bf16.msrb.mxu3 %v2279_v4  ;;  %v1704_v4 = vor.u32 %v1997_v61, %v1703_v60  ;;  %v1819_v60 = vld [vmem:[%s2350_s30 + $0x128] sm:$0xf]  ;;  %v2025_v61 = vld [vmem:[%s2350_s30 + $0x130] sm:$0xf0] }
  0x34   : > { %2069 = vmatpush.bf16.msrb.mxu3 %v2294_v7 }
  0x38   : > { %2070 = vmatpush.bf16.msrb.mxu3 %v2309_v10  ;;  %v1999_v10 = vld [vmem:[%s2350_s30 + $0x64] sm:$0xf] }
  0x3b   : > { %706 = vmatmul.bf16.gmra.mxu0 %v1680_v44  ;;  %766 = vmatmul.bf16.gmra.mxu3 %v1824_v45  ;;  %v1751_v44 = vld [vmem:[%s2350_s30 + $0xa8] sm:$0xf]  ;;  %v2009_v45 = vld [vmem:[%s2350_s30 + $0xb0] sm:$0xf0] }
  0x3c   : > { %2071 = vmatpush.bf16.msrb.mxu3 %v2046_v13  ;;  %795 = vmatmul.bf16.gmra.mxu1 %v1684_v46  ;;  %v1717_v13 = vld [vmem:[%s2350_s30 + $0x6c] sm:$0xf0]  ;;  %v2008_v46 = vld [vmem:[%s2350_s30 + $0xac] sm:$0xf]  ;;  %v1752_v52 = vor.u32 %v2009_v45, %v1751_v44 }
  0x3d   : > { %884 = vmatmul.bf16.gmra.mxu2 %v1688_v47  ;;  %v1720_v18 = vor.u32 %v1999_v10, %v1717_v13  ;;  %v2032_v47 = vld [vmem:[%s2350_s30 + $0x16c] sm:$0xf]  ;;  %v1756_v54 = vor.u32 %v2008_v46, %v1753_v49 }
  0x3e   : > { %v1852_v53 = vor.u32 %v2032_v47, %v1849_v48  ;;  %v1787_v47 = vld [vmem:[%s2350_s30 + $0xf0] sm:$0xf] }
  0x40   : > { %2072 = vmatpush.bf16.msrb.mxu3 %v2045_v16 }
  0x44   : > { %2073 = vmatpush.bf16.msrb.mxu3 %v2044_v19 }
  0x48   : > { %2074 = vmatpush.bf16.msrb.mxu3 %v2043_v22  ;;  %v2002_v22 = vld [vmem:[%s2350_s30 + $0x7c] sm:$0xf] }
  0x4b   : > { %711 = vmatmul.bf16.gmra.mxu0 %v1692_v56  ;;  %771 = vmatmul.bf16.gmra.mxu3 %v1836_v57  ;;  %v2453_v56 = vld [vmem:[%s2811_s2] ss:$0 sm:$0xff] }
  0x4c   : > { %2075 = vmatpush.bf16.msra.mxu3 %v2269_v2  ;;  %800 = vmatmul.bf16.gmra.mxu1 %v1696_v58  ;;  %v1711_v2 = vld [vmem:[%s2350_s30 + $0x50] sm:$0xf]  ;;  %v1763_v57 = vld [vmem:[%s2350_s30 + $0xc0] sm:$0xf]  ;;  %v2012_v58 = vld [vmem:[%s2350_s30 + $0xc8] sm:$0xf0] }
  0x4d   : > { %889 = vmatmul.bf16.gmra.mxu2 %v1700_v59  ;;  %v1712_v7 = vor.u32 %v1998_v3, %v1711_v2  ;;  %v2011_v59 = vld [vmem:[%s2350_s30 + $0xc4] sm:$0xf]  ;;  %v1764_v1 = vor.u32 %v2012_v58, %v1763_v57  ;;  %v1820_v2 = vor.u32 %v2025_v61, %v1819_v60  ;;  %v1795_v57 = vld [vmem:[%s2350_s30 + $0xf8] sm:$0xf] }
  0x4e   : > { %v2019_v58 = vld [vmem:[%s2350_s30 + $0x100] sm:$0xf0] }
  0x50   : > { %2076 = vmatpush.bf16.msra.mxu3 %v2284_v5  ;;  %v1848_v5 = vor.u32 %v2033_v63, %v1847_v62  ;;  %v1765_v62 = vld [vmem:[%s2350_s30 + $0xcc] sm:$0xf0]  ;;  %v1771_v63 = vld [vmem:[%s2350_s30 + $0xc8] sm:$0xf] }
  0x54   : > { %2077 = vmatpush.bf16.msra.mxu3 %v2299_v8  ;;  %v1715_v8 = vld [vmem:[%s2350_s30 + $0x60] sm:$0xf] }
  0x55   : > { %v1716_v16 = vor.u32 %v2000_v9, %v1715_v8 }
  0x58   : > { %2078 = vmatpush.bf16.msra.mxu3 %v2314_v11  ;;  %v2023_v11 = vld [vmem:[%s2350_s30 + $0x124] sm:$0xf] }
  0x5b   : > { %716 = vmatmul.bf16.gmra.mxu0 %v1704_v4  ;;  %776 = vmatmul.bf16.gmra.mxu3 %v1848_v5  ;;  %v1768_v4 = vor.u32 %v2011_v59, %v1765_v62  ;;  %v1772_v5 = vor.u32 %v2013_v0, %v1771_v63  ;;  %v1788_v62 = vor.u32 %v2018_v50, %v1787_v47 }
  0x5c   : > { %2079 = vmatpush.bf16.msra.mxu3 %v2329_v14  ;;  %805 = vmatmul.bf16.gmra.mxu1 %v1708_v6  ;;  %v1723_v14 = vld [vmem:[%s2350_s30 + $0x68] sm:$0xf] }
  0x5d   : > { %894 = vmatmul.bf16.gmra.mxu2 %v1712_v7  ;;  %v1724_v19 = vor.u32 %v2001_v15, %v1723_v14 }
  0x60   : > { %2080 = vmatpush.bf16.msra.mxu3 %v2342_v17  ;;  %v1816_v17 = vor.u32 %v2023_v11, %v1813_v12 }
  0x64   : > { %2081 = vmatpush.bf16.msra.mxu3 %v2359_v20  ;;  %v1727_v20 = vld [vmem:[%s2350_s30 + $0x78] sm:$0xf] }
  0x65   : > { %v1728_v28 = vor.u32 %v2003_v21, %v1727_v20  ;;  %v2028_v20 = vld [vmem:[%s2350_s30 + $0x148] sm:$0xf0]  ;;  %v1777_v21 = vld [vmem:[%s2350_s30 + $0xe4] sm:$0xf0] }
  0x68   : > { %2082 = vmatpush.bf16.msra.mxu3 %v2370_v23  ;;  %v1729_v23 = vld [vmem:[%s2350_s30 + $0x84] sm:$0xf0] }
  0x69   : > { %v1732_v30 = vor.u32 %v2002_v22, %v1729_v23  ;;  %v1783_v22 = vld [vmem:[%s2350_s30 + $0xe0] sm:$0xf] }
  0x6a   : > { %v1784_v32 = vor.u32 %v2016_v24, %v1783_v22 }
  0x6b   : > { %721 = vmatmul.bf16.gmra.mxu0 %v1716_v16  ;;  %850 = vmatmul.bf16.vlgmr.msrb.gmra.mxu3 %v1816_v17  ;;  %v1775_v16 = vld [vmem:[%s2350_s30 + $0xd8] sm:$0xf]  ;;  %v2015_v17 = vld [vmem:[%s2350_s30 + $0xe0] sm:$0xf0] }
  0x6c   : > { %810 = vmatmul.bf16.gmra.mxu1 %v1720_v18  ;;  %v2014_v18 = vld [vmem:[%s2350_s30 + $0xdc] sm:$0xf]  ;;  %v1776_v27 = vor.u32 %v2015_v17, %v1775_v16 }
  0x6d   : > { %899 = vmatmul.bf16.gmra.mxu2 %v1724_v19  ;;  %v1831_v19 = vld [vmem:[%s2350_s30 + $0x140] sm:$0xf] }
  0x7b   : > { %726 = vmatmul.bf16.gmra.mxu0 %v1728_v28  ;;  %855 = vmatmul.bf16.gmra.mxu3 %v1828_v29  ;;  %v1832_v28 = vor.u32 %v2028_v20, %v1831_v19 }
  0x7c   : > { %815 = vmatmul.bf16.gmra.mxu1 %v1732_v30 }
  0x7d   : > { %904 = vmatmul.bf16.gmra.mxu2 %v1736_v31  ;;  %v1780_v31 = vor.u32 %v2014_v18, %v1777_v21 }
  0x8b   : > { %731 = vmatmul.bf16.gmra.mxu0 %v1740_v40  ;;  %860 = vmatmul.bf16.gmra.mxu3 %v1840_v41 }
  0x8c   : > { %820 = vmatmul.bf16.gmra.mxu1 %v1744_v42 }
  0x8d   : > { %909 = vmatmul.bf16.gmra.mxu2 %v1748_v43 }
  0x9b   : > { %736 = vmatmul.bf16.gmra.mxu0 %v1752_v52  ;;  %865 = vmatmul.bf16.gmra.mxu3 %v1852_v53  ;;  %v1789_v53 = vld [vmem:[%s2350_s30 + $0xfc] sm:$0xf0] }
  0x9c   : > { %825 = vmatmul.bf16.gmra.mxu1 %v1756_v54  ;;  %v1843_v54 = vld [vmem:[%s2350_s30 + $0x158] sm:$0xf] }
  0x9d   : > { %914 = vmatmul.bf16.gmra.mxu2 %v1760_v55  ;;  %v2031_v55 = vld [vmem:[%s2350_s30 + $0x160] sm:$0xf0] }
  0xa8   : > { %v702_v3 = vpop.f32.mrf.mxu0 }
  0xa9   : > { %v703_v6 = vadd.f32 %v2453_v56, %v702_v3  ;;  %v791_v7 = vpop.f32.mrf.mxu1  ;;  %v1844_v3 = vor.u32 %v2031_v55, %v1843_v54 }
  0xab   : > { %741 = vmatmul.bf16.gmra.mxu0 %v1764_v1  ;;  %939 = vmatmul.bf16.vlgmr.msra.gmra.mxu3 %v1820_v2  ;;  %v792_v8 = vadd.f32 %v791_v7, %v703_v6  ;;  %v1792_v2 = vor.u32 %v2017_v51, %v1789_v53  ;;  %v1796_v7 = vor.u32 %v2019_v58, %v1795_v57 }
  0xac   : > { %830 = vmatmul.bf16.gmra.mxu1 %v1768_v4 }
  0xad   : > { %919 = vmatmul.bf16.gmra.mxu2 %v1772_v5 }
  0xae   : > { %v2464_v9 = vpop.f32.mrf.mxu3 }
  0xb0   : > { %v880_v10 = vpop.f32.mrf.mxu2  ;;  %v704_v12 = vpop.f32.mrf.mxu0 }
  0xb1   : > { %v881_v11 = vadd.f32 %v880_v10, %v792_v8  ;;  %v793_v13 = vpop.f32.mrf.mxu1  ;;  %v705_v15 = vadd.f32 %v2453_v56, %v704_v12 }
  0xb3   : > { %v1953_v14 = vmul.f32 -1.442695, %v881_v11  ;;  %v794_v25 = vadd.f32 %v793_v13, %v705_v15 }
  0xb5   : > { %2093 = vpow2.f32 %v1953_v14 }
  0xb6   : > { %v2475_v23 = vpop.f32.mrf.mxu3 }
  0xb8   : > { %v882_v26 = vpop.f32.mrf.mxu2  ;;  %v707_v30 = vpop.f32.mrf.mxu0 }
  0xb9   : > { %v883_v29 = vadd.f32 %v882_v26, %v794_v25  ;;  %v708_v33 = vadd.f32 %v2453_v56, %v707_v30  ;;  %v796_v34 = vpop.f32.mrf.mxu1 }
  0xbb   : > { %v2094_v35 = vpop.eup %2093  ;;  %v1954_v36 = vmul.f32 -1.442695, %v883_v29  ;;  %746 = vmatmul.bf16.gmra.mxu0 %v1776_v27  ;;  %944 = vmatmul.bf16.gmra.mxu3 %v1832_v28  ;;  %v797_v38 = vadd.f32 %v796_v34, %v708_v33 }
  0xbc   : > { %v1056_v37 = vadd.f32 1.0, %v2094_v35  ;;  %835 = vmatmul.bf16.gmra.mxu1 %v1780_v31  ;;  %v1799_v35 = vld [vmem:[%s2350_s30 + $0x108] sm:$0xf] }
  0xbd   : > { %2095 = vpow2.f32 %v1954_v36  ;;  %924 = vmatmul.bf16.gmra.mxu2 %v1784_v32  ;;  %v2021_v36 = vld [vmem:[%s2350_s30 + $0x110] sm:$0xf0] }
  0xbe   : > { %2097 = vrcp.f32 %v1056_v37  ;;  %v2478_v39 = vpop.f32.mrf.mxu3  ;;  %v1097_v63 = vand.u32 2147483647, %v1056_v37  ;;  %v1099_v0 = vand.u32 2147483648, %v1056_v37  ;;  %vm1093_vm1 = vweird.f32 %v1056_v37 }
  0xbf   : > { %v1800_v53 = vor.u32 %v2021_v36, %v1799_v35 }
  0xc0   : > { %v885_v40 = vpop.f32.mrf.mxu2  ;;  %v709_v42 = vpop.f32.mrf.mxu0  ;;  %vm1098_vm3 = vcmp.eq.f32.partialorder %v1097_v63, 8.507059e+37  ;;  %v1100_v15 = vor.u32 1.1754944e-38, %v1099_v0 }
  0xc1   : > { %v886_v41 = vadd.f32 %v885_v40, %v797_v38  ;;  %v798_v43 = vpop.f32.mrf.mxu1  ;;  %v710_v46 = vadd.f32 %v2453_v56, %v709_v42  ;;  %v1801_v42 = vld [vmem:[%s2350_s30 + $0x114] sm:$0xf0] }
  0xc3   : > { %v2096_v44 = vpop.eup %2095  ;;  %v1955_v45 = vmul.f32 -1.442695, %v886_v41  ;;  %v799_v60 = vadd.f32 %v798_v43, %v710_v46  ;;  %v2020_v41 = vld [vmem:[%s2350_s30 + $0x10c] sm:$0xf]  ;;  %v2034_v46 = vld [vmem:[%s2350_s30 + $0x178] sm:$0xf0] }
  0xc4   : > { %v2098_v48 = vpop.eup %2097  ;;  %v2482_v49 = vadd.f32 1.0, %v2096_v44  ;;  %v1804_v58 = vor.u32 %v2020_v41, %v1801_v42 }
  0xc5   : > { %v1089_v52 = vmul.f32 %v2098_v48, %v1056_v37  ;;  %2099 = vpow2.f32 %v1955_v45  ;;  %vm1094_vm0 = vweird.f32 %v2098_v48  ;;  %v1855_v45 = vld [vmem:[%s2350_s30 + $0x170] sm:$0xf] }
  0xc6   : > { %2101 = vrcp.f32 %v2482_v49  ;;  %v2492_v61 = vpop.f32.mrf.mxu3  ;;  %vm1095_vm2 = vmor %vm1093_vm1, %vm1094_vm0  ;;  %v1114_v24 = vand.u32 2147483648, %v2482_v49  ;;  %v1112_v27 = vand.u32 2147483647, %v2482_v49  ;;  %vm1108_vm5 = vweird.f32 %v2482_v49 }
  0xc7   : > { %v1090_v59 = vsub.f32 1.0, %v1089_v52 }
  0xc8   : > { %v887_v1 = vpop.f32.mrf.mxu2  ;;  %v712_v6 = vpop.f32.mrf.mxu0  ;;  %v1115_v38 = vor.u32 1.1754944e-38, %v1114_v24  ;;  %vm1113_vm7 = vcmp.eq.f32.partialorder %v1112_v27, 8.507059e+37 }
  0xc9   : > { %v1091_v4 = vmul.f32 %v2098_v48, %v1090_v59  ;;  %v888_v5 = vadd.f32 %v887_v1, %v799_v60  ;;  %v713_v8 = vadd.f32 %v2453_v56, %v712_v6  ;;  %v801_v10 = vpop.f32.mrf.mxu1  ;;  %v1856_v59 = vor.u32 %v2034_v46, %v1855_v45 }
  0xcb   : > { %v2100_v11 = vpop.eup %2099  ;;  %v1092_v12 = vadd.f32 %v2098_v48, %v1091_v4  ;;  %v1956_v13 = vmul.f32 -1.442695, %v888_v5  ;;  %751 = vmatmul.bf16.gmra.mxu0 %v1788_v62  ;;  %949 = vmatmul.bf16.gmra.mxu3 %v1844_v3  ;;  %v802_v19 = vadd.f32 %v801_v10, %v713_v8 }
  0xcc   : > { %v2102_v14 = vpop.eup %2101  ;;  %v2501_v16 = vadd.f32 1.0, %v2100_v11  ;;  %840 = vmatmul.bf16.gmra.mxu1 %v1792_v2 }
  0xcd   : > { %v1096_v17 = vsel %vm1095_vm2, %v2098_v48, %v1092_v12  ;;  %v1104_v18 = vmul.f32 %v2102_v14, %v2482_v49  ;;  %2103 = vpow2.f32 %v1956_v13  ;;  %929 = vmatmul.bf16.gmra.mxu2 %v1796_v7  ;;  %vm1109_vm4 = vweird.f32 %v2102_v14  ;;  %v1807_v48 = vld [vmem:[%s2350_s30 + $0x110] sm:$0xf]  ;;  %v2022_v49 = vld [vmem:[%s2350_s30 + $0x118] sm:$0xf0] }
  0xce   : > { %v1101_v20 = vsel %vm1098_vm3, %v1100_v15, %v1096_v17  ;;  %2105 = vrcp.f32 %v2501_v16  ;;  %v2506_v22 = vpop.f32.mrf.mxu3  ;;  %vm1110_vm6 = vmor %vm1108_vm5, %vm1109_vm4  ;;  %v1127_v54 = vand.u32 2147483647, %v2501_v16  ;;  %v1129_v55 = vand.u32 2147483648, %v2501_v16 }
  0xcf   : > { %1568 = vst [vmem:[%s2499_s21] sm:$0xff] %v1101_v20  ;;  %v1105_v21 = vsub.f32 1.0, %v1104_v18  ;;  %v1808_v0 = vor.u32 %v2022_v49, %v1807_v48  ;;  %vm1123_vm9 = vweird.f32 %v2501_v16 }
  0xd0   : > { %v890_v25 = vpop.f32.mrf.mxu2  ;;  %v714_v29 = vpop.f32.mrf.mxu0  ;;  %vm1128_vm11 = vcmp.eq.f32.partialorder %v1127_v54, 8.507059e+37  ;;  %v1130_v7 = vor.u32 1.1754944e-38, %v1129_v55 }
  0xd1   : > { %v1106_v26 = vmul.f32 %v2102_v14, %v1105_v21  ;;  %v891_v28 = vadd.f32 %v890_v25, %v802_v19  ;;  %v803_v30 = vpop.f32.mrf.mxu1  ;;  %v715_v34 = vadd.f32 %v2453_v56, %v714_v29 }
  0xd3   : > { %v2104_v31 = vpop.eup %2103  ;;  %v1107_v32 = vadd.f32 %v2102_v14, %v1106_v26  ;;  %v1957_v33 = vmul.f32 -1.442695, %v891_v28  ;;  %v804_v51 = vadd.f32 %v803_v30, %v715_v34 }
  0xd4   : > { %v2106_v37 = vpop.eup %2105  ;;  %v2514_v40 = vadd.f32 1.0, %v2104_v31 }
  0xd5   : > { %v1111_v43 = vsel %vm1110_vm6, %v2102_v14, %v1107_v32  ;;  %v1119_v44 = vmul.f32 %v2106_v37, %v2501_v16  ;;  %2107 = vpow2.f32 %v1957_v33  ;;  %vm1124_vm8 = vweird.f32 %v2106_v37 }
  0xd6   : > { %v1116_v47 = vsel %vm1113_vm7, %v1115_v38, %v1111_v43  ;;  %2109 = vrcp.f32 %v2514_v40  ;;  %v2525_v52 = vpop.f32.mrf.mxu3  ;;  %vm1125_vm10 = vmor %vm1123_vm9, %vm1124_vm8  ;;  %v1144_v16 = vand.u32 2147483648, %v2514_v40  ;;  %v1142_v19 = vand.u32 2147483647, %v2514_v40 }
  0xd7   : > { %1569 = vst [vmem:[%s2499_s21 + $0x8] sm:$0xff] %v1116_v47  ;;  %v1120_v50 = vsub.f32 1.0, %v1119_v44  ;;  %vm1138_vm13 = vweird.f32 %v2514_v40 }
  0xd8   : > { %v892_v57 = vpop.f32.mrf.mxu2  ;;  %v717_v63 = vpop.f32.mrf.mxu0  ;;  %v1145_v30 = vor.u32 1.1754944e-38, %v1144_v16  ;;  %vm1143_vm15 = vcmp.eq.f32.partialorder %v1142_v19, 8.507059e+37 }
  0xd9   : > { %v1121_v60 = vmul.f32 %v2106_v37, %v1120_v50  ;;  %v893_v62 = vadd.f32 %v892_v57, %v804_v51  ;;  %v718_v1 = vadd.f32 %v2453_v56, %v717_v63  ;;  %v806_v2 = vpop.f32.mrf.mxu1 }
  0xdb   : > { %v2108_v3 = vpop.eup %2107  ;;  %v1122_v4 = vadd.f32 %v2106_v37, %v1121_v60  ;;  %v1958_v5 = vmul.f32 -1.442695, %v893_v62  ;;  %756 = vmatmul.bf16.gmra.mxu0 %v1800_v53  ;;  %954 = vmatmul.bf16.gmra.mxu3 %v1856_v59  ;;  %v807_v12 = vadd.f32 %v806_v2, %v718_v1 }
  0xdc   : > { %v2110_v6 = vpop.eup %2109  ;;  %v1060_v8 = vadd.f32 1.0, %v2108_v3  ;;  %845 = vmatmul.bf16.gmra.mxu1 %v1804_v58 }
  0xdd   : > { %v1126_v10 = vsel %vm1125_vm10, %v2106_v37, %v1122_v4  ;;  %v1134_v11 = vmul.f32 %v2110_v6, %v2514_v40  ;;  %2111 = vpow2.f32 %v1958_v5  ;;  %934 = vmatmul.bf16.gmra.mxu2 %v1808_v0  ;;  %vm1139_vm12 = vweird.f32 %v2110_v6 }
  0xde   : > { %v1131_v13 = vsel %vm1128_vm11, %v1130_v7, %v1126_v10  ;;  %2113 = vrcp.f32 %v1060_v8  ;;  %v2533_v15 = vpop.f32.mrf.mxu3  ;;  %vm1140_vm14 = vmor %vm1138_vm13, %vm1139_vm12  ;;  %v1157_v38 = vand.u32 2147483647, %v1060_v8  ;;  %v1159_v40 = vand.u32 2147483648, %v1060_v8 }
  0xdf   : > { %1570 = vst [vmem:[%s2499_s21 + $0x10] sm:$0xff] %v1131_v13  ;;  %v1135_v14 = vsub.f32 1.0, %v1134_v11  ;;  %vm1153_vm1 = vweird.f32 %v1060_v8 }
  0xe0   : > { %v895_v17 = vpop.f32.mrf.mxu2  ;;  %v719_v21 = vpop.f32.mrf.mxu0  ;;  %vm1158_vm3 = vcmp.eq.f32.partialorder %v1157_v38, 8.507059e+37  ;;  %v1160_v51 = vor.u32 1.1754944e-38, %v1159_v40 }
  0xe1   : > { %v1136_v18 = vmul.f32 %v2110_v6, %v1135_v14  ;;  %v896_v20 = vadd.f32 %v895_v17, %v807_v12  ;;  %v808_v24 = vpop.f32.mrf.mxu1  ;;  %v720_v28 = vadd.f32 %v2453_v56, %v719_v21 }
  0xe3   : > { %v2112_v25 = vpop.eup %2111  ;;  %v1137_v26 = vadd.f32 %v2110_v6, %v1136_v18  ;;  %v1959_v27 = vmul.f32 -1.442695, %v896_v20  ;;  %v809_v36 = vadd.f32 %v808_v24, %v720_v28 }
  0xe4   : > { %v2114_v29 = vpop.eup %2113  ;;  %v1061_v31 = vadd.f32 1.0, %v2112_v25 }
  0xe5   : > { %v1141_v32 = vsel %vm1140_vm14, %v2110_v6, %v1137_v26  ;;  %v1149_v33 = vmul.f32 %v2114_v29, %v1060_v8  ;;  %2115 = vpow2.f32 %v1959_v27  ;;  %vm1154_vm0 = vweird.f32 %v2114_v29 }
  0xe6   : > { %v1146_v34 = vsel %vm1143_vm15, %v1145_v30, %v1141_v32  ;;  %2117 = vrcp.f32 %v1061_v31  ;;  %v2540_v37 = vpop.f32.mrf.mxu3  ;;  %vm1155_vm2 = vmor %vm1153_vm1, %vm1154_vm0  ;;  %v1174_v62 = vand.u32 2147483648, %v1061_v31  ;;  %v1172_v1 = vand.u32 2147483647, %v1061_v31 }
  0xe7   : > { %1571 = vst [vmem:[%s2499_s21 + $0x18] sm:$0xff] %v1146_v34  ;;  %v1150_v35 = vsub.f32 1.0, %v1149_v33  ;;  %vm1168_vm5 = vweird.f32 %v1061_v31 }
  0xe8   : > { %v897_v41 = vpop.f32.mrf.mxu2  ;;  %v722_v44 = vpop.f32.mrf.mxu0  ;;  %v1175_v11 = vor.u32 1.1754944e-38, %v1174_v62  ;;  %vm1173_vm7 = vcmp.eq.f32.partialorder %v1172_v1, 8.507059e+37 }
  0xe9   : > { %v1151_v42 = vmul.f32 %v2114_v29, %v1150_v35  ;;  %v898_v43 = vadd.f32 %v897_v41, %v809_v36  ;;  %v723_v45 = vadd.f32 %v2453_v56, %v722_v44  ;;  %v811_v46 = vpop.f32.mrf.mxu1 }
  0xeb   : > { %v2116_v47 = vpop.eup %2115  ;;  %v1152_v48 = vadd.f32 %v2114_v29, %v1151_v42  ;;  %v1960_v49 = vmul.f32 -1.442695, %v898_v43  ;;  %v812_v57 = vadd.f32 %v811_v46, %v723_v45 }
  0xec   : > { %v2118_v50 = vpop.eup %2117  ;;  %v1062_v53 = vadd.f32 1.0, %v2116_v47 }
  0xed   : > { %v1156_v54 = vsel %vm1155_vm2, %v2114_v29, %v1152_v48  ;;  %v1164_v55 = vmul.f32 %v2118_v50, %v1061_v31  ;;  %2119 = vpow2.f32 %v1960_v49  ;;  %vm1169_vm4 = vweird.f32 %v2118_v50 }
  0xee   : > { %v1161_v58 = vsel %vm1158_vm3, %v1160_v51, %v1156_v54  ;;  %2121 = vrcp.f32 %v1062_v53  ;;  %v2544_v60 = vpop.f32.mrf.mxu3  ;;  %vm1170_vm6 = vmor %vm1168_vm5, %vm1169_vm4  ;;  %v1187_v20 = vand.u32 2147483647, %v1062_v53  ;;  %v1189_v21 = vand.u32 2147483648, %v1062_v53 }
  0xef   : > { %1572 = vst [vmem:[%s2499_s21 + $0x20] sm:$0xff] %v1161_v58  ;;  %v1165_v59 = vsub.f32 1.0, %v1164_v55  ;;  %vm1183_vm9 = vweird.f32 %v1062_v53 }
  0xf0   : > { %v900_v63 = vpop.f32.mrf.mxu2  ;;  %v724_v3 = vpop.f32.mrf.mxu0  ;;  %vm1188_vm11 = vcmp.eq.f32.partialorder %v1187_v20, 8.507059e+37  ;;  %v1190_v34 = vor.u32 1.1754944e-38, %v1189_v21 }
  0xf1   : > { %v1166_v0 = vmul.f32 %v2118_v50, %v1165_v59  ;;  %v901_v2 = vadd.f32 %v900_v63, %v812_v57  ;;  %v813_v4 = vpop.f32.mrf.mxu1  ;;  %v725_v8 = vadd.f32 %v2453_v56, %v724_v3 }
  0xf3   : > { %v2120_v5 = vpop.eup %2119  ;;  %v1167_v6 = vadd.f32 %v2118_v50, %v1166_v0  ;;  %v1961_v7 = vmul.f32 -1.442695, %v901_v2  ;;  %v814_v18 = vadd.f32 %v813_v4, %v725_v8  ;;  %v770_v0 = vadd.f32 %v2453_v56, %v2492_v61 }
  0xf4   : > { %v2122_v10 = vpop.eup %2121  ;;  %v1063_v12 = vadd.f32 1.0, %v2120_v5 }
  0xf5   : > { %v1171_v13 = vsel %vm1170_vm6, %v2118_v50, %v1167_v6  ;;  %v1179_v14 = vmul.f32 %v2122_v10, %v1062_v53  ;;  %2123 = vpow2.f32 %v1961_v7  ;;  %vm1184_vm8 = vweird.f32 %v2122_v10 }
  0xf6   : > { %v1176_v16 = vsel %vm1173_vm7, %v1175_v11, %v1171_v13  ;;  %2125 = vrcp.f32 %v1063_v12  ;;  %v2548_v19 = vpop.f32.mrf.mxu3  ;;  %vm1185_vm10 = vmor %vm1183_vm9, %vm1184_vm8  ;;  %v1204_v44 = vand.u32 2147483648, %v1063_v12  ;;  %v1202_v47 = vand.u32 2147483647, %v1063_v12 }
  0xf7   : > { %1573 = vst [vmem:[%s2499_s21 + $0x28] sm:$0xff] %v1176_v16  ;;  %v1180_v17 = vsub.f32 1.0, %v1179_v14  ;;  %vm1198_vm13 = vweird.f32 %v1063_v12 }
  0xf8   : > { %v902_v24 = vpop.f32.mrf.mxu2  ;;  %v727_v27 = vpop.f32.mrf.mxu0  ;;  %v1205_v58 = vor.u32 1.1754944e-38, %v1204_v44  ;;  %vm1203_vm15 = vcmp.eq.f32.partialorder %v1202_v47, 8.507059e+37 }
  0xf9   : > { %v1181_v25 = vmul.f32 %v2122_v10, %v1180_v17  ;;  %v903_v26 = vadd.f32 %v902_v24, %v814_v18  ;;  %v728_v28 = vadd.f32 %v2453_v56, %v727_v27  ;;  %v816_v29 = vpop.f32.mrf.mxu1  ;;  %v773_v27 = vadd.f32 %v2453_v56, %v2506_v22 }
  0xfb   : > { %v2124_v30 = vpop.eup %2123  ;;  %v1182_v31 = vadd.f32 %v2122_v10, %v1181_v25  ;;  %v1962_v32 = vmul.f32 -1.442695, %v903_v26  ;;  %v817_v40 = vadd.f32 %v816_v29, %v728_v28 }
  0xfc   : > { %v2126_v33 = vpop.eup %2125  ;;  %v1064_v35 = vadd.f32 1.0, %v2124_v30 }
  0xfd   : > { %v1186_v36 = vsel %vm1185_vm10, %v2122_v10, %v1182_v31  ;;  %v1194_v38 = vmul.f32 %v2126_v33, %v1063_v12  ;;  %2127 = vpow2.f32 %v1962_v32  ;;  %vm1199_vm12 = vweird.f32 %v2126_v33 }
  0xfe   : > { %v1191_v41 = vsel %vm1188_vm11, %v1190_v34, %v1186_v36  ;;  %2129 = vrcp.f32 %v1064_v35  ;;  %v2552_v43 = vpop.f32.mrf.mxu3  ;;  %vm1200_vm14 = vmor %vm1198_vm13, %vm1199_vm12  ;;  %v1217_v5 = vand.u32 2147483647, %v1064_v35  ;;  %v1219_v6 = vand.u32 2147483648, %v1064_v35 }
  0xff   : > { %1574 = vst [vmem:[%s2499_s21 + $0x30] sm:$0xff] %v1191_v41  ;;  %v1195_v42 = vsub.f32 1.0, %v1194_v38  ;;  %vm1213_vm1 = vweird.f32 %v1064_v35 }
 0x100   : > { %v905_v45 = vpop.f32.mrf.mxu2  ;;  %v729_v49 = vpop.f32.mrf.mxu0  ;;  %vm1218_vm3 = vcmp.eq.f32.partialorder %v1217_v5, 8.507059e+37  ;;  %v1220_v20 = vor.u32 1.1754944e-38, %v1219_v6 }
 0x101   : > { %v1196_v46 = vmul.f32 %v2126_v33, %v1195_v42  ;;  %v906_v48 = vadd.f32 %v905_v45, %v817_v40  ;;  %v818_v50 = vpop.f32.mrf.mxu1  ;;  %v730_v55 = vadd.f32 %v2453_v56, %v729_v49 }
 0x103   : > { %v2128_v51 = vpop.eup %2127  ;;  %v1197_v53 = vadd.f32 %v2126_v33, %v1196_v46  ;;  %v1963_v54 = vmul.f32 -1.442695, %v906_v48  ;;  %v819_v3 = vadd.f32 %v818_v50, %v730_v55  ;;  %v775_v50 = vadd.f32 %v2453_v56, %v2525_v52 }
 0x104   : > { %v2130_v57 = vpop.eup %2129  ;;  %v1065_v59 = vadd.f32 1.0, %v2128_v51 }
 0x105   : > { %v1201_v62 = vsel %vm1200_vm14, %v2126_v33, %v1197_v53  ;;  %v1209_v63 = vmul.f32 %v2130_v57, %v1064_v35  ;;  %2131 = vpow2.f32 %v1963_v54  ;;  %vm1214_vm0 = vweird.f32 %v2130_v57 }
 0x106   : > { %v1206_v1 = vsel %vm1203_vm15, %v1205_v58, %v1201_v62  ;;  %2133 = vrcp.f32 %v1065_v59  ;;  %v858_v4 = vpop.f32.mrf.mxu3  ;;  %vm1215_vm2 = vmor %vm1213_vm1, %vm1214_vm0  ;;  %v1234_v31 = vand.u32 2147483648, %v1065_v59  ;;  %v1232_v35 = vand.u32 2147483647, %v1065_v59 }
 0x107   : > { %1575 = vst [vmem:[%s2499_s21 + $0x38] sm:$0xff] %v1206_v1  ;;  %v1210_v2 = vsub.f32 1.0, %v1209_v63  ;;  %v2558_v7 = vadd.f32 %v858_v4, %v770_v0  ;;  %vm1228_vm5 = vweird.f32 %v1065_v59 }
 0x108   : > { %v907_v8 = vpop.f32.mrf.mxu2  ;;  %v732_v12 = vpop.f32.mrf.mxu0  ;;  %v1235_v46 = vor.u32 1.1754944e-38, %v1234_v31  ;;  %vm1233_vm7 = vcmp.eq.f32.partialorder %v1232_v35, 8.507059e+37 }
 0x109   : > { %v1211_v10 = vmul.f32 %v2130_v57, %v1210_v2  ;;  %v908_v11 = vadd.f32 %v907_v8, %v819_v3  ;;  %v733_v13 = vadd.f32 %v2453_v56, %v732_v12  ;;  %v821_v14 = vpop.f32.mrf.mxu1 }
 0x10b   : > { %v2132_v16 = vpop.eup %2131  ;;  %v1212_v61 = vadd.f32 %v2130_v57, %v1211_v10  ;;  %v1964_v17 = vmul.f32 -1.442695, %v908_v11  ;;  %v822_v26 = vadd.f32 %v821_v14, %v733_v13  ;;  %v778_v14 = vadd.f32 %v2453_v56, %v2533_v15 }
 0x10c   : > { %v2134_v18 = vpop.eup %2133  ;;  %v1066_v21 = vadd.f32 1.0, %v2132_v16 }
 0x10d   : > { %v1216_v24 = vsel %vm1215_vm2, %v2130_v57, %v1212_v61  ;;  %v1224_v25 = vmul.f32 %v2134_v18, %v1065_v59  ;;  %2135 = vpow2.f32 %v1964_v17  ;;  %vm1229_vm4 = vweird.f32 %v2134_v18 }
 0x10e   : > { %v1221_v28 = vsel %vm1218_vm3, %v1220_v20, %v1216_v24  ;;  %2137 = vrcp.f32 %v1066_v21  ;;  %v861_v30 = vpop.f32.mrf.mxu3  ;;  %vm1230_vm6 = vmor %vm1228_vm5, %vm1229_vm4  ;;  %v1247_v57 = vand.u32 2147483647, %v1066_v21  ;;  %v1249_v58 = vand.u32 2147483648, %v1066_v21 }
 0x10f   : > { %1576 = vst [vmem:[%s2499_s21 + $0x40] sm:$0xff] %v1221_v28  ;;  %v1225_v29 = vsub.f32 1.0, %v1224_v25  ;;  %v2564_v32 = vadd.f32 %v861_v30, %v773_v27  ;;  %vm1243_vm9 = vweird.f32 %v1066_v21 }
 0x110   : > { %v910_v33 = vpop.f32.mrf.mxu2  ;;  %v734_v38 = vpop.f32.mrf.mxu0  ;;  %vm1248_vm11 = vcmp.eq.f32.partialorder %v1247_v57, 8.507059e+37  ;;  %v1250_v8 = vor.u32 1.1754944e-38, %v1249_v58 }
 0x111   : > { %v1226_v34 = vmul.f32 %v2134_v18, %v1225_v29  ;;  %v911_v36 = vadd.f32 %v910_v33, %v822_v26  ;;  %v823_v40 = vpop.f32.mrf.mxu1  ;;  %v735_v44 = vadd.f32 %v2453_v56, %v734_v38 }
 0x113   : > { %v2136_v41 = vpop.eup %2135  ;;  %v1227_v42 = vadd.f32 %v2134_v18, %v1226_v34  ;;  %v1965_v22 = vmul.f32 -1.442695, %v911_v36  ;;  %v824_v54 = vadd.f32 %v823_v40, %v735_v44  ;;  %v780_v40 = vadd.f32 %v2453_v56, %v2540_v37 }
 0x114   : > { %v2138_v45 = vpop.eup %2137  ;;  %v1067_v47 = vadd.f32 1.0, %v2136_v41 }
 0x115   : > { %v1231_v48 = vsel %vm1230_vm6, %v2134_v18, %v1227_v42  ;;  %v1239_v49 = vmul.f32 %v2138_v45, %v1066_v21  ;;  %2139 = vpow2.f32 %v1965_v22  ;;  %vm1244_vm8 = vweird.f32 %v2138_v45 }
 0x116   : > { %v1236_v51 = vsel %vm1233_vm7, %v1235_v46, %v1231_v48  ;;  %2141 = vrcp.f32 %v1067_v47  ;;  %v863_v55 = vpop.f32.mrf.mxu3  ;;  %vm1245_vm10 = vmor %vm1243_vm9, %vm1244_vm8  ;;  %v1264_v18 = vand.u32 2147483648, %v1067_v47  ;;  %v1262_v25 = vand.u32 2147483647, %v1067_v47 }
 0x117   : > { %1577 = vst [vmem:[%s2499_s21 + $0x48] sm:$0xff] %v1236_v51  ;;  %v1240_v53 = vsub.f32 1.0, %v1239_v49  ;;  %v2570_v59 = vadd.f32 %v863_v55, %v775_v50  ;;  %vm1258_vm13 = vweird.f32 %v1067_v47 }
 0x118   : > { %v912_v62 = vpop.f32.mrf.mxu2  ;;  %v737_v1 = vpop.f32.mrf.mxu0  ;;  %v1265_v34 = vor.u32 1.1754944e-38, %v1264_v18  ;;  %vm1263_vm15 = vcmp.eq.f32.partialorder %v1262_v25, 8.507059e+37  ;;  %v765_v25 = vadd.f32 %v2453_v56, %v2475_v23 }
 0x119   : > { %v1241_v63 = vmul.f32 %v2138_v45, %v1240_v53  ;;  %v913_v0 = vadd.f32 %v912_v62, %v824_v54  ;;  %v738_v2 = vadd.f32 %v2453_v56, %v737_v1  ;;  %v826_v3 = vpop.f32.mrf.mxu1  ;;  %v763_v62 = vadd.f32 %v2453_v56, %v2464_v9 }
 0x11b   : > { %v2140_v4 = vpop.eup %2139  ;;  %v1242_v52 = vadd.f32 %v2138_v45, %v1241_v63  ;;  %v1966_v5 = vmul.f32 -1.442695, %v913_v0  ;;  %v827_v13 = vadd.f32 %v826_v3, %v738_v2 }
 0x11c   : > { %v2142_v6 = vpop.eup %2141  ;;  %v1068_v10 = vadd.f32 1.0, %v2140_v4  ;;  %v852_v4 = vadd.f32 %v2544_v60, %v763_v62 }
 0x11d   : > { %v1246_v11 = vsel %vm1245_vm10, %v2138_v45, %v1242_v52  ;;  %v1254_v12 = vmul.f32 %v2142_v6, %v1067_v47  ;;  %2143 = vpow2.f32 %v1966_v5  ;;  %vm1259_vm12 = vweird.f32 %v2142_v6 }
 0x11e   : > { %v1251_v16 = vsel %vm1248_vm11, %v1250_v8, %v1246_v11  ;;  %2145 = vrcp.f32 %v1068_v10  ;;  %v866_v17 = vpop.f32.mrf.mxu3  ;;  %vm1260_vm14 = vmor %vm1258_vm13, %vm1259_vm12  ;;  %v1277_v45 = vand.u32 2147483647, %v1068_v10  ;;  %v1279_v46 = vand.u32 2147483648, %v1068_v10 }
 0x11f   : > { %1578 = vst [vmem:[%s2499_s21 + $0x50] sm:$0xff] %v1251_v16  ;;  %v1255_v61 = vsub.f32 1.0, %v1254_v12  ;;  %v2576_v20 = vadd.f32 %v866_v17, %v778_v14  ;;  %vm1273_vm1 = vweird.f32 %v1068_v10 }
 0x120   : > { %v915_v21 = vpop.f32.mrf.mxu2  ;;  %v739_v27 = vpop.f32.mrf.mxu0  ;;  %vm1278_vm3 = vcmp.eq.f32.partialorder %v1277_v45, 8.507059e+37  ;;  %v1280_v63 = vor.u32 1.1754944e-38, %v1279_v46 }
 0x121   : > { %v1256_v24 = vmul.f32 %v2142_v6, %v1255_v61  ;;  %v916_v26 = vadd.f32 %v915_v21, %v827_v13  ;;  %v828_v28 = vpop.f32.mrf.mxu1  ;;  %v740_v31 = vadd.f32 %v2453_v56, %v739_v27 }
 0x123   : > { %v2144_v29 = vpop.eup %2143  ;;  %v1257_v30 = vadd.f32 %v2142_v6, %v1256_v24  ;;  %v1967_v15 = vmul.f32 -1.442695, %v916_v26  ;;  %v829_v22 = vadd.f32 %v828_v28, %v740_v31 }
 0x124   : > { %v2146_v33 = vpop.eup %2145  ;;  %v2579_v35 = vadd.f32 1.0, %v2144_v29 }
 0x125   : > { %v1261_v36 = vsel %vm1260_vm14, %v2142_v6, %v1257_v30  ;;  %v1269_v38 = vmul.f32 %v2146_v33, %v1068_v10  ;;  %2147 = vpow2.f32 %v1967_v15  ;;  %vm1274_vm0 = vweird.f32 %v2146_v33 }
 0x126   : > { %v1266_v41 = vsel %vm1263_vm15, %v1265_v34, %v1261_v36  ;;  %2149 = vrcp.f32 %v2579_v35  ;;  %v868_v44 = vpop.f32.mrf.mxu3  ;;  %vm1275_vm2 = vmor %vm1273_vm1, %vm1274_vm0  ;;  %v1294_v9 = vand.u32 2147483648, %v2579_v35  ;;  %v1292_v12 = vand.u32 2147483647, %v2579_v35 }
 0x127   : > { %1579 = vst [vmem:[%s2499_s21 + $0x58] sm:$0xff] %v1266_v41  ;;  %v1270_v42 = vsub.f32 1.0, %v1269_v38  ;;  %v2585_v47 = vadd.f32 %v868_v44, %v780_v40  ;;  %vm1288_vm5 = vweird.f32 %v2579_v35  ;;  %v854_v30 = vadd.f32 %v2548_v19, %v765_v25  ;;  %v2613_v19 = vld [vmem:[%s2811_s2] ss:$0 sm:$0xff] }
 0x128   : > { %v917_v48 = vpop.f32.mrf.mxu2  ;;  %v742_v51 = vpop.f32.mrf.mxu0  ;;  %v1295_v26 = vor.u32 1.1754944e-38, %v1294_v9  ;;  %vm1293_vm7 = vcmp.eq.f32.partialorder %v1292_v12, 8.507059e+37 }
 0x129   : > { %v1271_v49 = vmul.f32 %v2146_v33, %v1270_v42  ;;  %v918_v50 = vadd.f32 %v917_v48, %v829_v22  ;;  %v743_v53 = vadd.f32 %v2453_v56, %v742_v51  ;;  %v831_v54 = vpop.f32.mrf.mxu1  ;;  %v768_v22 = vadd.f32 %v2613_v19, %v2478_v39 }
 0x12b   : > { %v2148_v37 = vpop.eup %2147  ;;  %v1272_v55 = vadd.f32 %v2146_v33, %v1271_v49  ;;  %v1968_v57 = vmul.f32 -1.442695, %v918_v50  ;;  %v832_v3 = vadd.f32 %v831_v54, %v743_v53 }
 0x12c   : > { %v2150_v58 = vpop.eup %2149  ;;  %v2590_v0 = vadd.f32 1.0, %v2148_v37 }
 0x12d   : > { %v1276_v1 = vsel %vm1275_vm2, %v2146_v33, %v1272_v55  ;;  %v1284_v2 = vmul.f32 %v2150_v58, %v2579_v35  ;;  %2151 = vpow2.f32 %v1968_v57  ;;  %vm1289_vm4 = vweird.f32 %v2150_v58 }
 0x12e   : > { %v1281_v52 = vsel %vm1278_vm3, %v1280_v63, %v1276_v1  ;;  %2153 = vrcp.f32 %v2590_v0  ;;  %v940_v6 = vpop.f32.mrf.mxu3  ;;  %vm1290_vm6 = vmor %vm1288_vm5, %vm1289_vm4  ;;  %v1307_v33 = vand.u32 2147483647, %v2590_v0  ;;  %v1309_v34 = vand.u32 2147483648, %v2590_v0 }
 0x12f   : > { %1580 = vst [vmem:[%s2499_s21 + $0x60] sm:$0xff] %v1281_v52  ;;  %v1285_v5 = vsub.f32 1.0, %v1284_v2  ;;  %v941_v10 = vadd.f32 %v940_v6, %v852_v4  ;;  %vm1303_vm9 = vweird.f32 %v2590_v0 }
 0x130   : > { %v920_v8 = vpop.f32.mrf.mxu2  ;;  %v744_v14 = vpop.f32.mrf.mxu0  ;;  %vm1308_vm10 = vcmp.eq.f32.partialorder %v1307_v33, 8.507059e+37  ;;  %v1310_v53 = vor.u32 1.1754944e-38, %v1309_v34 }
 0x131   : > { %v1286_v11 = vmul.f32 %v2150_v58, %v1285_v5  ;;  %v921_v13 = vadd.f32 %v920_v8, %v832_v3  ;;  %v1977_v16 = vmul.f32 -1.442695, %v941_v10  ;;  %v833_v61 = vpop.f32.mrf.mxu1  ;;  %v745_v21 = vadd.f32 %v2453_v56, %v744_v14 }
 0x133   : > { %v2152_v17 = vpop.eup %2151  ;;  %v1287_v60 = vadd.f32 %v2150_v58, %v1286_v11  ;;  %v1969_v18 = vmul.f32 -1.442695, %v921_v13  ;;  %2155 = vpow2.f32 %v1977_v16  ;;  %v834_v56 = vadd.f32 %v833_v61, %v745_v21 }
 0x134   : > { %v2154_v24 = vpop.eup %2153  ;;  %v2602_v27 = vadd.f32 1.0, %v2152_v17 }
 0x135   : > { %v1291_v28 = vsel %vm1290_vm6, %v2150_v58, %v1287_v60  ;;  %v1299_v29 = vmul.f32 %v2154_v24, %v2590_v0  ;;  %2157 = vpow2.f32 %v1969_v18  ;;  %vm1304_vm8 = vweird.f32 %v2154_v24 }
 0x136   : > { %v1296_v15 = vsel %vm1293_vm7, %v1295_v26, %v1291_v28  ;;  %2159 = vrcp.f32 %v2602_v27  ;;  %v942_v23 = vpop.f32.mrf.mxu3  ;;  %vm1305_vm11 = vmor %vm1303_vm9, %vm1304_vm8  ;;  %v857_v58 = vadd.f32 %v2552_v43, %v768_v22  ;;  %v1322_v63 = vand.u32 2147483647, %v2602_v27 }
 0x137   : > { %1581 = vst [vmem:[%s2499_s21 + $0x68] sm:$0xff] %v1296_v15  ;;  %v1300_v31 = vsub.f32 1.0, %v1299_v29  ;;  %v943_v36 = vadd.f32 %v942_v23, %v854_v30  ;;  %v1324_v1 = vand.u32 2147483648, %v2602_v27  ;;  %vm1318_vm13 = vweird.f32 %v2602_v27 }
 0x138   : > { %v922_v35 = vpop.f32.mrf.mxu2  ;;  %v747_v41 = vpop.f32.mrf.mxu0  ;;  %vm2632_vm14 = vcmp.eq.f32.partialorder %v1322_v63, 8.507059e+37 }
 0x139   : > { %v1301_v38 = vmul.f32 %v2154_v24, %v1300_v31  ;;  %v923_v40 = vadd.f32 %v922_v35, %v834_v56  ;;  %v2156_v42 = vpop.eup %2155  ;;  %v1978_v44 = vmul.f32 -1.442695, %v943_v36  ;;  %v748_v45 = vadd.f32 %v2613_v19, %v747_v41  ;;  %v836_v46 = vpop.f32.mrf.mxu1 }
 0x13a   : > { %v2619_v50 = vadd.f32 1.0, %v2156_v42  ;;  %v1325_v13 = vor.u32 1.1754944e-38, %v1324_v1 }
 0x13b   : > { %v2158_v48 = vpop.eup %2157  ;;  %v1302_v49 = vadd.f32 %v2154_v24, %v1301_v38  ;;  %v1970_v37 = vmul.f32 -1.442695, %v923_v40  ;;  %2161 = vpow2.f32 %v1978_v44  ;;  %v837_v57 = vadd.f32 %v836_v46, %v748_v45 }
 0x13c   : > { %v2160_v51 = vpop.eup %2159  ;;  %v2622_v54 = vadd.f32 1.0, %v2158_v48  ;;  %2163 = vrcp.f32 %v2619_v50  ;;  %v1459_v29 = vand.u32 2147483648, %v2619_v50  ;;  %vm1453_vm1 = vweird.f32 %v2619_v50 }
 0x13d   : > { %v1306_v39 = vsel %vm1305_vm11, %v2154_v24, %v1302_v49  ;;  %v1314_v55 = vmul.f32 %v2160_v51, %v2602_v27  ;;  %vm1319_vm12 = vweird.f32 %v2160_v51  ;;  %v1457_v56 = vand.u32 2147483647, %v2619_v50 }
 0x13e   : > { %v1311_v62 = vsel %vm1308_vm10, %v1310_v53, %v1306_v39  ;;  %2165 = vrcp.f32 %v2622_v54  ;;  %v945_v2 = vpop.f32.mrf.mxu3  ;;  %vm1320_vm15 = vmor %vm1318_vm13, %vm1319_vm12  ;;  %vm1333_vm0 = vweird.f32 %v2622_v54  ;;  %v1337_v17 = vand.u32 2147483647, %v2622_v54 }
 0x13f   : > { %1582 = vst [vmem:[%s2499_s21 + $0x70] sm:$0xff] %v1311_v62  ;;  %v1315_v0 = vsub.f32 1.0, %v1314_v55  ;;  %2167 = vpow2.f32 %v1970_v37  ;;  %v946_v4 = vadd.f32 %v945_v2, %v857_v58  ;;  %v1339_v27 = vand.u32 2147483648, %v2622_v54 }
 0x140   : > { %v925_v3 = vpop.f32.mrf.mxu2  ;;  %v749_v6 = vpop.f32.mrf.mxu0  ;;  %vm2655_vm4 = vcmp.eq.f32.partialorder %v1337_v17, 8.507059e+37  ;;  %v1460_v44 = vor.u32 1.1754944e-38, %v1459_v29  ;;  %vm1458_vm7 = vcmp.eq.f32.partialorder %v1457_v56, 8.507059e+37 }
 0x141   : > { %v1316_v52 = vmul.f32 %v2160_v51, %v1315_v0  ;;  %v926_v5 = vadd.f32 %v925_v3, %v837_v57  ;;  %v2162_v9 = vpop.eup %2161  ;;  %v1979_v8 = vmul.f32 -1.442695, %v946_v4  ;;  %v838_v10 = vpop.f32.mrf.mxu1  ;;  %v750_v24 = vadd.f32 %v2613_v19, %v749_v6 }
 0x142   : > { %v2164_v11 = vpop.eup %2163  ;;  %v2636_v14 = vadd.f32 1.0, %v2162_v9  ;;  %v1340_v42 = vor.u32 1.1754944e-38, %v1339_v27 }
 0x143   : > { %v1317_v12 = vadd.f32 %v2160_v51, %v1316_v52  ;;  %v1971_v16 = vmul.f32 -1.442695, %v926_v5  ;;  %v1449_v60 = vmul.f32 %v2164_v11, %v2619_v50  ;;  %2169 = vpow2.f32 %v1979_v8 }
 0x144   : > { %v2166_v61 = vpop.eup %2165  ;;  %2171 = vrcp.f32 %v2636_v14  ;;  %vm1454_vm2 = vweird.f32 %v2164_v11  ;;  %v839_v36 = vadd.f32 %v838_v10, %v750_v24  ;;  %v1472_v37 = vand.u32 2147483647, %v2636_v14 }
 0x145   : > { %v1321_v18 = vsel %vm1320_vm15, %v2160_v51, %v1317_v12  ;;  %v1329_v21 = vmul.f32 %v2166_v61, %v2622_v54  ;;  %v2168_v25 = vpop.eup %2167  ;;  %v1450_v28 = vsub.f32 1.0, %v1449_v60  ;;  %2173 = vpow2.f32 %v1971_v16  ;;  %vm1455_vm5 = vmor %vm1453_vm1, %vm1454_vm2 }
 0x146   : > { %v1326_v26 = vsel %vm2632_vm14, %v1325_v13, %v1321_v18  ;;  %v2650_v15 = vadd.f32 1.0, %v2168_v25  ;;  %v947_v31 = vpop.f32.mrf.mxu3  ;;  %vm1334_vm3 = vweird.f32 %v2166_v61  ;;  %v1474_v58 = vand.u32 2147483648, %v2636_v14 }
 0x147   : > { %1583 = vst [vmem:[%s2499_s21 + $0x78] sm:$0xff] %v1326_v26  ;;  %v1330_v30 = vsub.f32 1.0, %v1329_v21  ;;  %v1451_v33 = vmul.f32 %v2164_v11, %v1450_v28  ;;  %v948_v34 = vadd.f32 %v947_v31, %v2558_v7  ;;  %vm1335_vm6 = vmor %vm1333_vm0, %vm1334_vm3  ;;  %vm1468_vm10 = vweird.f32 %v2636_v14 }
 0x148   : > { %v927_v23 = vpop.f32.mrf.mxu2  ;;  %2175 = vrcp.f32 %v2650_v15  ;;  %v752_v38 = vpop.f32.mrf.mxu0  ;;  %v1352_v54 = vand.u32 2147483647, %v2650_v15  ;;  %v1354_v2 = vand.u32 2147483648, %v2650_v15  ;;  %vm1348_vm9 = vweird.f32 %v2650_v15 }
 0x149   : > { %v1331_v35 = vmul.f32 %v2166_v61, %v1330_v30  ;;  %v2170_v40 = vpop.eup %2169  ;;  %v1452_v22 = vadd.f32 %v2164_v11, %v1451_v33  ;;  %v928_v48 = vadd.f32 %v927_v23, %v839_v36  ;;  %v1980_v49 = vmul.f32 -1.442695, %v948_v34  ;;  %v841_v39 = vpop.f32.mrf.mxu1 }
 0x14a   : > { %v2172_v45 = vpop.eup %2171  ;;  %v2662_v7 = vadd.f32 1.0, %v2170_v40  ;;  %v753_v4 = vadd.f32 %v2613_v19, %v752_v38  ;;  %vm2684_vm11 = vcmp.eq.f32.partialorder %v1472_v37, 8.507059e+37  ;;  %v1475_v8 = vor.u32 1.1754944e-38, %v1474_v58 }
 0x14b   : > { %v1332_v46 = vadd.f32 %v2166_v61, %v1331_v35  ;;  %v1456_v51 = vsel %vm1455_vm5, %v2164_v11, %v1452_v22  ;;  %v1464_v53 = vmul.f32 %v2172_v45, %v2636_v14  ;;  %v2174_v55 = vpop.eup %2173  ;;  %v1972_v3 = vmul.f32 -1.442695, %v928_v48 }
 0x14c   : > { %v1461_v57 = vsel %vm1458_vm7, %v1460_v44, %v1456_v51  ;;  %2177 = vrcp.f32 %v2662_v7  ;;  %v2675_v0 = vadd.f32 1.0, %v2174_v55  ;;  %vm1469_vm8 = vweird.f32 %v2172_v45 }
 0x14d   : > { %v1336_v50 = vsel %vm1335_vm6, %v2166_v61, %v1332_v46  ;;  %1592 = vst [vmem:[%s2499_s21 + $0xc0] sm:$0xff] %v1461_v57  ;;  %v1465_v63 = vsub.f32 1.0, %v1464_v53  ;;  %2179 = vpow2.f32 %v1980_v49  ;;  %vm2688_vm12 = vcmp.eq.f32.partialorder %v1352_v54, 8.507059e+37  ;;  %vm1470_vm13 = vmor %vm1468_vm10, %vm1469_vm8 }
 0x14e   : > { %v1341_v62 = vsel %vm2655_vm4, %v1340_v42, %v1336_v50  ;;  %v2176_v1 = vpop.eup %2175  ;;  %v950_v52 = vpop.f32.mrf.mxu3  ;;  %2181 = vrcp.f32 %v2675_v0  ;;  %v1355_v61 = vor.u32 1.1754944e-38, %v1354_v2  ;;  %vm1483_vm14 = vweird.f32 %v2662_v7 }
 0x14f   : > { %1584 = vst [vmem:[%s2499_s21 + $0x80] sm:$0xff] %v1341_v62  ;;  %v1344_v5 = vmul.f32 %v2176_v1, %v2650_v15  ;;  %v1466_v6 = vmul.f32 %v2172_v45, %v1465_v63  ;;  %2183 = vpow2.f32 %v1972_v3  ;;  %v842_v14 = vadd.f32 %v841_v39, %v753_v4 }
 0x150   : > { %v930_v9 = vpop.f32.mrf.mxu2  ;;  %v754_v10 = vpop.f32.mrf.mxu0  ;;  %v951_v17 = vadd.f32 %v950_v52, %v2564_v32  ;;  %vm1349_vm15 = vweird.f32 %v2176_v1  ;;  %v1487_v26 = vand.u32 2147483647, %v2662_v7  ;;  %v1489_v33 = vand.u32 2147483648, %v2662_v7 }
 0x151   : > { %v1345_v11 = vsub.f32 1.0, %v1344_v5  ;;  %v1467_v13 = vadd.f32 %v2172_v45, %v1466_v6  ;;  %v931_v27 = vadd.f32 %v930_v9, %v842_v14  ;;  %v843_v56 = vpop.f32.mrf.mxu1  ;;  %vm1350_vm0 = vmor %vm1348_vm9, %vm1349_vm15  ;;  %v755_v35 = vadd.f32 %v2613_v19, %v754_v10 }
 0x152   : > { %v2178_v16 = vpop.eup %2177  ;;  %v1981_v28 = vmul.f32 -1.442695, %v951_v17  ;;  %v1367_v44 = vand.u32 2147483647, %v2675_v0  ;;  %v1369_v46 = vand.u32 2147483648, %v2675_v0  ;;  %v1490_v49 = vor.u32 1.1754944e-38, %v1489_v33 }
 0x153   : > { %v1346_v60 = vmul.f32 %v2176_v1, %v1345_v11  ;;  %v1471_v18 = vsel %vm1470_vm13, %v2172_v45, %v1467_v13  ;;  %v1479_v21 = vmul.f32 %v2178_v16, %v2662_v7  ;;  %v2180_v24 = vpop.eup %2179  ;;  %v1973_v34 = vmul.f32 -1.442695, %v931_v27 }
 0x154   : > { %v1476_v25 = vsel %vm2684_vm11, %v1475_v8, %v1471_v18  ;;  %v2182_v29 = vpop.eup %2181  ;;  %v2700_v32 = vadd.f32 1.0, %v2180_v24  ;;  %2185 = vpow2.f32 %v1981_v28  ;;  %vm1484_vm1 = vweird.f32 %v2178_v16 }
 0x155   : > { %v1347_v30 = vadd.f32 %v2176_v1, %v1346_v60  ;;  %1593 = vst [vmem:[%s2499_s21 + $0xc8] sm:$0xff] %v1476_v25  ;;  %v1480_v31 = vsub.f32 1.0, %v1479_v21  ;;  %v1359_v23 = vmul.f32 %v2182_v29, %v2675_v0  ;;  %v2184_v38 = vpop.eup %2183  ;;  %vm1364_vm2 = vweird.f32 %v2182_v29  ;;  %vm1485_vm3 = vmor %vm1483_vm14, %vm1484_vm1 }
 0x156   : > { %v952_v36 = vpop.f32.mrf.mxu3  ;;  %2187 = vrcp.f32 %v2700_v32  ;;  %v2711_v45 = vadd.f32 1.0, %v2184_v38  ;;  %v844_v37 = vadd.f32 %v843_v56, %v755_v35  ;;  %vm1488_vm4 = vcmp.eq.f32.partialorder %v1487_v26, 8.507059e+37 }
 0x157   : > { %v1351_v40 = vsel %vm1350_vm0, %v2176_v1, %v1347_v30  ;;  %v1481_v41 = vmul.f32 %v2178_v16, %v1480_v31  ;;  %v1360_v15 = vsub.f32 1.0, %v1359_v23  ;;  %2189 = vpow2.f32 %v1973_v34 }
 0x158   : > { %v932_v42 = vpop.f32.mrf.mxu2  ;;  %v1356_v22 = vsel %vm2688_vm12, %v1355_v61, %v1351_v40  ;;  %v757_v51 = vpop.f32.mrf.mxu0  ;;  %2191 = vrcp.f32 %v2711_v45  ;;  %vm1363_vm5 = vweird.f32 %v2675_v0  ;;  %vm1368_vm7 = vcmp.eq.f32.partialorder %v1367_v44, 8.507059e+37 }
 0x159   : > { %1585 = vst [vmem:[%s2499_s21 + $0x88] sm:$0xff] %v1356_v22  ;;  %v1482_v48 = vadd.f32 %v2178_v16, %v1481_v41  ;;  %v1361_v53 = vmul.f32 %v2182_v29, %v1360_v15  ;;  %v933_v58 = vadd.f32 %v932_v42, %v844_v37  ;;  %vm1365_vm6 = vmor %vm1363_vm5, %vm1364_vm2  ;;  %v1370_v54 = vor.u32 1.1754944e-38, %v1369_v46  ;;  %v846_v43 = vpop.f32.mrf.mxu1 }
 0x15a   : > { %v2186_v55 = vpop.eup %2185  ;;  %v953_v7 = vadd.f32 %v952_v36, %v2570_v59  ;;  %v1502_v3 = vand.u32 2147483647, %v2700_v32  ;;  %v1382_v6 = vand.u32 2147483647, %v2711_v45  ;;  %v1504_v9 = vand.u32 2147483648, %v2700_v32 }
 0x15b   : > { %v1486_v39 = vsel %vm1485_vm3, %v2178_v16, %v1482_v48  ;;  %v1362_v50 = vadd.f32 %v2182_v29, %v1361_v53  ;;  %v2721_v63 = vadd.f32 1.0, %v2186_v55  ;;  %v1974_v4 = vmul.f32 -1.442695, %v933_v58 }
 0x15c   : > { %v1491_v57 = vsel %vm1488_vm4, %v1490_v49, %v1486_v39  ;;  %v2188_v62 = vpop.eup %2187  ;;  %v758_v12 = vadd.f32 %v2613_v19, %v757_v51  ;;  %v1384_v16 = vand.u32 2147483648, %v2711_v45  ;;  %vm1498_vm8 = vweird.f32 %v2700_v32 }
 0x15d   : > { %1594 = vst [vmem:[%s2499_s21 + $0xd0] sm:$0xff] %v1491_v57  ;;  %v1366_v1 = vsel %vm1365_vm6, %v2182_v29, %v1362_v50  ;;  %v1494_v2 = vmul.f32 %v2188_v62, %v2700_v32  ;;  %v2190_v0 = vpop.eup %2189  ;;  %2193 = vrcp.f32 %v2721_v63  ;;  %v1982_v61 = vmul.f32 -1.442695, %v953_v7 }
 0x15e   : > { %v955_v52 = vpop.f32.mrf.mxu3  ;;  %v1371_v5 = vsel %vm1368_vm7, %v1370_v54, %v1366_v1  ;;  %v2192_v10 = vpop.eup %2191  ;;  %v2730_v11 = vadd.f32 1.0, %v2190_v0  ;;  %2195 = vpow2.f32 %v1974_v4  ;;  %vm1378_vm9 = vweird.f32 %v2711_v45 }
 0x15f   : > { %1586 = vst [vmem:[%s2499_s21 + $0x90] sm:$0xff] %v1371_v5  ;;  %v1495_v59 = vsub.f32 1.0, %v1494_v2  ;;  %v1374_v13 = vmul.f32 %v2192_v10, %v2711_v45  ;;  %vm1499_vm10 = vweird.f32 %v2188_v62  ;;  %vm2738_vm11 = vcmp.eq.f32.partialorder %v1502_v3, 8.507059e+37 }
 0x160   : > { %v935_v8 = vpop.f32.mrf.mxu2  ;;  %2197 = vrcp.f32 %v2730_v11  ;;  %v1505_v18 = vor.u32 1.1754944e-38, %v1504_v9  ;;  %v759_v21 = vpop.f32.mrf.mxu0  ;;  %vm2742_vm12 = vcmp.eq.f32.partialorder %v1382_v6, 8.507059e+37  ;;  %v847_v26 = vadd.f32 %v846_v43, %v758_v12  ;;  %vm1500_vm14 = vmor %vm1498_vm8, %vm1499_vm10 }
 0x161   : > { %v1496_v14 = vmul.f32 %v2188_v62, %v1495_v59  ;;  %v1375_v17 = vsub.f32 1.0, %v1374_v13  ;;  %2199 = vpow2.f32 %v1982_v61  ;;  %v956_v27 = vadd.f32 %v955_v52, %v2576_v20  ;;  %v848_v49 = vpop.f32.mrf.mxu1 }
 0x162   : > { %vm1379_vm13 = vweird.f32 %v2192_v10  ;;  %v1385_v30 = vor.u32 1.1754944e-38, %v1384_v16  ;;  %v1517_v31 = vand.u32 2147483647, %v2721_v63  ;;  %v936_v34 = vadd.f32 %v935_v8, %v847_v26 }
 0x163   : > { %v1497_v25 = vadd.f32 %v2188_v62, %v1496_v14  ;;  %v2194_v28 = vpop.eup %2193  ;;  %v1376_v29 = vmul.f32 %v2192_v10, %v1375_v17  ;;  %v760_v35 = vadd.f32 %v2613_v19, %v759_v21  ;;  %v1519_v38 = vand.u32 2147483648, %v2721_v63  ;;  %vm1380_vm15 = vmor %vm1378_vm9, %vm1379_vm13 }
 0x164   : > { %v2196_v33 = vpop.eup %2195  ;;  %v1509_v23 = vmul.f32 %v2194_v28, %v2721_v63  ;;  %vm1513_vm0 = vweird.f32 %v2721_v63  ;;  %v1975_v42 = vmul.f32 -1.442695, %v936_v34  ;;  %v1983_v22 = vmul.f32 -1.442695, %v956_v27 }
 0x165   : > { %v1501_v56 = vsel %vm1500_vm14, %v2188_v62, %v1497_v25  ;;  %v1377_v36 = vadd.f32 %v2192_v10, %v1376_v29  ;;  %v2756_v40 = vadd.f32 1.0, %v2196_v33  ;;  %v1397_v48 = vand.u32 2147483647, %v2730_v11 }
 0x166   : > { %v1506_v20 = vsel %vm2738_vm11, %v1505_v18, %v1501_v56  ;;  %v2198_v41 = vpop.eup %2197  ;;  %v1510_v32 = vsub.f32 1.0, %v1509_v23  ;;  %v957_v19 = vpop.f32.mrf.mxu3  ;;  %vm1514_vm1 = vweird.f32 %v2194_v28  ;;  %v849_v37 = vadd.f32 %v848_v49, %v760_v35 }
 0x167   : > { %1595 = vst [vmem:[%s2499_s21 + $0xd8] sm:$0xff] %v1506_v20  ;;  %v2200_v15 = vpop.eup %2199  ;;  %v1381_v44 = vsel %vm1380_vm15, %v2192_v10, %v1377_v36  ;;  %v1389_v46 = vmul.f32 %v2198_v41, %v2730_v11  ;;  %2201 = vrcp.f32 %v2756_v40  ;;  %v958_v50 = vadd.f32 %v957_v19, %v2585_v47  ;;  %vm1515_vm3 = vmor %vm1513_vm0, %vm1514_vm1 }
 0x168   : > { %v937_v51 = vpop.f32.mrf.mxu2  ;;  %v1386_v45 = vsel %vm2742_vm12, %v1385_v30, %v1381_v44  ;;  %v1511_v53 = vmul.f32 %v2194_v28, %v1510_v32  ;;  %v2768_v55 = vadd.f32 1.0, %v2200_v15  ;;  %2203 = vpow2.f32 %v1975_v42 }
 0x169   : > { %1587 = vst [vmem:[%s2499_s21 + $0x98] sm:$0xff] %v1386_v45  ;;  %v1390_v39 = vsub.f32 1.0, %v1389_v46  ;;  %v1399_v57 = vand.u32 2147483648, %v2730_v11  ;;  %2205 = vpow2.f32 %v1983_v22  ;;  %v938_v62 = vadd.f32 %v937_v51, %v849_v37 }
 0x16a   : > { %v1512_v58 = vadd.f32 %v2194_v28, %v1511_v53  ;;  %vm1394_vm2 = vweird.f32 %v2198_v41  ;;  %v1520_v7 = vor.u32 1.1754944e-38, %v1519_v38  ;;  %2207 = vrcp.f32 %v2768_v55 }
 0x16b   : > { %v1391_v54 = vmul.f32 %v2198_v41, %v1390_v39  ;;  %vm1518_vm4 = vcmp.eq.f32.partialorder %v1517_v31, 8.507059e+37  ;;  %v1976_v2 = vmul.f32 -1.442695, %v938_v62  ;;  %vm1393_vm5 = vweird.f32 %v2730_v11 }
 0x16c   : > { %v1516_v1 = vsel %vm1515_vm3, %v2194_v28, %v1512_v58  ;;  %v1984_v52 = vmul.f32 -1.442695, %v958_v50  ;;  %vm1395_vm6 = vmor %vm1393_vm5, %vm1394_vm2  ;;  %v1400_v0 = vor.u32 1.1754944e-38, %v1399_v57  ;;  %vm1398_vm7 = vcmp.eq.f32.partialorder %v1397_v48, 8.507059e+37 }
 0x16d   : > { %v2202_v3 = vpop.eup %2201  ;;  %v1392_v4 = vadd.f32 %v2198_v41, %v1391_v54  ;;  %v1521_v47 = vsel %vm1518_vm4, %v1520_v7, %v1516_v1  ;;  %2209 = vpow2.f32 %v1976_v2  ;;  %v1412_v11 = vand.u32 2147483647, %v2756_v40 }
 0x16e   : > { %1596 = vst [vmem:[%s2499_s21 + $0xe0] sm:$0xff] %v1521_v47  ;;  %v1404_v5 = vmul.f32 %v2202_v3, %v2756_v40  ;;  %v2204_v63 = vpop.eup %2203  ;;  %2211 = vpow2.f32 %v1984_v52  ;;  %v1414_v12 = vand.u32 2147483648, %v2756_v40  ;;  %vm1409_vm8 = vweird.f32 %v2202_v3 }
 0x16f   : > { %v1396_v6 = vsel %vm1395_vm6, %v2198_v41, %v1392_v4  ;;  %v2206_v9 = vpop.eup %2205  ;;  %v1078_v10 = vadd.f32 1.0, %v2204_v63  ;;  %vm1408_vm9 = vweird.f32 %v2756_v40  ;;  %vm1413_vm11 = vcmp.eq.f32.partialorder %v1412_v11, 8.507059e+37 }
 0x170   : > { %v1401_v43 = vsel %vm1398_vm7, %v1400_v0, %v1396_v6  ;;  %v1405_v8 = vsub.f32 1.0, %v1404_v5  ;;  %v2208_v59 = vpop.eup %2207  ;;  %v1086_v13 = vadd.f32 1.0, %v2206_v9  ;;  %vm1410_vm10 = vmor %vm1408_vm9, %vm1409_vm8  ;;  %v1415_v18 = vor.u32 1.1754944e-38, %v1414_v12 }
 0x171   : > { %1588 = vst [vmem:[%s2499_s21 + $0xa0] sm:$0xff] %v1401_v43  ;;  %v1524_v61 = vmul.f32 %v2208_v59, %v2768_v55  ;;  %2213 = vrcp.f32 %v1078_v10  ;;  %v1532_v21 = vand.u32 2147483647, %v2768_v55  ;;  %v1534_v24 = vand.u32 2147483648, %v2768_v55 }
 0x172   : > { %v1406_v16 = vmul.f32 %v2202_v3, %v1405_v8  ;;  %2215 = vrcp.f32 %v1086_v13  ;;  %vm1529_vm12 = vweird.f32 %v2208_v59  ;;  %vm1528_vm13 = vweird.f32 %v2768_v55 }
 0x173   : > { %v1525_v17 = vsub.f32 1.0, %v1524_v61  ;;  %v2210_v60 = vpop.eup %2209  ;;  %vm1530_vm14 = vmor %vm1528_vm13, %vm1529_vm12  ;;  %v1535_v23 = vor.u32 1.1754944e-38, %v1534_v24  ;;  %vm1533_vm15 = vcmp.eq.f32.partialorder %v1532_v21, 8.507059e+37  ;;  %v1427_v40 = vand.u32 2147483647, %v1078_v10 }
 0x174   : > { %v1407_v14 = vadd.f32 %v2202_v3, %v1406_v16  ;;  %v2212_v25 = vpop.eup %2211  ;;  %v2785_v28 = vadd.f32 1.0, %v2210_v60  ;;  %v1429_v41 = vand.u32 2147483648, %v1078_v10  ;;  %v1547_v42 = vand.u32 2147483647, %v1086_v13 }
 0x175   : > { %v1526_v27 = vmul.f32 %v2208_v59, %v1525_v17  ;;  %v2787_v30 = vadd.f32 1.0, %v2212_v25  ;;  %v1549_v19 = vand.u32 2147483648, %v1086_v13  ;;  %vm1423_vm1 = vweird.f32 %v1078_v10 }
 0x176   : > { %v1411_v26 = vsel %vm1410_vm10, %v2202_v3, %v1407_v14  ;;  %2217 = vrcp.f32 %v2785_v28  ;;  %vm1428_vm3 = vcmp.eq.f32.partialorder %v1427_v40, 8.507059e+37  ;;  %vm1543_vm4 = vweird.f32 %v1086_v13 }
 0x177   : > { %v1416_v29 = vsel %vm1413_vm11, %v1415_v18, %v1411_v26  ;;  %v2214_v31 = vpop.eup %2213  ;;  %v1527_v33 = vadd.f32 %v2208_v59, %v1526_v27  ;;  %2219 = vrcp.f32 %v2787_v30  ;;  %v1430_v51 = vor.u32 1.1754944e-38, %v1429_v41 }
 0x178   : > { %1589 = vst [vmem:[%s2499_s21 + $0xa8] sm:$0xff] %v1416_v29  ;;  %v2216_v56 = vpop.eup %2215  ;;  %v1419_v34 = vmul.f32 %v2214_v31, %v1078_v10  ;;  %vm1424_vm0 = vweird.f32 %v2214_v31  ;;  %vm1548_vm6 = vcmp.eq.f32.partialorder %v1547_v42, 8.507059e+37  ;;  %v1550_v39 = vor.u32 1.1754944e-38, %v1549_v19 }
 0x179   : > { %v1531_v35 = vsel %vm1530_vm14, %v2208_v59, %v1527_v33  ;;  %v1539_v36 = vmul.f32 %v2216_v56, %v1086_v13  ;;  %vm1544_vm2 = vweird.f32 %v2216_v56  ;;  %vm1425_vm5 = vmor %vm1423_vm1, %vm1424_vm0  ;;  %v1442_v50 = vand.u32 2147483647, %v2785_v28 }
 0x17a   : > { %v1536_v20 = vsel %vm1533_vm15, %v1535_v23, %v1531_v35  ;;  %v1420_v38 = vsub.f32 1.0, %v1419_v34  ;;  %vm1545_vm7 = vmor %vm1543_vm4, %vm1544_vm2  ;;  %v1444_v62 = vand.u32 2147483648, %v2785_v28  ;;  %v1564_v2 = vand.u32 2147483648, %v2787_v30 }
 0x17b   : > { %1597 = vst [vmem:[%s2499_s21 + $0xe8] sm:$0xff] %v1536_v20  ;;  %v1540_v32 = vsub.f32 1.0, %v1539_v36  ;;  %v1562_v4 = vand.u32 2147483647, %v2787_v30  ;;  %vm1438_vm10 = vweird.f32 %v2785_v28  ;;  %vm1558_vm12 = vweird.f32 %v2787_v30 }
 0x17c   : > { %v1421_v22 = vmul.f32 %v2214_v31, %v1420_v38  ;;  %v2218_v15 = vpop.eup %2217  ;;  %v1445_v52 = vor.u32 1.1754944e-38, %v1444_v62  ;;  %vm1443_vm13 = vcmp.eq.f32.partialorder %v1442_v50, 8.507059e+37  ;;  %v1565_v63 = vor.u32 1.1754944e-38, %v1564_v2 }
 0x17d   : > { %v1541_v44 = vmul.f32 %v2216_v56, %v1540_v32  ;;  %v2220_v46 = vpop.eup %2219  ;;  %v1434_v49 = vmul.f32 %v2218_v15, %v2785_v28  ;;  %vm1439_vm8 = vweird.f32 %v2218_v15  ;;  %vm1563_vm15 = vcmp.eq.f32.partialorder %v1562_v4, 8.507059e+37 }
 0x17e   : > { %v1422_v48 = vadd.f32 %v2214_v31, %v1421_v22  ;;  %v1554_v53 = vmul.f32 %v2220_v46, %v2787_v30  ;;  %vm1559_vm9 = vweird.f32 %v2220_v46  ;;  %vm1440_vm11 = vmor %vm1438_vm10, %vm1439_vm8 }
 0x17f   : > { %v1542_v45 = vadd.f32 %v2216_v56, %v1541_v44  ;;  %v1435_v55 = vsub.f32 1.0, %v1434_v49  ;;  %vm1560_vm14 = vmor %vm1558_vm12, %vm1559_vm9 }
 0x180   : > { %v1426_v37 = vsel %vm1425_vm5, %v2214_v31, %v1422_v48  ;;  %v1555_v54 = vsub.f32 1.0, %v1554_v53 }
 0x181   : > { %v1431_v57 = vsel %vm1428_vm3, %v1430_v51, %v1426_v37  ;;  %v1546_v58 = vsel %vm1545_vm7, %v2216_v56, %v1542_v45  ;;  %v1436_v1 = vmul.f32 %v2218_v15, %v1435_v55 }
 0x182   : > { %1590 = vst [vmem:[%s2499_s21 + $0xb0] sm:$0xff] %v1431_v57  ;;  %v1551_v7 = vsel %vm1548_vm6, %v1550_v39, %v1546_v58  ;;  %v1556_v3 = vmul.f32 %v2220_v46, %v1555_v54 }
 0x183   : > { %1598 = vst [vmem:[%s2499_s21 + $0xf0] sm:$0xff] %v1551_v7  ;;  %v1437_v47 = vadd.f32 %v2218_v15, %v1436_v1 }
 0x184   : > { %v1557_v0 = vadd.f32 %v2220_v46, %v1556_v3 }
 0x185   : > { %v1441_v5 = vsel %vm1440_vm11, %v2218_v15, %v1437_v47 }
 0x186   : > { %v1446_v6 = vsel %vm1443_vm13, %v1445_v52, %v1441_v5  ;;  %v1561_v9 = vsel %vm1560_vm14, %v2220_v46, %v1557_v0 }
 0x187   : > { %1591 = vst [vmem:[%s2499_s21 + $0xb8] sm:$0xff] %v1446_v6  ;;  %v1566_v43 = vsel %vm1563_vm15, %v1565_v63, %v1561_v9 }
 0x188   : > { %1599 = vst [vmem:[%s2499_s21 + $0xf8] sm:$0xff] %v1566_v43 }
 0x189 PF: > { %s13_s12 = sadd.s32 1, %s2228_s12  }
 0x18a   : > { %p10_p4 = scmp.ge.s32.totalorder %s13_s12, 4  }
 0x18c   :  { %12 = sbr.rel (!%p10_p4) target bundleno = 1 (0x1), region = 62 }

</bundles_post_ra>
